<compile_context>
chip_gen: v6e
topology: v6e:2x2x1
jax: 0.10.0
libtpu: 0.0.40
codegen_flags: <defaults>
</compile_context>

<pallas_src>
import math

import numpy as np
import jax
import jax.numpy as jnp
from jax import lax
from jax.experimental import pallas as pl
from jax.experimental.pallas import tpu as pltpu  # noqa: F401  (kept for TPU-backend clarity)

# Full-precision f32 matmuls everywhere (kernel dots and the XLA reference) so the check is
# not dominated by single-pass-bf16 MXU lowering differences between the two graphs.
jax.config.update("jax_default_matmul_precision", "highest")

# ---------------- configuration (small shapes consistent with the module) ----------------
D_MODEL = 32          # d_model (= channels c)
D_K = 16              # per-head key dim
D_V = 16              # per-head value dim
H_HEADS = 4           # h
H_SP, W_SP = 7, 7     # H, W  (nq must equal H*W)
RATIO = 3
B = 2                 # batch
NQ = H_SP * W_SP      # 49

KSIZE = RATIO + 1     # sr_conv kernel size
PAD = RATIO // 2
STRIDE = RATIO
OUT_H = (H_SP + 2 * PAD - KSIZE) // STRIDE + 1
OUT_W = (W_SP + 2 * PAD - KSIZE) // STRIDE + 1
NK = OUT_H * OUT_W    # reduced key/value length (sr path)
KK = KSIZE * KSIZE
HNK = H_HEADS * NK    # stacked (head-major) key axis
HDK = H_HEADS * D_K
HDV = H_HEADS * D_V

LN_EPS = 1e-5         # nn.LayerNorm default eps
IN_EPS = 1e-5         # nn.InstanceNorm2d default eps

# TODO(synk): nn.Dropout is omitted (inference / identity); attention_mask and
# attention_weights are None in the reference forward and therefore not implemented.


def emsa_kernel(x_ref, wq_ref, bq_ref, wkv_ref, bkv_ref, wo_ref, bo_ref,
                g_ref, wtap_ref, r_ref, bsr_ref, lng_ref, lnb_ref,
                wtrb_ref, btrb_ref, hmask_ref, psel_ref,
                mhdk_ref, mhdv_ref, o_ref):
    f32 = jnp.float32
    x_all = x_ref[...]                                                   # (B*NQ, C)

    # ---- fc_q on the batched slab: one (B*NQ, C) @ (C, h*d_k) matmul ----
    q_all = jnp.dot(x_all, wq_ref[...], preferred_element_type=f32) + bq_ref[...]

    # ---- depthwise strided sr_conv, vectorized: R @ ((G @ x) * Wtap) + bias ----
    gathered = jnp.dot(g_ref[...], x_all, preferred_element_type=f32)    # (B*NK*KK, C)
    xsr = jnp.dot(r_ref[...], gathered * wtap_ref[...],
                  preferred_element_type=f32) + bsr_ref[...]             # (B*NK, C)

    # ---- sr_ln : LayerNorm over channels ----
    mu = jnp.mean(xsr, axis=-1, keepdims=True)
    var = jnp.mean((xsr - mu) * (xsr - mu), axis=-1, keepdims=True)
    xsr = (xsr - mu) * lax.rsqrt(var + LN_EPS) * lng_ref[...] + lnb_ref[...]

    # ---- fused fc_k | fc_v : one lane-dense (C, 2*h*d_k) matmul ----
    kv = jnp.dot(xsr, wkv_ref[...], preferred_element_type=f32) + bkv_ref[...]   # (B*NK, 2*HDK)

    hmask = hmask_ref[...]       # (h, h*NK)    0/1 head-block masks on the stacked key axis
    wtrb = wtrb_ref[...]         # (h*NK, h*NK) 1x1 head-mixing conv (1/sqrt(d_k) folded in)
    btrb = btrb_ref[...]         # (1, h*NK)    head-mixing bias, pre-broadcast along NK
    mhdk = mhdk_ref[...]         # (h*NK, h*d_k) block-diagonal mask for K
    mhdv = mhdv_ref[...]         # (h*NK, h*d_v) block-diagonal mask for V
    inv_npix = 1.0 / float(NQ * NK)

    for b in range(B):           # B == 2, unrolled; per-batch attention on stacked-head tiles
        # Replicate this batch's (NK, 2*h*d_k) keys/values h times along sublanes and mask
        # them into block-diagonal form so every head is handled by single matmuls below.
        rep = jnp.dot(psel_ref[b], kv, preferred_element_type=f32)       # (h*NK, 2*HDK)
        k_bd = rep[:, :HDK] * mhdk                                       # (h*NK, h*d_k)
        v_bd = rep[:, HDK:] * mhdv                                       # (h*NK, h*d_v)

        q_b = q_all[b * NQ:(b + 1) * NQ, :]                              # (NQ, h*d_k)
        scores = lax.dot_general(q_b, k_bd, (((1,), (1,)), ((), ())),
                                 preferred_element_type=f32)             # (NQ, h*NK)

        # 1x1 head-mixing conv (transform.conv); scale + bias already folded on the host.
        att = jnp.dot(scores, wtrb, preferred_element_type=f32) + btrb

        # per-head softmax over each head's NK lanes; exact masked VPU/XLU reductions
        mx = jnp.zeros_like(att)
        for h in range(H_HEADS):
            hm = hmask[h:h + 1, :]
            m_h = jnp.max(jnp.where(hm > 0.5, att, -1e30), axis=-1, keepdims=True)
            mx = mx + m_h * hm
        e = jnp.exp(att - mx)
        denom = jnp.zeros_like(att)
        for h in range(H_HEADS):
            hm = hmask[h:h + 1, :]
            s_h = jnp.sum(e * hm, axis=-1, keepdims=True)                # (NQ, 1)
            denom = denom + s_h * hm
        att = e / denom   # exact divide (InstanceNorm below may be eps-dominated)

        # InstanceNorm2d over each head's (NQ, NK) attention map (biased var, no affine)
        mean_bc = jnp.zeros((1, HNK), f32)
        for h in range(H_HEADS):
            hm = hmask[h:h + 1, :]
            m_h = jnp.sum(jnp.sum(att * hm, axis=-1, keepdims=True),
                          axis=0, keepdims=True) * inv_npix              # (1, 1)
            mean_bc = mean_bc + m_h * hm
        cen = att - mean_bc
        inv_bc = jnp.zeros((1, HNK), f32)
        for h in range(H_HEADS):
            hm = hmask[h:h + 1, :]
            ch = cen * hm
            v_h = jnp.sum(jnp.sum(ch * ch, axis=-1, keepdims=True),
                          axis=0, keepdims=True) * inv_npix              # (1, 1)
            inv_bc = inv_bc + lax.rsqrt(v_h + IN_EPS) * hm
        att = cen * inv_bc

        # att @ block-diagonal(V) directly yields the head-concatenated output (NQ, h*d_v)
        out_b = jnp.dot(att, v_bd, preferred_element_type=f32)
        y_b = jnp.dot(out_b, wo_ref[...], preferred_element_type=f32) + bo_ref[...]
        o_ref[b] = y_b.astype(o_ref.dtype)


def emsa_pallas(queries, p):
    b_s, nq, c = queries.shape
    assert (b_s, nq, c) == (B, NQ, D_MODEL)
    x2d = queries.reshape(b_s * nq, c)   # batched slab for the dense projections
    # No grid: the whole problem (<100 KB) sits in VMEM for a single kernel invocation.
    return pl.pallas_call(
        emsa_kernel,
        out_shape=jax.ShapeDtypeStruct((b_s, nq, c), jnp.float32),
    )(x2d, p["wq"], p["bq"], p["wkv"], p["bkv"], p["wo"], p["bo"],
      p["G"], p["wtap"], p["R"], p["bsr"], p["ln_g"], p["ln_b"],
      p["wtrb"], p["btrb"], p["hmask"], p["psel"],
      p["mhd_k"], p["mhd_v"])


# ---------------- host-side parameter preparation (pure numpy, done once) ----------------
def prepare_kernel_params(raw):
    wsr = np.asarray(raw["wsr"], np.float32)            # (KK, C) depthwise taps per channel
    wtr = np.asarray(raw["wtr"], np.float32)            # (h, h) 1x1 head-mixing conv
    btr = np.asarray(raw["btr"], np.float32)            # (h,)

    # sr_conv as gather / weight / reduce matrices over the batched (B*NQ, C) slab.
    G = np.zeros((B * NK * KK, B * NQ), np.float32)     # tap gather (0/1)
    R = np.zeros((B * NK, B * NK * KK), np.float32)     # per-output-pixel tap reduction (0/1)
    wtap = np.zeros((B * NK * KK, D_MODEL), np.float32)  # per-row tap weights (per channel)
    for b in range(B):
        for oh in range(OUT_H):
            for ow in range(OUT_W):
                o = oh * OUT_W + ow
                for kh in range(KSIZE):
                    for kw in range(KSIZE):
                        w = kh * KSIZE + kw
                        row = (b * NK + o) * KK + w
                        R[b * NK + o, row] = 1.0
                        wtap[row, :] = wsr[w, :]
                        ih = oh * STRIDE - PAD + kh
                        iw = ow * STRIDE - PAD + kw
                        if 0 <= ih < H_SP and 0 <= iw < W_SP:
                            G[row, b * NQ + ih * W_SP + iw] = 1.0

    # head-block masks on the stacked (head-major) key axis of width h*NK
    hmask = np.zeros((H_HEADS, HNK), np.float32)
    for h in range(H_HEADS):
        hmask[h, h * NK:(h + 1) * NK] = 1.0

    # per-batch sublane replication: row h*NK+j selects kv row b*NK+j
    psel = np.zeros((B, HNK, B * NK), np.float32)
    for b in range(B):
        for h in range(H_HEADS):
            for j in range(NK):
                psel[b, h * NK + j, b * NK + j] = 1.0

    # block-diagonal lane masks for K / V
    mhd_k = np.zeros((HNK, HDK), np.float32)
    mhd_v = np.zeros((HNK, HDV), np.float32)
    for h in range(H_HEADS):
        mhd_k[h * NK:(h + 1) * NK, h * D_K:(h + 1) * D_K] = 1.0
        mhd_v[h * NK:(h + 1) * NK, h * D_V:(h + 1) * D_V] = 1.0

    # 1x1 head-mixing conv on the stacked score tile; 1/sqrt(d_k) folded, bias hoisted.
    wtrb = np.kron((wtr / math.sqrt(D_K)).T, np.eye(NK, dtype=np.float32)).astype(np.float32)
    btrb = np.repeat(btr, NK)[None, :].astype(np.float32)

    return dict(
        wq=raw["wq"], bq=raw["bq"],
        wkv=jnp.concatenate([raw["wk"], raw["wv"]], axis=1),
        bkv=jnp.concatenate([raw["bk"], raw["bv"]], axis=1),
        wo=raw["wo"], bo=raw["bo"],
        G=jnp.asarray(G), wtap=jnp.asarray(wtap), R=jnp.asarray(R),
        bsr=raw["bsr"], ln_g=raw["ln_g"], ln_b=raw["ln_b"],
        wtrb=jnp.asarray(wtrb), btrb=jnp.asarray(btrb),
        hmask=jnp.asarray(hmask),
        psel=jnp.asarray(psel),
        mhd_k=jnp.asarray(mhd_k), mhd_v=jnp.asarray(mhd_v),
    )


# ---------------- pure-JAX reference (for in-script validation only) ----------------
def emsa_ref(queries, p):
    b_s, nq, c = queries.shape
    q = (queries @ p["wq"] + p["bq"]).reshape(b_s, nq, H_HEADS, D_K).transpose(0, 2, 1, 3)
    x = queries.transpose(0, 2, 1).reshape(b_s, c, H_SP, W_SP)          # NCHW
    w_conv = p["wsr"].T.reshape(c, 1, KSIZE, KSIZE)
    x = lax.conv_general_dilated(x, w_conv, window_strides=(STRIDE, STRIDE),
                                 padding=((PAD, PAD), (PAD, PAD)),
                                 dimension_numbers=("NCHW", "OIHW", "NCHW"),
                                 feature_group_count=c)
    x = x.reshape(b_s, c, -1).transpose(0, 2, 1)                        # (b, NK, c)
    mu = x.mean(-1, keepdims=True)
    var = ((x - mu) ** 2).mean(-1, keepdims=True)
    x = (x - mu) / jnp.sqrt(var + LN_EPS) * p["ln_g"] + p["ln_b"]
    k = (x @ p["wk"] + p["bk"]).reshape(b_s, NK, H_HEADS, D_K).transpose(0, 2, 3, 1)
    v = (x @ p["wv"] + p["bv"]).reshape(b_s, NK, H_HEADS, D_V).transpose(0, 2, 1, 3)
    att = jnp.einsum("bhqd,bhdk->bhqk", q, k) / math.sqrt(D_K)
    att = jnp.einsum("ij,bjqk->biqk", p["wtr"], att) + p["btr"][None, :, None, None]
    att = jax.nn.softmax(att, axis=-1)
    mu = att.mean(axis=(2, 3), keepdims=True)
    var = ((att - mu) ** 2).mean(axis=(2, 3), keepdims=True)
    att = (att - mu) / jnp.sqrt(var + IN_EPS)
    out = jnp.einsum("bhqk,bhkd->bhqd", att, v).transpose(0, 2, 1, 3).reshape(b_s, nq, H_HEADS * D_V)
    return out @ p["wo"] + p["bo"]


if __name__ == "__main__":
    key = jax.random.PRNGKey(0)
    ks = jax.random.split(key, 8)

    # Deterministic synthetic parameters (shapes from EMSA.__init__; PyTorch stores Linear
    # weights as (out, in) -> transpose for x @ W layout used here; biases init to 0).
    # NOTE: init_weights uses std=0.001 for Linear; we scale to 0.1 so the InstanceNorm on the
    # attention maps is not eps/ulp-dominated and the numerical check below is meaningful.
    LIN_STD = 0.1
    wq_pt = LIN_STD * jax.random.normal(ks[0], (HDK, D_MODEL), jnp.float32)
    wk_pt = LIN_STD * jax.random.normal(ks[1], (HDK, D_MODEL), jnp.float32)
    wv_pt = LIN_STD * jax.random.normal(ks[2], (HDV, D_MODEL), jnp.float32)
    wo_pt = LIN_STD * jax.random.normal(ks[3], (D_MODEL, HDV), jnp.float32)
    wsr_conv = math.sqrt(2.0 / (KSIZE * KSIZE)) * jax.random.normal(
        ks[4], (D_MODEL, 1, KSIZE, KSIZE), jnp.float32)                 # depthwise conv weight
    wtr_conv = math.sqrt(2.0 / H_HEADS) * jax.random.normal(
        ks[5], (H_HEADS, H_HEADS, 1, 1), jnp.float32)                   # 1x1 head-mixing conv

    raw = dict(
        wq=wq_pt.T, bq=jnp.zeros((1, HDK), jnp.float32),
        wk=wk_pt.T, bk=jnp.zeros((1, HDK), jnp.float32),
        wv=wv_pt.T, bv=jnp.zeros((1, HDV), jnp.float32),
        wo=wo_pt.T, bo=jnp.zeros((1, D_MODEL), jnp.float32),
        wsr=wsr_conv[:, 0].reshape(D_MODEL, KK).T,                      # (KK, C)
        bsr=jnp.zeros((1, D_MODEL), jnp.float32),
        ln_g=jnp.ones((1, D_MODEL), jnp.float32),
        ln_b=jnp.zeros((1, D_MODEL), jnp.float32),
        wtr=wtr_conv[:, :, 0, 0],                                       # (h, h)
        btr=jnp.zeros((H_HEADS,), jnp.float32),
    )
    kparams = prepare_kernel_params(raw)

    queries = jax.random.normal(ks[6], (B, NQ, D_MODEL), jnp.float32)
    # keys/values exist in the PyTorch signature but are unused when ratio > 1.

    out = jax.block_until_ready(emsa_pallas(queries, kparams))
    ref = emsa_ref(queries, raw)

    assert out.shape == (B, NQ, D_MODEL)
    # Observed ~1e-5 with full-precision f32 matmuls on both sides; the bound leaves headroom
    # for backends that lower default-precision f32 dot products to single bf16 MXU passes.
    rel_err = float(jnp.max(jnp.abs(out - ref)) / (jnp.max(jnp.abs(ref)) + 1e-12))
    assert rel_err < 5e-3, f"relative error too large: {rel_err}"
    print("KERNEL_OK")
</pallas_src>

<mosaic_0001>
module attributes {stable_mosaic.version = 11 : i64} {
  func.func @emsa_kernel(%arg0: memref<98x32xf32, #tpu.memory_space<vmem>>, %arg1: memref<32x64xf32, #tpu.memory_space<vmem>>, %arg2: memref<1x64xf32, #tpu.memory_space<vmem>>, %arg3: memref<32x128xf32, #tpu.memory_space<vmem>>, %arg4: memref<1x128xf32, #tpu.memory_space<vmem>>, %arg5: memref<64x32xf32, #tpu.memory_space<vmem>>, %arg6: memref<1x32xf32, #tpu.memory_space<vmem>>, %arg7: memref<128x98xf32, #tpu.memory_space<vmem>>, %arg8: memref<128x32xf32, #tpu.memory_space<vmem>>, %arg9: memref<8x128xf32, #tpu.memory_space<vmem>>, %arg10: memref<1x32xf32, #tpu.memory_space<vmem>>, %arg11: memref<1x32xf32, #tpu.memory_space<vmem>>, %arg12: memref<1x32xf32, #tpu.memory_space<vmem>>, %arg13: memref<16x16xf32, #tpu.memory_space<vmem>>, %arg14: memref<1x16xf32, #tpu.memory_space<vmem>>, %arg15: memref<4x16xf32, #tpu.memory_space<vmem>>, %arg16: memref<2x16x8xf32, #tpu.memory_space<vmem>>, %arg17: memref<16x64xf32, #tpu.memory_space<vmem>>, %arg18: memref<16x64xf32, #tpu.memory_space<vmem>>, %arg19: memref<2x49x32xf32, #tpu.memory_space<vmem>>) attributes {dimension_semantics = [], scalar_prefetch = 0 : i64, scratch_operands = 0 : i64, tpu.core_type = #tpu.core_type<tc>} {
    %c0 = arith.constant 0 : index
    %c0_0 = arith.constant 0 : index
    %0 = vector.load %arg0[%c0, %c0_0] : memref<98x32xf32, #tpu.memory_space<vmem>>, vector<98x32xf32>
    %c0_1 = arith.constant 0 : index
    %c0_2 = arith.constant 0 : index
    %1 = vector.load %arg1[%c0_1, %c0_2] : memref<32x64xf32, #tpu.memory_space<vmem>>, vector<32x64xf32>
    %cst = arith.constant dense<0.000000e+00> : vector<98x64xf32>
    %2 = tpu.matmul %0, %1, %cst {dimension_numbers = #tpu.dot_dimension_numbers<[1], [0], [0], [1], [0, 0, 1, 1], [], []>, precision = #tpu.contract_precision<fp32>} : vector<98x32xf32>, vector<32x64xf32>, vector<98x64xf32> -> vector<98x64xf32>
    %c0_3 = arith.constant 0 : index
    %c0_4 = arith.constant 0 : index
    %3 = vector.load %arg2[%c0_3, %c0_4] : memref<1x64xf32, #tpu.memory_space<vmem>>, vector<1x64xf32>
    %4 = vector.broadcast %3 : vector<1x64xf32> to vector<98x64xf32>
    %5 = arith.addf %2, %4 : vector<98x64xf32>
    %c0_5 = arith.constant 0 : index
    %c0_6 = arith.constant 0 : index
    %6 = vector.load %arg7[%c0_5, %c0_6] : memref<128x98xf32, #tpu.memory_space<vmem>>, vector<128x98xf32>
    %cst_7 = arith.constant dense<0.000000e+00> : vector<128x32xf32>
    %7 = tpu.matmul %6, %0, %cst_7 {dimension_numbers = #tpu.dot_dimension_numbers<[1], [0], [0], [1], [0, 0, 1, 1], [], []>, precision = #tpu.contract_precision<fp32>} : vector<128x98xf32>, vector<98x32xf32>, vector<128x32xf32> -> vector<128x32xf32>
    %c0_8 = arith.constant 0 : index
    %c0_9 = arith.constant 0 : index
    %8 = vector.load %arg9[%c0_8, %c0_9] : memref<8x128xf32, #tpu.memory_space<vmem>>, vector<8x128xf32>
    %c0_10 = arith.constant 0 : index
    %c0_11 = arith.constant 0 : index
    %9 = vector.load %arg8[%c0_10, %c0_11] : memref<128x32xf32, #tpu.memory_space<vmem>>, vector<128x32xf32>
    %10 = arith.mulf %7, %9 : vector<128x32xf32>
    %cst_12 = arith.constant dense<0.000000e+00> : vector<8x32xf32>
    %11 = tpu.matmul %8, %10, %cst_12 {dimension_numbers = #tpu.dot_dimension_numbers<[1], [0], [0], [1], [0, 0, 1, 1], [], []>, precision = #tpu.contract_precision<fp32>} : vector<8x128xf32>, vector<128x32xf32>, vector<8x32xf32> -> vector<8x32xf32>
    %c0_13 = arith.constant 0 : index
    %c0_14 = arith.constant 0 : index
    %12 = vector.load %arg10[%c0_13, %c0_14] : memref<1x32xf32, #tpu.memory_space<vmem>>, vector<1x32xf32>
    %13 = vector.broadcast %12 : vector<1x32xf32> to vector<8x32xf32>
    %14 = arith.addf %11, %13 : vector<8x32xf32>
    %cst_15 = arith.constant dense<0.000000e+00> : vector<8xf32>
    %15 = vector.multi_reduction <add>, %14, %cst_15 [1] : vector<8x32xf32> to vector<8xf32>
    %16 = vector.shape_cast %15 : vector<8xf32> to vector<8x1xf32>
    %cst_16 = arith.constant 3.200000e+01 : f32
    %17 = vector.broadcast %cst_16 : f32 to vector<8x1xf32>
    %18 = arith.divf %16, %17 : vector<8x1xf32>
    %19 = vector.broadcast %18 : vector<8x1xf32> to vector<8x32xf32>
    %20 = arith.subf %14, %19 : vector<8x32xf32>
    %21 = vector.broadcast %18 : vector<8x1xf32> to vector<8x32xf32>
    %22 = arith.subf %14, %21 : vector<8x32xf32>
    %23 = arith.mulf %20, %22 : vector<8x32xf32>
    %cst_17 = arith.constant dense<0.000000e+00> : vector<8xf32>
    %24 = vector.multi_reduction <add>, %23, %cst_17 [1] : vector<8x32xf32> to vector<8xf32>
    %25 = vector.shape_cast %24 : vector<8xf32> to vector<8x1xf32>
    %cst_18 = arith.constant 3.200000e+01 : f32
    %26 = vector.broadcast %cst_18 : f32 to vector<8x1xf32>
    %27 = arith.divf %25, %26 : vector<8x1xf32>
    %28 = vector.broadcast %18 : vector<8x1xf32> to vector<8x32xf32>
    %29 = arith.subf %14, %28 : vector<8x32xf32>
    %cst_19 = arith.constant 9.99999974E-6 : f32
    %30 = vector.broadcast %cst_19 : f32 to vector<8x1xf32>
    %31 = arith.addf %27, %30 : vector<8x1xf32>
    %32 = math.rsqrt %31 : vector<8x1xf32>
    %33 = vector.broadcast %32 : vector<8x1xf32> to vector<8x32xf32>
    %34 = arith.mulf %29, %33 : vector<8x32xf32>
    %c0_20 = arith.constant 0 : index
    %c0_21 = arith.constant 0 : index
    %35 = vector.load %arg11[%c0_20, %c0_21] : memref<1x32xf32, #tpu.memory_space<vmem>>, vector<1x32xf32>
    %36 = vector.broadcast %35 : vector<1x32xf32> to vector<8x32xf32>
    %37 = arith.mulf %34, %36 : vector<8x32xf32>
    %c0_22 = arith.constant 0 : index
    %c0_23 = arith.constant 0 : index
    %38 = vector.load %arg12[%c0_22, %c0_23] : memref<1x32xf32, #tpu.memory_space<vmem>>, vector<1x32xf32>
    %39 = vector.broadcast %38 : vector<1x32xf32> to vector<8x32xf32>
    %40 = arith.addf %37, %39 : vector<8x32xf32>
    %c0_24 = arith.constant 0 : index
    %c0_25 = arith.constant 0 : index
    %41 = vector.load %arg3[%c0_24, %c0_25] : memref<32x128xf32, #tpu.memory_space<vmem>>, vector<32x128xf32>
    %cst_26 = arith.constant dense<0.000000e+00> : vector<8x128xf32>
    %42 = tpu.matmul %40, %41, %cst_26 {dimension_numbers = #tpu.dot_dimension_numbers<[1], [0], [0], [1], [0, 0, 1, 1], [], []>, precision = #tpu.contract_precision<fp32>} : vector<8x32xf32>, vector<32x128xf32>, vector<8x128xf32> -> vector<8x128xf32>
    %c0_27 = arith.constant 0 : index
    %c0_28 = arith.constant 0 : index
    %43 = vector.load %arg4[%c0_27, %c0_28] : memref<1x128xf32, #tpu.memory_space<vmem>>, vector<1x128xf32>
    %44 = vector.broadcast %43 : vector<1x128xf32> to vector<8x128xf32>
    %45 = arith.addf %42, %44 : vector<8x128xf32>
    %c0_29 = arith.constant 0 : index
    %c0_30 = arith.constant 0 : index
    %46 = vector.load %arg15[%c0_29, %c0_30] : memref<4x16xf32, #tpu.memory_space<vmem>>, vector<4x16xf32>
    %c0_31 = arith.constant 0 : index
    %c0_32 = arith.constant 0 : index
    %47 = vector.load %arg13[%c0_31, %c0_32] : memref<16x16xf32, #tpu.memory_space<vmem>>, vector<16x16xf32>
    %c0_33 = arith.constant 0 : index
    %c0_34 = arith.constant 0 : index
    %48 = vector.load %arg14[%c0_33, %c0_34] : memref<1x16xf32, #tpu.memory_space<vmem>>, vector<1x16xf32>
    %c0_35 = arith.constant 0 : index
    %c0_36 = arith.constant 0 : index
    %49 = vector.load %arg17[%c0_35, %c0_36] : memref<16x64xf32, #tpu.memory_space<vmem>>, vector<16x64xf32>
    %c0_37 = arith.constant 0 : index
    %c0_38 = arith.constant 0 : index
    %50 = vector.load %arg18[%c0_37, %c0_38] : memref<16x64xf32, #tpu.memory_space<vmem>>, vector<16x64xf32>
    %c0_39 = arith.constant 0 : index
    %c0_40 = arith.constant 0 : index
    %c0_41 = arith.constant 0 : index
    %51 = vector.load %arg16[%c0_39, %c0_40, %c0_41] : memref<2x16x8xf32, #tpu.memory_space<vmem>>, vector<1x16x8xf32>
    %52 = vector.shape_cast %51 : vector<1x16x8xf32> to vector<16x8xf32>
    %cst_42 = arith.constant dense<0.000000e+00> : vector<16x128xf32>
    %53 = tpu.matmul %52, %45, %cst_42 {dimension_numbers = #tpu.dot_dimension_numbers<[1], [0], [0], [1], [0, 0, 1, 1], [], []>, precision = #tpu.contract_precision<fp32>} : vector<16x8xf32>, vector<8x128xf32>, vector<16x128xf32> -> vector<16x128xf32>
    %54 = vector.extract_strided_slice %53 {offsets = [0, 0], sizes = [16, 64], strides = [1, 1]} : vector<16x128xf32> to vector<16x64xf32>
    %55 = arith.mulf %54, %49 : vector<16x64xf32>
    %56 = vector.extract_strided_slice %53 {offsets = [0, 64], sizes = [16, 64], strides = [1, 1]} : vector<16x128xf32> to vector<16x64xf32>
    %57 = arith.mulf %56, %50 : vector<16x64xf32>
    %58 = vector.extract_strided_slice %5 {offsets = [0, 0], sizes = [49, 64], strides = [1, 1]} : vector<98x64xf32> to vector<49x64xf32>
    %cst_43 = arith.constant dense<0.000000e+00> : vector<49x16xf32>
    %59 = tpu.matmul %58, %55, %cst_43 {dimension_numbers = #tpu.dot_dimension_numbers<[1], [1], [0], [0], [0, 0, 1, 0], [], []>, precision = #tpu.contract_precision<fp32>} : vector<49x64xf32>, vector<16x64xf32>, vector<49x16xf32> -> vector<49x16xf32>
    %cst_44 = arith.constant dense<0.000000e+00> : vector<49x16xf32>
    %60 = tpu.matmul %59, %47, %cst_44 {dimension_numbers = #tpu.dot_dimension_numbers<[1], [0], [0], [1], [0, 0, 1, 1], [], []>, precision = #tpu.contract_precision<fp32>} : vector<49x16xf32>, vector<16x16xf32>, vector<49x16xf32> -> vector<49x16xf32>
    %61 = vector.broadcast %48 : vector<1x16xf32> to vector<49x16xf32>
    %62 = arith.addf %60, %61 : vector<49x16xf32>
    %cst_45 = arith.constant 0.000000e+00 : f32
    %63 = vector.broadcast %cst_45 : f32 to vector<49x16xf32>
    %64 = vector.extract_strided_slice %46 {offsets = [0, 0], sizes = [1, 16], strides = [1, 1]} : vector<4x16xf32> to vector<1x16xf32>
    %cst_46 = arith.constant 5.000000e-01 : f32
    %65 = vector.broadcast %cst_46 : f32 to vector<1x16xf32>
    %66 = arith.cmpf ogt, %64, %65 : vector<1x16xf32>
    %cst_47 = arith.constant -1.000000e+30 : f32
    %67 = vector.shape_cast %66 : vector<1x16xi1> to vector<1x16xi1>
    %68 = vector.broadcast %67 : vector<1x16xi1> to vector<49x16xi1>
    %69 = vector.broadcast %cst_47 : f32 to vector<49x16xf32>
    %70 = arith.select %68, %62, %69 : vector<49x16xi1>, vector<49x16xf32>
    %cst_48 = arith.constant dense<0xFF800000> : vector<49xf32>
    %71 = vector.multi_reduction <maximumf>, %70, %cst_48 [1] : vector<49x16xf32> to vector<49xf32>
    %72 = vector.shape_cast %71 : vector<49xf32> to vector<49x1xf32>
    %73 = vector.broadcast %72 : vector<49x1xf32> to vector<49x16xf32>
    %74 = vector.broadcast %64 : vector<1x16xf32> to vector<49x16xf32>
    %75 = arith.mulf %73, %74 : vector<49x16xf32>
    %76 = arith.addf %63, %75 : vector<49x16xf32>
    %77 = vector.extract_strided_slice %46 {offsets = [1, 0], sizes = [1, 16], strides = [1, 1]} : vector<4x16xf32> to vector<1x16xf32>
    %cst_49 = arith.constant 5.000000e-01 : f32
    %78 = vector.broadcast %cst_49 : f32 to vector<1x16xf32>
    %79 = arith.cmpf ogt, %77, %78 : vector<1x16xf32>
    %cst_50 = arith.constant -1.000000e+30 : f32
    %80 = vector.shape_cast %79 : vector<1x16xi1> to vector<1x16xi1>
    %81 = vector.broadcast %80 : vector<1x16xi1> to vector<49x16xi1>
    %82 = vector.broadcast %cst_50 : f32 to vector<49x16xf32>
    %83 = arith.select %81, %62, %82 : vector<49x16xi1>, vector<49x16xf32>
    %cst_51 = arith.constant dense<0xFF800000> : vector<49xf32>
    %84 = vector.multi_reduction <maximumf>, %83, %cst_51 [1] : vector<49x16xf32> to vector<49xf32>
    %85 = vector.shape_cast %84 : vector<49xf32> to vector<49x1xf32>
    %86 = vector.broadcast %85 : vector<49x1xf32> to vector<49x16xf32>
    %87 = vector.broadcast %77 : vector<1x16xf32> to vector<49x16xf32>
    %88 = arith.mulf %86, %87 : vector<49x16xf32>
    %89 = arith.addf %76, %88 : vector<49x16xf32>
    %90 = vector.extract_strided_slice %46 {offsets = [2, 0], sizes = [1, 16], strides = [1, 1]} : vector<4x16xf32> to vector<1x16xf32>
    %cst_52 = arith.constant 5.000000e-01 : f32
    %91 = vector.broadcast %cst_52 : f32 to vector<1x16xf32>
    %92 = arith.cmpf ogt, %90, %91 : vector<1x16xf32>
    %cst_53 = arith.constant -1.000000e+30 : f32
    %93 = vector.shape_cast %92 : vector<1x16xi1> to vector<1x16xi1>
    %94 = vector.broadcast %93 : vector<1x16xi1> to vector<49x16xi1>
    %95 = vector.broadcast %cst_53 : f32 to vector<49x16xf32>
    %96 = arith.select %94, %62, %95 : vector<49x16xi1>, vector<49x16xf32>
    %cst_54 = arith.constant dense<0xFF800000> : vector<49xf32>
    %97 = vector.multi_reduction <maximumf>, %96, %cst_54 [1] : vector<49x16xf32> to vector<49xf32>
    %98 = vector.shape_cast %97 : vector<49xf32> to vector<49x1xf32>
    %99 = vector.broadcast %98 : vector<49x1xf32> to vector<49x16xf32>
    %100 = vector.broadcast %90 : vector<1x16xf32> to vector<49x16xf32>
    %101 = arith.mulf %99, %100 : vector<49x16xf32>
    %102 = arith.addf %89, %101 : vector<49x16xf32>
    %103 = vector.extract_strided_slice %46 {offsets = [3, 0], sizes = [1, 16], strides = [1, 1]} : vector<4x16xf32> to vector<1x16xf32>
    %cst_55 = arith.constant 5.000000e-01 : f32
    %104 = vector.broadcast %cst_55 : f32 to vector<1x16xf32>
    %105 = arith.cmpf ogt, %103, %104 : vector<1x16xf32>
    %cst_56 = arith.constant -1.000000e+30 : f32
    %106 = vector.shape_cast %105 : vector<1x16xi1> to vector<1x16xi1>
    %107 = vector.broadcast %106 : vector<1x16xi1> to vector<49x16xi1>
    %108 = vector.broadcast %cst_56 : f32 to vector<49x16xf32>
    %109 = arith.select %107, %62, %108 : vector<49x16xi1>, vector<49x16xf32>
    %cst_57 = arith.constant dense<0xFF800000> : vector<49xf32>
    %110 = vector.multi_reduction <maximumf>, %109, %cst_57 [1] : vector<49x16xf32> to vector<49xf32>
    %111 = vector.shape_cast %110 : vector<49xf32> to vector<49x1xf32>
    %112 = vector.broadcast %111 : vector<49x1xf32> to vector<49x16xf32>
    %113 = vector.broadcast %103 : vector<1x16xf32> to vector<49x16xf32>
    %114 = arith.mulf %112, %113 : vector<49x16xf32>
    %115 = arith.addf %102, %114 : vector<49x16xf32>
    %116 = arith.subf %62, %115 : vector<49x16xf32>
    %117 = math.exp %116 : vector<49x16xf32>
    %cst_58 = arith.constant 0.000000e+00 : f32
    %118 = vector.broadcast %cst_58 : f32 to vector<49x16xf32>
    %119 = vector.extract_strided_slice %46 {offsets = [0, 0], sizes = [1, 16], strides = [1, 1]} : vector<4x16xf32> to vector<1x16xf32>
    %120 = vector.broadcast %119 : vector<1x16xf32> to vector<49x16xf32>
    %121 = arith.mulf %117, %120 : vector<49x16xf32>
    %cst_59 = arith.constant dense<0.000000e+00> : vector<49xf32>
    %122 = vector.multi_reduction <add>, %121, %cst_59 [1] : vector<49x16xf32> to vector<49xf32>
    %123 = vector.shape_cast %122 : vector<49xf32> to vector<49x1xf32>
    %124 = vector.broadcast %123 : vector<49x1xf32> to vector<49x16xf32>
    %125 = vector.broadcast %119 : vector<1x16xf32> to vector<49x16xf32>
    %126 = arith.mulf %124, %125 : vector<49x16xf32>
    %127 = arith.addf %118, %126 : vector<49x16xf32>
    %128 = vector.extract_strided_slice %46 {offsets = [1, 0], sizes = [1, 16], strides = [1, 1]} : vector<4x16xf32> to vector<1x16xf32>
    %129 = vector.broadcast %128 : vector<1x16xf32> to vector<49x16xf32>
    %130 = arith.mulf %117, %129 : vector<49x16xf32>
    %cst_60 = arith.constant dense<0.000000e+00> : vector<49xf32>
    %131 = vector.multi_reduction <add>, %130, %cst_60 [1] : vector<49x16xf32> to vector<49xf32>
    %132 = vector.shape_cast %131 : vector<49xf32> to vector<49x1xf32>
    %133 = vector.broadcast %132 : vector<49x1xf32> to vector<49x16xf32>
    %134 = vector.broadcast %128 : vector<1x16xf32> to vector<49x16xf32>
    %135 = arith.mulf %133, %134 : vector<49x16xf32>
    %136 = arith.addf %127, %135 : vector<49x16xf32>
    %137 = vector.extract_strided_slice %46 {offsets = [2, 0], sizes = [1, 16], strides = [1, 1]} : vector<4x16xf32> to vector<1x16xf32>
    %138 = vector.broadcast %137 : vector<1x16xf32> to vector<49x16xf32>
    %139 = arith.mulf %117, %138 : vector<49x16xf32>
    %cst_61 = arith.constant dense<0.000000e+00> : vector<49xf32>
    %140 = vector.multi_reduction <add>, %139, %cst_61 [1] : vector<49x16xf32> to vector<49xf32>
    %141 = vector.shape_cast %140 : vector<49xf32> to vector<49x1xf32>
    %142 = vector.broadcast %141 : vector<49x1xf32> to vector<49x16xf32>
    %143 = vector.broadcast %137 : vector<1x16xf32> to vector<49x16xf32>
    %144 = arith.mulf %142, %143 : vector<49x16xf32>
    %145 = arith.addf %136, %144 : vector<49x16xf32>
    %146 = vector.extract_strided_slice %46 {offsets = [3, 0], sizes = [1, 16], strides = [1, 1]} : vector<4x16xf32> to vector<1x16xf32>
    %147 = vector.broadcast %146 : vector<1x16xf32> to vector<49x16xf32>
    %148 = arith.mulf %117, %147 : vector<49x16xf32>
    %cst_62 = arith.constant dense<0.000000e+00> : vector<49xf32>
    %149 = vector.multi_reduction <add>, %148, %cst_62 [1] : vector<49x16xf32> to vector<49xf32>
    %150 = vector.shape_cast %149 : vector<49xf32> to vector<49x1xf32>
    %151 = vector.broadcast %150 : vector<49x1xf32> to vector<49x16xf32>
    %152 = vector.broadcast %146 : vector<1x16xf32> to vector<49x16xf32>
    %153 = arith.mulf %151, %152 : vector<49x16xf32>
    %154 = arith.addf %145, %153 : vector<49x16xf32>
    %155 = arith.divf %117, %154 : vector<49x16xf32>
    %cst_63 = arith.constant 0.000000e+00 : f32
    %156 = vector.broadcast %cst_63 : f32 to vector<1x16xf32>
    %157 = vector.extract_strided_slice %46 {offsets = [0, 0], sizes = [1, 16], strides = [1, 1]} : vector<4x16xf32> to vector<1x16xf32>
    %158 = vector.broadcast %157 : vector<1x16xf32> to vector<49x16xf32>
    %159 = arith.mulf %155, %158 : vector<49x16xf32>
    %cst_64 = arith.constant dense<0.000000e+00> : vector<49xf32>
    %160 = vector.multi_reduction <add>, %159, %cst_64 [1] : vector<49x16xf32> to vector<49xf32>
    %161 = vector.shape_cast %160 : vector<49xf32> to vector<49x1xf32>
    %cst_65 = arith.constant dense<0.000000e+00> : vector<1xf32>
    %162 = vector.multi_reduction <add>, %161, %cst_65 [0] : vector<49x1xf32> to vector<1xf32>
    %163 = vector.shape_cast %162 : vector<1xf32> to vector<1x1xf32>
    %cst_66 = arith.constant 0.00510204071 : f32
    %164 = vector.broadcast %cst_66 : f32 to vector<1x1xf32>
    %165 = arith.mulf %163, %164 : vector<1x1xf32>
    %166 = vector.broadcast %165 : vector<1x1xf32> to vector<1x16xf32>
    %167 = arith.mulf %166, %157 : vector<1x16xf32>
    %168 = arith.addf %156, %167 : vector<1x16xf32>
    %169 = vector.extract_strided_slice %46 {offsets = [1, 0], sizes = [1, 16], strides = [1, 1]} : vector<4x16xf32> to vector<1x16xf32>
    %170 = vector.broadcast %169 : vector<1x16xf32> to vector<49x16xf32>
    %171 = arith.mulf %155, %170 : vector<49x16xf32>
    %cst_67 = arith.constant dense<0.000000e+00> : vector<49xf32>
    %172 = vector.multi_reduction <add>, %171, %cst_67 [1] : vector<49x16xf32> to vector<49xf32>
    %173 = vector.shape_cast %172 : vector<49xf32> to vector<49x1xf32>
    %cst_68 = arith.constant dense<0.000000e+00> : vector<1xf32>
    %174 = vector.multi_reduction <add>, %173, %cst_68 [0] : vector<49x1xf32> to vector<1xf32>
    %175 = vector.shape_cast %174 : vector<1xf32> to vector<1x1xf32>
    %cst_69 = arith.constant 0.00510204071 : f32
    %176 = vector.broadcast %cst_69 : f32 to vector<1x1xf32>
    %177 = arith.mulf %175, %176 : vector<1x1xf32>
    %178 = vector.broadcast %177 : vector<1x1xf32> to vector<1x16xf32>
    %179 = arith.mulf %178, %169 : vector<1x16xf32>
    %180 = arith.addf %168, %179 : vector<1x16xf32>
    %181 = vector.extract_strided_slice %46 {offsets = [2, 0], sizes = [1, 16], strides = [1, 1]} : vector<4x16xf32> to vector<1x16xf32>
    %182 = vector.broadcast %181 : vector<1x16xf32> to vector<49x16xf32>
    %183 = arith.mulf %155, %182 : vector<49x16xf32>
    %cst_70 = arith.constant dense<0.000000e+00> : vector<49xf32>
    %184 = vector.multi_reduction <add>, %183, %cst_70 [1] : vector<49x16xf32> to vector<49xf32>
    %185 = vector.shape_cast %184 : vector<49xf32> to vector<49x1xf32>
    %cst_71 = arith.constant dense<0.000000e+00> : vector<1xf32>
    %186 = vector.multi_reduction <add>, %185, %cst_71 [0] : vector<49x1xf32> to vector<1xf32>
    %187 = vector.shape_cast %186 : vector<1xf32> to vector<1x1xf32>
    %cst_72 = arith.constant 0.00510204071 : f32
    %188 = vector.broadcast %cst_72 : f32 to vector<1x1xf32>
    %189 = arith.mulf %187, %188 : vector<1x1xf32>
    %190 = vector.broadcast %189 : vector<1x1xf32> to vector<1x16xf32>
    %191 = arith.mulf %190, %181 : vector<1x16xf32>
    %192 = arith.addf %180, %191 : vector<1x16xf32>
    %193 = vector.extract_strided_slice %46 {offsets = [3, 0], sizes = [1, 16], strides = [1, 1]} : vector<4x16xf32> to vector<1x16xf32>
    %194 = vector.broadcast %193 : vector<1x16xf32> to vector<49x16xf32>
    %195 = arith.mulf %155, %194 : vector<49x16xf32>
    %cst_73 = arith.constant dense<0.000000e+00> : vector<49xf32>
    %196 = vector.multi_reduction <add>, %195, %cst_73 [1] : vector<49x16xf32> to vector<49xf32>
    %197 = vector.shape_cast %196 : vector<49xf32> to vector<49x1xf32>
    %cst_74 = arith.constant dense<0.000000e+00> : vector<1xf32>
    %198 = vector.multi_reduction <add>, %197, %cst_74 [0] : vector<49x1xf32> to vector<1xf32>
    %199 = vector.shape_cast %198 : vector<1xf32> to vector<1x1xf32>
    %cst_75 = arith.constant 0.00510204071 : f32
    %200 = vector.broadcast %cst_75 : f32 to vector<1x1xf32>
    %201 = arith.mulf %199, %200 : vector<1x1xf32>
    %202 = vector.broadcast %201 : vector<1x1xf32> to vector<1x16xf32>
    %203 = arith.mulf %202, %193 : vector<1x16xf32>
    %204 = arith.addf %192, %203 : vector<1x16xf32>
    %205 = vector.broadcast %204 : vector<1x16xf32> to vector<49x16xf32>
    %206 = arith.subf %155, %205 : vector<49x16xf32>
    %cst_76 = arith.constant 0.000000e+00 : f32
    %207 = vector.broadcast %cst_76 : f32 to vector<1x16xf32>
    %208 = vector.extract_strided_slice %46 {offsets = [0, 0], sizes = [1, 16], strides = [1, 1]} : vector<4x16xf32> to vector<1x16xf32>
    %209 = vector.broadcast %208 : vector<1x16xf32> to vector<49x16xf32>
    %210 = arith.mulf %206, %209 : vector<49x16xf32>
    %211 = arith.mulf %210, %210 : vector<49x16xf32>
    %cst_77 = arith.constant dense<0.000000e+00> : vector<49xf32>
    %212 = vector.multi_reduction <add>, %211, %cst_77 [1] : vector<49x16xf32> to vector<49xf32>
    %213 = vector.shape_cast %212 : vector<49xf32> to vector<49x1xf32>
    %cst_78 = arith.constant dense<0.000000e+00> : vector<1xf32>
    %214 = vector.multi_reduction <add>, %213, %cst_78 [0] : vector<49x1xf32> to vector<1xf32>
    %215 = vector.shape_cast %214 : vector<1xf32> to vector<1x1xf32>
    %cst_79 = arith.constant 0.00510204071 : f32
    %216 = vector.broadcast %cst_79 : f32 to vector<1x1xf32>
    %217 = arith.mulf %215, %216 : vector<1x1xf32>
    %cst_80 = arith.constant 9.99999974E-6 : f32
    %218 = vector.broadcast %cst_80 : f32 to vector<1x1xf32>
    %219 = arith.addf %217, %218 : vector<1x1xf32>
    %220 = math.rsqrt %219 : vector<1x1xf32>
    %221 = vector.broadcast %220 : vector<1x1xf32> to vector<1x16xf32>
    %222 = arith.mulf %221, %208 : vector<1x16xf32>
    %223 = arith.addf %207, %222 : vector<1x16xf32>
    %224 = vector.extract_strided_slice %46 {offsets = [1, 0], sizes = [1, 16], strides = [1, 1]} : vector<4x16xf32> to vector<1x16xf32>
    %225 = vector.broadcast %224 : vector<1x16xf32> to vector<49x16xf32>
    %226 = arith.mulf %206, %225 : vector<49x16xf32>
    %227 = arith.mulf %226, %226 : vector<49x16xf32>
    %cst_81 = arith.constant dense<0.000000e+00> : vector<49xf32>
    %228 = vector.multi_reduction <add>, %227, %cst_81 [1] : vector<49x16xf32> to vector<49xf32>
    %229 = vector.shape_cast %228 : vector<49xf32> to vector<49x1xf32>
    %cst_82 = arith.constant dense<0.000000e+00> : vector<1xf32>
    %230 = vector.multi_reduction <add>, %229, %cst_82 [0] : vector<49x1xf32> to vector<1xf32>
    %231 = vector.shape_cast %230 : vector<1xf32> to vector<1x1xf32>
    %cst_83 = arith.constant 0.00510204071 : f32
    %232 = vector.broadcast %cst_83 : f32 to vector<1x1xf32>
    %233 = arith.mulf %231, %232 : vector<1x1xf32>
    %cst_84 = arith.constant 9.99999974E-6 : f32
    %234 = vector.broadcast %cst_84 : f32 to vector<1x1xf32>
    %235 = arith.addf %233, %234 : vector<1x1xf32>
    %236 = math.rsqrt %235 : vector<1x1xf32>
    %237 = vector.broadcast %236 : vector<1x1xf32> to vector<1x16xf32>
    %238 = arith.mulf %237, %224 : vector<1x16xf32>
    %239 = arith.addf %223, %238 : vector<1x16xf32>
    %240 = vector.extract_strided_slice %46 {offsets = [2, 0], sizes = [1, 16], strides = [1, 1]} : vector<4x16xf32> to vector<1x16xf32>
    %241 = vector.broadcast %240 : vector<1x16xf32> to vector<49x16xf32>
    %242 = arith.mulf %206, %241 : vector<49x16xf32>
    %243 = arith.mulf %242, %242 : vector<49x16xf32>
    %cst_85 = arith.constant dense<0.000000e+00> : vector<49xf32>
    %244 = vector.multi_reduction <add>, %243, %cst_85 [1] : vector<49x16xf32> to vector<49xf32>
    %245 = vector.shape_cast %244 : vector<49xf32> to vector<49x1xf32>
    %cst_86 = arith.constant dense<0.000000e+00> : vector<1xf32>
    %246 = vector.multi_reduction <add>, %245, %cst_86 [0] : vector<49x1xf32> to vector<1xf32>
    %247 = vector.shape_cast %246 : vector<1xf32> to vector<1x1xf32>
    %cst_87 = arith.constant 0.00510204071 : f32
    %248 = vector.broadcast %cst_87 : f32 to vector<1x1xf32>
    %249 = arith.mulf %247, %248 : vector<1x1xf32>
    %cst_88 = arith.constant 9.99999974E-6 : f32
    %250 = vector.broadcast %cst_88 : f32 to vector<1x1xf32>
    %251 = arith.addf %249, %250 : vector<1x1xf32>
    %252 = math.rsqrt %251 : vector<1x1xf32>
    %253 = vector.broadcast %252 : vector<1x1xf32> to vector<1x16xf32>
    %254 = arith.mulf %253, %240 : vector<1x16xf32>
    %255 = arith.addf %239, %254 : vector<1x16xf32>
    %256 = vector.extract_strided_slice %46 {offsets = [3, 0], sizes = [1, 16], strides = [1, 1]} : vector<4x16xf32> to vector<1x16xf32>
    %257 = vector.broadcast %256 : vector<1x16xf32> to vector<49x16xf32>
    %258 = arith.mulf %206, %257 : vector<49x16xf32>
    %259 = arith.mulf %258, %258 : vector<49x16xf32>
    %cst_89 = arith.constant dense<0.000000e+00> : vector<49xf32>
    %260 = vector.multi_reduction <add>, %259, %cst_89 [1] : vector<49x16xf32> to vector<49xf32>
    %261 = vector.shape_cast %260 : vector<49xf32> to vector<49x1xf32>
    %cst_90 = arith.constant dense<0.000000e+00> : vector<1xf32>
    %262 = vector.multi_reduction <add>, %261, %cst_90 [0] : vector<49x1xf32> to vector<1xf32>
    %263 = vector.shape_cast %262 : vector<1xf32> to vector<1x1xf32>
    %cst_91 = arith.constant 0.00510204071 : f32
    %264 = vector.broadcast %cst_91 : f32 to vector<1x1xf32>
    %265 = arith.mulf %263, %264 : vector<1x1xf32>
    %cst_92 = arith.constant 9.99999974E-6 : f32
    %266 = vector.broadcast %cst_92 : f32 to vector<1x1xf32>
    %267 = arith.addf %265, %266 : vector<1x1xf32>
    %268 = math.rsqrt %267 : vector<1x1xf32>
    %269 = vector.broadcast %268 : vector<1x1xf32> to vector<1x16xf32>
    %270 = arith.mulf %269, %256 : vector<1x16xf32>
    %271 = arith.addf %255, %270 : vector<1x16xf32>
    %272 = vector.broadcast %271 : vector<1x16xf32> to vector<49x16xf32>
    %273 = arith.mulf %206, %272 : vector<49x16xf32>
    %cst_93 = arith.constant dense<0.000000e+00> : vector<49x64xf32>
    %274 = tpu.matmul %273, %57, %cst_93 {dimension_numbers = #tpu.dot_dimension_numbers<[1], [0], [0], [1], [0, 0, 1, 1], [], []>, precision = #tpu.contract_precision<fp32>} : vector<49x16xf32>, vector<16x64xf32>, vector<49x64xf32> -> vector<49x64xf32>
    %c0_94 = arith.constant 0 : index
    %c0_95 = arith.constant 0 : index
    %275 = vector.load %arg5[%c0_94, %c0_95] : memref<64x32xf32, #tpu.memory_space<vmem>>, vector<64x32xf32>
    %cst_96 = arith.constant dense<0.000000e+00> : vector<49x32xf32>
    %276 = tpu.matmul %274, %275, %cst_96 {dimension_numbers = #tpu.dot_dimension_numbers<[1], [0], [0], [1], [0, 0, 1, 1], [], []>, precision = #tpu.contract_precision<fp32>} : vector<49x64xf32>, vector<64x32xf32>, vector<49x32xf32> -> vector<49x32xf32>
    %c0_97 = arith.constant 0 : index
    %c0_98 = arith.constant 0 : index
    %277 = vector.load %arg6[%c0_97, %c0_98] : memref<1x32xf32, #tpu.memory_space<vmem>>, vector<1x32xf32>
    %278 = vector.broadcast %277 : vector<1x32xf32> to vector<49x32xf32>
    %279 = arith.addf %276, %278 : vector<49x32xf32>
    %c0_99 = arith.constant 0 : index
    %c0_100 = arith.constant 0 : index
    %c0_101 = arith.constant 0 : index
    %280 = vector.load %arg19[%c0_99, %c0_100, %c0_101] : memref<2x49x32xf32, #tpu.memory_space<vmem>>, vector<1x49x32xf32>
    %281 = vector.shape_cast %280 : vector<1x49x32xf32> to vector<49x32xf32>
    %282 = vector.shape_cast %279 : vector<49x32xf32> to vector<1x49x32xf32>
    tpu.vector_store %arg19[%c0_99, %c0_100, %c0_101], %282 {strides = array<i32>} : memref<2x49x32xf32, #tpu.memory_space<vmem>>, vector<1x49x32xf32>,
    %c1 = arith.constant 1 : index
    %c0_102 = arith.constant 0 : index
    %c0_103 = arith.constant 0 : index
    %283 = vector.load %arg16[%c1, %c0_102, %c0_103] : memref<2x16x8xf32, #tpu.memory_space<vmem>>, vector<1x16x8xf32>
    %284 = vector.shape_cast %283 : vector<1x16x8xf32> to vector<16x8xf32>
    %cst_104 = arith.constant dense<0.000000e+00> : vector<16x128xf32>
    %285 = tpu.matmul %284, %45, %cst_104 {dimension_numbers = #tpu.dot_dimension_numbers<[1], [0], [0], [1], [0, 0, 1, 1], [], []>, precision = #tpu.contract_precision<fp32>} : vector<16x8xf32>, vector<8x128xf32>, vector<16x128xf32> -> vector<16x128xf32>
    %286 = vector.extract_strided_slice %285 {offsets = [0, 0], sizes = [16, 64], strides = [1, 1]} : vector<16x128xf32> to vector<16x64xf32>
    %287 = arith.mulf %286, %49 : vector<16x64xf32>
    %288 = vector.extract_strided_slice %285 {offsets = [0, 64], sizes = [16, 64], strides = [1, 1]} : vector<16x128xf32> to vector<16x64xf32>
    %289 = arith.mulf %288, %50 : vector<16x64xf32>
    %290 = vector.extract_strided_slice %5 {offsets = [49, 0], sizes = [49, 64], strides = [1, 1]} : vector<98x64xf32> to vector<49x64xf32>
    %cst_105 = arith.constant dense<0.000000e+00> : vector<49x16xf32>
    %291 = tpu.matmul %290, %287, %cst_105 {dimension_numbers = #tpu.dot_dimension_numbers<[1], [1], [0], [0], [0, 0, 1, 0], [], []>, precision = #tpu.contract_precision<fp32>} : vector<49x64xf32>, vector<16x64xf32>, vector<49x16xf32> -> vector<49x16xf32>
    %cst_106 = arith.constant dense<0.000000e+00> : vector<49x16xf32>
    %292 = tpu.matmul %291, %47, %cst_106 {dimension_numbers = #tpu.dot_dimension_numbers<[1], [0], [0], [1], [0, 0, 1, 1], [], []>, precision = #tpu.contract_precision<fp32>} : vector<49x16xf32>, vector<16x16xf32>, vector<49x16xf32> -> vector<49x16xf32>
    %293 = vector.broadcast %48 : vector<1x16xf32> to vector<49x16xf32>
    %294 = arith.addf %292, %293 : vector<49x16xf32>
    %cst_107 = arith.constant 0.000000e+00 : f32
    %295 = vector.broadcast %cst_107 : f32 to vector<49x16xf32>
    %296 = vector.extract_strided_slice %46 {offsets = [0, 0], sizes = [1, 16], strides = [1, 1]} : vector<4x16xf32> to vector<1x16xf32>
    %cst_108 = arith.constant 5.000000e-01 : f32
    %297 = vector.broadcast %cst_108 : f32 to vector<1x16xf32>
    %298 = arith.cmpf ogt, %296, %297 : vector<1x16xf32>
    %cst_109 = arith.constant -1.000000e+30 : f32
    %299 = vector.shape_cast %298 : vector<1x16xi1> to vector<1x16xi1>
    %300 = vector.broadcast %299 : vector<1x16xi1> to vector<49x16xi1>
    %301 = vector.broadcast %cst_109 : f32 to vector<49x16xf32>
    %302 = arith.select %300, %294, %301 : vector<49x16xi1>, vector<49x16xf32>
    %cst_110 = arith.constant dense<0xFF800000> : vector<49xf32>
    %303 = vector.multi_reduction <maximumf>, %302, %cst_110 [1] : vector<49x16xf32> to vector<49xf32>
    %304 = vector.shape_cast %303 : vector<49xf32> to vector<49x1xf32>
    %305 = vector.broadcast %304 : vector<49x1xf32> to vector<49x16xf32>
    %306 = vector.broadcast %296 : vector<1x16xf32> to vector<49x16xf32>
    %307 = arith.mulf %305, %306 : vector<49x16xf32>
    %308 = arith.addf %295, %307 : vector<49x16xf32>
    %309 = vector.extract_strided_slice %46 {offsets = [1, 0], sizes = [1, 16], strides = [1, 1]} : vector<4x16xf32> to vector<1x16xf32>
    %cst_111 = arith.constant 5.000000e-01 : f32
    %310 = vector.broadcast %cst_111 : f32 to vector<1x16xf32>
    %311 = arith.cmpf ogt, %309, %310 : vector<1x16xf32>
    %cst_112 = arith.constant -1.000000e+30 : f32
    %312 = vector.shape_cast %311 : vector<1x16xi1> to vector<1x16xi1>
    %313 = vector.broadcast %312 : vector<1x16xi1> to vector<49x16xi1>
    %314 = vector.broadcast %cst_112 : f32 to vector<49x16xf32>
    %315 = arith.select %313, %294, %314 : vector<49x16xi1>, vector<49x16xf32>
    %cst_113 = arith.constant dense<0xFF800000> : vector<49xf32>
    %316 = vector.multi_reduction <maximumf>, %315, %cst_113 [1] : vector<49x16xf32> to vector<49xf32>
    %317 = vector.shape_cast %316 : vector<49xf32> to vector<49x1xf32>
    %318 = vector.broadcast %317 : vector<49x1xf32> to vector<49x16xf32>
    %319 = vector.broadcast %309 : vector<1x16xf32> to vector<49x16xf32>
    %320 = arith.mulf %318, %319 : vector<49x16xf32>
    %321 = arith.addf %308, %320 : vector<49x16xf32>
    %322 = vector.extract_strided_slice %46 {offsets = [2, 0], sizes = [1, 16], strides = [1, 1]} : vector<4x16xf32> to vector<1x16xf32>
    %cst_114 = arith.constant 5.000000e-01 : f32
    %323 = vector.broadcast %cst_114 : f32 to vector<1x16xf32>
    %324 = arith.cmpf ogt, %322, %323 : vector<1x16xf32>
    %cst_115 = arith.constant -1.000000e+30 : f32
    %325 = vector.shape_cast %324 : vector<1x16xi1> to vector<1x16xi1>
    %326 = vector.broadcast %325 : vector<1x16xi1> to vector<49x16xi1>
    %327 = vector.broadcast %cst_115 : f32 to vector<49x16xf32>
    %328 = arith.select %326, %294, %327 : vector<49x16xi1>, vector<49x16xf32>
    %cst_116 = arith.constant dense<0xFF800000> : vector<49xf32>
    %329 = vector.multi_reduction <maximumf>, %328, %cst_116 [1] : vector<49x16xf32> to vector<49xf32>
    %330 = vector.shape_cast %329 : vector<49xf32> to vector<49x1xf32>
    %331 = vector.broadcast %330 : vector<49x1xf32> to vector<49x16xf32>
    %332 = vector.broadcast %322 : vector<1x16xf32> to vector<49x16xf32>
    %333 = arith.mulf %331, %332 : vector<49x16xf32>
    %334 = arith.addf %321, %333 : vector<49x16xf32>
    %335 = vector.extract_strided_slice %46 {offsets = [3, 0], sizes = [1, 16], strides = [1, 1]} : vector<4x16xf32> to vector<1x16xf32>
    %cst_117 = arith.constant 5.000000e-01 : f32
    %336 = vector.broadcast %cst_117 : f32 to vector<1x16xf32>
    %337 = arith.cmpf ogt, %335, %336 : vector<1x16xf32>
    %cst_118 = arith.constant -1.000000e+30 : f32
    %338 = vector.shape_cast %337 : vector<1x16xi1> to vector<1x16xi1>
    %339 = vector.broadcast %338 : vector<1x16xi1> to vector<49x16xi1>
    %340 = vector.broadcast %cst_118 : f32 to vector<49x16xf32>
    %341 = arith.select %339, %294, %340 : vector<49x16xi1>, vector<49x16xf32>
    %cst_119 = arith.constant dense<0xFF800000> : vector<49xf32>
    %342 = vector.multi_reduction <maximumf>, %341, %cst_119 [1] : vector<49x16xf32> to vector<49xf32>
    %343 = vector.shape_cast %342 : vector<49xf32> to vector<49x1xf32>
    %344 = vector.broadcast %343 : vector<49x1xf32> to vector<49x16xf32>
    %345 = vector.broadcast %335 : vector<1x16xf32> to vector<49x16xf32>
    %346 = arith.mulf %344, %345 : vector<49x16xf32>
    %347 = arith.addf %334, %346 : vector<49x16xf32>
    %348 = arith.subf %294, %347 : vector<49x16xf32>
    %349 = math.exp %348 : vector<49x16xf32>
    %cst_120 = arith.constant 0.000000e+00 : f32
    %350 = vector.broadcast %cst_120 : f32 to vector<49x16xf32>
    %351 = vector.extract_strided_slice %46 {offsets = [0, 0], sizes = [1, 16], strides = [1, 1]} : vector<4x16xf32> to vector<1x16xf32>
    %352 = vector.broadcast %351 : vector<1x16xf32> to vector<49x16xf32>
    %353 = arith.mulf %349, %352 : vector<49x16xf32>
    %cst_121 = arith.constant dense<0.000000e+00> : vector<49xf32>
    %354 = vector.multi_reduction <add>, %353, %cst_121 [1] : vector<49x16xf32> to vector<49xf32>
    %355 = vector.shape_cast %354 : vector<49xf32> to vector<49x1xf32>
    %356 = vector.broadcast %355 : vector<49x1xf32> to vector<49x16xf32>
    %357 = vector.broadcast %351 : vector<1x16xf32> to vector<49x16xf32>
    %358 = arith.mulf %356, %357 : vector<49x16xf32>
    %359 = arith.addf %350, %358 : vector<49x16xf32>
    %360 = vector.extract_strided_slice %46 {offsets = [1, 0], sizes = [1, 16], strides = [1, 1]} : vector<4x16xf32> to vector<1x16xf32>
    %361 = vector.broadcast %360 : vector<1x16xf32> to vector<49x16xf32>
    %362 = arith.mulf %349, %361 : vector<49x16xf32>
    %cst_122 = arith.constant dense<0.000000e+00> : vector<49xf32>
    %363 = vector.multi_reduction <add>, %362, %cst_122 [1] : vector<49x16xf32> to vector<49xf32>
    %364 = vector.shape_cast %363 : vector<49xf32> to vector<49x1xf32>
    %365 = vector.broadcast %364 : vector<49x1xf32> to vector<49x16xf32>
    %366 = vector.broadcast %360 : vector<1x16xf32> to vector<49x16xf32>
    %367 = arith.mulf %365, %366 : vector<49x16xf32>
    %368 = arith.addf %359, %367 : vector<49x16xf32>
    %369 = vector.extract_strided_slice %46 {offsets = [2, 0], sizes = [1, 16], strides = [1, 1]} : vector<4x16xf32> to vector<1x16xf32>
    %370 = vector.broadcast %369 : vector<1x16xf32> to vector<49x16xf32>
    %371 = arith.mulf %349, %370 : vector<49x16xf32>
    %cst_123 = arith.constant dense<0.000000e+00> : vector<49xf32>
    %372 = vector.multi_reduction <add>, %371, %cst_123 [1] : vector<49x16xf32> to vector<49xf32>
    %373 = vector.shape_cast %372 : vector<49xf32> to vector<49x1xf32>
    %374 = vector.broadcast %373 : vector<49x1xf32> to vector<49x16xf32>
    %375 = vector.broadcast %369 : vector<1x16xf32> to vector<49x16xf32>
    %376 = arith.mulf %374, %375 : vector<49x16xf32>
    %377 = arith.addf %368, %376 : vector<49x16xf32>
    %378 = vector.extract_strided_slice %46 {offsets = [3, 0], sizes = [1, 16], strides = [1, 1]} : vector<4x16xf32> to vector<1x16xf32>
    %379 = vector.broadcast %378 : vector<1x16xf32> to vector<49x16xf32>
    %380 = arith.mulf %349, %379 : vector<49x16xf32>
    %cst_124 = arith.constant dense<0.000000e+00> : vector<49xf32>
    %381 = vector.multi_reduction <add>, %380, %cst_124 [1] : vector<49x16xf32> to vector<49xf32>
    %382 = vector.shape_cast %381 : vector<49xf32> to vector<49x1xf32>
    %383 = vector.broadcast %382 : vector<49x1xf32> to vector<49x16xf32>
    %384 = vector.broadcast %378 : vector<1x16xf32> to vector<49x16xf32>
    %385 = arith.mulf %383, %384 : vector<49x16xf32>
    %386 = arith.addf %377, %385 : vector<49x16xf32>
    %387 = arith.divf %349, %386 : vector<49x16xf32>
    %cst_125 = arith.constant 0.000000e+00 : f32
    %388 = vector.broadcast %cst_125 : f32 to vector<1x16xf32>
    %389 = vector.extract_strided_slice %46 {offsets = [0, 0], sizes = [1, 16], strides = [1, 1]} : vector<4x16xf32> to vector<1x16xf32>
    %390 = vector.broadcast %389 : vector<1x16xf32> to vector<49x16xf32>
    %391 = arith.mulf %387, %390 : vector<49x16xf32>
    %cst_126 = arith.constant dense<0.000000e+00> : vector<49xf32>
    %392 = vector.multi_reduction <add>, %391, %cst_126 [1] : vector<49x16xf32> to vector<49xf32>
    %393 = vector.shape_cast %392 : vector<49xf32> to vector<49x1xf32>
    %cst_127 = arith.constant dense<0.000000e+00> : vector<1xf32>
    %394 = vector.multi_reduction <add>, %393, %cst_127 [0] : vector<49x1xf32> to vector<1xf32>
    %395 = vector.shape_cast %394 : vector<1xf32> to vector<1x1xf32>
    %cst_128 = arith.constant 0.00510204071 : f32
    %396 = vector.broadcast %cst_128 : f32 to vector<1x1xf32>
    %397 = arith.mulf %395, %396 : vector<1x1xf32>
    %398 = vector.broadcast %397 : vector<1x1xf32> to vector<1x16xf32>
    %399 = arith.mulf %398, %389 : vector<1x16xf32>
    %400 = arith.addf %388, %399 : vector<1x16xf32>
    %401 = vector.extract_strided_slice %46 {offsets = [1, 0], sizes = [1, 16], strides = [1, 1]} : vector<4x16xf32> to vector<1x16xf32>
    %402 = vector.broadcast %401 : vector<1x16xf32> to vector<49x16xf32>
    %403 = arith.mulf %387, %402 : vector<49x16xf32>
    %cst_129 = arith.constant dense<0.000000e+00> : vector<49xf32>
    %404 = vector.multi_reduction <add>, %403, %cst_129 [1] : vector<49x16xf32> to vector<49xf32>
    %405 = vector.shape_cast %404 : vector<49xf32> to vector<49x1xf32>
    %cst_130 = arith.constant dense<0.000000e+00> : vector<1xf32>
    %406 = vector.multi_reduction <add>, %405, %cst_130 [0] : vector<49x1xf32> to vector<1xf32>
    %407 = vector.shape_cast %406 : vector<1xf32> to vector<1x1xf32>
    %cst_131 = arith.constant 0.00510204071 : f32
    %408 = vector.broadcast %cst_131 : f32 to vector<1x1xf32>
    %409 = arith.mulf %407, %408 : vector<1x1xf32>
    %410 = vector.broadcast %409 : vector<1x1xf32> to vector<1x16xf32>
    %411 = arith.mulf %410, %401 : vector<1x16xf32>
    %412 = arith.addf %400, %411 : vector<1x16xf32>
    %413 = vector.extract_strided_slice %46 {offsets = [2, 0], sizes = [1, 16], strides = [1, 1]} : vector<4x16xf32> to vector<1x16xf32>
    %414 = vector.broadcast %413 : vector<1x16xf32> to vector<49x16xf32>
    %415 = arith.mulf %387, %414 : vector<49x16xf32>
    %cst_132 = arith.constant dense<0.000000e+00> : vector<49xf32>
    %416 = vector.multi_reduction <add>, %415, %cst_132 [1] : vector<49x16xf32> to vector<49xf32>
    %417 = vector.shape_cast %416 : vector<49xf32> to vector<49x1xf32>
    %cst_133 = arith.constant dense<0.000000e+00> : vector<1xf32>
    %418 = vector.multi_reduction <add>, %417, %cst_133 [0] : vector<49x1xf32> to vector<1xf32>
    %419 = vector.shape_cast %418 : vector<1xf32> to vector<1x1xf32>
    %cst_134 = arith.constant 0.00510204071 : f32
    %420 = vector.broadcast %cst_134 : f32 to vector<1x1xf32>
    %421 = arith.mulf %419, %420 : vector<1x1xf32>
    %422 = vector.broadcast %421 : vector<1x1xf32> to vector<1x16xf32>
    %423 = arith.mulf %422, %413 : vector<1x16xf32>
    %424 = arith.addf %412, %423 : vector<1x16xf32>
    %425 = vector.extract_strided_slice %46 {offsets = [3, 0], sizes = [1, 16], strides = [1, 1]} : vector<4x16xf32> to vector<1x16xf32>
    %426 = vector.broadcast %425 : vector<1x16xf32> to vector<49x16xf32>
    %427 = arith.mulf %387, %426 : vector<49x16xf32>
    %cst_135 = arith.constant dense<0.000000e+00> : vector<49xf32>
    %428 = vector.multi_reduction <add>, %427, %cst_135 [1] : vector<49x16xf32> to vector<49xf32>
    %429 = vector.shape_cast %428 : vector<49xf32> to vector<49x1xf32>
    %cst_136 = arith.constant dense<0.000000e+00> : vector<1xf32>
    %430 = vector.multi_reduction <add>, %429, %cst_136 [0] : vector<49x1xf32> to vector<1xf32>
    %431 = vector.shape_cast %430 : vector<1xf32> to vector<1x1xf32>
    %cst_137 = arith.constant 0.00510204071 : f32
    %432 = vector.broadcast %cst_137 : f32 to vector<1x1xf32>
    %433 = arith.mulf %431, %432 : vector<1x1xf32>
    %434 = vector.broadcast %433 : vector<1x1xf32> to vector<1x16xf32>
    %435 = arith.mulf %434, %425 : vector<1x16xf32>
    %436 = arith.addf %424, %435 : vector<1x16xf32>
    %437 = vector.broadcast %436 : vector<1x16xf32> to vector<49x16xf32>
    %438 = arith.subf %387, %437 : vector<49x16xf32>
    %cst_138 = arith.constant 0.000000e+00 : f32
    %439 = vector.broadcast %cst_138 : f32 to vector<1x16xf32>
    %440 = vector.extract_strided_slice %46 {offsets = [0, 0], sizes = [1, 16], strides = [1, 1]} : vector<4x16xf32> to vector<1x16xf32>
    %441 = vector.broadcast %440 : vector<1x16xf32> to vector<49x16xf32>
    %442 = arith.mulf %438, %441 : vector<49x16xf32>
    %443 = arith.mulf %442, %442 : vector<49x16xf32>
    %cst_139 = arith.constant dense<0.000000e+00> : vector<49xf32>
    %444 = vector.multi_reduction <add>, %443, %cst_139 [1] : vector<49x16xf32> to vector<49xf32>
    %445 = vector.shape_cast %444 : vector<49xf32> to vector<49x1xf32>
    %cst_140 = arith.constant dense<0.000000e+00> : vector<1xf32>
    %446 = vector.multi_reduction <add>, %445, %cst_140 [0] : vector<49x1xf32> to vector<1xf32>
    %447 = vector.shape_cast %446 : vector<1xf32> to vector<1x1xf32>
    %cst_141 = arith.constant 0.00510204071 : f32
    %448 = vector.broadcast %cst_141 : f32 to vector<1x1xf32>
    %449 = arith.mulf %447, %448 : vector<1x1xf32>
    %cst_142 = arith.constant 9.99999974E-6 : f32
    %450 = vector.broadcast %cst_142 : f32 to vector<1x1xf32>
    %451 = arith.addf %449, %450 : vector<1x1xf32>
    %452 = math.rsqrt %451 : vector<1x1xf32>
    %453 = vector.broadcast %452 : vector<1x1xf32> to vector<1x16xf32>
    %454 = arith.mulf %453, %440 : vector<1x16xf32>
    %455 = arith.addf %439, %454 : vector<1x16xf32>
    %456 = vector.extract_strided_slice %46 {offsets = [1, 0], sizes = [1, 16], strides = [1, 1]} : vector<4x16xf32> to vector<1x16xf32>
    %457 = vector.broadcast %456 : vector<1x16xf32> to vector<49x16xf32>
    %458 = arith.mulf %438, %457 : vector<49x16xf32>
    %459 = arith.mulf %458, %458 : vector<49x16xf32>
    %cst_143 = arith.constant dense<0.000000e+00> : vector<49xf32>
    %460 = vector.multi_reduction <add>, %459, %cst_143 [1] : vector<49x16xf32> to vector<49xf32>
    %461 = vector.shape_cast %460 : vector<49xf32> to vector<49x1xf32>
    %cst_144 = arith.constant dense<0.000000e+00> : vector<1xf32>
    %462 = vector.multi_reduction <add>, %461, %cst_144 [0] : vector<49x1xf32> to vector<1xf32>
    %463 = vector.shape_cast %462 : vector<1xf32> to vector<1x1xf32>
    %cst_145 = arith.constant 0.00510204071 : f32
    %464 = vector.broadcast %cst_145 : f32 to vector<1x1xf32>
    %465 = arith.mulf %463, %464 : vector<1x1xf32>
    %cst_146 = arith.constant 9.99999974E-6 : f32
    %466 = vector.broadcast %cst_146 : f32 to vector<1x1xf32>
    %467 = arith.addf %465, %466 : vector<1x1xf32>
    %468 = math.rsqrt %467 : vector<1x1xf32>
    %469 = vector.broadcast %468 : vector<1x1xf32> to vector<1x16xf32>
    %470 = arith.mulf %469, %456 : vector<1x16xf32>
    %471 = arith.addf %455, %470 : vector<1x16xf32>
    %472 = vector.extract_strided_slice %46 {offsets = [2, 0], sizes = [1, 16], strides = [1, 1]} : vector<4x16xf32> to vector<1x16xf32>
    %473 = vector.broadcast %472 : vector<1x16xf32> to vector<49x16xf32>
    %474 = arith.mulf %438, %473 : vector<49x16xf32>
    %475 = arith.mulf %474, %474 : vector<49x16xf32>
    %cst_147 = arith.constant dense<0.000000e+00> : vector<49xf32>
    %476 = vector.multi_reduction <add>, %475, %cst_147 [1] : vector<49x16xf32> to vector<49xf32>
    %477 = vector.shape_cast %476 : vector<49xf32> to vector<49x1xf32>
    %cst_148 = arith.constant dense<0.000000e+00> : vector<1xf32>
    %478 = vector.multi_reduction <add>, %477, %cst_148 [0] : vector<49x1xf32> to vector<1xf32>
    %479 = vector.shape_cast %478 : vector<1xf32> to vector<1x1xf32>
    %cst_149 = arith.constant 0.00510204071 : f32
    %480 = vector.broadcast %cst_149 : f32 to vector<1x1xf32>
    %481 = arith.mulf %479, %480 : vector<1x1xf32>
    %cst_150 = arith.constant 9.99999974E-6 : f32
    %482 = vector.broadcast %cst_150 : f32 to vector<1x1xf32>
    %483 = arith.addf %481, %482 : vector<1x1xf32>
    %484 = math.rsqrt %483 : vector<1x1xf32>
    %485 = vector.broadcast %484 : vector<1x1xf32> to vector<1x16xf32>
    %486 = arith.mulf %485, %472 : vector<1x16xf32>
    %487 = arith.addf %471, %486 : vector<1x16xf32>
    %488 = vector.extract_strided_slice %46 {offsets = [3, 0], sizes = [1, 16], strides = [1, 1]} : vector<4x16xf32> to vector<1x16xf32>
    %489 = vector.broadcast %488 : vector<1x16xf32> to vector<49x16xf32>
    %490 = arith.mulf %438, %489 : vector<49x16xf32>
    %491 = arith.mulf %490, %490 : vector<49x16xf32>
    %cst_151 = arith.constant dense<0.000000e+00> : vector<49xf32>
    %492 = vector.multi_reduction <add>, %491, %cst_151 [1] : vector<49x16xf32> to vector<49xf32>
    %493 = vector.shape_cast %492 : vector<49xf32> to vector<49x1xf32>
    %cst_152 = arith.constant dense<0.000000e+00> : vector<1xf32>
    %494 = vector.multi_reduction <add>, %493, %cst_152 [0] : vector<49x1xf32> to vector<1xf32>
    %495 = vector.shape_cast %494 : vector<1xf32> to vector<1x1xf32>
    %cst_153 = arith.constant 0.00510204071 : f32
    %496 = vector.broadcast %cst_153 : f32 to vector<1x1xf32>
    %497 = arith.mulf %495, %496 : vector<1x1xf32>
    %cst_154 = arith.constant 9.99999974E-6 : f32
    %498 = vector.broadcast %cst_154 : f32 to vector<1x1xf32>
    %499 = arith.addf %497, %498 : vector<1x1xf32>
    %500 = math.rsqrt %499 : vector<1x1xf32>
    %501 = vector.broadcast %500 : vector<1x1xf32> to vector<1x16xf32>
    %502 = arith.mulf %501, %488 : vector<1x16xf32>
    %503 = arith.addf %487, %502 : vector<1x16xf32>
    %504 = vector.broadcast %503 : vector<1x16xf32> to vector<49x16xf32>
    %505 = arith.mulf %438, %504 : vector<49x16xf32>
    %cst_155 = arith.constant dense<0.000000e+00> : vector<49x64xf32>
    %506 = tpu.matmul %505, %289, %cst_155 {dimension_numbers = #tpu.dot_dimension_numbers<[1], [0], [0], [1], [0, 0, 1, 1], [], []>, precision = #tpu.contract_precision<fp32>} : vector<49x16xf32>, vector<16x64xf32>, vector<49x64xf32> -> vector<49x64xf32>
    %c0_156 = arith.constant 0 : index
    %c0_157 = arith.constant 0 : index
    %507 = vector.load %arg5[%c0_156, %c0_157] : memref<64x32xf32, #tpu.memory_space<vmem>>, vector<64x32xf32>
    %cst_158 = arith.constant dense<0.000000e+00> : vector<49x32xf32>
    %508 = tpu.matmul %506, %507, %cst_158 {dimension_numbers = #tpu.dot_dimension_numbers<[1], [0], [0], [1], [0, 0, 1, 1], [], []>, precision = #tpu.contract_precision<fp32>} : vector<49x64xf32>, vector<64x32xf32>, vector<49x32xf32> -> vector<49x32xf32>
    %c0_159 = arith.constant 0 : index
    %c0_160 = arith.constant 0 : index
    %509 = vector.load %arg6[%c0_159, %c0_160] : memref<1x32xf32, #tpu.memory_space<vmem>>, vector<1x32xf32>
    %510 = vector.broadcast %509 : vector<1x32xf32> to vector<49x32xf32>
    %511 = arith.addf %508, %510 : vector<49x32xf32>
    %c1_161 = arith.constant 1 : index
    %c0_162 = arith.constant 0 : index
    %c0_163 = arith.constant 0 : index
    %512 = vector.load %arg19[%c1_161, %c0_162, %c0_163] : memref<2x49x32xf32, #tpu.memory_space<vmem>>, vector<1x49x32xf32>
    %513 = vector.shape_cast %512 : vector<1x49x32xf32> to vector<49x32xf32>
    %514 = vector.shape_cast %511 : vector<49x32xf32> to vector<1x49x32xf32>
    tpu.vector_store %arg19[%c1_161, %c0_162, %c0_163], %514 {strides = array<i32>} : memref<2x49x32xf32, #tpu.memory_space<vmem>>, vector<1x49x32xf32>,
    return
  }
}

</mosaic_0001>

<bundles_post_ra>
// kernel: tpu_custom_call.1
= control target key start
LH: loop header
LB: loop body
LE: loop exit
PB: predicated region body
PF: predicated region fallthrough
CT: control target
= control target key end

     0   :  { %vm86_vm0 = vcmask 261120   ;;  %v21611_v0 = vmov 0.0   ;;  %vm15780_vm1 = vmmov 0   ;;  %vm1192_vm2 = vcmask 1041408   ;;  %s15782_s27 = smov 64   ;;  %s21576_s1 = inlined_call_operand.vmem [shape: f32[32,64], index: 1, kind: input, shape index: {}]   ;;  %s21577_s0 = inlined_call_operand.vmem [shape: f32[98,32], index: 0, kind: input, shape index: {}]   ;;  %s21578_s7 = inlined_call_operand.vmem [shape: f32[128,98], index: 7, kind: input, shape index: {}]   ;;  %s21579_s2 = inlined_call_operand.vmem [shape: f32[1,64], index: 2, kind: input, shape index: {}]   ;;  %s21580_s8 = inlined_call_operand.vmem [shape: f32[128,32], index: 8, kind: input, shape index: {}]   ;;  %s21581_s9 = inlined_call_operand.vmem [shape: f32[8,128], index: 9, kind: input, shape index: {}]   ;;  %s21582_s10 = inlined_call_operand.vmem [shape: f32[1,32], index: 10, kind: input, shape index: {}]   ;;  %s21583_s3 = inlined_call_operand.vmem [shape: f32[32,128], index: 3, kind: input, shape index: {}]   ;;  %s21584_s11 = inlined_call_operand.vmem [shape: f32[1,32], index: 11, kind: input, shape index: {}]   ;;  %s21585_s12 = inlined_call_operand.vmem [shape: f32[1,32], index: 12, kind: input, shape index: {}]   ;;  %s21586_s16 = inlined_call_operand.vmem [shape: f32[2,16,8], index: 16, kind: input, shape index: {}]   ;;  %s21587_s4 = inlined_call_operand.vmem [shape: f32[1,128], index: 4, kind: input, shape index: {}]   ;;  %s21588_s17 = inlined_call_operand.vmem [shape: f32[16,64], index: 17, kind: input, shape index: {}]   ;;  %s21589_s13 = inlined_call_operand.vmem [shape: f32[16,16], index: 13, kind: input, shape index: {}]   ;;  %s21590_s14 = inlined_call_operand.vmem [shape: f32[1,16], index: 14, kind: input, shape index: {}]   ;;  %s21591_s15 = inlined_call_operand.vmem [shape: f32[4,16], index: 15, kind: input, shape index: {}]   ;;  %s21592_s18 = inlined_call_operand.vmem [shape: f32[16,64], index: 18, kind: input, shape index: {}]   ;;  %s21593_s5 = inlined_call_operand.vmem [shape: f32[64,32], index: 5, kind: input, shape index: {}]   ;;  %s21594_s6 = inlined_call_operand.vmem [shape: f32[1,32], index: 6, kind: input, shape index: {}]   ;;  %s21595_s19 = inlined_call_operand.vmem [shape: f32[2,49,32], index: 19, kind: output, shape index: {}]  }
   0x1   :  { %21697 = sst [smem:[#allocation32_spill]] %s21576_s1  ;;  %13434 = vmatprep.subr.mxu0 %v21611_v0  ;;  %13481 = vmatprep.subr.mxu1 %v21611_v0  ;;  %vm1143_vm3 = vcmask 801792   ;;  %vm8592_vm4 = vcmask 1046528   ;;  %vm3662_vm5 = vcmask 64512   ;;  %vm4170_vm6 = vcmask 523264  }
   0x2   :  { %21698 = sst [smem:[#allocation33_spill]] %s21577_s0  ;;  %13442 = vmatprep.mubr.msk.f32.mxu0 %vm15780_vm1, %v21611_v0  ;;  %13489 = vmatprep.mubr.msk.f32.mxu1 %vm15780_vm1, %v21611_v0  ;;  %vm4921_vm7 = vcmask 130048   ;;  %vm5692_vm13 = vcmask 122880   ;;  %vm6103_vm14 = vcmask 1040384   ;;  %vm8082_vm15 = vcmask 253952  }
   0x3   :  { %21699 = sst [smem:[#allocation34_spill]] %s21578_s7 }
   0x4   :  { %21700 = sst [smem:[#allocation35_spill]] %s21579_s2 }
   0x5   :  { %s21701_s20 = sld [smem:[#allocation32_spill]] }
   0x6   :  { %s21702_s26 = sld [smem:[#allocation33_spill]] }
   0x7   :  { %s21717_s24 = sld [smem:[#allocation34_spill]] }
   0x8   :  { %s21730_s28 = sld [smem:[#allocation35_spill]] }
   0xb   :  { %v78_v1 = vld [vmem:[%s21701_s20 + $0x18] sm:$0xff]  ;;  %v77_v2 = vld [vmem:[%s21701_s20 + $0x10] sm:$0xff]  ;;  %v76_v3 = vld [vmem:[%s21701_s20 + $0x8] sm:$0xff] }
   0xc   :  { %v15894_v4 = vand.u32 4294901760, %v78_v1  ;;  %v15896_v5 = vand.u32 4294901760, %v77_v2  ;;  %v15898_v6 = vand.u32 4294901760, %v76_v3  ;;  %v75_v7 = vld [vmem:[%s21701_s20] sm:$0xff]  ;;  %v15913_v9 = vld [vmem:[%s21702_s26 + $0x8] sm:$0xff]  ;;  %v15926_v13 = vld [vmem:[%s21702_s26 + $0x10] sm:$0xff] }
   0xd   :  { %v15908_v8 = vld [vmem:[%s21702_s26] sm:$0xff]  ;;  %v15917_v10 = vand.u32 4294901760, %v75_v7  ;;  %v91_v12 = vsel %vm86_vm0, %v15913_v9, 0  ;;  %v94_v20 = vsel %vm86_vm0, %v15926_v13, 0  ;;  %v15958_v25 = vld [vmem:[%s21702_s26 + $0x18] sm:$0xff]  ;;  %v16007_v44 = vld [vmem:[%s21702_s26 + $0x28] sm:$0xff] }
   0xe   :  { %v88_v11 = vsel %vm86_vm0, %v15908_v8, 0  ;;  %13435 = vmatpush3.msra.mxu0 %v15894_v4  ;;  %v15930_v14 = vsub.f32 %v78_v1, %v15894_v4  ;;  %v15935_v16 = vsub.f32 %v77_v2, %v15896_v5  ;;  %v15938_v17 = vsub.f32 %v76_v3, %v15898_v6  ;;  %v15988_v36 = vld [vmem:[%s21702_s26 + $0x20] sm:$0xff]  ;;  %v16012_v45 = vld [vmem:[%s21702_s26 + $0x30] sm:$0xff]  ;;  %v16041_v59 = vld [vmem:[%s21702_s26 + $0x38] sm:$0xff] }
   0xf   :  { %v15932_v15 = vand.u32 4294901760, %v88_v11  ;;  %13436 = vmatprep.subr.mxu0 %v21611_v0  ;;  %v15941_v18 = vand.u32 4294901760, %v91_v12  ;;  %v15944_v19 = vsub.f32 %v75_v7, %v15917_v10  ;;  %v15965_v28 = vand.u32 4294901760, %v94_v20  ;;  %v16060_v3 = vld [vmem:[%s21702_s26 + $0x40] sm:$0xff] }
  0x10   :  { %13437 = vmatpush3.msra.mxu0 %v15896_v5  ;;  %v352_v21 = vand.u32 4294901760, %v15930_v14  ;;  %v359_v23 = vand.u32 4294901760, %v15935_v16  ;;  %v366_v24 = vand.u32 4294901760, %v15938_v17  ;;  %v97_v35 = vsel %vm86_vm0, %v15958_v25, 0 }
  0x11   :  { %v15951_v22 = vsub.f32 %v88_v11, %v15932_v15  ;;  %13438 = vmatprep.subr.mxu0 %v21611_v0  ;;  %v15962_v26 = vsub.f32 %v91_v12, %v15941_v18  ;;  %v373_v27 = vand.u32 4294901760, %v15944_v19  ;;  %v15981_v34 = vsub.f32 %v94_v20, %v15965_v28 }
  0x12   :  { %13439 = vmatpush3.msra.mxu0 %v15898_v6  ;;  %v353_v29 = vsub.f32 %v15930_v14, %v352_v21  ;;  %v360_v31 = vsub.f32 %v15935_v16, %v359_v23  ;;  %v367_v32 = vsub.f32 %v15938_v17, %v366_v24  ;;  %v16002_v43 = vand.u32 4294901760, %v97_v35 }
  0x13   :  { %v197_v30 = vand.u32 4294901760, %v15951_v22  ;;  %13440 = vmatprep.subr.mxu0 %v21611_v0  ;;  %v207_v33 = vand.u32 4294901760, %v15962_v26  ;;  %v374_v40 = vsub.f32 %v15944_v19, %v373_v27  ;;  %v217_v42 = vand.u32 4294901760, %v15981_v34 }
  0x14   :  { %13441 = vmatpush3.msra.mxu0 %v15917_v10  ;;  %v354_v37 = vand.u32 4294901760, %v353_v29  ;;  %v361_v39 = vand.u32 4294901760, %v360_v31  ;;  %v368_v47 = vand.u32 4294901760, %v367_v32  ;;  %v100_v48 = vsel %vm86_vm0, %v15988_v36, 0  ;;  %v16091_v32 = vld [vmem:[%s21702_s26 + $0x48] sm:$0xff] }
  0x15   :  { %v198_v38 = vsub.f32 %v15951_v22, %v197_v30  ;;  %v208_v41 = vsub.f32 %v15962_v26, %v207_v33  ;;  %13528 = vmatprep.subr.mxu0 %v21611_v0  ;;  %v218_v49 = vsub.f32 %v15981_v34, %v217_v42  ;;  %v16021_v50 = vsub.f32 %v97_v35, %v16002_v43 }
  0x16   :  { %13482 = vmatpush3.msra.mxu1 %v354_v37  ;;  %v16023_v51 = vand.u32 4294901760, %v100_v48  ;;  %v375_v53 = vand.u32 4294901760, %v374_v40  ;;  %v103_v54 = vsel %vm86_vm0, %v16007_v44, 0  ;;  %v106_v55 = vsel %vm86_vm0, %v16012_v45, 0 }
  0x17   :  { %v199_v46 = vand.u32 4294901760, %v198_v38  ;;  %13483 = vmatprep.subr.mxu1 %v21611_v0  ;;  %v209_v52 = vand.u32 4294901760, %v208_v41  ;;  %v227_v56 = vand.u32 4294901760, %v16021_v50  ;;  %v16036_v58 = vand.u32 4294901760, %v103_v54 }
  0x18   :  { %13484 = vmatpush3.msra.mxu1 %v361_v39  ;;  %v16034_v57 = vsub.f32 %v100_v48, %v16023_v51  ;;  %v219_v60 = vand.u32 4294901760, %v218_v49  ;;  %v16046_v61 = vand.u32 4294901760, %v106_v55  ;;  %v109_v2 = vsel %vm86_vm0, %v16041_v59, 0 }
  0x19   :  { %13443 = vmatmul.mubr.f32.vlgmr.msra.gmra.mxu0 %v199_v46  ;;  %13485 = vmatprep.subr.mxu1 %v21611_v0  ;;  %v228_v62 = vsub.f32 %v16021_v50, %v227_v56  ;;  %v16053_v1 = vsub.f32 %v103_v54, %v16036_v58  ;;  %v16070_v7 = vand.u32 4294901760, %v109_v2  ;;  %v112_v11 = vsel %vm86_vm0, %v16060_v3, 0  ;;  %v16116_v46 = vld [vmem:[%s21702_s26 + $0x50] sm:$0xff] }
  0x1a   :  { %13445 = vmatprep.mubr.msk.f32.mxu0 %vm15780_vm1, %v21611_v0  ;;  %13486 = vmatpush3.msra.mxu1 %v368_v47  ;;  %v237_v63 = vand.u32 4294901760, %v16034_v57  ;;  %v16080_v31 = vsub.f32 %v106_v55, %v16046_v61  ;;  %v16093_v35 = vand.u32 4294901760, %v112_v11  ;;  %v115_v41 = vsel %vm86_vm0, %v16091_v32, 0  ;;  %v16140_v55 = vld [vmem:[%s21702_s26 + $0x58] sm:$0xff] }
  0x1b   :  { %13529 = vmatpush3.msra.mxu0 %v15930_v14  ;;  %13487 = vmatprep.subr.mxu1 %v21611_v0  ;;  %v229_v12 = vand.u32 4294901760, %v228_v62  ;;  %v21602_v29 = vand.u32 4294901760, %v16053_v1  ;;  %v16102_v40 = vsub.f32 %v109_v2, %v16070_v7  ;;  %v118_v54 = vsel %vm86_vm0, %v16116_v46, 0 }
  0x1c   :  { %13530 = vmatprep.subr.mxu0 %v21611_v0  ;;  %13488 = vmatpush3.msra.mxu1 %v375_v53  ;;  %v238_v20 = vsub.f32 %v16034_v57, %v237_v63  ;;  %v21600_v39 = vand.u32 4294901760, %v16080_v31  ;;  %v16119_v47 = vsub.f32 %v112_v11, %v16093_v35  ;;  %v16127_v53 = vand.u32 4294901760, %v115_v41 }
  0x1d   :  { %13446 = vmatmul.mubr.f32.gmra.mxu0 %v209_v52  ;;  %13490 = vmatmul.mubr.f32.vlgmr.msra.gmra.mxu1 %v15932_v15  ;;  %v248_v38 = vsub.f32 %v16053_v1, %v21602_v29  ;;  %v21599_v52 = vand.u32 4294901760, %v16102_v40 }
  0x1e   :  { %13448 = vmatprep.mubr.msk.f32.mxu0 %vm15780_vm1, %v21611_v0  ;;  %13575 = vmatprep.subr.mxu1 %v21611_v0  ;;  %v239_v37 = vand.u32 4294901760, %v238_v20  ;;  %v258_v49 = vsub.f32 %v16080_v31, %v21600_v39  ;;  %v16150_v11 = vsub.f32 %v115_v41, %v16127_v53  ;;  %v121_v20 = vsel %vm86_vm0, %v16140_v55, 0 }
  0x1f   :  { %13492 = vmatprep.mubr.msk.f32.mxu1 %vm15780_vm1, %v21611_v0  ;;  %13576 = vmatpush3.msra.mxu1 %v15894_v4  ;;  %v249_v48 = vand.u32 4294901760, %v248_v38  ;;  %v268_v2 = vsub.f32 %v16102_v40, %v21599_v52  ;;  %v16171_v52 = vand.u32 4294901760, %v121_v20 }
  0x20   :  { %13531 = vmatpush3.msra.mxu0 %v15935_v16  ;;  %13577 = vmatprep.subr.mxu1 %v21611_v0  ;;  %v259_v62 = vand.u32 4294901760, %v258_v49  ;;  %v21705_v16 = vand.u32 4294901760, %v16102_v40 }
  0x21   :  { %13449 = vmatmul.mubr.f32.gmra.mxu0 %v219_v60  ;;  %13493 = vmatmul.mubr.f32.gmra.mxu1 %v15941_v18  ;;  %v21601_v60 = vand.u32 4294901760, %v16119_v47  ;;  %v269_v41 = vand.u32 4294901760, %v268_v2  ;;  %v16184_v2 = vsub.f32 %v121_v20, %v16171_v52 }
  0x22   :  { %13451 = vmatprep.mubr.msk.f32.mxu0 %vm15780_vm1, %v21611_v0  ;;  %13495 = vmatprep.mubr.msk.f32.mxu1 %vm15780_vm1, %v21611_v0 }
  0x23   :  { %13578 = vmatpush3.msra.mxu1 %v15896_v5  ;;  %13532 = vmatprep.subr.mxu0 %v21611_v0  ;;  %v278_v38 = vsub.f32 %v16119_v47, %v21601_v60 }
  0x24   :  { %13579 = vmatprep.subr.mxu1 %v21611_v0  ;;  %13533 = vmatpush3.msra.mxu0 %v15938_v17  ;;  %v21706_v17 = vand.u32 4294901760, %v16119_v47 }
  0x25   :  { %13452 = vmatmul.mubr.f32.gmra.mxu0 %v229_v12  ;;  %13580 = vmatpush3.msra.mxu1 %v15898_v6  ;;  %v16152_v12 = vand.u32 4294901760, %v118_v54  ;;  %v279_v60 = vand.u32 4294901760, %v278_v38 }
  0x26   :  { %13496 = vmatmul.mubr.f32.gmra.mxu1 %v15965_v28  ;;  %13454 = vmatprep.mubr.msk.f32.mxu0 %vm15780_vm1, %v21611_v0 }
  0x27   :  { %13498 = vmatprep.mubr.msk.f32.mxu1 %vm15780_vm1, %v21611_v0  ;;  %13534 = vmatprep.subr.mxu0 %v21611_v0  ;;  %v16169_v49 = vsub.f32 %v118_v54, %v16152_v12 }
  0x28   :  { %13581 = vmatprep.subr.mxu1 %v21611_v0  ;;  %13535 = vmatpush3.msra.mxu0 %v15944_v19  ;;  %v16334_v19 = vand.u32 4294901760, %v16140_v55 }
  0x29   :  { %13455 = vmatmul.mubr.f32.gmra.mxu0 %v239_v37  ;;  %13582 = vmatpush3.msra.mxu1 %v15917_v10  ;;  %v74_v37 = vld [vmem:[%s21702_s26 + $0x60] sm:$0x3]  ;;  %v21604_v54 = vand.u32 4294901760, %v16169_v49 }
  0x2a   :  { %13499 = vmatmul.mubr.f32.gmra.mxu1 %v16002_v43  ;;  %13457 = vmatprep.mubr.msk.f32.mxu0 %vm15780_vm1, %v21611_v0  ;;  %v124_v39 = vsel %vm86_vm0, %v74_v37, 0 }
  0x2b   :  { %13501 = vmatprep.mubr.msk.f32.mxu1 %vm15780_vm1, %v21611_v0  ;;  %13622 = vmatprep.subr.mxu0 %v21611_v0  ;;  %v16186_v29 = vand.u32 4294901760, %v124_v39 }
  0x2c   :  { %13669 = vmatprep.subr.mxu1 %v21611_v0 }
  0x2d   :  { %13458 = vmatmul.mubr.f32.gmra.mxu0 %v249_v48  ;;  %v21603_v48 = vand.u32 4294901760, %v16150_v11  ;;  %v16198_v20 = vsub.f32 %v124_v39, %v16186_v29 }
  0x2e   :  { %13502 = vmatmul.mubr.f32.gmra.mxu1 %v16023_v51  ;;  %13460 = vmatprep.mubr.msk.f32.mxu0 %vm15780_vm1, %v21611_v0 }
  0x2f   :  { %13504 = vmatprep.mubr.msk.f32.mxu1 %vm15780_vm1, %v21611_v0 }
  0x31   :  { %13461 = vmatmul.mubr.f32.gmra.mxu0 %v259_v62  ;;  %v288_v62 = vsub.f32 %v16150_v11, %v21603_v48  ;;  %v307_v48 = vand.u32 4294901760, %v16184_v2 }
  0x32   :  { %13505 = vmatmul.mubr.f32.gmra.mxu1 %v16036_v58  ;;  %13463 = vmatprep.mubr.msk.f32.mxu0 %vm15780_vm1, %v21611_v0 }
  0x33   :  { %13507 = vmatprep.mubr.msk.f32.mxu1 %vm15780_vm1, %v21611_v0  ;;  %v289_v38 = vand.u32 4294901760, %v288_v62  ;;  %v308_v62 = vsub.f32 %v16184_v2, %v307_v48 }
  0x35   :  { %13464 = vmatmul.mubr.f32.gmra.mxu0 %v269_v41  ;;  %v298_v41 = vsub.f32 %v16169_v49, %v21604_v54  ;;  %v317_v54 = vand.u32 4294901760, %v16198_v20  ;;  %v309_v39 = vand.u32 4294901760, %v308_v62 }
  0x36   :  { %13508 = vmatmul.mubr.f32.gmra.mxu1 %v16046_v61  ;;  %13466 = vmatprep.mubr.msk.f32.mxu0 %vm15780_vm1, %v21611_v0 }
  0x37   :  { %13510 = vmatprep.mubr.msk.f32.mxu1 %vm15780_vm1, %v21611_v0 }
  0x39   :  { %13467 = vmatmul.mubr.f32.gmra.mxu0 %v279_v60  ;;  %v299_v60 = vand.u32 4294901760, %v298_v41 }
  0x3a   :  { %13511 = vmatmul.mubr.f32.gmra.mxu1 %v16070_v7  ;;  %13469 = vmatprep.mubr.msk.f32.mxu0 %vm15780_vm1, %v21611_v0 }
  0x3b   :  { %13513 = vmatprep.mubr.msk.f32.mxu1 %vm15780_vm1, %v21611_v0 }
  0x3d   :  { %13470 = vmatmul.mubr.f32.gmra.mxu0 %v289_v38  ;;  %v318_v38 = vsub.f32 %v16198_v20, %v317_v54 }
  0x3e   :  { %13514 = vmatmul.mubr.f32.gmra.mxu1 %v16093_v35  ;;  %13472 = vmatprep.mubr.msk.f32.mxu0 %vm15780_vm1, %v21611_v0 }
  0x3f   :  { %13516 = vmatprep.mubr.msk.f32.mxu1 %vm15780_vm1, %v21611_v0  ;;  %v319_v41 = vand.u32 4294901760, %v318_v38  ;;  %v16492_v38 = vand.u32 4294901760, %v15926_v13 }
  0x41   :  { %13473 = vmatmul.mubr.f32.gmra.mxu0 %v299_v60  ;;  %v1193_v60 = vsel %vm1192_vm2, %v74_v37, 0 }
  0x42   :  { %13517 = vmatmul.mubr.f32.gmra.mxu1 %v16127_v53  ;;  %13475 = vmatprep.mubr.msk.f32.mxu0 %vm15780_vm1, %v21611_v0  ;;  %v16232_v62 = vand.u32 4294901760, %v1193_v60 }
  0x43   :  { %13519 = vmatprep.mubr.msk.f32.mxu1 %vm15780_vm1, %v21611_v0 }
  0x44   :  { %v16244_v37 = vsub.f32 %v1193_v60, %v16232_v62 }
  0x45   :  { %13476 = vmatmul.mubr.f32.gmra.mxu0 %v309_v39 }
  0x46   :  { %13520 = vmatmul.mubr.f32.gmra.mxu1 %v16152_v12  ;;  %13478 = vmatprep.mubr.msk.f32.mxu0 %vm15780_vm1, %v21611_v0  ;;  %v16258_v14 = vand.u32 4294901760, %v16244_v37 }
  0x47   :  { %13522 = vmatprep.mubr.msk.f32.mxu1 %vm15780_vm1, %v21611_v0 }
  0x49   :  { %13479 = vmatmul.mubr.f32.gmra.mxu0 %v319_v41 }
  0x4a   :  { %13523 = vmatmul.mubr.f32.gmra.mxu1 %v16171_v52  ;;  %13536 = vmatprep.mubr.msk.f32.mxu0 %vm15780_vm1, %v21611_v0 }
  0x4b   :  { %13525 = vmatprep.mubr.msk.f32.mxu1 %vm15780_vm1, %v21611_v0 }
  0x4d   :  { %13537 = vmatmul.mubr.f32.vlgmr.msra.gmra.mxu0 %v15951_v22  ;;  %v16344_v22 = vand.u32 4294901760, %v16116_v46 }
  0x4e   :  { %13526 = vmatmul.mubr.f32.gmra.mxu1 %v16186_v29  ;;  %13539 = vmatprep.mubr.msk.f32.mxu0 %vm15780_vm1, %v21611_v0 }
  0x4f   :  { %13583 = vmatprep.mubr.msk.f32.mxu1 %vm15780_vm1, %v21611_v0  ;;  %13623 = vmatpush3.msra.mxu0 %v352_v21  ;;  %v21707_v21 = vand.u32 4294901760, %v16150_v11 }
  0x50   :  { %13624 = vmatprep.subr.mxu0 %v21611_v0 }
  0x51   :  { %13540 = vmatmul.mubr.f32.gmra.mxu0 %v15962_v26  ;;  %v16358_v26 = vand.u32 4294901760, %v16091_v32 }
  0x52   :  { %13584 = vmatmul.mubr.f32.vlgmr.msra.gmra.mxu1 %v197_v30  ;;  %13542 = vmatprep.mubr.msk.f32.mxu0 %vm15780_vm1, %v21611_v0  ;;  %v16365_v30 = vsub.f32 %v16116_v46, %v16344_v22 }
  0x53   :  { %13586 = vmatprep.mubr.msk.f32.mxu1 %vm15780_vm1, %v21611_v0  ;;  %13670 = vmatpush3.msra.mxu1 %v15894_v4  ;;  %v1443_v4 = vsub.f32 %v16244_v37, %v16258_v14 }
  0x54   :  { %13625 = vmatpush3.msra.mxu0 %v359_v23  ;;  %13671 = vmatprep.subr.mxu1 %v21611_v0  ;;  %v16348_v23 = vsub.f32 %v16140_v55, %v16334_v19 }
  0x55   :  { %13543 = vmatmul.mubr.f32.gmra.mxu0 %v15981_v34  ;;  %13672 = vmatpush3.msra.mxu1 %v15896_v5  ;;  %v16286_v5 = vand.u32 4294901760, %v1443_v4  ;;  %v1127_v4 = vld [vmem:[%s21717_s24] sm:$0xff] }
  0x56   :  { %13587 = vmatmul.mubr.f32.gmra.mxu1 %v207_v33  ;;  %13545 = vmatprep.mubr.msk.f32.mxu0 %vm15780_vm1, %v21611_v0  ;;  %v16375_v33 = vand.u32 4294901760, %v16060_v3 }
  0x57   :  { %13589 = vmatprep.mubr.msk.f32.mxu1 %vm15780_vm1, %v21611_v0  ;;  %13626 = vmatprep.subr.mxu0 %v21611_v0 }
  0x58   :  { %13627 = vmatpush3.msra.mxu0 %v366_v24  ;;  %13673 = vmatprep.subr.mxu1 %v21611_v0  ;;  %v21708_v24 = vand.u32 4294901760, %v16169_v49 }
  0x59   :  { %13546 = vmatmul.mubr.f32.gmra.mxu0 %v16021_v50  ;;  %13674 = vmatpush3.msra.mxu1 %v15898_v6  ;;  %v21703_v6 = vand.u32 4294901760, %v16053_v1  ;;  %v16384_v50 = vsub.f32 %v16091_v32, %v16358_v26  ;;  %v16412_v32 = vand.u32 4294901760, %v16012_v45 }
  0x5a   :  { %13590 = vmatmul.mubr.f32.gmra.mxu1 %v217_v42  ;;  %13548 = vmatprep.mubr.msk.f32.mxu0 %vm15780_vm1, %v21611_v0  ;;  %v16380_v42 = vand.u32 4294901760, %v16365_v30 }
  0x5b   :  { %13592 = vmatprep.mubr.msk.f32.mxu1 %vm15780_vm1, %v21611_v0  ;;  %13628 = vmatprep.subr.mxu0 %v21611_v0 }
  0x5c   :  { %13629 = vmatpush3.msra.mxu0 %v373_v27  ;;  %13675 = vmatprep.subr.mxu1 %v21611_v0  ;;  %v16361_v27 = vand.u32 4294901760, %v16348_v23  ;;  %21710 = vst [vmem:[#allocation3_spill] sm:$0xff] %v16380_v42 }
  0x5d   :  { %13549 = vmatmul.mubr.f32.gmra.mxu0 %v16034_v57  ;;  %13676 = vmatpush3.msra.mxu1 %v15917_v10  ;;  %v21704_v10 = vand.u32 4294901760, %v16080_v31 }
  0x5e   :  { %13593 = vmatmul.mubr.f32.gmra.mxu1 %v227_v56  ;;  %13551 = vmatprep.mubr.msk.f32.mxu0 %vm15780_vm1, %v21611_v0  ;;  %21709 = vst [vmem:[#allocation2_spill] sm:$0xff] %v16361_v27  ;;  %v1450_v34 = vsub.f32 %v16348_v23, %v16361_v27  ;;  %v16392_v56 = vand.u32 4294901760, %v16041_v59 }
  0x5f   :  { %13595 = vmatprep.mubr.msk.f32.mxu1 %vm15780_vm1, %v21611_v0  ;;  %13716 = vmatprep.subr.mxu0 %v16232_v62 }
  0x60   :  { %13766 = vmatprep.subr.mxu1 %v16286_v5  ;;  %v1451_v57 = vand.u32 4294901760, %v1450_v34  ;;  %v16425_v46 = vsub.f32 %v16041_v59, %v16392_v56 }
  0x61   :  { %13552 = vmatmul.mubr.f32.gmra.mxu0 %v16053_v1  ;;  %v16401_v1 = vand.u32 4294901760, %v16384_v50 }
  0x62   :  { %13596 = vmatmul.mubr.f32.gmra.mxu1 %v237_v63  ;;  %13554 = vmatprep.mubr.msk.f32.mxu0 %vm15780_vm1, %v21611_v0  ;;  %v1457_v63 = vsub.f32 %v16365_v30, %v16380_v42 }
  0x63   :  { %13598 = vmatprep.mubr.msk.f32.mxu1 %vm15780_vm1, %v21611_v0  ;;  %21711 = vst [vmem:[#allocation4_spill] sm:$0xff] %v16401_v1 }
  0x65   :  { %13555 = vmatmul.mubr.f32.gmra.mxu0 %v16080_v31  ;;  %v16405_v31 = vsub.f32 %v16060_v3, %v16375_v33  ;;  %v1458_v3 = vand.u32 4294901760, %v1457_v63 }
  0x66   :  { %13599 = vmatmul.mubr.f32.gmra.mxu1 %v21703_v6  ;;  %13557 = vmatprep.mubr.msk.f32.mxu0 %vm15780_vm1, %v21611_v0  ;;  %v1128_v6 = vld [vmem:[%s21717_s24 + $0x8] sm:$0xff] }
  0x67   :  { %13601 = vmatprep.mubr.msk.f32.mxu1 %vm15780_vm1, %v21611_v0 }
  0x69   :  { %13558 = vmatmul.mubr.f32.gmra.mxu0 %v16102_v40  ;;  %v1464_v40 = vsub.f32 %v16384_v50, %v16401_v1 }
  0x6a   :  { %13602 = vmatmul.mubr.f32.gmra.mxu1 %v21704_v10  ;;  %13560 = vmatprep.mubr.msk.f32.mxu0 %vm15780_vm1, %v21611_v0 }
  0x6b   :  { %13604 = vmatprep.mubr.msk.f32.mxu1 %vm15780_vm1, %v21611_v0  ;;  %v1465_v59 = vand.u32 4294901760, %v1464_v40 }
  0x6d   :  { %13561 = vmatmul.mubr.f32.gmra.mxu0 %v16119_v47  ;;  %v16432_v47 = vand.u32 4294901760, %v16007_v44 }
  0x6e   :  { %13605 = vmatmul.mubr.f32.gmra.mxu1 %v21705_v16  ;;  %13563 = vmatprep.mubr.msk.f32.mxu0 %vm15780_vm1, %v21611_v0 }
  0x6f   :  { %13607 = vmatprep.mubr.msk.f32.mxu1 %vm15780_vm1, %v21611_v0 }
  0x71   :  { %13564 = vmatmul.mubr.f32.gmra.mxu0 %v16150_v11  ;;  %v16445_v11 = vsub.f32 %v16012_v45, %v16412_v32 }
  0x72   :  { %13608 = vmatmul.mubr.f32.gmra.mxu1 %v21706_v17  ;;  %13566 = vmatprep.mubr.msk.f32.mxu0 %vm15780_vm1, %v21611_v0  ;;  %v1145_v17 = vsel %vm1143_vm3, %v1127_v4, 0 }
  0x73   :  { %13610 = vmatprep.mubr.msk.f32.mxu1 %vm15780_vm1, %v21611_v0  ;;  %v16548_v34 = vand.u32 4294901760, %v1145_v17 }
  0x75   :  { %13567 = vmatmul.mubr.f32.gmra.mxu0 %v16169_v49 }
  0x76   :  { %13611 = vmatmul.mubr.f32.gmra.mxu1 %v21707_v21  ;;  %13569 = vmatprep.mubr.msk.f32.mxu0 %vm15780_vm1, %v21611_v0  ;;  %v1148_v21 = vsel %vm1143_vm3, %v1128_v6, 0 }
  0x77   :  { %13613 = vmatprep.mubr.msk.f32.mxu1 %vm15780_vm1, %v21611_v0 }
  0x79   :  { %13570 = vmatmul.mubr.f32.gmra.mxu0 %v16184_v2  ;;  %v16472_v2 = vand.u32 4294901760, %v15958_v25 }
  0x7a   :  { %13614 = vmatmul.mubr.f32.gmra.mxu1 %v21708_v24  ;;  %13572 = vmatprep.mubr.msk.f32.mxu0 %vm15780_vm1, %v21611_v0  ;;  %v16543_v24 = vand.u32 4294901760, %v15908_v8 }
  0x7b   :  { %13616 = vmatprep.mubr.msk.f32.mxu1 %vm15780_vm1, %v21611_v0  ;;  %v16505_v60 = vsub.f32 %v15958_v25, %v16472_v2  ;;  %v16522_v25 = vsub.f32 %v15926_v13, %v16492_v38  ;;  %v1129_v13 = vld [vmem:[%s21717_s24 + $0x10] sm:$0xff] }
  0x7c   :  { %v16594_v6 = vsub.f32 %v15908_v8, %v16543_v24 }
  0x7d   :  { %13573 = vmatmul.mubr.f32.gmra.mxu0 %v16198_v20  ;;  %v16531_v16 = vand.u32 4294901760, %v16505_v60  ;;  %v16558_v40 = vand.u32 4294901760, %v16522_v25 }
  0x7e   :  { %13617 = vmatmul.mubr.f32.gmra.mxu1 %v307_v48  ;;  %13630 = vmatprep.mubr.msk.f32.mxu0 %vm15780_vm1, %v21611_v0  ;;  %v16452_v48 = vand.u32 4294901760, %v15988_v36 }
  0x7f   :  { %13619 = vmatprep.mubr.msk.f32.mxu1 %vm15780_vm1, %v21611_v0  ;;  %21718 = vst [vmem:[#allocation10_spill] sm:$0xff] %v16531_v16  ;;  %21719 = vst [vmem:[#allocation11_spill] sm:$0xff] %v16558_v40 }
  0x80   :  { %v16485_v39 = vsub.f32 %v15988_v36, %v16452_v48 }
  0x81   :  { %13631 = vmatmul.mubr.f32.vlgmr.msra.gmra.mxu0 %v15932_v15 }
  0x82   :  { %13620 = vmatmul.mubr.f32.gmra.mxu1 %v317_v54  ;;  %13633 = vmatprep.mubr.msk.f32.mxu0 %vm15780_vm1, %v21611_v0  ;;  %v16465_v54 = vsub.f32 %v16007_v44, %v16432_v47 }
  0x83   :  { %13677 = vmatprep.mubr.msk.f32.mxu1 %vm15780_vm1, %v21611_v0  ;;  %13717 = vmatpush3.msra.mxu0 %v16232_v62 }
  0x84   :  { %13718 = vmatprep.subr.mxu0 %v16334_v19 }
  0x85   :  { %13634 = vmatmul.mubr.f32.gmra.mxu0 %v15941_v18 }
  0x86   :  { %13678 = vmatmul.mubr.f32.vlgmr.msra.gmra.mxu1 %v15932_v15  ;;  %13636 = vmatprep.mubr.msk.f32.mxu0 %vm15780_vm1, %v21611_v0  ;;  %v16421_v15 = vand.u32 4294901760, %v16405_v31 }
  0x87   :  { %13680 = vmatprep.mubr.msk.f32.mxu1 %vm15780_vm1, %v21611_v0  ;;  %13767 = vmatpush3.msra.mxu1 %v16286_v5  ;;  %v16515_v5 = vand.u32 4294901760, %v15913_v9 }
  0x88   :  { %13719 = vmatpush3.msra.mxu0 %v16334_v19  ;;  %13768 = vmatprep.subr.mxu1 %v1451_v57  ;;  %21712 = vst [vmem:[#allocation5_spill] sm:$0xff] %v16421_v15  ;;  %v1471_v55 = vsub.f32 %v16405_v31, %v16421_v15 }
  0x89   :  { %13637 = vmatmul.mubr.f32.gmra.mxu0 %v15965_v28  ;;  %13769 = vmatpush3.msra.mxu1 %v1451_v57  ;;  %v1151_v57 = vsel %vm1143_vm3, %v1129_v13, 0 }
  0x8a   :  { %13681 = vmatmul.mubr.f32.gmra.mxu1 %v15941_v18  ;;  %13639 = vmatprep.mubr.msk.f32.mxu0 %vm15780_vm1, %v21611_v0  ;;  %v16441_v18 = vand.u32 4294901760, %v16425_v46  ;;  %v1472_v45 = vand.u32 4294901760, %v1471_v55  ;;  %v1131_v55 = vld [vmem:[%s21717_s24 + $0x20] sm:$0xff] }
  0x8b   :  { %13683 = vmatprep.mubr.msk.f32.mxu1 %vm15780_vm1, %v21611_v0  ;;  %13720 = vmatprep.subr.mxu0 %v16344_v22 }
  0x8c   :  { %13721 = vmatpush3.msra.mxu0 %v16344_v22  ;;  %13770 = vmatprep.subr.mxu1 %v1458_v3  ;;  %21713 = vst [vmem:[#allocation6_spill] sm:$0xff] %v16441_v18  ;;  %v1478_v49 = vsub.f32 %v16425_v46, %v16441_v18 }
  0x8d   :  { %13640 = vmatmul.mubr.f32.gmra.mxu0 %v16002_v43  ;;  %13771 = vmatpush3.msra.mxu1 %v1458_v3  ;;  %v1506_v3 = vsub.f32 %v16505_v60, %v16531_v16 }
  0x8e   :  { %13684 = vmatmul.mubr.f32.gmra.mxu1 %v15965_v28  ;;  %13642 = vmatprep.mubr.msk.f32.mxu0 %vm15780_vm1, %v21611_v0  ;;  %v16461_v28 = vand.u32 4294901760, %v16445_v11  ;;  %v1479_v44 = vand.u32 4294901760, %v1478_v49  ;;  %v16573_v49 = vand.u32 4294901760, %v1151_v57 }
  0x8f   :  { %13686 = vmatprep.mubr.msk.f32.mxu1 %vm15780_vm1, %v21611_v0  ;;  %13722 = vmatprep.subr.mxu0 %v16358_v26 }
  0x90   :  { %13723 = vmatpush3.msra.mxu0 %v16358_v26  ;;  %13772 = vmatprep.subr.mxu1 %v1465_v59  ;;  %21714 = vst [vmem:[#allocation7_spill] sm:$0xff] %v16461_v28  ;;  %v1485_v20 = vsub.f32 %v16445_v11, %v16461_v28  ;;  %21720 = vst [vmem:[#allocation12_spill] sm:$0xff] %v16573_v49  ;;  %v16610_v8 = vsub.f32 %v1151_v57, %v16573_v49 }
  0x91   :  { %13643 = vmatmul.mubr.f32.gmra.mxu0 %v16023_v51  ;;  %13773 = vmatpush3.msra.mxu1 %v1465_v59  ;;  %v16562_v59 = vsub.f32 %v15913_v9, %v16515_v5  ;;  %v1132_v9 = vld [vmem:[%s21717_s24 + $0x28] sm:$0xff] }
  0x92   :  { %13687 = vmatmul.mubr.f32.gmra.mxu1 %v16002_v43  ;;  %13645 = vmatprep.mubr.msk.f32.mxu0 %vm15780_vm1, %v21611_v0  ;;  %v16481_v43 = vand.u32 4294901760, %v16465_v54  ;;  %v1486_v36 = vand.u32 4294901760, %v1485_v20  ;;  %v16583_v20 = vsub.f32 %v1145_v17, %v16548_v34  ;;  %v1160_v13 = vsel %vm1143_vm3, %v1132_v9, 0 }
  0x93   :  { %13689 = vmatprep.mubr.msk.f32.mxu1 %vm15780_vm1, %v21611_v0  ;;  %13724 = vmatprep.subr.mxu0 %v16375_v33  ;;  %v16590_v4 = vand.u32 4294901760, %v16562_v59  ;;  %v16628_v9 = vand.u32 4294901760, %v1160_v13 }
  0x94   :  { %13725 = vmatpush3.msra.mxu0 %v16375_v33  ;;  %13774 = vmatprep.subr.mxu1 %v1472_v45  ;;  %21715 = vst [vmem:[#allocation8_spill] sm:$0xff] %v16481_v43  ;;  %v1492_v41 = vsub.f32 %v16465_v54, %v16481_v43 }
  0x95   :  { %13646 = vmatmul.mubr.f32.gmra.mxu0 %v16036_v58  ;;  %13775 = vmatpush3.msra.mxu1 %v1472_v45  ;;  %v16568_v45 = vand.u32 4294901760, %v1148_v21  ;;  %21721 = vst [vmem:[#allocation13_spill] sm:$0xff] %v16590_v4 }
  0x96   :  { %13690 = vmatmul.mubr.f32.gmra.mxu1 %v16023_v51  ;;  %13648 = vmatprep.mubr.msk.f32.mxu0 %vm15780_vm1, %v21611_v0  ;;  %v16501_v51 = vand.u32 4294901760, %v16485_v39 }
  0x97   :  { %13692 = vmatprep.mubr.msk.f32.mxu1 %vm15780_vm1, %v21611_v0  ;;  %13726 = vmatprep.subr.mxu0 %v16392_v56 }
  0x98   :  { %13727 = vmatpush3.msra.mxu0 %v16392_v56  ;;  %13776 = vmatprep.subr.mxu1 %v1479_v44  ;;  %21716 = vst [vmem:[#allocation9_spill] sm:$0xff] %v16501_v51  ;;  %v1499_v10 = vsub.f32 %v16485_v39, %v16501_v51 }
  0x99   :  { %13649 = vmatmul.mubr.f32.gmra.mxu0 %v16046_v61  ;;  %13777 = vmatpush3.msra.mxu1 %v1479_v44 }
  0x9a   :  { %13693 = vmatmul.mubr.f32.gmra.mxu1 %v16036_v58  ;;  %13651 = vmatprep.mubr.msk.f32.mxu0 %vm15780_vm1, %v21611_v0  ;;  %v1493_v58 = vand.u32 4294901760, %v1492_v41  ;;  %v1500_v63 = vand.u32 4294901760, %v1499_v10  ;;  %v1513_v41 = vsub.f32 %v16522_v25, %v16558_v40  ;;  %v16601_v10 = vsub.f32 %v1148_v21, %v16568_v45 }
  0x9b   :  { %13695 = vmatprep.mubr.msk.f32.mxu1 %vm15780_vm1, %v21611_v0  ;;  %13728 = vmatprep.subr.mxu0 %v16412_v32 }
  0x9c   :  { %13729 = vmatpush3.msra.mxu0 %v16412_v32  ;;  %13778 = vmatprep.subr.mxu1 %v1486_v36  ;;  %v1514_v57 = vand.u32 4294901760, %v1513_v41 }
  0x9d   :  { %13652 = vmatmul.mubr.f32.gmra.mxu0 %v16070_v7  ;;  %13779 = vmatpush3.msra.mxu1 %v1486_v36  ;;  %v1507_v36 = vand.u32 4294901760, %v1506_v3  ;;  %v1520_v3 = vsub.f32 %v16562_v59, %v16590_v4 }
  0x9e   :  { %13696 = vmatmul.mubr.f32.gmra.mxu1 %v16046_v61  ;;  %13654 = vmatprep.mubr.msk.f32.mxu0 %vm15780_vm1, %v21611_v0  ;;  %v1130_v61 = vld [vmem:[%s21717_s24 + $0x18] sm:$0xff] }
  0x9f   :  { %13698 = vmatprep.mubr.msk.f32.mxu1 %vm15780_vm1, %v21611_v0  ;;  %13730 = vmatprep.subr.mxu0 %v16432_v47  ;;  %v1154_v44 = vsel %vm1143_vm3, %v1130_v61, 0 }
  0xa0   :  { %13731 = vmatpush3.msra.mxu0 %v16432_v47  ;;  %13780 = vmatprep.subr.mxu1 %v1493_v58  ;;  %v16603_v17 = vand.u32 4294901760, %v1154_v44 }
  0xa1   :  { %13655 = vmatmul.mubr.f32.gmra.mxu0 %v16093_v35  ;;  %13781 = vmatpush3.msra.mxu1 %v1493_v58  ;;  %v1133_v58 = vld [vmem:[%s21717_s24 + $0x30] sm:$0xff] }
  0xa2   :  { %13699 = vmatmul.mubr.f32.gmra.mxu1 %v16070_v7  ;;  %13657 = vmatprep.mubr.msk.f32.mxu0 %vm15780_vm1, %v21611_v0  ;;  %v1157_v7 = vsel %vm1143_vm3, %v1131_v55, 0  ;;  %v16626_v55 = vand.u32 4294901760, %v16594_v6  ;;  %v16633_v21 = vsub.f32 %v1154_v44, %v16603_v17 }
  0xa3   :  { %13701 = vmatprep.mubr.msk.f32.mxu1 %vm15780_vm1, %v21611_v0  ;;  %13732 = vmatprep.subr.mxu0 %v16452_v48  ;;  %v16612_v61 = vand.u32 4294901760, %v1157_v7 }
  0xa4   :  { %13733 = vmatpush3.msra.mxu0 %v16452_v48  ;;  %13782 = vmatprep.subr.mxu1 %v1500_v63  ;;  %21722 = vst [vmem:[#allocation14_spill] sm:$0xff] %v16626_v55  ;;  %v1527_v41 = vsub.f32 %v16594_v6, %v16626_v55  ;;  %v21629_v51 = vand.u32 4294901760, %v16633_v21  ;;  %v21725_v55 = vmov 0.0  }
  0xa5   :  { %13658 = vmatmul.mubr.f32.gmra.mxu0 %v16127_v53  ;;  %13783 = vmatpush3.msra.mxu1 %v1500_v63  ;;  %v1163_v63 = vsel %vm1143_vm3, %v1133_v58, 0  ;;  %v16640_v4 = vsub.f32 %v1157_v7, %v16612_v61  ;;  %v1136_v7 = vld [vmem:[%s21717_s24 + $0x48] sm:$0xff]  ;;  %v16661_v58 = vsub.f32 %v1160_v13, %v16628_v9  ;;  %v21726_v13 = vand.u32 4294901760, %v16610_v8 }
  0xa6   :  { %13702 = vmatmul.mubr.f32.gmra.mxu1 %v16093_v35  ;;  %13660 = vmatprep.mubr.msk.f32.mxu0 %vm15780_vm1, %v21611_v0  ;;  %v1134_v35 = vld [vmem:[%s21717_s24 + $0x38] sm:$0xff]  ;;  %v16642_v40 = vand.u32 4294901760, %v1163_v63 }
  0xa7   :  { %13704 = vmatprep.mubr.msk.f32.mxu1 %vm15780_vm1, %v21611_v0  ;;  %13734 = vmatprep.subr.mxu0 %v16472_v2  ;;  %v1166_v16 = vsel %vm1143_vm3, %v1134_v35, 0  ;;  %v1521_v35 = vand.u32 4294901760, %v1520_v3  ;;  %v1296_v28 = vsub.f32 %v16610_v8, %v21726_v13  ;;  %v1528_v13 = vand.u32 4294901760, %v1527_v41 }
  0xa8   :  { %13735 = vmatpush3.msra.mxu0 %v16472_v2  ;;  %13784 = vmatprep.subr.mxu1 %v1507_v36  ;;  %v16669_v43 = vand.u32 4294901760, %v1166_v16  ;;  %v16680_v15 = vsub.f32 %v1163_v63, %v16642_v40 }
  0xa9   :  { %13661 = vmatmul.mubr.f32.gmra.mxu0 %v16152_v12  ;;  %13785 = vmatpush3.msra.mxu1 %v1507_v36  ;;  %v1135_v36 = vld [vmem:[%s21717_s24 + $0x40] sm:$0xff]  ;;  %v1297_v41 = vand.u32 4294901760, %v1296_v28 }
  0xaa   :  { %13705 = vmatmul.mubr.f32.gmra.mxu1 %v16127_v53  ;;  %13663 = vmatprep.mubr.msk.f32.mxu0 %vm15780_vm1, %v21611_v0  ;;  %v21723_v53 = vand.u32 4294901760, %v16583_v20  ;;  %v1169_v3 = vsel %vm1143_vm3, %v1135_v36, 0  ;;  %v1137_v36 = vld [vmem:[%s21717_s24 + $0x50] sm:$0xff]  ;;  %v16698_v1 = vsub.f32 %v1166_v16, %v16669_v43 }
  0xab   :  { %13707 = vmatprep.mubr.msk.f32.mxu1 %vm15780_vm1, %v21611_v0  ;;  %13736 = vmatprep.subr.mxu0 %v16492_v38  ;;  %v16691_v63 = vand.u32 4294901760, %v1169_v3  ;;  %v1175_v16 = vsel %vm1143_vm3, %v1137_v36, 0 }
  0xac   :  { %v1276_v44 = vsub.f32 %v16583_v20, %v21723_v53  ;;  %13737 = vmatpush3.msra.mxu0 %v16492_v38  ;;  %13786 = vmatprep.subr.mxu1 %v1514_v57  ;;  %v21724_v53 = vand.u32 4294901760, %v16601_v10 }
  0xad   :  { %13664 = vmatmul.mubr.f32.gmra.mxu0 %v16171_v52  ;;  %13738 = vmatprep.subr.mxu0 %v16515_v5  ;;  %v16719_v28 = vsub.f32 %v1169_v3, %v16691_v63 }
  0xae   :  { %v1286_v0 = vsub.f32 %v16601_v10, %v21724_v53  ;;  %13708 = vmatmul.mubr.f32.gmra.mxu1 %v16152_v12  ;;  %13666 = vmatprep.mubr.msk.f32.mxu0 %vm15780_vm1, %v21725_v55  ;;  %v1172_v53 = vsel %vm1143_vm3, %v1136_v7, 0  ;;  %v1277_v12 = vand.u32 4294901760, %v1276_v44  ;;  %v1306_v44 = vsub.f32 %v16633_v21, %v21629_v51 }
  0xaf   :  { %13710 = vmatprep.mubr.msk.f32.mxu1 %vm15780_vm1, %v21725_v55  ;;  %13739 = vmatpush3.msra.mxu0 %v16515_v5  ;;  %v16700_v42 = vand.u32 4294901760, %v1172_v53 }
  0xb0   :  { %13787 = vmatpush3.msra.mxu1 %v1514_v57  ;;  %13740 = vmatprep.subr.mxu0 %v16543_v24  ;;  %v1287_v7 = vand.u32 4294901760, %v1286_v0  ;;  %v1138_v57 = vld [vmem:[%s21717_s24 + $0x58] sm:$0xff]  ;;  %v21727_v0 = vand.u32 4294901760, %v16640_v4  ;;  %v1307_v51 = vand.u32 4294901760, %v1306_v44  ;;  %v1140_v44 = vld [vmem:[%s21717_s24 + $0x68] sm:$0xff] }
  0xb1   :  { %13667 = vmatmul.mubr.f32.gmra.mxu0 %v16186_v29  ;;  %13788 = vmatprep.subr.mxu1 %v1521_v35  ;;  %v16724_v36 = vsub.f32 %v1172_v53, %v16700_v42 }
  0xb2   :  { %13711 = vmatmul.mubr.f32.gmra.mxu1 %v16171_v52  ;;  %13741 = vmatpush3.msra.mxu0 %v16543_v24  ;;  %v1316_v18 = vsub.f32 %v16640_v4, %v21727_v0  ;;  %v21728_v52 = vand.u32 4294901760, %v16661_v58  ;;  %v1178_v0 = vsel %vm1143_vm3, %v1138_v57, 0  ;;  %v21729_v57 = vand.u32 4294901760, %v16680_v15 }
  0xb3   :  { %13742 = vmatprep.mubr.f32.mxu0 %v1277_v12  ;;  %13713 = vmatprep.mubr.msk.f32.mxu1 %vm15780_vm1, %v21725_v55  ;;  %v21633_v12 = vand.u32 4294901760, %v16698_v1  ;;  %v1139_v55 = vld [vmem:[%s21717_s24 + $0x60] sm:$0xff]  ;;  %v16739_v53 = vand.u32 4294901760, %v1178_v0 }
  0xb4   :  { %13789 = vmatpush3.msra.mxu1 %v1521_v35  ;;  %13816 = vmatprep.subr.mxu0 %v16244_v37  ;;  %v1326_v27 = vsub.f32 %v16661_v58, %v21728_v52  ;;  %v16726_v35 = vand.u32 4294901760, %v1175_v16  ;;  %v1317_v3 = vand.u32 4294901760, %v1316_v18  ;;  %v1181_v18 = vsel %vm1143_vm3, %v1139_v55, 0 }
  0xb5   :  { %13743 = vmatmul.mubr.f32.vlgmr.msra.gmra.mxu0 %v1287_v7  ;;  %13790 = vmatprep.subr.mxu1 %v1528_v13  ;;  %v1336_v7 = vsub.f32 %v16680_v15, %v21729_v57  ;;  %v16761_v55 = vsub.f32 %v1178_v0, %v16739_v53 }
  0xb6   :  { %13714 = vmatmul.mubr.f32.gmra.mxu1 %v16186_v29  ;;  %13745 = vmatprep.mubr.f32.mxu0 %v1297_v41  ;;  %v1327_v52 = vand.u32 4294901760, %v1326_v27  ;;  %v21636_v29 = vand.u32 4294901760, %v16719_v28  ;;  %v21637_v41 = vand.u32 4294901760, %v16724_v36  ;;  %v16751_v57 = vsub.f32 %v1175_v16, %v16726_v35 }
  0xb7   :  { %13791 = vmatpush3.msra.mxu1 %v1528_v13  ;;  %13792 = vmatprep.mubr.f32.mxu1 %v16548_v34  ;;  %v1346_v13 = vsub.f32 %v16698_v1, %v21633_v12  ;;  %v1337_v27 = vand.u32 4294901760, %v1336_v7  ;;  %v16763_v12 = vand.u32 4294901760, %v1181_v18  ;;  %v1142_v7 = vld [vmem:[%s21717_s24 + $0x78] sm:$0xff] }
  0xb8   :  { %13817 = vmatpush3.msra.mxu0 %v16244_v37  ;;  %13866 = vmatprep.subr.mxu1 %v16232_v62  ;;  %v1184_v37 = vsel %vm1143_vm3, %v1140_v44, 0  ;;  %v1356_v16 = vsub.f32 %v16719_v28, %v21636_v29  ;;  %v1366_v0 = vsub.f32 %v16724_v36, %v21637_v41  ;;  %v1375_v44 = vand.u32 4294901760, %v16751_v57 }
  0xb9   :  { %13746 = vmatmul.mubr.f32.gmra.mxu0 %v1307_v51  ;;  %13818 = vmatprep.subr.mxu0 %v16348_v23  ;;  %v1141_v51 = vld [vmem:[%s21717_s24 + $0x70] sm:$0xff]  ;;  %v16786_v29 = vsub.f32 %v1181_v18, %v16763_v12 }
  0xba   :  { %13793 = vmatmul.mubr.f32.vlgmr.msra.gmra.mxu1 %v16568_v45  ;;  %13748 = vmatprep.mubr.f32.mxu0 %v1317_v3  ;;  %v16770_v3 = vand.u32 4294901760, %v1184_v37  ;;  %v1357_v41 = vand.u32 4294901760, %v1356_v16  ;;  %v1376_v18 = vsub.f32 %v16751_v57, %v1375_v44 }
  0xbb   :  { %13795 = vmatprep.mubr.f32.mxu1 %v16573_v49  ;;  %13819 = vmatpush3.msra.mxu0 %v16348_v23  ;;  %v1347_v23 = vand.u32 4294901760, %v1346_v13  ;;  %v1187_v49 = vsel %vm1143_vm3, %v1141_v51, 0  ;;  %v1190_v13 = vsel %vm1143_vm3, %v1142_v7, 0  ;;  %v1395_v16 = vand.u32 4294901760, %v16786_v29 }
  0xbc   :  { %13867 = vmatpush3.msra.mxu1 %v16232_v62  ;;  %13820 = vmatprep.subr.mxu0 %v16365_v30  ;;  %v16792_v51 = vsub.f32 %v1184_v37, %v16770_v3  ;;  %v16802_v7 = vand.u32 4294901760, %v1190_v13 }
  0xbd   :  { %13749 = vmatmul.mubr.f32.gmra.mxu0 %v1327_v52  ;;  %13868 = vmatprep.subr.mxu1 %v16334_v19  ;;  %v21638_v52 = vand.u32 4294901760, %v16761_v55 }
  0xbe   :  { %13796 = vmatmul.mubr.f32.gmra.mxu1 %v16603_v17  ;;  %13751 = vmatprep.mubr.f32.mxu0 %v1337_v27  ;;  %v16794_v27 = vand.u32 4294901760, %v1187_v49 }
  0xbf   :  { %13821 = vmatpush3.msra.mxu0 %v16365_v30  ;;  %13869 = vmatpush3.msra.mxu1 %v16334_v19  ;;  %v1367_v30 = vand.u32 4294901760, %v1366_v0  ;;  %v1386_v37 = vsub.f32 %v16761_v55, %v21638_v52  ;;  %v1377_v0 = vand.u32 4294901760, %v1376_v18  ;;  %v16819_v52 = vsub.f32 %v1190_v13, %v16802_v7 }
  0xc0   :  { %13822 = vmatprep.subr.mxu0 %v16384_v50  ;;  %13798 = vmatprep.mubr.f32.mxu1 %v16612_v61 }
  0xc1   :  { %13752 = vmatmul.mubr.f32.gmra.mxu0 %v1347_v23  ;;  %13870 = vmatprep.subr.mxu1 %v16344_v22  ;;  %v1405_v23 = vand.u32 4294901760, %v16792_v51 }
  0xc2   :  { %13823 = vmatpush3.msra.mxu0 %v16384_v50  ;;  %13799 = vmatmul.mubr.f32.gmra.mxu1 %v16628_v9  ;;  %v16813_v50 = vsub.f32 %v1187_v49, %v16794_v27  ;;  %v1396_v49 = vsub.f32 %v16786_v29, %v1395_v16 }
  0xc3   :  { %13824 = vmatprep.subr.mxu0 %v16405_v31  ;;  %13871 = vmatpush3.msra.mxu1 %v16344_v22 }
  0xc4   :  { %13754 = vmatprep.mubr.f32.mxu0 %v1357_v41  ;;  %13825 = vmatpush3.msra.mxu0 %v16405_v31  ;;  %v1387_v31 = vand.u32 4294901760, %v1386_v37  ;;  %v1406_v41 = vsub.f32 %v16792_v51, %v1405_v23  ;;  %v1415_v13 = vand.u32 4294901760, %v16813_v50 }
  0xc5   :  { %13755 = vmatmul.mubr.f32.gmra.mxu0 %v1367_v30  ;;  %13826 = vmatprep.subr.mxu0 %v16425_v46  ;;  %v1397_v30 = vand.u32 4294901760, %v1396_v49 }
  0xc6   :  { %13872 = vmatprep.subr.mxu1 %v16358_v26  ;;  %13801 = vmatprep.mubr.f32.mxu1 %v16642_v40  ;;  %v1407_v18 = vand.u32 4294901760, %v1406_v41  ;;  %v1416_v37 = vsub.f32 %v16813_v50, %v1415_v13 }
  0xc7   :  { %13827 = vmatpush3.msra.mxu0 %v16425_v46  ;;  %13873 = vmatpush3.msra.mxu1 %v16358_v26  ;;  %v1425_v46 = vand.u32 4294901760, %v16819_v52 }
  0xc8   :  { %13802 = vmatmul.mubr.f32.gmra.mxu1 %v16669_v43  ;;  %13828 = vmatprep.subr.mxu0 %v16445_v11 }
  0xc9   :  { %13874 = vmatprep.subr.mxu1 %v16375_v33  ;;  %13757 = vmatprep.mubr.f32.mxu0 %v1377_v0 }
  0xca   :  { %13829 = vmatpush3.msra.mxu0 %v16445_v11  ;;  %13875 = vmatpush3.msra.mxu1 %v16375_v33  ;;  %v1426_v11 = vsub.f32 %v16819_v52, %v1425_v46 }
  0xcb   :  { %13758 = vmatmul.mubr.f32.gmra.mxu0 %v1387_v31  ;;  %13830 = vmatprep.subr.mxu0 %v16465_v54 }
  0xcc   :  { %13804 = vmatprep.mubr.f32.mxu1 %v16691_v63  ;;  %13831 = vmatpush3.msra.mxu0 %v16465_v54  ;;  %v1417_v54 = vand.u32 4294901760, %v1416_v37  ;;  %v1427_v0 = vand.u32 4294901760, %v1426_v11  ;;  %v21731_v37 = vand.u32 4294901760, %v16583_v20 }
  0xcd   :  { %13876 = vmatprep.subr.mxu1 %v16392_v56  ;;  %13805 = vmatmul.mubr.f32.gmra.mxu1 %v16700_v42 }
  0xce   :  { %13832 = vmatprep.subr.mxu0 %v16485_v39  ;;  %13877 = vmatpush3.msra.mxu1 %v16392_v56 }
  0xcf   :  { %13760 = vmatprep.mubr.f32.mxu0 %v1397_v30  ;;  %13833 = vmatpush3.msra.mxu0 %v16485_v39  ;;  %v16868_v39 = vld [vmem:[%s21730_s28] ss:$0 sm:$0xff] }
  0xd0   :  { %13878 = vmatprep.subr.mxu1 %v16412_v32  ;;  %13761 = vmatmul.mubr.f32.gmra.mxu0 %v1407_v18 }
  0xd1   :  { %13834 = vmatprep.subr.mxu0 %v16505_v60  ;;  %13879 = vmatpush3.msra.mxu1 %v16412_v32 }
  0xd2   :  { %13807 = vmatprep.mubr.f32.mxu1 %v16726_v35  ;;  %13835 = vmatpush3.msra.mxu0 %v16505_v60 }
  0xd3   :  { %13808 = vmatmul.mubr.f32.gmra.mxu1 %v16739_v53  ;;  %13836 = vmatprep.subr.mxu0 %v16522_v25 }
  0xd4   :  { %13880 = vmatprep.subr.mxu1 %v16432_v47  ;;  %13763 = vmatprep.mubr.f32.mxu0 %v1417_v54  ;;  %v21732_v54 = vand.u32 4294901760, %v16601_v10 }
  0xd5   :  { %13837 = vmatpush3.msra.mxu0 %v16522_v25  ;;  %13881 = vmatpush3.msra.mxu1 %v16432_v47 }
  0xd6   :  { %13764 = vmatmul.mubr.f32.gmra.mxu0 %v1427_v0  ;;  %13838 = vmatprep.subr.mxu0 %v16562_v59 }
  0xd7   :  { %13882 = vmatprep.subr.mxu1 %v16452_v48  ;;  %13810 = vmatprep.mubr.f32.mxu1 %v16763_v12 }
  0xd8   :  { %13839 = vmatpush3.msra.mxu0 %v16562_v59  ;;  %13883 = vmatpush3.msra.mxu1 %v16452_v48 }
  0xd9   :  { %13811 = vmatmul.mubr.f32.gmra.mxu1 %v16770_v3  ;;  %13840 = vmatprep.subr.mxu0 %v16594_v6  ;;  %v201_v60 = vpop.f32.mrf.mxu0 }
  0xda   :  { %13884 = vmatprep.subr.mxu1 %v16472_v2  ;;  %13841 = vmatpush3.msra.mxu0 %v16594_v6  ;;  %v202_v25 = vadd.f32 %v16868_v39, %v201_v60 }
  0xdb   :  { %13842 = vmatprep.mubr.f32.mxu0 %v16583_v20  ;;  %13885 = vmatpush3.msra.mxu1 %v16472_v2  ;;  %v13444_v59 = vpop.f32.mrf.mxu0  ;;  %v21733_v20 = vld [vmem:[#allocation2_spill] sm:$0xff] }
  0xdc   :  { %13843 = vmatmul.mubr.f32.vlgmr.msra.gmra.mxu0 %v16601_v10  ;;  %13886 = vmatprep.subr.mxu1 %v16492_v38  ;;  %v21734_v10 = vand.u32 4294901760, %v16610_v8 }
  0xdd   :  { %13813 = vmatprep.mubr.f32.mxu1 %v16794_v27  ;;  %13887 = vmatpush3.msra.mxu1 %v16492_v38  ;;  %v211_v31 = vpop.f32.mrf.mxu0  ;;  %v412_v6 = vpop.f32.mrf.mxu1 }
  0xde   :  { %13814 = vmatmul.mubr.f32.gmra.mxu1 %v16802_v7  ;;  %13888 = vmatprep.subr.mxu1 %v16515_v5  ;;  %v212_v49 = vadd.f32 %v16868_v39, %v211_v31  ;;  %v16886_v30 = vadd.f32 %v412_v6, %v202_v25 }
  0xdf   :  { %13845 = vmatprep.mubr.f32.mxu0 %v16610_v8  ;;  %13889 = vmatpush3.msra.mxu1 %v16515_v5  ;;  %v13447_v41 = vpop.f32.mrf.mxu0  ;;  %v13491_v18 = vpop.f32.mrf.mxu1 }
  0xe0   :  { %13846 = vmatmul.mubr.f32.gmra.mxu0 %v16633_v21  ;;  %13890 = vmatprep.subr.mxu1 %v16543_v24  ;;  %v21735_v41 = vand.u32 4294901760, %v16633_v21 }
  0xe1   :  { %13891 = vmatpush3.msra.mxu1 %v16543_v24  ;;  %13892 = vmatprep.mubr.f32.mxu1 %v21731_v37  ;;  %v221_v11 = vpop.f32.mrf.mxu0  ;;  %v418_v0 = vpop.f32.mrf.mxu1 }
  0xe2   :  { %13893 = vmatmul.mubr.f32.vlgmr.msra.gmra.mxu1 %v21732_v54  ;;  %13916 = vmatprep.subr.mxu0 %v16258_v14  ;;  %v222_v60 = vadd.f32 %v16868_v39, %v221_v11  ;;  %v16899_v59 = vadd.f32 %v418_v0, %v212_v49  ;;  %v21736_v49 = vld [vmem:[#allocation3_spill] sm:$0xff]  ;;  %v21737_v54 = vld [vmem:[#allocation4_spill] sm:$0xff]  ;;  %v21738_v0 = vand.u32 4294901760, %v16640_v4 }
  0xe3   :  { %13848 = vmatprep.mubr.f32.mxu0 %v16640_v4  ;;  %13917 = vmatpush3.msra.mxu0 %v16258_v14  ;;  %v13450_v25 = vpop.f32.mrf.mxu0  ;;  %v13494_v31 = vpop.f32.mrf.mxu1 }
  0xe4   :  { %13849 = vmatmul.mubr.f32.gmra.mxu0 %v16661_v58  ;;  %13918 = vmatprep.subr.mxu0 %v21733_v20  ;;  %v21739_v31 = vand.u32 4294901760, %v16661_v58 }
  0xe5   :  { %13966 = vmatprep.subr.mxu1 %v16232_v62  ;;  %13895 = vmatprep.mubr.f32.mxu1 %v21734_v10  ;;  %v231_v6 = vpop.f32.mrf.mxu0 }
  0xe6   :  { %13919 = vmatpush3.msra.mxu0 %v21733_v20  ;;  %13967 = vmatpush3.msra.mxu1 %v16232_v62  ;;  %v424_v14 = vpop.f32.mrf.mxu1  ;;  %v232_v18 = vadd.f32 %v16868_v39, %v231_v6  ;;  %v21740_v6 = vld [vmem:[#allocation5_spill] sm:$0xff] }
  0xe7   :  { %13896 = vmatmul.mubr.f32.gmra.mxu1 %v21735_v41  ;;  %13920 = vmatprep.subr.mxu0 %v21736_v49  ;;  %v13453_v37 = vpop.f32.mrf.mxu0  ;;  %v16912_v11 = vadd.f32 %v424_v14, %v222_v60  ;;  %v21741_v14 = vld [vmem:[#allocation6_spill] sm:$0xff] }
  0xe8   :  { %13851 = vmatprep.mubr.f32.mxu0 %v16680_v15  ;;  %13921 = vmatpush3.msra.mxu0 %v21736_v49  ;;  %v13497_v8 = vpop.f32.mrf.mxu1 }
  0xe9   :  { %13968 = vmatprep.subr.mxu1 %v16334_v19  ;;  %13852 = vmatmul.mubr.f32.gmra.mxu0 %v16698_v1  ;;  %v241_v62 = vpop.f32.mrf.mxu0  ;;  %v21743_v8 = vand.u32 4294901760, %v16698_v1  ;;  %v21745_v1 = vld [vmem:[#allocation8_spill] sm:$0xff] }
  0xea   :  { %13922 = vmatprep.subr.mxu0 %v21737_v54  ;;  %13969 = vmatpush3.msra.mxu1 %v16334_v19  ;;  %v430_v21 = vpop.f32.mrf.mxu1  ;;  %v242_v60 = vadd.f32 %v16868_v39, %v241_v62  ;;  %v21744_v62 = vld [vmem:[#allocation7_spill] sm:$0xff] }
  0xeb   :  { %13898 = vmatprep.mubr.f32.mxu1 %v21738_v0  ;;  %13923 = vmatpush3.msra.mxu0 %v21737_v54  ;;  %v13456_v25 = vpop.f32.mrf.mxu0  ;;  %v16924_v20 = vadd.f32 %v430_v21, %v232_v18  ;;  %v21742_v18 = vand.u32 4294901760, %v16680_v15 }
  0xec   :  { %13970 = vmatprep.subr.mxu1 %v16344_v22  ;;  %13899 = vmatmul.mubr.f32.gmra.mxu1 %v21739_v31  ;;  %v13500_v10 = vpop.f32.mrf.mxu1  ;;  %v21746_v25 = vand.u32 4294901760, %v16719_v28 }
  0xed   :  { %13924 = vmatprep.subr.mxu0 %v21740_v6  ;;  %13971 = vmatpush3.msra.mxu1 %v16344_v22  ;;  %v251_v19 = vpop.f32.mrf.mxu0 }
  0xee   :  { %13854 = vmatprep.mubr.f32.mxu0 %v16719_v28  ;;  %13925 = vmatpush3.msra.mxu0 %v21740_v6  ;;  %v436_v4 = vpop.f32.mrf.mxu1  ;;  %v252_v41 = vadd.f32 %v16868_v39, %v251_v19  ;;  %v21747_v6 = vand.u32 4294901760, %v16724_v36 }
  0xef   :  { %13855 = vmatmul.mubr.f32.gmra.mxu0 %v16724_v36  ;;  %13926 = vmatprep.subr.mxu0 %v21741_v14  ;;  %v13459_v49 = vpop.f32.mrf.mxu0  ;;  %v16936_v58 = vadd.f32 %v436_v4, %v242_v60  ;;  %v21748_v4 = vld [vmem:[#allocation9_spill] sm:$0xff] }
  0xf0   :  { %13972 = vmatprep.subr.mxu1 %v16358_v26  ;;  %13901 = vmatprep.mubr.f32.mxu1 %v21742_v18  ;;  %v13503_v22 = vpop.f32.mrf.mxu1  ;;  %v21749_v49 = vld [vmem:[#allocation10_spill] sm:$0xff] }
  0xf1   :  { %13927 = vmatpush3.msra.mxu0 %v21741_v14  ;;  %13973 = vmatpush3.msra.mxu1 %v16358_v26  ;;  %v261_v37 = vpop.f32.mrf.mxu0 }
  0xf2   :  { %13902 = vmatmul.mubr.f32.gmra.mxu1 %v21743_v8  ;;  %13928 = vmatprep.subr.mxu0 %v21744_v62  ;;  %v442_v54 = vpop.f32.mrf.mxu1  ;;  %v262_v21 = vadd.f32 %v16868_v39, %v261_v37  ;;  %v21750_v37 = vand.u32 4294901760, %v16761_v55  ;;  %v21751_v8 = vld [vmem:[#allocation11_spill] sm:$0xff] }
  0xf3   :  { %13974 = vmatprep.subr.mxu1 %v16375_v33  ;;  %13857 = vmatprep.mubr.f32.mxu0 %v16751_v57  ;;  %v13462_v15 = vpop.f32.mrf.mxu0  ;;  %v16949_v0 = vadd.f32 %v442_v54, %v252_v41 }
  0xf4   :  { %13929 = vmatpush3.msra.mxu0 %v21744_v62  ;;  %13975 = vmatpush3.msra.mxu1 %v16375_v33  ;;  %v13506_v26 = vpop.f32.mrf.mxu1 }
  0xf5   :  { %13858 = vmatmul.mubr.f32.gmra.mxu0 %v16761_v55  ;;  %13930 = vmatprep.subr.mxu0 %v21745_v1  ;;  %v271_v60 = vpop.f32.mrf.mxu0  ;;  %v21752_v55 = vld [vmem:[#allocation13_spill] sm:$0xff] }
  0xf6   :  { %13904 = vmatprep.mubr.f32.mxu1 %v21746_v25  ;;  %13931 = vmatpush3.msra.mxu0 %v21745_v1  ;;  %v272_v31 = vadd.f32 %v16868_v39, %v271_v60  ;;  %v448_v10 = vpop.f32.mrf.mxu1  ;;  %v21753_v1 = vld [vmem:[#allocation14_spill] sm:$0xff] }
  0xf7   :  { %13976 = vmatprep.subr.mxu1 %v16392_v56  ;;  %13905 = vmatmul.mubr.f32.gmra.mxu1 %v21747_v6  ;;  %v13465_v33 = vpop.f32.mrf.mxu0  ;;  %v16962_v19 = vadd.f32 %v448_v10, %v262_v21  ;;  %v21754_v10 = vld [vmem:[#allocation12_spill] sm:$0xff] }
  0xf8   :  { %13932 = vmatprep.subr.mxu0 %v21748_v4  ;;  %13977 = vmatpush3.msra.mxu1 %v16392_v56  ;;  %v13509_v14 = vpop.f32.mrf.mxu1  ;;  %v21755_v33 = vmov 0.0  }
  0xf9   :  { %13860 = vmatprep.mubr.f32.mxu0 %v16786_v29  ;;  %13933 = vmatpush3.msra.mxu0 %v21748_v4  ;;  %v281_v28 = vpop.f32.mrf.mxu0 }
  0xfa   :  { %13978 = vmatprep.subr.mxu1 %v16412_v32  ;;  %13861 = vmatmul.mubr.f32.gmra.mxu0 %v16792_v51  ;;  %v282_v36 = vadd.f32 %v16868_v39, %v281_v28  ;;  %v454_v41 = vpop.f32.mrf.mxu1 }
  0xfb   :  { %13934 = vmatprep.subr.mxu0 %v21749_v49  ;;  %13979 = vmatpush3.msra.mxu1 %v16412_v32  ;;  %v13468_v18 = vpop.f32.mrf.mxu0  ;;  %v16973_v22 = vadd.f32 %v454_v41, %v272_v31 }
  0xfc   :  { %13907 = vmatprep.mubr.f32.mxu1 %v1375_v44  ;;  %13935 = vmatpush3.msra.mxu0 %v21749_v49  ;;  %v13512_v56 = vpop.f32.mrf.mxu1 }
  0xfd   :  { %13908 = vmatmul.mubr.f32.gmra.mxu1 %v21750_v37  ;;  %13936 = vmatprep.subr.mxu0 %v21751_v8  ;;  %v291_v62 = vpop.f32.mrf.mxu0 }
  0xfe   :  { %13980 = vmatprep.subr.mxu1 %v16432_v47  ;;  %13863 = vmatprep.mubr.f32.mxu0 %v16813_v50  ;;  %v292_v32 = vadd.f32 %v16868_v39, %v291_v62  ;;  %v460_v54 = vpop.f32.mrf.mxu1 }
  0xff   :  { %13937 = vmatpush3.msra.mxu0 %v21751_v8  ;;  %13981 = vmatpush3.msra.mxu1 %v16432_v47  ;;  %v13471_v57 = vpop.f32.mrf.mxu0  ;;  %v16986_v44 = vadd.f32 %v460_v54, %v282_v36 }
 0x100   :  { %13864 = vmatmul.mubr.f32.gmra.mxu0 %v16819_v52  ;;  %13938 = vmatprep.subr.mxu0 %v21752_v55  ;;  %v13515_v21 = vpop.f32.mrf.mxu1 }
 0x101   :  { %13982 = vmatprep.subr.mxu1 %v16452_v48  ;;  %13910 = vmatprep.mubr.f32.mxu1 %v1395_v16  ;;  %v301_v15 = vpop.f32.mrf.mxu0 }
 0x102   :  { %13939 = vmatpush3.msra.mxu0 %v21752_v55  ;;  %13983 = vmatpush3.msra.mxu1 %v16452_v48  ;;  %v302_v47 = vadd.f32 %v16868_v39, %v301_v15  ;;  %v466_v26 = vpop.f32.mrf.mxu1 }
 0x103   :  { %13911 = vmatmul.mubr.f32.gmra.mxu1 %v1405_v23  ;;  %13940 = vmatprep.subr.mxu0 %v21753_v1  ;;  %v13474_v60 = vpop.f32.mrf.mxu0  ;;  %v16999_v25 = vadd.f32 %v466_v26, %v292_v32 }
 0x104   :  { %13984 = vmatprep.subr.mxu1 %v16472_v2  ;;  %13941 = vmatpush3.msra.mxu0 %v21753_v1  ;;  %v13518_v29 = vpop.f32.mrf.mxu1 }
 0x105   :  { %13942 = vmatprep.mubr.f32.mxu0 %v16548_v34  ;;  %13985 = vmatpush3.msra.mxu1 %v16472_v2  ;;  %v311_v48 = vpop.f32.mrf.mxu0 }
 0x106   :  { %13943 = vmatmul.mubr.f32.vlgmr.msra.gmra.mxu0 %v16568_v45  ;;  %13986 = vmatprep.subr.mxu1 %v16492_v38  ;;  %v312_v51 = vadd.f32 %v16868_v39, %v311_v48  ;;  %v472_v16 = vpop.f32.mrf.mxu1 }
 0x107   :  { %13913 = vmatprep.mubr.f32.mxu1 %v1415_v13  ;;  %13987 = vmatpush3.msra.mxu1 %v16492_v38  ;;  %v13477_v23 = vpop.f32.mrf.mxu0  ;;  %v17011_v31 = vadd.f32 %v472_v16, %v302_v47 }
 0x108   :  { %13914 = vmatmul.mubr.f32.gmra.mxu1 %v1425_v46  ;;  %13988 = vmatprep.subr.mxu1 %v16515_v5  ;;  %v13521_v2 = vpop.f32.mrf.mxu1 }
 0x109   :  { %13945 = vmatprep.mubr.f32.mxu0 %v21754_v10  ;;  %13989 = vmatpush3.msra.mxu1 %v16515_v5  ;;  %v321_v6 = vpop.f32.mrf.mxu0 }
 0x10a   :  { %13946 = vmatmul.mubr.f32.gmra.mxu0 %v16603_v17  ;;  %13990 = vmatprep.subr.mxu1 %v16543_v24  ;;  %v322_v38 = vadd.f32 %v16868_v39, %v321_v6  ;;  %v478_v50 = vpop.f32.mrf.mxu1 }
 0x10b   :  { %13991 = vmatpush3.msra.mxu1 %v16543_v24  ;;  %13992 = vmatprep.mubr.f32.mxu1 %v16548_v34  ;;  %v13480_v52 = vpop.f32.mrf.mxu0  ;;  %v17023_v13 = vadd.f32 %v478_v50, %v312_v51 }
 0x10c   :  { %13993 = vmatmul.mubr.f32.vlgmr.msra.gmra.mxu1 %v16568_v45  ;;  %13948 = vmatprep.mubr.f32.mxu0 %v16612_v61  ;;  %v13524_v5 = vpop.f32.mrf.mxu1 }
 0x10d   :  { %13995 = vmatprep.mubr.f32.mxu1 %v21754_v10  ;;  %v564_v46 = vpop.f32.mrf.mxu0  ;;  %14016 = vmatprep.subr.mxu0 %v21755_v33 }
 0x10e   :  { %13949 = vmatmul.mubr.f32.gmra.mxu0 %v16628_v9  ;;  %v565_v39 = vadd.f32 %v564_v46, %v16886_v30  ;;  %v484_v24 = vpop.f32.mrf.mxu1  ;;  %14051 = vmatprep.subr.mxu1 %v21755_v33 }
 0x10f   :  { %13951 = vmatprep.mubr.f32.mxu0 %v16642_v40  ;;  %v17033_v34 = vadd.f32 %v484_v24, %v322_v38  ;;  %v13538_v45 = vpop.f32.mrf.mxu0 }
 0x110   :  { %13996 = vmatmul.mubr.f32.gmra.mxu1 %v16603_v17  ;;  %v13527_v4 = vpop.f32.mrf.mxu1 }
 0x111   :  { %13998 = vmatprep.mubr.f32.mxu1 %v16612_v61  ;;  %v571_v14 = vpop.f32.mrf.mxu0 }
 0x112   :  { %13952 = vmatmul.mubr.f32.gmra.mxu0 %v16669_v43  ;;  %v572_v28 = vadd.f32 %v571_v14, %v16899_v59  ;;  %v725_v36 = vpop.f32.mrf.mxu1 }
 0x113   :  { %13954 = vmatprep.mubr.f32.mxu0 %v16691_v63  ;;  %v13541_v30 = vpop.f32.mrf.mxu0  ;;  %v17040_v41 = vadd.f32 %v725_v36, %v565_v39 }
 0x114   :  { %13999 = vmatmul.mubr.f32.gmra.mxu1 %v16628_v9  ;;  %v13585_v49 = vpop.f32.mrf.mxu1 }
 0x115   :  { %14001 = vmatprep.mubr.f32.mxu1 %v16642_v40  ;;  %v578_v17 = vpop.f32.mrf.mxu0 }
 0x116   :  { %13955 = vmatmul.mubr.f32.gmra.mxu0 %v16700_v42  ;;  %v579_v61 = vadd.f32 %v578_v17, %v16912_v11  ;;  %v733_v18 = vpop.f32.mrf.mxu1 }
 0x117   :  { %13957 = vmatprep.mubr.f32.mxu0 %v16726_v35  ;;  %v13544_v59 = vpop.f32.mrf.mxu0  ;;  %v17047_v56 = vadd.f32 %v733_v18, %v572_v28 }
 0x118   :  { %14002 = vmatmul.mubr.f32.gmra.mxu1 %v16669_v43  ;;  %v13588_v37 = vpop.f32.mrf.mxu1 }
 0x119   :  { %14004 = vmatprep.mubr.f32.mxu1 %v16691_v63  ;;  %v585_v9 = vpop.f32.mrf.mxu0 }
 0x11a   :  { %13958 = vmatmul.mubr.f32.gmra.mxu0 %v16739_v53  ;;  %v586_v40 = vadd.f32 %v585_v9, %v16924_v20  ;;  %v741_v8 = vpop.f32.mrf.mxu1 }
 0x11b   :  { %13960 = vmatprep.mubr.f32.mxu0 %v16763_v12  ;;  %v13547_v11 = vpop.f32.mrf.mxu0  ;;  %v17054_v62 = vadd.f32 %v741_v8, %v579_v61 }
 0x11c   :  { %14005 = vmatmul.mubr.f32.gmra.mxu1 %v16700_v42  ;;  %v13591_v32 = vpop.f32.mrf.mxu1 }
 0x11d   :  { %14007 = vmatprep.mubr.f32.mxu1 %v16726_v35  ;;  %v592_v43 = vpop.f32.mrf.mxu0 }
 0x11e   :  { %13961 = vmatmul.mubr.f32.gmra.mxu0 %v16770_v3  ;;  %v593_v63 = vadd.f32 %v592_v43, %v16936_v58  ;;  %v749_v54 = vpop.f32.mrf.mxu1 }
 0x11f   :  { %13963 = vmatprep.mubr.f32.mxu0 %v16794_v27  ;;  %v13550_v20 = vpop.f32.mrf.mxu0  ;;  %v17061_v57 = vadd.f32 %v749_v54, %v586_v40 }
 0x120   :  { %14008 = vmatmul.mubr.f32.gmra.mxu1 %v16739_v53  ;;  %v13594_v55 = vpop.f32.mrf.mxu1 }
 0x121   :  { %14010 = vmatprep.mubr.f32.mxu1 %v16763_v12  ;;  %v599_v42 = vpop.f32.mrf.mxu0 }
 0x122   :  { %13964 = vmatmul.mubr.f32.gmra.mxu0 %v16802_v7  ;;  %v600_v35 = vadd.f32 %v599_v42, %v16949_v0  ;;  %v757_v21 = vpop.f32.mrf.mxu1 }
 0x123   :  { %v13553_v15 = vpop.f32.mrf.mxu0  ;;  %v17067_v47 = vadd.f32 %v757_v21, %v593_v63  ;;  %14048 = vmatprep.mubr.msk.f32.mxu0 %vm15780_vm1, %v21755_v33 }
 0x124   :  { %14011 = vmatmul.mubr.f32.gmra.mxu1 %v16770_v3  ;;  %v13597_v58 = vpop.f32.mrf.mxu1 }
 0x125   :  { %14013 = vmatprep.mubr.f32.mxu1 %v16794_v27  ;;  %v606_v53 = vpop.f32.mrf.mxu0 }
 0x126   :  { %v607_v12 = vadd.f32 %v606_v53, %v16962_v19  ;;  %v765_v26 = vpop.f32.mrf.mxu1 }
 0x127   :  { %v13556_v1 = vpop.f32.mrf.mxu0  ;;  %v17074_v60 = vadd.f32 %v765_v26, %v600_v35 }
 0x128   :  { %14014 = vmatmul.mubr.f32.gmra.mxu1 %v16802_v7  ;;  %v13600_v0 = vpop.f32.mrf.mxu1 }
 0x129   :  { %v613_v29 = vpop.f32.mrf.mxu0  ;;  %14083 = vmatprep.mubr.msk.f32.mxu1 %vm15780_vm1, %v21755_v33 }
 0x12a   :  { %v614_v48 = vadd.f32 %v613_v29, %v16973_v22  ;;  %v773_v3 = vpop.f32.mrf.mxu1 }
 0x12b   :  { %v13559_v51 = vpop.f32.mrf.mxu0  ;;  %v17080_v16 = vadd.f32 %v773_v3, %v607_v12 }
 0x12c   :  { %v13603_v27 = vpop.f32.mrf.mxu1 }
 0x12d   :  { %v620_v23 = vpop.f32.mrf.mxu0 }
 0x12e   :  { %v621_v19 = vadd.f32 %v620_v23, %v16986_v44  ;;  %v781_v2 = vpop.f32.mrf.mxu1 }
 0x12f   :  { %v13562_v10 = vpop.f32.mrf.mxu0  ;;  %v17083_v6 = vadd.f32 %v781_v2, %v614_v48 }
 0x130   :  { %v13606_v7 = vpop.f32.mrf.mxu1 }
 0x131   :  { %v627_v38 = vpop.f32.mrf.mxu0 }
 0x132   :  { %v628_v50 = vadd.f32 %v627_v38, %v16999_v25  ;;  %v789_v52 = vpop.f32.mrf.mxu1 }
 0x133   :  { %v13565_v5 = vpop.f32.mrf.mxu0  ;;  %v17086_v46 = vadd.f32 %v789_v52, %v621_v19 }
 0x134   :  { %v13609_v22 = vpop.f32.mrf.mxu1 }
 0x135   :  { %v634_v39 = vpop.f32.mrf.mxu0 }
 0x136   :  { %v635_v24 = vadd.f32 %v634_v39, %v17011_v31  ;;  %v797_v45 = vpop.f32.mrf.mxu1 }
 0x137   :  { %v13568_v4 = vpop.f32.mrf.mxu0  ;;  %v17089_v14 = vadd.f32 %v797_v45, %v628_v50 }
 0x138   :  { %v13612_v44 = vpop.f32.mrf.mxu1 }
 0x139   :  { %v641_v28 = vpop.f32.mrf.mxu0 }
 0x13a   :  { %v642_v36 = vadd.f32 %v641_v28, %v17023_v13  ;;  %v805_v30 = vpop.f32.mrf.mxu1 }
 0x13b   :  { %v13571_v49 = vpop.f32.mrf.mxu0  ;;  %v17092_v17 = vadd.f32 %v805_v30, %v635_v24 }
 0x13c   :  { %v13615_v25 = vpop.f32.mrf.mxu1 }
 0x13d   :  { %v648_v61 = vpop.f32.mrf.mxu0 }
 0x13e   :  { %v649_v18 = vadd.f32 %v648_v61, %v17033_v34  ;;  %v813_v59 = vpop.f32.mrf.mxu1 }
 0x13f   :  { %v13574_v37 = vpop.f32.mrf.mxu0  ;;  %v17095_v9 = vadd.f32 %v813_v59, %v642_v36 }
 0x140   :  { %v13618_v31 = vpop.f32.mrf.mxu1 }
 0x141   :  { %v904_v40 = vpop.f32.mrf.mxu0 }
 0x142   :  { %v905_v8 = vadd.f32 %v904_v40, %v17040_v41  ;;  %v821_v11 = vpop.f32.mrf.mxu1 }
 0x143   :  { %v17098_v32 = vadd.f32 %v821_v11, %v649_v18  ;;  %v13632_v13 = vpop.f32.mrf.mxu0 }
 0x144   :  { %v13621_v43 = vpop.f32.mrf.mxu1 }
 0x145   :  { %v910_v63 = vpop.f32.mrf.mxu0 }
 0x146   :  { %v911_v54 = vadd.f32 %v910_v63, %v17047_v56  ;;  %v1051_v20 = vpop.f32.mrf.mxu1 }
 0x147   :  { %v13635_v55 = vpop.f32.mrf.mxu0  ;;  %v17101_v42 = vadd.f32 %v1051_v20, %v905_v8 }
 0x148   :  { %v13679_v34 = vpop.f32.mrf.mxu1 }
 0x149   :  { %21756 = vst [vmem:[#allocation2_spill] sm:$0xff] %v17101_v42  ;;  %v916_v35 = vpop.f32.mrf.mxu0 }
 0x14a   :  { %v917_v21 = vadd.f32 %v916_v35, %v17054_v62  ;;  %v1057_v15 = vpop.f32.mrf.mxu1 }
 0x14b   :  { %v13638_v58 = vpop.f32.mrf.mxu0  ;;  %v17104_v53 = vadd.f32 %v1057_v15, %v911_v54 }
 0x14c   :  { %v13682_v41 = vpop.f32.mrf.mxu1 }
 0x14d   :  { %21757 = vst [vmem:[#allocation3_spill] sm:$0xff] %v17104_v53  ;;  %v922_v12 = vpop.f32.mrf.mxu0 }
 0x14e   :  { %v923_v26 = vadd.f32 %v922_v12, %v17061_v57  ;;  %v1063_v1 = vpop.f32.mrf.mxu1 }
 0x14f   :  { %v13641_v0 = vpop.f32.mrf.mxu0  ;;  %v17107_v29 = vadd.f32 %v1063_v1, %v917_v21 }
 0x150   :  { %v13685_v56 = vpop.f32.mrf.mxu1 }
 0x151   :  { %21758 = vst [vmem:[#allocation4_spill] sm:$0xff] %v17107_v29  ;;  %v928_v48 = vpop.f32.mrf.mxu0 }
 0x152   :  { %v929_v3 = vadd.f32 %v928_v48, %v17067_v47  ;;  %v1069_v51 = vpop.f32.mrf.mxu1 }
 0x153   :  { %v13644_v27 = vpop.f32.mrf.mxu0  ;;  %v17110_v23 = vadd.f32 %v1069_v51, %v923_v26 }
 0x154   :  { %v13688_v62 = vpop.f32.mrf.mxu1 }
 0x155   :  { %21759 = vst [vmem:[#allocation5_spill] sm:$0xff] %v17110_v23  ;;  %v934_v19 = vpop.f32.mrf.mxu0 }
 0x156   :  { %v935_v2 = vadd.f32 %v934_v19, %v17074_v60  ;;  %v1075_v10 = vpop.f32.mrf.mxu1 }
 0x157   :  { %v13647_v7 = vpop.f32.mrf.mxu0  ;;  %v17113_v38 = vadd.f32 %v1075_v10, %v929_v3 }
 0x158   :  { %v13691_v57 = vpop.f32.mrf.mxu1 }
 0x159   :  { %21760 = vst [vmem:[#allocation6_spill] sm:$0xff] %v17113_v38  ;;  %v940_v50 = vpop.f32.mrf.mxu0 }
 0x15a   :  { %v941_v52 = vadd.f32 %v940_v50, %v17080_v16  ;;  %v1081_v5 = vpop.f32.mrf.mxu1 }
 0x15b   :  { %v13650_v22 = vpop.f32.mrf.mxu0  ;;  %v17116_v39 = vadd.f32 %v1081_v5, %v935_v2 }
 0x15c   :  { %v13694_v47 = vpop.f32.mrf.mxu1 }
 0x15d   :  { %21761 = vst [vmem:[#allocation7_spill] sm:$0xff] %v17116_v39  ;;  %v946_v24 = vpop.f32.mrf.mxu0 }
 0x15e   :  { %v947_v45 = vadd.f32 %v946_v24, %v17083_v6  ;;  %v1087_v4 = vpop.f32.mrf.mxu1 }
 0x15f   :  { %v13653_v44 = vpop.f32.mrf.mxu0  ;;  %v17119_v28 = vadd.f32 %v1087_v4, %v941_v52 }
 0x160   :  { %v13697_v60 = vpop.f32.mrf.mxu1 }
 0x161   :  { %21762 = vst [vmem:[#allocation8_spill] sm:$0xff] %v17119_v28  ;;  %v952_v36 = vpop.f32.mrf.mxu0  ;;  %v8593_v18 = vrot.slane %v17119_v28, 1 }
 0x162   :  { %v953_v30 = vadd.f32 %v952_v36, %v17086_v46  ;;  %v1093_v49 = vpop.f32.mrf.mxu1 }
 0x163   :  { %v13656_v25 = vpop.f32.mrf.mxu0  ;;  %v1094_v61 = vadd.f32 %v1093_v49, %v947_v45 }
 0x164   :  { %v13700_v16 = vpop.f32.mrf.mxu1 }
 0x165   :  { %v8594_v59 = vrot.slane %v1094_v61, 1  ;;  %v958_v37 = vpop.f32.mrf.mxu0 }
 0x166   :  { %v959_v31 = vadd.f32 %v958_v37, %v17089_v14  ;;  %v1099_v6 = vpop.f32.mrf.mxu1 }
 0x167   :  { %v17125_v40 = vsel %vm8592_vm4, %v8593_v18, %v8594_v59  ;;  %v13659_v8 = vpop.f32.mrf.mxu0  ;;  %v1100_v11 = vadd.f32 %v1099_v6, %v953_v30 }
 0x168   :  { %21763 = vst [vmem:[#allocation9_spill] sm:$0xff] %v17125_v40  ;;  %v13703_v13 = vpop.f32.mrf.mxu1 }
 0x169   :  { %v8596_v43 = vrot.slane %v1100_v11, 1  ;;  %v964_v46 = vpop.f32.mrf.mxu0 }
 0x16a   :  { %v965_v63 = vadd.f32 %v964_v46, %v17092_v17  ;;  %v1105_v54 = vpop.f32.mrf.mxu1 }
 0x16b   :  { %v17129_v20 = vsel %vm8592_vm4, %v8594_v59, %v8596_v43  ;;  %v13662_v55 = vpop.f32.mrf.mxu0  ;;  %v1106_v34 = vadd.f32 %v1105_v54, %v959_v31 }
 0x16c   :  { %21764 = vst [vmem:[#allocation10_spill] sm:$0xff] %v17129_v20  ;;  %v13706_v35 = vpop.f32.mrf.mxu1 }
 0x16d   :  { %v8598_v21 = vrot.slane %v1106_v34, 1  ;;  %v970_v14 = vpop.f32.mrf.mxu0 }
 0x16e   :  { %v971_v15 = vadd.f32 %v970_v14, %v17095_v9  ;;  %v1111_v58 = vpop.f32.mrf.mxu1 }
 0x16f   :  { %v17133_v41 = vsel %vm8592_vm4, %v8596_v43, %v8598_v21  ;;  %v13665_v12 = vpop.f32.mrf.mxu0  ;;  %v1112_v26 = vadd.f32 %v1111_v58, %v965_v63 }
 0x170   :  { %21765 = vst [vmem:[#allocation11_spill] sm:$0xff] %v17133_v41  ;;  %v13709_v1 = vpop.f32.mrf.mxu1 }
 0x171   :  { %v8600_v0 = vrot.slane %v1112_v26, 1  ;;  %v976_v17 = vpop.f32.mrf.mxu0 }
 0x172   :  { %v977_v56 = vadd.f32 %v976_v17, %v17098_v32  ;;  %v1117_v48 = vpop.f32.mrf.mxu1 }
 0x173   :  { %v17137_v3 = vsel %vm8592_vm4, %v8598_v21, %v8600_v0  ;;  %v13668_v51 = vpop.f32.mrf.mxu0  ;;  %v1118_v27 = vadd.f32 %v1117_v48, %v971_v15 }
 0x174   :  { %21766 = vst [vmem:[#allocation13_spill] sm:$0xff] %v17137_v3  ;;  %v13712_v62 = vpop.f32.mrf.mxu1 }
 0x175   :  { %v8602_v19 = vrot.slane %v1118_v27, 1  ;;  %v13744_v9 = vpop.f32.mrf.mxu0 }
 0x176   :  { %v1123_v2 = vpop.f32.mrf.mxu1 }
 0x177   :  { %v17140_v10 = vsel %vm8592_vm4, %v8600_v0, %v8602_v19  ;;  %v17142_v7 = vadd.f32 %v1123_v2, %v977_v56  ;;  %v17144_v57 = vpop.f32.mrf.mxu0 }
 0x178   :  { %21767 = vst [vmem:[#allocation14_spill] sm:$0xff] %v17140_v10  ;;  %v13715_v50 = vpop.f32.mrf.mxu1 }
 0x179   :  { %21768 = vst [vmem:[#allocation12_spill] sm:$0xff] %v17142_v7  ;;  %v21639_v32 = vrot.slane %v17142_v7, 1  ;;  %v13747_v52 = vpop.f32.mrf.mxu0 }
 0x17a   :  { %v13794_v5 = vpop.f32.mrf.mxu1 }
 0x17b   :  { %v17150_v22 = vsel %vm8592_vm4, %v8602_v19, %v21639_v32  ;;  %v17152_v47 = vpop.f32.mrf.mxu0  ;;  %v1572_v24 = vadd.f32 %v13794_v5, %v13744_v9 }
 0x17c   :  { %21769 = vst [vmem:[#allocation15_spill] sm:$0xff] %v17150_v22  ;;  %v17154_v45 = vpop.f32.mrf.mxu1 }
 0x17d   :  { %v13750_v4 = vpop.f32.mrf.mxu0 }
 0x17e   :  { %v13797_v44 = vpop.f32.mrf.mxu1 }
 0x17f   :  { %v17156_v60 = vpop.f32.mrf.mxu0  ;;  %v1584_v36 = vadd.f32 %v13797_v44, %v13747_v52 }
 0x180   :  { %v17158_v30 = vpop.f32.mrf.mxu1 }
 0x181   :  { %v13753_v49 = vpop.f32.mrf.mxu0 }
 0x182   :  { %v13800_v25 = vpop.f32.mrf.mxu1 }
 0x183   :  { %v17160_v61 = vpop.f32.mrf.mxu0  ;;  %v1596_v16 = vadd.f32 %v13800_v25, %v13750_v4 }
 0x184   :  { %v17162_v18 = vpop.f32.mrf.mxu1 }
 0x185   :  { %v13756_v59 = vpop.f32.mrf.mxu0 }
 0x187   :  { %v17164_v37 = vpop.f32.mrf.mxu0 }
 0x188   :  { %v13803_v31 = vpop.f32.mrf.mxu1 }
 0x189   :  { %v17166_v6 = vadd.f32 %v13803_v31, %v13753_v49 }
 0x18a   :  { %v17168_v8 = vpop.f32.mrf.mxu1 }
 0x18b   :  { %v13759_v11 = vpop.f32.mrf.mxu0 }
 0x18d   :  { %v17170_v13 = vpop.f32.mrf.mxu0  ;;  %v13806_v43 = vpop.f32.mrf.mxu1 }
 0x18e   :  { %v17172_v46 = vadd.f32 %v13806_v43, %v13756_v59 }
 0x18f   :  { %v17174_v63 = vpop.f32.mrf.mxu1 }
 0x190   :  { %v13762_v54 = vpop.f32.mrf.mxu0 }
 0x192   :  { %v17176_v55 = vpop.f32.mrf.mxu0 }
 0x193   :  { %v13809_v34 = vpop.f32.mrf.mxu1 }
 0x194   :  { %v17178_v35 = vadd.f32 %v13809_v34, %v13759_v11 }
 0x195   :  { %v17180_v21 = vpop.f32.mrf.mxu1 }
 0x196   :  { %v17182_v14 = vpop.f32.mrf.mxu0 }
 0x198   :  { %v17184_v15 = vpop.f32.mrf.mxu0 }
 0x199   :  { %v13812_v58 = vpop.f32.mrf.mxu1 }
 0x19a   :  { %v17186_v12 = vadd.f32 %v13812_v58, %v13762_v54 }
 0x19b   :  { %v17188_v26 = vpop.f32.mrf.mxu1 }
 0x19c   :  { %v13844_v1 = vpop.f32.mrf.mxu0 }
 0x19d   :  { %v1761_v0 = vadd.f32 %v13844_v1, %v1572_v24 }
 0x19e   :  { %v17190_v17 = vpop.f32.mrf.mxu1  ;;  %v17192_v56 = vpop.f32.mrf.mxu0 }
 0x1a0   :  { %v17194_v48 = vpop.f32.mrf.mxu1  ;;  %v13847_v51 = vpop.f32.mrf.mxu0 }
 0x1a1   :  { %v1775_v27 = vadd.f32 %v13847_v51, %v1584_v36 }
 0x1a2   :  { %v17196_v62 = vpop.f32.mrf.mxu0  ;;  %v13894_v19 = vpop.f32.mrf.mxu1 }
 0x1a3   :  { %v17198_v9 = vadd.f32 %v13894_v19, %v1761_v0 }
 0x1a4   :  { %v13850_v2 = vpop.f32.mrf.mxu0  ;;  %v17200_v50 = vpop.f32.mrf.mxu1 }
 0x1a5   :  { %21770 = vst [vmem:[#allocation16_spill] sm:$0xff] %v17198_v9  ;;  %v1789_v52 = vadd.f32 %v13850_v2, %v1596_v16 }
 0x1a6   :  { %v17202_v5 = vpop.f32.mrf.mxu0 }
 0x1a7   :  { %v13897_v24 = vpop.f32.mrf.mxu1 }
 0x1a8   :  { %v17204_v4 = vadd.f32 %v13897_v24, %v1775_v27 }
 0x1a9   :  { %v17206_v44 = vpop.f32.mrf.mxu0  ;;  %v17208_v49 = vpop.f32.mrf.mxu1 }
 0x1aa   :  { %21771 = vst [vmem:[#allocation17_spill] sm:$0xff] %v17204_v4 }
 0x1ab   :  { %v17210_v25 = vpop.f32.mrf.mxu0 }
 0x1ac   :  { %v13900_v36 = vpop.f32.mrf.mxu1 }
 0x1ad   :  { %v17212_v59 = vadd.f32 %v13900_v36, %v1789_v52 }
 0x1ae   :  { %v17214_v31 = vpop.f32.mrf.mxu1 }
 0x1af   :  { %21772 = vst [vmem:[#allocation18_spill] sm:$0xff] %v17212_v59  ;;  %v17216_v11 = vpop.f32.mrf.mxu0  ;;  %v1614_v59 = vadd.f32 %v17174_v63, %v17164_v37 }
 0x1b1   :  { %v17218_v43 = vpop.f32.mrf.mxu0 }
 0x1b2   :  { %v17220_v16 = vpop.f32.mrf.mxu1 }
 0x1b4   :  { %v17222_v54 = vpop.f32.mrf.mxu1 }
 0x1b5   :  { %v13859_v34 = vpop.f32.mrf.mxu0 }
 0x1b7   :  { %v1823_v58 = vpop.f32.mrf.mxu0  ;;  %v17224_v1 = vpop.f32.mrf.mxu1 }
 0x1b9   :  { %v17226_v0 = vpop.f32.mrf.mxu1 }
 0x1ba   :  { %v13862_v51 = vpop.f32.mrf.mxu0 }
 0x1bc   :  { %v1837_v27 = vpop.f32.mrf.mxu0 }
 0x1bd   :  { %v13909_v19 = vpop.f32.mrf.mxu1 }
 0x1bf   :  { %v2024_v2 = vpop.f32.mrf.mxu1 }
 0x1c0   :  { %v13865_v52 = vpop.f32.mrf.mxu0 }
 0x1c2   :  { %v1851_v24 = vpop.f32.mrf.mxu0 }
 0x1c3   :  { %v13912_v36 = vpop.f32.mrf.mxu1 }
 0x1c5   :  { %v2040_v32 = vpop.f32.mrf.mxu1 }
 0x1c6   :  { %v17228_v7 = vpop.f32.mrf.mxu0 }
 0x1c7   :  { %21773 = vst [vmem:[#allocation19_spill] sm:$0xff] %v17228_v7 }
 0x1c8   :  { %v13915_v22 = vpop.f32.mrf.mxu1  ;;  %v17230_v10 = vpop.f32.mrf.mxu0 }
 0x1c9   :  { %21774 = vst [vmem:[#allocation20_spill] sm:$0xff] %v17230_v10 }
 0x1ca   :  { %v17232_v3 = vpop.f32.mrf.mxu1  ;;  %v17234_v41 = vpop.f32.mrf.mxu0 }
 0x1cb   :  { %21775 = vst [vmem:[#allocation21_spill] sm:$0xff] %v17234_v41  ;;  %v1831_v41 = vadd.f32 %v13859_v34, %v17178_v35 }
 0x1cc   :  { %v17236_v20 = vpop.f32.mrf.mxu0  ;;  %v17238_v40 = vpop.f32.mrf.mxu1 }
 0x1cd   :  { %21776 = vst [vmem:[#allocation22_spill] sm:$0xff] %v17236_v20  ;;  %21777 = vst [vmem:[#allocation23_spill] sm:$0xff] %v17238_v40  ;;  %v2033_v37 = vadd.f32 %v13909_v19, %v1831_v41 }
 0x1ce   :  { %v17240_v28 = vpop.f32.mrf.mxu0  ;;  %v17242_v39 = vpop.f32.mrf.mxu1 }
 0x1cf   :  { %21778 = vst [vmem:[#allocation24_spill] sm:$0xff] %v17240_v28  ;;  %21779 = vst [vmem:[#allocation25_spill] sm:$0xff] %v17242_v39 }
 0x1d0   :  { %v17244_v38 = vpop.f32.mrf.mxu0  ;;  %v17246_v23 = vpop.f32.mrf.mxu1 }
 0x1d1   :  { %21780 = vst [vmem:[#allocation26_spill] sm:$0xff] %v17244_v38  ;;  %21781 = vst [vmem:[#allocation27_spill] sm:$0xff] %v17246_v23  ;;  %v1566_v23 = vadd.f32 %v17154_v45, %v17144_v57  ;;  %v1626_v57 = vadd.f32 %v17180_v21, %v17170_v13 }
 0x1d2   :  { %v17248_v29 = vpop.f32.mrf.mxu0  ;;  %v17250_v53 = vpop.f32.mrf.mxu1 }
 0x1d3   :  { %21782 = vst [vmem:[#allocation28_spill] sm:$0xff] %v17250_v53  ;;  %v1578_v53 = vadd.f32 %v17158_v30, %v17152_v47  ;;  %v1638_v47 = vadd.f32 %v17188_v26, %v17176_v55  ;;  %v1754_v45 = vadd.f32 %v17192_v56, %v1566_v23  ;;  %v1656_v30 = vadd.f32 %v17190_v17, %v17182_v14 }
 0x1d4   :  { %v17252_v42 = vpop.f32.mrf.mxu0  ;;  %v17254_v10 = vpop.f32.mrf.mxu1  ;;  %v1824_v35 = vadd.f32 %v1823_v58, %v1626_v57  ;;  %v1817_v14 = vadd.f32 %v17216_v11, %v17172_v46 }
 0x1d5   :  { %21783 = vst [vmem:[#allocation29_spill] sm:$0xff] %v17254_v10  ;;  %v1590_v10 = vadd.f32 %v17162_v18, %v17156_v60  ;;  %v1845_v60 = vadd.f32 %v13862_v51, %v17186_v12  ;;  %v1768_v18 = vadd.f32 %v17196_v62, %v1578_v53  ;;  %v17287_v13 = vadd.f32 %v17200_v50, %v1754_v45 }
 0x1d6   :  { %v13956_v7 = vpop.f32.mrf.mxu0  ;;  %v17256_v9 = vpop.f32.mrf.mxu1  ;;  %v1838_v55 = vadd.f32 %v1837_v27, %v1638_v47  ;;  %v1803_v12 = vadd.f32 %v17206_v44, %v17166_v6  ;;  %v1859_v41 = vadd.f32 %v13865_v52, %v1656_v30  ;;  %v2025_v17 = vadd.f32 %v2024_v2, %v1824_v35  ;;  %v2456_v6 = vld [vmem:[%s21580_s8 + $0x68] sm:$0xff]  ;;  %v2454_v44 = vld [vmem:[%s21580_s8 + $0x58] sm:$0xff] }
 0x1d7   :  { %21784 = vst [vmem:[#allocation30_spill] sm:$0xff] %v17256_v9  ;;  %v1602_v9 = vadd.f32 %v17168_v8, %v17160_v61  ;;  %v1650_v61 = vadd.f32 %v17194_v48, %v17184_v15  ;;  %v2049_v21 = vadd.f32 %v13912_v36, %v1845_v60  ;;  %v1782_v23 = vadd.f32 %v17202_v5, %v1590_v10 }
 0x1d8   :  { %v2222_v40 = vpop.f32.mrf.mxu0  ;;  %v17258_v20 = vpop.f32.mrf.mxu1  ;;  %v2041_v56 = vadd.f32 %v2040_v32, %v1838_v55  ;;  %v1810_v62 = vadd.f32 %v17218_v43, %v1614_v59  ;;  %v2017_v50 = vadd.f32 %v17224_v1, %v1817_v14  ;;  %v2065_v5 = vadd.f32 %v13915_v22, %v1859_v41  ;;  %v2455_v22 = vld [vmem:[%s21580_s8 + $0x60] sm:$0xff]  ;;  %v21787_v41 = vld [vmem:[#allocation21_spill] sm:$0xff] }
 0x1d9   :  { %v1852_v34 = vadd.f32 %v1851_v24, %v1650_v61  ;;  %v2001_v52 = vadd.f32 %v17220_v16, %v1803_v12 }
 0x1da   :  { %v13959_v33 = vpop.f32.mrf.mxu0  ;;  %v17260_v39 = vpop.f32.mrf.mxu1  ;;  %v2009_v59 = vadd.f32 %v17226_v0, %v1810_v62  ;;  %v2229_v43 = vadd.f32 %v13956_v7, %v2017_v50  ;;  %v2452_v0 = vld [vmem:[%s21580_s8 + $0x48] sm:$0xff]  ;;  %v2449_v62 = vld [vmem:[%s21580_s8 + $0x30] sm:$0xff] }
 0x1db   :  { %21785 = vst [vmem:[#allocation31_spill] sm:$0xff] %v17260_v39  ;;  %v2241_v15 = vadd.f32 %v13959_v33, %v2033_v37  ;;  %v2057_v11 = vadd.f32 %v17232_v3, %v1852_v34  ;;  %v2453_v3 = vld [vmem:[%s21580_s8 + $0x50] sm:$0xff]  ;;  %v2217_v60 = vadd.f32 %v17248_v29, %v2001_v52 }
 0x1dc   :  { %v2234_v38 = vpop.f32.mrf.mxu0  ;;  %v14006_v28 = vpop.f32.mrf.mxu1  ;;  %v2223_v24 = vadd.f32 %v2222_v40, %v2009_v59  ;;  %v2457_v37 = vld [vmem:[%s21580_s8 + $0x70] sm:$0xff]  ;;  %v2448_v59 = vld [vmem:[%s21580_s8 + $0x28] sm:$0xff] }
 0x1dd   :  { %v2235_v46 = vadd.f32 %v2234_v38, %v2025_v17  ;;  %v2403_v36 = vadd.f32 %v14006_v28, %v2229_v43  ;;  %v1961_v28 = vadd.f32 %v17208_v49, %v1768_v18 }
 0x1de   :  { %v13962_v39 = vpop.f32.mrf.mxu0  ;;  %v17273_v4 = vpop.f32.mrf.mxu1 }
 0x1df   :  { %v2253_v48 = vadd.f32 %v13962_v39, %v2049_v21  ;;  %v1796_v39 = vadd.f32 %v17210_v25, %v1602_v9  ;;  %v2458_v25 = vld [vmem:[%s21580_s8 + $0x78] sm:$0xff]  ;;  %v2397_v30 = vadd.f32 %v17273_v4, %v2223_v24  ;;  %v2391_v4 = vadd.f32 %v17258_v20, %v2217_v60  ;;  %v2447_v24 = vld [vmem:[%s21580_s8 + $0x20] sm:$0xff] }
 0x1e0   :  { %v2246_v8 = vpop.f32.mrf.mxu0  ;;  %v14009_v63 = vpop.f32.mrf.mxu1  ;;  %v2468_v18 = vmul.f32 %v2452_v0, %v2403_v36  ;;  %v2450_v21 = vld [vmem:[%s21580_s8 + $0x38] sm:$0xff] }
 0x1e1   :  { %v2415_v58 = vadd.f32 %v14009_v63, %v2241_v15  ;;  %v2247_v33 = vadd.f32 %v2246_v8, %v2041_v56  ;;  %v1993_v45 = vadd.f32 %v17222_v54, %v1796_v39  ;;  %v2451_v8 = vld [vmem:[%s21580_s8 + $0x40] sm:$0xff]  ;;  %v1977_v54 = vadd.f32 %v17214_v31, %v1782_v23 }
 0x1e2   :  { %v13965_v26 = vpop.f32.mrf.mxu0  ;;  %v2408_v53 = vpop.f32.mrf.mxu1  ;;  %v21788_v23 = vld [vmem:[#allocation18_spill] sm:$0xff]  ;;  %v21790_v20 = vld [vmem:[#allocation31_spill] sm:$0xff]  ;;  %v21793_v39 = vmov 0.0  }
 0x1e3   :  { %v2265_v38 = vadd.f32 %v13965_v26, %v2065_v5  ;;  %v2409_v27 = vadd.f32 %v2408_v53, %v2235_v46  ;;  %v2470_v9 = vmul.f32 %v2454_v44, %v2415_v58  ;;  %v2211_v29 = vadd.f32 %v17252_v42, %v1993_v45  ;;  %v21786_v53 = vld [vmem:[#allocation17_spill] sm:$0xff]  ;;  %v21789_v42 = vld [vmem:[#allocation24_spill] sm:$0xff] }
 0x1e4   :  { %v14012_v10 = vpop.f32.mrf.mxu1  ;;  %v2258_v1 = vpop.f32.mrf.mxu0  ;;  %v2193_v31 = vadd.f32 %v21787_v41, %v21786_v53  ;;  %v2205_v17 = vadd.f32 %v21789_v42, %v21788_v23  ;;  %v21792_v46 = vld [vmem:[#allocation29_spill] sm:$0xff]  ;;  %v2466_v44 = vmul.f32 %v2450_v21, %v2391_v4  ;;  %v2445_v4 = vld [vmem:[%s21580_s8 + $0x10] sm:$0xff]  ;;  %v2442_v41 = vld [vmem:[%s21581_s9] sm:$0xff] }
 0x1e5   :  { %v2427_v32 = vadd.f32 %v14012_v10, %v2253_v48  ;;  %v2259_v57 = vadd.f32 %v2258_v1, %v2057_v11  ;;  %v2469_v63 = vmul.f32 %v2453_v3, %v2409_v27  ;;  %v17338_v12 = vand.u32 4294901760, %v2470_v9  ;;  %v21795_v27 = vld [vmem:[#allocation30_spill] sm:$0xff]  ;;  %v21801_v42 = vld [vmem:[#allocation23_spill] sm:$0xff] }
 0x1e6   :  { %v2420_v51 = vpop.f32.mrf.mxu1  ;;  %v2385_v56 = vadd.f32 %v21790_v20, %v2211_v29  ;;  %v2467_v48 = vmul.f32 %v2451_v8, %v2397_v30  ;;  %v21798_v8 = vld [vmem:[#allocation19_spill] sm:$0xff] }
 0x1e7   :  { %v2472_v19 = vmul.f32 %v2456_v6, %v2427_v32  ;;  %v2421_v2 = vadd.f32 %v2420_v51, %v2247_v33  ;;  %v17353_v50 = vand.u32 4294901760, %v2469_v63  ;;  %v21791_v6 = vld [vmem:[#allocation26_spill] sm:$0xff]  ;;  %v2379_v33 = vadd.f32 %v21792_v46, %v2205_v17  ;;  %v21802_v46 = vld [vmem:[#allocation25_spill] sm:$0xff] }
 0x1e8   :  { %v14015_v7 = vpop.f32.mrf.mxu1  ;;  %v2199_v5 = vadd.f32 %v21791_v6, %v1977_v54  ;;  %v17366_v32 = vand.u32 4294901760, %v2468_v18  ;;  %v17373_v11 = vsub.f32 %v2470_v9, %v17338_v12  ;;  %v17383_v52 = vand.u32 4294901760, %v2467_v48 }
 0x1e9   :  { %v17318_v47 = vand.u32 4294901760, %v2472_v19  ;;  %v2471_v16 = vmul.f32 %v2455_v22, %v2421_v2  ;;  %v2439_v40 = vadd.f32 %v14015_v7, %v2265_v38  ;;  %v21794_v22 = vld [vmem:[#allocation22_spill] sm:$0xff]  ;;  %v2465_v2 = vmul.f32 %v2449_v62, %v2385_v56 }
 0x1ea   :  { %v2432_v61 = vpop.f32.mrf.mxu1  ;;  %v2187_v38 = vadd.f32 %v21794_v22, %v1961_v28  ;;  %v17390_v36 = vsub.f32 %v2469_v63, %v17353_v50  ;;  %v2446_v28 = vld [vmem:[%s21580_s8 + $0x18] sm:$0xff]  ;;  %v2604_v45 = vand.u32 4294901760, %v17373_v11 }
 0x1eb   :  { %v17330_v35 = vand.u32 4294901760, %v2471_v16  ;;  %v2474_v55 = vmul.f32 %v2458_v25, %v2439_v40  ;;  %v2433_v49 = vadd.f32 %v2432_v61, %v2259_v57  ;;  %v17341_v14 = vsub.f32 %v2472_v19, %v17318_v47  ;;  %v21796_v25 = vld [vmem:[#allocation27_spill] sm:$0xff] }
 0x1ec   :  { %v2373_v19 = vadd.f32 %v21795_v27, %v2199_v5  ;;  %v2367_v0 = vadd.f32 %v21796_v25, %v2193_v31  ;;  %v2464_v57 = vmul.f32 %v2448_v59, %v2379_v33  ;;  %v17402_v40 = vsub.f32 %v2468_v18, %v17366_v32  ;;  %v21800_v31 = vld [vmem:[#allocation20_spill] sm:$0xff] }
 0x1ed   :  { %v17343_v15 = vand.u32 4294901760, %v2474_v55  ;;  %v2473_v26 = vmul.f32 %v2457_v37, %v2433_v49  ;;  %v17356_v34 = vsub.f32 %v2471_v16, %v17330_v35  ;;  %v2590_v43 = vand.u32 4294901760, %v17341_v14  ;;  %v21797_v37 = vld [vmem:[#allocation16_spill] sm:$0xff] }
 0x1ee   :  { %v17399_v16 = vand.u32 4294901760, %v2466_v44  ;;  %v2181_v63 = vadd.f32 %v21798_v8, %v21797_v37  ;;  %v2463_v54 = vmul.f32 %v2447_v24, %v2373_v19  ;;  %v17419_v29 = vand.u32 4294901760, %v2465_v2 }
 0x1ef   :  { %v17359_v58 = vsub.f32 %v2474_v55, %v17343_v15  ;;  %v17361_v10 = vand.u32 4294901760, %v2473_v26  ;;  %14017 = vmatpush3.msra.mxu0 %v17343_v15  ;;  %v2597_v7 = vand.u32 4294901760, %v17356_v34  ;;  %v2591_v61 = vsub.f32 %v17341_v14, %v2590_v43  ;;  %v21799_v55 = vld [vmem:[#allocation28_spill] sm:$0xff] }
 0x1f0   :  { %14018 = vmatprep.subr.mxu0 %v21793_v39  ;;  %v2361_v49 = vadd.f32 %v21799_v55, %v2187_v38  ;;  %v17426_v18 = vsub.f32 %v2467_v48, %v17383_v52  ;;  %v2611_v53 = vand.u32 4294901760, %v17390_v36  ;;  %v2175_v23 = vadd.f32 %v21800_v31, %v17287_v13  ;;  %v2444_v48 = vld [vmem:[%s21580_s8 + $0x8] sm:$0xff]  ;;  %v2443_v38 = vld [vmem:[%s21580_s8] sm:$0xff] }
 0x1f1   :  { %v2576_v1 = vand.u32 4294901760, %v17359_v58  ;;  %v17378_v51 = vsub.f32 %v2473_v26, %v17361_v10  ;;  %14019 = vmatpush3.msra.mxu0 %v17361_v10  ;;  %v2598_v26 = vsub.f32 %v17356_v34, %v2597_v7  ;;  %v2355_v17 = vadd.f32 %v21801_v42, %v2181_v63 }
 0x1f2   :  { %14020 = vmatprep.subr.mxu0 %v21793_v39  ;;  %v2462_v20 = vmul.f32 %v2446_v28, %v2367_v0  ;;  %v17439_v56 = vand.u32 4294901760, %v2464_v57  ;;  %v17447_v62 = vsub.f32 %v2466_v44, %v17399_v16  ;;  %v2618_v6 = vand.u32 4294901760, %v17402_v40 }
 0x1f3   :  { %14021 = vmatpush3.msra.mxu0 %v17318_v47  ;;  %v2577_v9 = vsub.f32 %v17359_v58, %v2576_v1  ;;  %v2583_v3 = vand.u32 4294901760, %v17378_v51  ;;  %v2592_v13 = vand.u32 4294901760, %v2591_v61  ;;  %v2605_v5 = vsub.f32 %v17373_v11, %v2604_v45 }
 0x1f4   :  { %14022 = vmatprep.subr.mxu0 %v21793_v39  ;;  %v2349_v33 = vadd.f32 %v21802_v46, %v2175_v23  ;;  %v2461_v59 = vmul.f32 %v2445_v4, %v2361_v49  ;;  %v17455_v22 = vand.u32 4294901760, %v2463_v54  ;;  %v17459_v44 = vand.u32 4294901760, %v2442_v41 }
 0x1f5   :  { %14023 = vmatpush3.msra.mxu0 %v17330_v35  ;;  %v2578_v60 = vand.u32 4294901760, %v2577_v9  ;;  %v2584_v30 = vsub.f32 %v17378_v51, %v2583_v3  ;;  %v17465_v27 = vsub.f32 %v2465_v2, %v17419_v29  ;;  %v2599_v19 = vand.u32 4294901760, %v2598_v26 }
 0x1f6   :  { %14024 = vmatprep.subr.mxu0 %v21793_v39  ;;  %v2612_v24 = vsub.f32 %v17390_v36, %v2611_v53  ;;  %v2625_v9 = vand.u32 4294901760, %v17426_v18  ;;  %v2460_v25 = vmul.f32 %v2444_v48, %v2355_v17  ;;  %v17472_v0 = vand.u32 4294901760, %v2462_v20 }
 0x1f7   :  { %14025 = vmatpush3.msra.mxu0 %v17338_v12  ;;  %14052 = vmatpush3.msra.mxu1 %v2578_v60  ;;  %v2585_v21 = vand.u32 4294901760, %v2584_v30  ;;  %v17477_v2 = vsub.f32 %v2464_v57, %v17439_v56  ;;  %v2632_v28 = vand.u32 4294901760, %v17447_v62  ;;  %v2606_v60 = vand.u32 4294901760, %v2605_v5 }
 0x1f8   :  { %14026 = vmatprep.subr.mxu0 %v21793_v39  ;;  %14053 = vmatprep.subr.mxu1 %v21793_v39  ;;  %v2619_v30 = vsub.f32 %v17402_v40, %v2618_v6  ;;  %v2459_v61 = vmul.f32 %v2443_v38, %v2349_v33  ;;  %v17484_v37 = vand.u32 4294901760, %v2461_v59  ;;  %v17489_v57 = vsub.f32 %v2442_v41, %v17459_v44 }
 0x1f9   :  { %14027 = vmatpush3.msra.mxu0 %v17353_v50  ;;  %14054 = vmatpush3.msra.mxu1 %v2585_v21  ;;  %v17492_v8 = vsub.f32 %v2463_v54, %v17455_v22  ;;  %v2613_v63 = vand.u32 4294901760, %v2612_v24  ;;  %v2626_v55 = vsub.f32 %v17426_v18, %v2625_v9  ;;  %v2639_v49 = vand.u32 4294901760, %v17465_v27 }
 0x1fa   :  { %14028 = vmatprep.subr.mxu0 %v21793_v39  ;;  %14055 = vmatprep.subr.mxu1 %v21793_v39  ;;  %v17499_v4 = vand.u32 4294901760, %v2460_v25  ;;  %v17504_v21 = vsub.f32 %v2462_v20, %v17472_v0  ;;  %v2646_v54 = vand.u32 4294901760, %v17477_v2  ;;  %v2620_v26 = vand.u32 4294901760, %v2619_v30 }
 0x1fb   :  { %14029 = vmatpush3.msra.mxu0 %v17366_v32  ;;  %14056 = vmatpush3.msra.mxu1 %v2592_v13  ;;  %v2633_v41 = vsub.f32 %v17447_v62, %v2632_v28  ;;  %v17511_v31 = vand.u32 4294901760, %v2459_v61  ;;  %v2565_v23 = vand.u32 4294901760, %v17489_v57  ;;  %v17517_v42 = vsub.f32 %v2461_v59, %v17484_v37 }
 0x1fc   :  { %14030 = vmatprep.subr.mxu0 %v21793_v39  ;;  %14057 = vmatprep.subr.mxu1 %v21793_v39  ;;  %v2627_v17 = vand.u32 4294901760, %v2626_v55  ;;  %v2640_v20 = vsub.f32 %v17465_v27, %v2639_v49  ;;  %v2653_v48 = vand.u32 4294901760, %v17492_v8  ;;  %v17527_v13 = vsub.f32 %v2460_v25, %v17499_v4 }
 0x1fd   :  { %14031 = vmatpush3.msra.mxu0 %v17383_v52  ;;  %14058 = vmatpush3.msra.mxu1 %v2599_v19  ;;  %v2660_v5 = vand.u32 4294901760, %v17504_v21  ;;  %v2634_v46 = vand.u32 4294901760, %v2633_v41  ;;  %v2647_v33 = vsub.f32 %v17477_v2, %v2646_v54  ;;  %v2566_v59 = vsub.f32 %v17489_v57, %v2565_v23 }
 0x1fe   :  { %14032 = vmatprep.subr.mxu0 %v21793_v39  ;;  %14059 = vmatprep.subr.mxu1 %v21793_v39  ;;  %v17540_v38 = vsub.f32 %v2459_v61, %v17511_v31  ;;  %v2641_v19 = vand.u32 4294901760, %v2640_v20  ;;  %v2654_v24 = vsub.f32 %v17492_v8, %v2653_v48  ;;  %v2667_v25 = vand.u32 4294901760, %v17517_v42 }
 0x1ff   :  { %14033 = vmatpush3.msra.mxu0 %v17399_v16  ;;  %14060 = vmatpush3.msra.mxu1 %v2606_v60  ;;  %v2674_v60 = vand.u32 4294901760, %v17527_v13  ;;  %v2648_v30 = vand.u32 4294901760, %v2647_v33  ;;  %v2661_v61 = vsub.f32 %v17504_v21, %v2660_v5  ;;  %v2567_v55 = vand.u32 4294901760, %v2566_v59 }
 0x200   :  { %14034 = vmatprep.subr.mxu0 %v21793_v39  ;;  %14061 = vmatprep.subr.mxu1 %v21793_v39  ;;  %v2681_v41 = vand.u32 4294901760, %v17540_v38 }
 0x201   :  { %14035 = vmatpush3.msra.mxu0 %v17419_v29  ;;  %14062 = vmatpush3.msra.mxu1 %v2613_v63  ;;  %v2655_v63 = vand.u32 4294901760, %v2654_v24  ;;  %v2675_v20 = vsub.f32 %v17527_v13, %v2674_v60 }
 0x202   :  { %14036 = vmatprep.subr.mxu0 %v21793_v39  ;;  %14063 = vmatprep.subr.mxu1 %v21793_v39  ;;  %v2682_v33 = vsub.f32 %v17540_v38, %v2681_v41 }
 0x203   :  { %14037 = vmatpush3.msra.mxu0 %v17439_v56  ;;  %14064 = vmatpush3.msra.mxu1 %v2620_v26  ;;  %v2668_v26 = vsub.f32 %v17517_v42, %v2667_v25  ;;  %v2676_v59 = vand.u32 4294901760, %v2675_v20 }
 0x204   :  { %14038 = vmatprep.subr.mxu0 %v21793_v39  ;;  %14065 = vmatprep.subr.mxu1 %v21793_v39 }
 0x205   :  { %14039 = vmatpush3.msra.mxu0 %v17455_v22  ;;  %14066 = vmatpush3.msra.mxu1 %v2627_v17  ;;  %v2662_v17 = vand.u32 4294901760, %v2661_v61 }
 0x206   :  { %14040 = vmatprep.subr.mxu0 %v21793_v39  ;;  %14067 = vmatprep.subr.mxu1 %v21793_v39 }
 0x207   :  { %14041 = vmatpush3.msra.mxu0 %v17472_v0  ;;  %14068 = vmatpush3.msra.mxu1 %v2634_v46  ;;  %v2669_v46 = vand.u32 4294901760, %v2668_v26  ;;  %v12472_v26 = vld [vmem:[%s21585_s12] ss:$0 sm:$0xff] }
 0x208   :  { %14042 = vmatprep.subr.mxu0 %v21793_v39  ;;  %14069 = vmatprep.subr.mxu1 %v21793_v39 }
 0x209   :  { %14043 = vmatpush3.msra.mxu0 %v17484_v37  ;;  %14070 = vmatpush3.msra.mxu1 %v2641_v19  ;;  %v2683_v19 = vand.u32 4294901760, %v2682_v33 }
 0x20a   :  { %14044 = vmatprep.subr.mxu0 %v21793_v39  ;;  %14071 = vmatprep.subr.mxu1 %v21793_v39 }
 0x20b   :  { %14045 = vmatpush3.msra.mxu0 %v17499_v4  ;;  %14072 = vmatpush3.msra.mxu1 %v2648_v30 }
 0x20c   :  { %14046 = vmatprep.subr.mxu0 %v21793_v39  ;;  %14073 = vmatprep.subr.mxu1 %v21793_v39 }
 0x20d   :  { %14047 = vmatpush3.msra.mxu0 %v17511_v31  ;;  %14074 = vmatpush3.msra.mxu1 %v2655_v63  ;;  %v12471_v63 = vld [vmem:[%s21584_s11] ss:$0 sm:$0xff] }
 0x20e   :  { %14075 = vmatprep.subr.mxu1 %v21793_v39  ;;  %14086 = vmatprep.subr.mxu0 %v21793_v39 }
 0x20f   :  { %14049 = vmatmul.mubr.f32.vlgmr.msra.gmra.mxu0 %v2567_v55  ;;  %14076 = vmatpush3.msra.mxu1 %v2662_v17 }
 0x210   :  { %14087 = vmatpush3.msra.mxu0 %v17359_v58  ;;  %14077 = vmatprep.subr.mxu1 %v21793_v39 }
 0x211   :  { %14088 = vmatprep.subr.mxu0 %v21793_v39  ;;  %14078 = vmatpush3.msra.mxu1 %v2669_v46 }
 0x212   :  { %14089 = vmatpush3.msra.mxu0 %v17378_v51  ;;  %14079 = vmatprep.subr.mxu1 %v21793_v39 }
 0x213   :  { %14090 = vmatprep.subr.mxu0 %v21793_v39  ;;  %14080 = vmatpush3.msra.mxu1 %v2676_v59 }
 0x214   :  { %14091 = vmatpush3.msra.mxu0 %v17341_v14  ;;  %14081 = vmatprep.subr.mxu1 %v21793_v39 }
 0x215   :  { %14092 = vmatprep.subr.mxu0 %v21793_v39  ;;  %14082 = vmatpush3.msra.mxu1 %v2683_v19 }
 0x216   :  { %14093 = vmatpush3.msra.mxu0 %v17356_v34  ;;  %14084 = vmatmul.mubr.f32.vlgmr.msra.gmra.mxu1 %v17459_v44 }
 0x217   :  { %14094 = vmatprep.subr.mxu0 %v21793_v39  ;;  %14121 = vmatprep.subr.mxu1 %v21793_v39 }
 0x218   :  { %14095 = vmatpush3.msra.mxu0 %v17373_v11  ;;  %14122 = vmatpush3.msra.mxu1 %v17343_v15 }
 0x219   :  { %14096 = vmatprep.subr.mxu0 %v21793_v39  ;;  %14123 = vmatprep.subr.mxu1 %v21793_v39 }
 0x21a   :  { %14097 = vmatpush3.msra.mxu0 %v17390_v36  ;;  %14124 = vmatpush3.msra.mxu1 %v17361_v10 }
 0x21b   :  { %14098 = vmatprep.subr.mxu0 %v21793_v39  ;;  %14125 = vmatprep.subr.mxu1 %v21793_v39 }
 0x21c   :  { %14099 = vmatpush3.msra.mxu0 %v17402_v40  ;;  %14126 = vmatpush3.msra.mxu1 %v17318_v47 }
 0x21d   :  { %14100 = vmatprep.subr.mxu0 %v21793_v39  ;;  %14127 = vmatprep.subr.mxu1 %v21793_v39 }
 0x21e   :  { %14101 = vmatpush3.msra.mxu0 %v17426_v18  ;;  %14128 = vmatpush3.msra.mxu1 %v17330_v35 }
 0x21f   :  { %14102 = vmatprep.subr.mxu0 %v21793_v39  ;;  %14129 = vmatprep.subr.mxu1 %v21793_v39 }
 0x220   :  { %14103 = vmatpush3.msra.mxu0 %v17447_v62  ;;  %14130 = vmatpush3.msra.mxu1 %v17338_v12  ;;  %v3156_v62 = vld [vmem:[%s21583_s3 + $0x18] sm:$0xff] }
 0x221   :  { %14104 = vmatprep.subr.mxu0 %v21793_v39  ;;  %14131 = vmatprep.subr.mxu1 %v21793_v39 }
 0x222   :  { %14105 = vmatpush3.msra.mxu0 %v17465_v27  ;;  %14132 = vmatpush3.msra.mxu1 %v17353_v50 }
 0x223   :  { %14106 = vmatprep.subr.mxu0 %v21793_v39  ;;  %14133 = vmatprep.subr.mxu1 %v21793_v39 }
 0x224   :  { %14107 = vmatpush3.msra.mxu0 %v17477_v2  ;;  %14134 = vmatpush3.msra.mxu1 %v17366_v32 }
 0x225   :  { %14108 = vmatprep.subr.mxu0 %v21793_v39  ;;  %14135 = vmatprep.subr.mxu1 %v21793_v39 }
 0x226   :  { %14109 = vmatpush3.msra.mxu0 %v17492_v8  ;;  %14136 = vmatpush3.msra.mxu1 %v17383_v52 }
 0x227   :  { %14110 = vmatprep.subr.mxu0 %v21793_v39  ;;  %14137 = vmatprep.subr.mxu1 %v21793_v39 }
 0x228   :  { %14111 = vmatpush3.msra.mxu0 %v17504_v21  ;;  %14138 = vmatpush3.msra.mxu1 %v17399_v16 }
 0x229   :  { %14112 = vmatprep.subr.mxu0 %v21793_v39  ;;  %14139 = vmatprep.subr.mxu1 %v21793_v39 }
 0x22a   :  { %14113 = vmatpush3.msra.mxu0 %v17517_v42  ;;  %14140 = vmatpush3.msra.mxu1 %v17419_v29 }
 0x22b   :  { %14114 = vmatprep.subr.mxu0 %v21793_v39  ;;  %14141 = vmatprep.subr.mxu1 %v21793_v39 }
 0x22c   :  { %14115 = vmatpush3.msra.mxu0 %v17527_v13  ;;  %14142 = vmatpush3.msra.mxu1 %v17439_v56 }
 0x22d   :  { %14116 = vmatprep.subr.mxu0 %v21793_v39  ;;  %14143 = vmatprep.subr.mxu1 %v21793_v39 }
 0x22e   :  { %14117 = vmatpush3.msra.mxu0 %v17540_v38  ;;  %14118 = vmatprep.mubr.msk.f32.mxu0 %vm15780_vm1, %v21793_v39 }
 0x22f   :  { %14144 = vmatpush3.msra.mxu1 %v17455_v22  ;;  %14119 = vmatmul.mubr.f32.vlgmr.msra.gmra.mxu0 %v17489_v57 }
 0x230   :  { %14145 = vmatprep.subr.mxu1 %v21793_v39  ;;  %14156 = vmatprep.subr.mxu0 %v21793_v39 }
 0x231   :  { %14146 = vmatpush3.msra.mxu1 %v17472_v0  ;;  %14157 = vmatpush3.msra.mxu0 %v2576_v1 }
 0x232   :  { %14147 = vmatprep.subr.mxu1 %v21793_v39  ;;  %14158 = vmatprep.subr.mxu0 %v21793_v39 }
 0x233   :  { %14148 = vmatpush3.msra.mxu1 %v17484_v37  ;;  %14159 = vmatpush3.msra.mxu0 %v2583_v3 }
 0x234   :  { %14149 = vmatprep.subr.mxu1 %v21793_v39  ;;  %14160 = vmatprep.subr.mxu0 %v21793_v39 }
 0x235   :  { %14150 = vmatpush3.msra.mxu1 %v17499_v4  ;;  %14161 = vmatpush3.msra.mxu0 %v2590_v43 }
 0x236   :  { %14151 = vmatprep.subr.mxu1 %v21793_v39  ;;  %14162 = vmatprep.subr.mxu0 %v21793_v39 }
 0x237   :  { %14152 = vmatpush3.msra.mxu1 %v17511_v31  ;;  %14153 = vmatprep.mubr.msk.f32.mxu1 %vm15780_vm1, %v21793_v39 }
 0x238   :  { %14163 = vmatpush3.msra.mxu0 %v2597_v7  ;;  %14154 = vmatmul.mubr.f32.vlgmr.msra.gmra.mxu1 %v2565_v23 }
 0x239   :  { %14164 = vmatprep.subr.mxu0 %v21793_v39  ;;  %14191 = vmatprep.subr.mxu1 %v21793_v39 }
 0x23a   :  { %14165 = vmatpush3.msra.mxu0 %v2604_v45  ;;  %14192 = vmatpush3.msra.mxu1 %v17343_v15 }
 0x23b   :  { %14166 = vmatprep.subr.mxu0 %v21793_v39  ;;  %14193 = vmatprep.subr.mxu1 %v21793_v39 }
 0x23c   :  { %14167 = vmatpush3.msra.mxu0 %v2611_v53  ;;  %14194 = vmatpush3.msra.mxu1 %v17361_v10  ;;  %v12470_v10 = vld [vmem:[%s21582_s10] ss:$0 sm:$0xff] }
 0x23d   :  { %14168 = vmatprep.subr.mxu0 %v21793_v39  ;;  %14195 = vmatprep.subr.mxu1 %v21793_v39 }
 0x23e   :  { %14169 = vmatpush3.msra.mxu0 %v2618_v6  ;;  %14196 = vmatpush3.msra.mxu1 %v17318_v47  ;;  %v17746_v6 = vand.u32 4294901760, %v3156_v62 }
 0x23f   :  { %14170 = vmatprep.subr.mxu0 %v21793_v39  ;;  %14197 = vmatprep.subr.mxu1 %v21793_v39 }
 0x240   :  { %14171 = vmatpush3.msra.mxu0 %v2625_v9  ;;  %14198 = vmatpush3.msra.mxu1 %v17330_v35  ;;  %v3154_v9 = vld [vmem:[%s21583_s3 + $0x8] sm:$0xff] }
 0x241   :  { %14172 = vmatprep.subr.mxu0 %v21793_v39  ;;  %14199 = vmatprep.subr.mxu1 %v21793_v39 }
 0x242   :  { %14173 = vmatpush3.msra.mxu0 %v2632_v28  ;;  %14200 = vmatpush3.msra.mxu1 %v17338_v12  ;;  %v17765_v28 = vand.u32 4294901760, %v3154_v9 }
 0x243   :  { %14174 = vmatprep.subr.mxu0 %v21793_v39  ;;  %14201 = vmatprep.subr.mxu1 %v21793_v39 }
 0x244   :  { %14175 = vmatpush3.msra.mxu0 %v2639_v49  ;;  %14202 = vmatpush3.msra.mxu1 %v17353_v50  ;;  %v17777_v49 = vsub.f32 %v3154_v9, %v17765_v28 }
 0x245   :  { %14176 = vmatprep.subr.mxu0 %v21793_v39  ;;  %14203 = vmatprep.subr.mxu1 %v21793_v39 }
 0x246   :  { %14177 = vmatpush3.msra.mxu0 %v2646_v54  ;;  %14204 = vmatpush3.msra.mxu1 %v17366_v32 }
 0x247   :  { %14178 = vmatprep.subr.mxu0 %v21793_v39  ;;  %14205 = vmatprep.subr.mxu1 %v21793_v39 }
 0x248   :  { %14179 = vmatpush3.msra.mxu0 %v2653_v48  ;;  %14206 = vmatpush3.msra.mxu1 %v17383_v52 }
 0x249   :  { %14180 = vmatprep.subr.mxu0 %v21793_v39  ;;  %14207 = vmatprep.subr.mxu1 %v21793_v39 }
 0x24a   :  { %14181 = vmatpush3.msra.mxu0 %v2660_v5  ;;  %14208 = vmatpush3.msra.mxu1 %v17399_v16 }
 0x24b   :  { %14182 = vmatprep.subr.mxu0 %v21793_v39  ;;  %14209 = vmatprep.subr.mxu1 %v21793_v39 }
 0x24c   :  { %14183 = vmatpush3.msra.mxu0 %v2667_v25  ;;  %14210 = vmatpush3.msra.mxu1 %v17419_v29 }
 0x24d   :  { %14184 = vmatprep.subr.mxu0 %v21793_v39  ;;  %14211 = vmatprep.subr.mxu1 %v21793_v39 }
 0x24e   :  { %14185 = vmatpush3.msra.mxu0 %v2674_v60  ;;  %14212 = vmatpush3.msra.mxu1 %v17439_v56 }
 0x24f   :  { %14186 = vmatprep.subr.mxu0 %v21793_v39  ;;  %14213 = vmatprep.subr.mxu1 %v21793_v39 }
 0x250   :  { %14187 = vmatpush3.msra.mxu0 %v2681_v41  ;;  %14188 = vmatprep.mubr.msk.f32.mxu0 %vm15780_vm1, %v21793_v39 }
 0x251   :  { %14214 = vmatpush3.msra.mxu1 %v17455_v22  ;;  %14189 = vmatmul.mubr.f32.vlgmr.msra.gmra.mxu0 %v17459_v44  ;;  %v3155_v22 = vld [vmem:[%s21583_s3 + $0x10] sm:$0xff] }
 0x252   :  { %14215 = vmatprep.subr.mxu1 %v21793_v39  ;;  %14223 = vmatprep.mubr.msk.f32.mxu1 %vm15780_vm1, %v21793_v39  ;;  %v17754_v27 = vand.u32 4294901760, %v3155_v22 }
 0x253   :  { %14216 = vmatpush3.msra.mxu1 %v17472_v0  ;;  %14226 = vmatprep.subr.mxu0 %v21793_v39 }
 0x254   :  { %14217 = vmatprep.subr.mxu1 %v21793_v39  ;;  %14234 = vmatprep.mubr.msk.f32.mxu0 %vm15780_vm1, %v21793_v39  ;;  %v17763_v2 = vsub.f32 %v3155_v22, %v17754_v27 }
 0x255   :  { %14218 = vmatpush3.msra.mxu1 %v17484_v37  ;;  %14227 = vmatpush3.msra.mxu0 %v17746_v6  ;;  %v3153_v37 = vld [vmem:[%s21583_s3] sm:$0xff] }
 0x256   :  { %14219 = vmatprep.subr.mxu1 %v21793_v39  ;;  %14228 = vmatprep.subr.mxu0 %v21793_v39  ;;  %v3280_v8 = vand.u32 4294901760, %v17763_v2 }
 0x257   :  { %14220 = vmatpush3.msra.mxu1 %v17499_v4  ;;  %14229 = vmatpush3.msra.mxu0 %v17754_v27  ;;  %v17779_v4 = vand.u32 4294901760, %v3153_v37 }
 0x258   :  { %14221 = vmatprep.subr.mxu1 %v21793_v39  ;;  %14230 = vmatprep.subr.mxu0 %v21793_v39  ;;  %v3281_v54 = vsub.f32 %v17763_v2, %v3280_v8 }
 0x259   :  { %14222 = vmatpush3.msra.mxu1 %v17511_v31  ;;  %14231 = vmatpush3.msra.mxu0 %v17765_v28  ;;  %v3287_v31 = vand.u32 4294901760, %v17777_v49  ;;  %v17788_v23 = vsub.f32 %v3153_v37, %v17779_v4 }
 0x25a   :  { %14224 = vmatmul.mubr.f32.vlgmr.msra.gmra.mxu1 %v17459_v44  ;;  %14237 = vmatprep.subr.mxu1 %v21793_v39  ;;  %v17752_v44 = vsub.f32 %v3156_v62, %v17746_v6  ;;  %v3282_v42 = vand.u32 4294901760, %v3281_v54 }
 0x25b   :  { %14245 = vmatprep.mubr.msk.f32.mxu1 %vm15780_vm1, %v21793_v39  ;;  %14232 = vmatprep.subr.mxu0 %v21793_v39  ;;  %v3288_v48 = vsub.f32 %v17777_v49, %v3287_v31  ;;  %v3294_v13 = vand.u32 4294901760, %v17788_v23 }
 0x25c   :  { %v3273_v0 = vand.u32 4294901760, %v17752_v44  ;;  %14233 = vmatpush3.msra.mxu0 %v17779_v4 }
 0x25d   :  { %14248 = vmatprep.subr.mxu0 %v21793_v39  ;;  %v3289_v5 = vand.u32 4294901760, %v3288_v48  ;;  %v3295_v38 = vsub.f32 %v17788_v23, %v3294_v13  ;;  %v21807_v48 = vld [vmem:[#allocation2_spill] sm:$0xff] }
 0x25e   :  { %v3274_v57 = vsub.f32 %v17752_v44, %v3273_v0 }
 0x25f   :  { %v3296_v24 = vand.u32 4294901760, %v3295_v38 }
 0x260   :  { %v3275_v21 = vand.u32 4294901760, %v3274_v57 }
 0x262   :  { %14238 = vmatpush3.msra.mxu1 %v3275_v21 }
 0x263   :  { %14239 = vmatprep.subr.mxu1 %v21793_v39 }
 0x264   :  { %14240 = vmatpush3.msra.mxu1 %v3282_v42 }
 0x265   :  { %14241 = vmatprep.subr.mxu1 %v21793_v39 }
 0x266   :  { %14242 = vmatpush3.msra.mxu1 %v3289_v5 }
 0x267   :  { %14243 = vmatprep.subr.mxu1 %v21793_v39 }
 0x268   :  { %14244 = vmatpush3.msra.mxu1 %v3296_v24 }
 0x269   :  { %14259 = vmatprep.subr.mxu1 %v21793_v39 }
 0x2cf   :  { %v2569_v47 = vpop.f32.mrf.mxu0 }
 0x2d0   :  { %v2570_v32 = vadd.f32 %v12470_v10, %v2569_v47 }
 0x2d1   :  { %v14050_v35 = vpop.f32.mrf.mxu0 }
 0x2d2   :  { %v3660_v35 = vld [vmem:[%s21586_s16] sm:$0xff] }
 0x2d6   :  { %v2720_v12 = vpop.f32.mrf.mxu1 }
 0x2d7   :  { %v2721_v43 = vadd.f32 %v2720_v12, %v2570_v32  ;;  %v3664_v12 = vsel %vm3662_vm5, %v3660_v35, 0 }
 0x2d8   :  { %v14085_v14 = vpop.f32.mrf.mxu1 }
 0x2d9   :  { %v3735_v14 = vand.u32 4294901760, %v3664_v12 }
 0x2ef   :  { %v2824_v15 = vpop.f32.mrf.mxu0 }
 0x2f0   :  { %v2825_v51 = vadd.f32 %v2824_v15, %v2721_v43  ;;  %v3736_v15 = vsub.f32 %v3664_v12, %v3735_v14  ;;  %v21809_v12 = vld [vmem:[#allocation4_spill] sm:$0xff] }
 0x2f1   :  { %v14120_v50 = vpop.f32.mrf.mxu0 }
 0x2f2   :  { %v3737_v50 = vand.u32 4294901760, %v3736_v15 }
 0x2f8   :  { %v2913_v34 = vpop.f32.mrf.mxu1 }
 0x2f9   :  { %v2914_v52 = vadd.f32 %v2913_v34, %v2825_v51  ;;  %v3738_v34 = vsub.f32 %v3736_v15, %v3737_v50 }
 0x2fa   :  { %v14155_v58 = vpop.f32.mrf.mxu1 }
 0x2fb   :  { %v3739_v58 = vand.u32 4294901760, %v3738_v34  ;;  %v3656_v34 = vld [vmem:[%s21588_s17] sm:$0xff] }
 0x311   :  { %v3032_v11 = vpop.f32.mrf.mxu0 }
 0x312   :  { %v3033_v36 = vadd.f32 %v3032_v11, %v2914_v52 }
 0x313   :  { %v14190_v1 = vpop.f32.mrf.mxu0 }
 0x314   :  { %v3661_v1 = vld [vmem:[%s21586_s16 + $0x8] sm:$0xff] }
 0x31a   :  { %v3119_v3 = vpop.f32.mrf.mxu1 }
 0x31b   :  { %v3120_v7 = vadd.f32 %v3119_v3, %v3033_v36  ;;  %v12473_v36 = vld [vmem:[%s21587_s4] ss:$0 sm:$0xff]  ;;  %v3667_v3 = vsel %vm3662_vm5, %v3661_v1, 0 }
 0x31c   :  { %v14225_v16 = vpop.f32.mrf.mxu1 }
 0x31d   :  { %v3123_v40 = vsel %vm86_vm0, %v3120_v7, 0.0  ;;  %v3745_v16 = vand.u32 4294901760, %v3667_v3 }
 0x31e   :  { %3124 = vadd.xlane.f32.xlu0 %v3123_v40 }
 0x3a7   :  { %v3125_v45 = vpop.xlane.xlu0 %3124 }
 0x3a8   :  { %v3127_v29 = vmul.f32 0.03125, %v3125_v45 }
 0x3aa   :  { %v3128_v18 = vsub.f32 %v3120_v7, %v3127_v29 }
 0x3ac   :  { %v3129_v53 = vmul.f32 %v3128_v18, %v3128_v18 }
 0x3ae   :  { %v3130_v56 = vsel %vm86_vm0, %v3129_v53, 0.0  ;;  %v3746_v53 = vsub.f32 %v3667_v3, %v3745_v16 }
 0x3af   :  { %3131 = vadd.xlane.f32.xlu0 %v3130_v56 }
 0x438   :  { %v3132_v25 = vpop.xlane.xlu0 %3131 }
 0x439   :  { %v3133_v60 = vmul.f32 0.03125, %v3132_v25 }
 0x43b   :  { %v3134_v30 = vadd.f32 1e-05, %v3133_v60 }
 0x43d   :  { %15700 = vrsqrt.f32 %v3134_v30 }
 0x44a   :  { %v15701_v61 = vpop.eup %15700 }
 0x44b   :  { %v3136_v55 = vmul.f32 %v15701_v61, %v3128_v18 }
 0x44d   :  { %v3144_v41 = vmul.f32 %v12471_v63, %v3136_v55 }
 0x44f   :  { %v3152_v17 = vadd.f32 %v12472_v26, %v3144_v41  ;;  %v21808_v26 = vld [vmem:[#allocation3_spill] sm:$0xff] }
 0x450   :  { %v4175_v41 = vsel %vm4170_vm6, %v21808_v26, 0 }
 0x451   :  { %v3165_v20 = vsel %vm86_vm0, %v3152_v17, 0  ;;  %v17905_v35 = vand.u32 4294901760, %v4175_v41 }
 0x452   :  { %v3236_v46 = vand.u32 4294901760, %v3165_v20 }
 0x453   :  { %v17921_v1 = vsub.f32 %v4175_v41, %v17905_v35 }
 0x454   :  { %v3237_v33 = vsub.f32 %v3165_v20, %v3236_v46  ;;  %14246 = vmatmul.mubr.f32.vlgmr.msra.gmra.mxu1 %v3236_v46 }
 0x455   :  { %14260 = vmatpush3.msra.mxu1 %v17746_v6  ;;  %14267 = vmatprep.mubr.msk.f32.mxu1 %vm15780_vm1, %v21793_v39 }
 0x456   :  { %14261 = vmatprep.subr.mxu1 %v21793_v39  ;;  %v3238_v59 = vand.u32 4294901760, %v3237_v33 }
 0x457   :  { %14262 = vmatpush3.msra.mxu1 %v17754_v27 }
 0x458   :  { %14263 = vmatprep.subr.mxu1 %v21793_v39  ;;  %v3239_v19 = vsub.f32 %v3237_v33, %v3238_v59 }
 0x459   :  { %14264 = vmatpush3.msra.mxu1 %v17765_v28 }
 0x45a   :  { %14265 = vmatprep.subr.mxu1 %v21793_v39  ;;  %v3240_v47 = vand.u32 4294901760, %v3239_v19  ;;  %v3657_v19 = vld [vmem:[%s21588_s17 + $0x8] sm:$0xff] }
 0x45b   :  { %14266 = vmatpush3.msra.mxu1 %v17779_v4 }
 0x45c   :  { %14268 = vmatmul.mubr.f32.vlgmr.msra.gmra.mxu1 %v3238_v59  ;;  %14281 = vmatprep.subr.mxu1 %v21793_v39 }
 0x45d   :  { %14235 = vmatmul.mubr.f32.vlgmr.msra.gmra.mxu0 %v3240_v47  ;;  %14282 = vmatpush3.msra.mxu1 %v17746_v6  ;;  %v3747_v6 = vand.u32 4294901760, %v3746_v53 }
 0x45e   :  { %14249 = vmatpush3.msra.mxu0 %v17752_v44  ;;  %14283 = vmatprep.subr.mxu1 %v21793_v39 }
 0x45f   :  { %14250 = vmatprep.subr.mxu0 %v21793_v39  ;;  %14284 = vmatpush3.msra.mxu1 %v17754_v27  ;;  %v3748_v9 = vsub.f32 %v3746_v53, %v3747_v6 }
 0x460   :  { %14251 = vmatpush3.msra.mxu0 %v17763_v2  ;;  %14285 = vmatprep.subr.mxu1 %v21793_v39 }
 0x461   :  { %14252 = vmatprep.subr.mxu0 %v21793_v39  ;;  %14286 = vmatpush3.msra.mxu1 %v17765_v28  ;;  %v3749_v37 = vand.u32 4294901760, %v3748_v9 }
 0x462   :  { %14253 = vmatpush3.msra.mxu0 %v17777_v49  ;;  %14287 = vmatprep.subr.mxu1 %v21793_v39 }
 0x463   :  { %14254 = vmatprep.subr.mxu0 %v21793_v39  ;;  %14256 = vmatprep.mubr.msk.f32.mxu0 %vm15780_vm1, %v21793_v39 }
 0x464   :  { %14255 = vmatpush3.msra.mxu0 %v17788_v23  ;;  %14288 = vmatpush3.msra.mxu1 %v17779_v4 }
 0x465   :  { %14289 = vmatprep.mubr.msk.f32.mxu1 %vm15780_vm1, %v21793_v39  ;;  %14257 = vmatmul.mubr.f32.vlgmr.msra.gmra.mxu0 %v3237_v33 }
 0x466   :  { %14270 = vmatprep.subr.mxu0 %v21793_v39  ;;  %14290 = vmatmul.mubr.f32.vlgmr.msra.gmra.mxu1 %v3236_v46 }
 0x467   :  { %14271 = vmatpush3.msra.mxu0 %v3273_v0  ;;  %14278 = vmatprep.mubr.msk.f32.mxu0 %vm15780_vm1, %v21793_v39 }
 0x468   :  { %14272 = vmatprep.subr.mxu0 %v21793_v39  ;;  %14299 = vmatprep.mubr.f32.mxu1 %v3735_v14 }
 0x469   :  { %14273 = vmatpush3.msra.mxu0 %v3280_v8 }
 0x46a   :  { %14274 = vmatprep.subr.mxu0 %v21793_v39 }
 0x46b   :  { %14275 = vmatpush3.msra.mxu0 %v3287_v31 }
 0x46c   :  { %14276 = vmatprep.subr.mxu0 %v21793_v39 }
 0x46d   :  { %14277 = vmatpush3.msra.mxu0 %v3294_v13  ;;  %v4172_v13 = vsel %vm4170_vm6, %v21807_v48, 0 }
 0x46e   :  { %14279 = vmatmul.mubr.f32.vlgmr.msra.gmra.mxu0 %v3236_v46  ;;  %v17895_v60 = vand.u32 4294901760, %v4172_v13 }
 0x46f   :  { %14294 = vmatprep.mubr.f32.mxu0 %v3739_v58 }
 0x470   :  { %v17900_v33 = vsub.f32 %v4172_v13, %v17895_v60 }
 0x514   :  { %v3333_v10 = vpop.f32.mrf.mxu1 }
 0x516   :  { %v14247_v32 = vpop.f32.mrf.mxu1 }
 0x51c   :  { %v3490_v11 = vpop.f32.mrf.mxu1 }
 0x51d   :  { %v3242_v43 = vpop.f32.mrf.mxu0 }
 0x51e   :  { %v14269_v51 = vpop.f32.mrf.mxu1  ;;  %v3243_v7 = vadd.f32 %v12473_v36, %v3242_v43  ;;  %v4267_v43 = vand.u32 4294901760, %v17900_v33  ;;  %v21810_v36 = vld [vmem:[#allocation5_spill] sm:$0xff] }
 0x51f   :  { %v14236_v52 = vpop.f32.mrf.mxu0  ;;  %v4181_v3 = vsel %vm4170_vm6, %v21810_v36, 0 }
 0x520   :  { %v3334_v29 = vadd.f32 %v3333_v10, %v3243_v7 }
 0x525   :  { %v3413_v40 = vpop.f32.mrf.mxu0 }
 0x526   :  { %v3648_v45 = vpop.f32.mrf.mxu1  ;;  %v3414_v62 = vadd.f32 %v3413_v40, %v3334_v29 }
 0x527   :  { %v14258_v18 = vpop.f32.mrf.mxu0 }
 0x528   :  { %v14291_v56 = vpop.f32.mrf.mxu1  ;;  %v3491_v22 = vadd.f32 %v3490_v11, %v3414_v62  ;;  %v4268_v18 = vsub.f32 %v17900_v33, %v4267_v43  ;;  %v21811_v62 = vld [vmem:[#allocation6_spill] sm:$0xff] }
 0x529   :  { %v17943_v56 = vand.u32 4294901760, %v4181_v3 }
 0x52e   :  { %v3573_v44 = vpop.f32.mrf.mxu0 }
 0x52f   :  { %v3574_v27 = vadd.f32 %v3573_v44, %v3491_v22 }
 0x530   :  { %v14280_v0 = vpop.f32.mrf.mxu0 }
 0x531   :  { %v3649_v2 = vadd.f32 %v3648_v45, %v3574_v27 }
 0x533   :  { %v17863_v28 = vand.u32 4294901760, %v3649_v2 }
 0x535   :  { %21803 = vst [vmem:[#allocation17_spill] sm:$0xff] %v17863_v28  ;;  %v17866_v57 = vsub.f32 %v3649_v2, %v17863_v28  ;;  %14292 = vmatprep.subr.mxu0 %v17863_v28  ;;  %v4269_v2 = vand.u32 4294901760, %v4268_v18 }
 0x536   :  { %14293 = vmatpush3.msra.mxu0 %v17863_v28 }
 0x537   :  { %21804 = vst [vmem:[#allocation21_spill] sm:$0xff] %v17866_v57  ;;  %14295 = vmatmul.mubr.f32.vlgmr.msra.gmra.mxu0 %v3749_v37  ;;  %14302 = vmatprep.subr.mxu0 %v17866_v57  ;;  %v17872_v8 = vand.u32 4294901760, %v17866_v57  ;;  %v17959_v37 = vsub.f32 %v4181_v3, %v17943_v56 }
 0x538   :  { %14303 = vmatpush3.msra.mxu0 %v17866_v57  ;;  %14304 = vmatprep.mubr.f32.mxu0 %v3736_v15 }
 0x539   :  { %21805 = vst [vmem:[#allocation18_spill] sm:$0xff] %v17872_v8  ;;  %14312 = vmatprep.subr.mxu0 %v17872_v8  ;;  %v3789_v49 = vsub.f32 %v17866_v57, %v17872_v8  ;;  %v4297_v13 = vand.u32 4294901760, %v17959_v37 }
 0x53b   :  { %14305 = vmatmul.mubr.f32.vlgmr.msra.gmra.mxu0 %v3746_v53  ;;  %v17878_v4 = vand.u32 4294901760, %v3789_v49  ;;  %v4277_v53 = vand.u32 4294901760, %v17921_v1 }
 0x53c   :  { %14313 = vmatpush3.msra.mxu0 %v17872_v8  ;;  %14314 = vmatprep.mubr.f32.mxu0 %v3735_v14 }
 0x53d   :  { %21806 = vst [vmem:[#allocation24_spill] sm:$0xff] %v17878_v4  ;;  %14297 = vmatprep.subr.mxu1 %v17878_v4  ;;  %14322 = vmatprep.subr.mxu0 %v21793_v39 }
 0x53e   :  { %14298 = vmatpush3.msra.mxu1 %v17878_v4 }
 0x53f   :  { %14300 = vmatmul.mubr.f32.vlgmr.msra.gmra.mxu1 %v3745_v16  ;;  %14307 = vmatprep.subr.mxu1 %v17863_v28 }
 0x540   :  { %14308 = vmatpush3.msra.mxu1 %v17863_v28  ;;  %14309 = vmatprep.mubr.f32.mxu1 %v3737_v50 }
 0x541   :  { %14317 = vmatprep.subr.mxu1 %v17863_v28  ;;  %14315 = vmatmul.mubr.f32.vlgmr.msra.gmra.mxu0 %v3745_v16 }
 0x542   :  { %14326 = vmatprep.mubr.msk.f32.mxu0 %vm15780_vm1, %v21793_v39 }
 0x543   :  { %14310 = vmatmul.mubr.f32.vlgmr.msra.gmra.mxu1 %v3747_v6  ;;  %v4184_v6 = vsel %vm4170_vm6, %v21811_v62, 0 }
 0x544   :  { %14318 = vmatpush3.msra.mxu1 %v17863_v28  ;;  %14319 = vmatprep.mubr.f32.mxu1 %v3735_v14  ;;  %v4178_v14 = vsel %vm4170_vm6, %v21809_v12, 0  ;;  %v17961_v49 = vand.u32 4294901760, %v4184_v6 }
 0x545   :  { %14347 = vmatprep.subr.mxu1 %v21793_v39  ;;  %v17917_v11 = vand.u32 4294901760, %v4178_v14 }
 0x547   :  { %14320 = vmatmul.mubr.f32.vlgmr.msra.gmra.mxu1 %v3745_v16  ;;  %v17931_v40 = vsub.f32 %v4178_v14, %v17917_v11 }
 0x548   :  { %14351 = vmatprep.mubr.msk.f32.mxu1 %vm15780_vm1, %v21793_v39 }
 0x549   :  { %v4287_v27 = vand.u32 4294901760, %v17931_v40 }
 0x54b   :  { %v4288_v48 = vsub.f32 %v17931_v40, %v4287_v27 }
 0x5f7   :  { %v14296_v21 = vpop.f32.mrf.mxu0 }
 0x5f9   :  { %v3741_v54 = vpop.f32.mrf.mxu0 }
 0x5fb   :  { %v14306_v31 = vpop.f32.mrf.mxu0 }
 0x5fd   :  { %v3907_v42 = vpop.f32.mrf.mxu0 }
 0x5ff   :  { %v14301_v23 = vpop.f32.mrf.mxu1 }
 0x600   :  { %v3834_v5 = vadd.f32 %v14301_v23, %v14296_v21  ;;  %v4278_v21 = vsub.f32 %v17921_v1, %v4277_v53 }
 0x601   :  { %v3827_v38 = vpop.f32.mrf.mxu1  ;;  %v14316_v61 = vpop.f32.mrf.mxu0 }
 0x602   :  { %v3828_v24 = vadd.f32 %v3827_v38, %v3741_v54  ;;  %v3915_v25 = vadd.f32 %v14306_v31, %v3834_v5  ;;  %v21812_v54 = vld [vmem:[#allocation7_spill] sm:$0xff]  ;;  %v17978_v5 = vsub.f32 %v4184_v6, %v17961_v49 }
 0x603   :  { %v14311_v30 = vpop.f32.mrf.mxu1  ;;  %v4070_v59 = vpop.f32.mrf.mxu0  ;;  %v4187_v31 = vsel %vm4170_vm6, %v21812_v54, 0 }
 0x604   :  { %v3908_v63 = vadd.f32 %v3907_v42, %v3828_v24  ;;  %v3997_v55 = vadd.f32 %v14311_v30, %v3915_v25  ;;  %v17980_v38 = vand.u32 4294901760, %v4187_v31  ;;  %v4279_v24 = vand.u32 4294901760, %v4278_v21  ;;  %v21813_v25 = vld [vmem:[#allocation8_spill] sm:$0xff] }
 0x605   :  { %v3988_v17 = vpop.f32.mrf.mxu1  ;;  %v4190_v30 = vsel %vm4170_vm6, %v21813_v25, 0 }
 0x606   :  { %v3989_v20 = vadd.f32 %v3988_v17, %v3908_v63  ;;  %v4077_v46 = vadd.f32 %v14316_v61, %v3997_v55  ;;  %v4289_v63 = vand.u32 4294901760, %v4288_v48  ;;  %v4307_v55 = vand.u32 4294901760, %v17978_v5 }
 0x607   :  { %v14321_v47 = vpop.f32.mrf.mxu1  ;;  %v17991_v26 = vsub.f32 %v4187_v31, %v17980_v38  ;;  %v17993_v41 = vand.u32 4294901760, %v4190_v30  ;;  %v4298_v17 = vsub.f32 %v17959_v37, %v4297_v13 }
 0x608   :  { %v4071_v15 = vadd.f32 %v4070_v59, %v3989_v20  ;;  %v17909_v50 = vadd.f32 %v14321_v47, %v4077_v46 }
 0x609   :  { %v4148_v58 = vpop.f32.mrf.mxu1  ;;  %v4317_v20 = vand.u32 4294901760, %v17991_v26  ;;  %v18008_v46 = vsub.f32 %v4190_v30, %v17993_v41  ;;  %v4299_v59 = vand.u32 4294901760, %v4298_v17 }
 0x60a   :  { %v4159_v10 = vmul.f32 %v17909_v50, %v3657_v19  ;;  %v17915_v32 = vadd.f32 %v4148_v58, %v4071_v15  ;;  %v4308_v19 = vsub.f32 %v17978_v5, %v4307_v55 }
 0x60b   :  { %v4327_v47 = vand.u32 4294901760, %v18008_v46  ;;  %v4318_v14 = vsub.f32 %v17991_v26, %v4317_v20 }
 0x60c   :  { %v4196_v51 = vsel %vm4170_vm6, %v4159_v10, 0  ;;  %v4158_v52 = vmul.f32 %v17915_v32, %v3656_v34  ;;  %v4309_v12 = vand.u32 4294901760, %v4308_v19 }
 0x60d   :  { %v17927_v7 = vand.u32 4294901760, %v4196_v51  ;;  %v4319_v15 = vand.u32 4294901760, %v4318_v14  ;;  %v4328_v34 = vsub.f32 %v18008_v46, %v4327_v47 }
 0x60e   :  { %v4193_v16 = vsel %vm4170_vm6, %v4158_v52, 0 }
 0x60f   :  { %v17934_v45 = vsub.f32 %v4196_v51, %v17927_v7  ;;  %v17936_v29 = vand.u32 4294901760, %v4193_v16  ;;  %14323 = vmatpush3.xpose.msra.mxu0 %v17927_v7  ;;  %v4329_v58 = vand.u32 4294901760, %v4328_v34 }
 0x610   :  { %14324 = vmatprep.subr.mxu0 %v21793_v39 }
 0x611   :  { %v17949_v22 = vsub.f32 %v4193_v16, %v17936_v29  ;;  %v4366_v44 = vand.u32 4294901760, %v17934_v45 }
 0x613   :  { %14325 = vmatpush3.xpose.msra.mxu0 %v17936_v29  ;;  %v4367_v9 = vsub.f32 %v17934_v45, %v4366_v44  ;;  %v4373_v0 = vand.u32 4294901760, %v17949_v22 }
 0x614   :  { %14372 = vmatprep.subr.mxu0 %v21793_v39 }
 0x615   :  { %v4368_v23 = vand.u32 4294901760, %v4367_v9  ;;  %v4374_v42 = vsub.f32 %v17949_v22, %v4373_v0 }
 0x616   :  { %14327 = vmatmul.mubr.f32.vlgmr.msra.gmra.mxu0 %v4269_v2 }
 0x617   :  { %14348 = vmatpush3.xpose.msra.mxu1 %v4368_v23  ;;  %14373 = vmatpush3.xpose.msra.mxu0 %v17934_v45  ;;  %v4375_v61 = vand.u32 4294901760, %v4374_v42 }
 0x618   :  { %14329 = vmatprep.mubr.msk.f32.mxu0 %vm15780_vm1, %v21793_v39  ;;  %14349 = vmatprep.subr.mxu1 %v21793_v39 }
 0x619   :  { %14374 = vmatprep.subr.mxu0 %v21793_v39 }
 0x61a   :  { %14330 = vmatmul.mubr.f32.gmra.mxu0 %v4279_v24 }
 0x61b   :  { %14350 = vmatpush3.xpose.msra.mxu1 %v4375_v61  ;;  %14375 = vmatpush3.xpose.msra.mxu0 %v17949_v22 }
 0x61c   :  { %14332 = vmatprep.mubr.msk.f32.mxu0 %vm15780_vm1, %v21793_v39  ;;  %14397 = vmatprep.subr.mxu1 %v21793_v39 }
 0x61d   :  { %14422 = vmatprep.subr.mxu0 %v21793_v39 }
 0x61e   :  { %14333 = vmatmul.mubr.f32.gmra.mxu0 %v4289_v63  ;;  %14352 = vmatmul.mubr.f32.vlgmr.msra.gmra.mxu1 %v17895_v60 }
 0x61f   :  { %14398 = vmatpush3.xpose.msra.mxu1 %v17927_v7  ;;  %14335 = vmatprep.mubr.msk.f32.mxu0 %vm15780_vm1, %v21793_v39 }
 0x620   :  { %14354 = vmatprep.mubr.msk.f32.mxu1 %vm15780_vm1, %v21793_v39  ;;  %14399 = vmatprep.subr.mxu1 %v21793_v39 }
 0x622   :  { %14336 = vmatmul.mubr.f32.gmra.mxu0 %v4299_v59  ;;  %14355 = vmatmul.mubr.f32.gmra.mxu1 %v17905_v35 }
 0x623   :  { %14400 = vmatpush3.xpose.msra.mxu1 %v17936_v29  ;;  %14338 = vmatprep.mubr.msk.f32.mxu0 %vm15780_vm1, %v21793_v39 }
 0x624   :  { %14357 = vmatprep.mubr.msk.f32.mxu1 %vm15780_vm1, %v21793_v39  ;;  %14447 = vmatprep.subr.mxu1 %v21793_v39 }
 0x626   :  { %14339 = vmatmul.mubr.f32.gmra.mxu0 %v4309_v12  ;;  %14358 = vmatmul.mubr.f32.gmra.mxu1 %v17917_v11 }
 0x627   :  { %14341 = vmatprep.mubr.msk.f32.mxu0 %vm15780_vm1, %v21793_v39  ;;  %14360 = vmatprep.mubr.msk.f32.mxu1 %vm15780_vm1, %v21793_v39 }
 0x62a   :  { %14342 = vmatmul.mubr.f32.gmra.mxu0 %v4319_v15  ;;  %14361 = vmatmul.mubr.f32.gmra.mxu1 %v17943_v56 }
 0x62b   :  { %14344 = vmatprep.mubr.msk.f32.mxu0 %vm15780_vm1, %v21793_v39  ;;  %14363 = vmatprep.mubr.msk.f32.mxu1 %vm15780_vm1, %v21793_v39 }
 0x62e   :  { %14345 = vmatmul.mubr.f32.gmra.mxu0 %v4329_v58  ;;  %14364 = vmatmul.mubr.f32.gmra.mxu1 %v17961_v49 }
 0x62f   :  { %14366 = vmatprep.mubr.msk.f32.mxu1 %vm15780_vm1, %v21793_v39  ;;  %14376 = vmatprep.mubr.msk.f32.mxu0 %vm15780_vm1, %v21793_v39 }
 0x632   :  { %14367 = vmatmul.mubr.f32.gmra.mxu1 %v17980_v38  ;;  %14377 = vmatmul.mubr.f32.vlgmr.msra.gmra.mxu0 %v17900_v33 }
 0x633   :  { %14423 = vmatpush3.xpose.msra.mxu0 %v4366_v44  ;;  %14369 = vmatprep.mubr.msk.f32.mxu1 %vm15780_vm1, %v21793_v39 }
 0x634   :  { %14379 = vmatprep.mubr.msk.f32.mxu0 %vm15780_vm1, %v21793_v39  ;;  %14424 = vmatprep.subr.mxu0 %v21793_v39 }
 0x636   :  { %14370 = vmatmul.mubr.f32.gmra.mxu1 %v17993_v41  ;;  %14380 = vmatmul.mubr.f32.gmra.mxu0 %v17921_v1 }
 0x637   :  { %14425 = vmatpush3.xpose.msra.mxu0 %v4373_v0  ;;  %14382 = vmatprep.mubr.msk.f32.mxu0 %vm15780_vm1, %v21793_v39 }
 0x638   :  { %14401 = vmatprep.mubr.msk.f32.mxu1 %vm15780_vm1, %v21793_v39  ;;  %14472 = vmatprep.subr.mxu0 %v21793_v39 }
 0x63a   :  { %14383 = vmatmul.mubr.f32.gmra.mxu0 %v17931_v40  ;;  %14402 = vmatmul.mubr.f32.vlgmr.msra.gmra.mxu1 %v4267_v43 }
 0x63b   :  { %14448 = vmatpush3.xpose.msra.mxu1 %v17927_v7  ;;  %14385 = vmatprep.mubr.msk.f32.mxu0 %vm15780_vm1, %v21793_v39 }
 0x63c   :  { %14404 = vmatprep.mubr.msk.f32.mxu1 %vm15780_vm1, %v21793_v39  ;;  %14449 = vmatprep.subr.mxu1 %v21793_v39 }
 0x63e   :  { %14386 = vmatmul.mubr.f32.gmra.mxu0 %v17959_v37  ;;  %14405 = vmatmul.mubr.f32.gmra.mxu1 %v4277_v53 }
 0x63f   :  { %14450 = vmatpush3.xpose.msra.mxu1 %v17936_v29  ;;  %14388 = vmatprep.mubr.msk.f32.mxu0 %vm15780_vm1, %v21793_v39 }
 0x640   :  { %14407 = vmatprep.mubr.msk.f32.mxu1 %vm15780_vm1, %v21793_v39  ;;  %14497 = vmatprep.subr.mxu1 %v21793_v39 }
 0x642   :  { %14389 = vmatmul.mubr.f32.gmra.mxu0 %v17978_v5  ;;  %14408 = vmatmul.mubr.f32.gmra.mxu1 %v4287_v27 }
 0x643   :  { %14391 = vmatprep.mubr.msk.f32.mxu0 %vm15780_vm1, %v21793_v39  ;;  %14410 = vmatprep.mubr.msk.f32.mxu1 %vm15780_vm1, %v21793_v39 }
 0x646   :  { %14392 = vmatmul.mubr.f32.gmra.mxu0 %v17991_v26  ;;  %14411 = vmatmul.mubr.f32.gmra.mxu1 %v4297_v13 }
 0x647   :  { %14394 = vmatprep.mubr.msk.f32.mxu0 %vm15780_vm1, %v21793_v39  ;;  %14413 = vmatprep.mubr.msk.f32.mxu1 %vm15780_vm1, %v21793_v39 }
 0x64a   :  { %14395 = vmatmul.mubr.f32.gmra.mxu0 %v18008_v46  ;;  %14414 = vmatmul.mubr.f32.gmra.mxu1 %v4307_v55 }
 0x64b   :  { %14416 = vmatprep.mubr.msk.f32.mxu1 %vm15780_vm1, %v21793_v39  ;;  %14426 = vmatprep.mubr.msk.f32.mxu0 %vm15780_vm1, %v21793_v39 }
 0x64e   :  { %14417 = vmatmul.mubr.f32.gmra.mxu1 %v4317_v20  ;;  %14427 = vmatmul.mubr.f32.vlgmr.msra.gmra.mxu0 %v17895_v60 }
 0x64f   :  { %14419 = vmatprep.mubr.msk.f32.mxu1 %vm15780_vm1, %v21793_v39  ;;  %14429 = vmatprep.mubr.msk.f32.mxu0 %vm15780_vm1, %v21793_v39 }
 0x652   :  { %14420 = vmatmul.mubr.f32.gmra.mxu1 %v4327_v47  ;;  %14430 = vmatmul.mubr.f32.gmra.mxu0 %v17905_v35 }
 0x653   :  { %14432 = vmatprep.mubr.msk.f32.mxu0 %vm15780_vm1, %v21793_v39  ;;  %14451 = vmatprep.mubr.msk.f32.mxu1 %vm15780_vm1, %v21793_v39 }
 0x656   :  { %14433 = vmatmul.mubr.f32.gmra.mxu0 %v17917_v11  ;;  %14452 = vmatmul.mubr.f32.vlgmr.msra.gmra.mxu1 %v17895_v60  ;;  %v3654_v60 = vld [vmem:[%s21589_s13 + $0x8] sm:$0xff] }
 0x657   :  { %14435 = vmatprep.mubr.msk.f32.mxu0 %vm15780_vm1, %v21793_v39  ;;  %14454 = vmatprep.mubr.msk.f32.mxu1 %vm15780_vm1, %v21793_v39  ;;  %v18151_v33 = vand.u32 4294901760, %v3654_v60 }
 0x659   :  { %21814 = vst [vmem:[#allocation31_spill] sm:$0xff] %v18151_v33  ;;  %14473 = vmatpush3.msra.mxu0 %v18151_v33 }
 0x65a   :  { %14436 = vmatmul.mubr.f32.gmra.mxu0 %v17943_v56  ;;  %14455 = vmatmul.mubr.f32.gmra.mxu1 %v17905_v35  ;;  %v18155_v35 = vsub.f32 %v3654_v60, %v18151_v33 }
 0x65b   :  { %14438 = vmatprep.mubr.msk.f32.mxu0 %vm15780_vm1, %v21793_v39  ;;  %14457 = vmatprep.mubr.msk.f32.mxu1 %vm15780_vm1, %v21793_v39 }
 0x65c   :  { %21815 = vst [vmem:[#allocation26_spill] sm:$0xff] %v18155_v35  ;;  %14474 = vmatprep.subr.mxu0 %v21793_v39  ;;  %v18159_v10 = vand.u32 4294901760, %v18155_v35 }
 0x65e   :  { %14439 = vmatmul.mubr.f32.gmra.mxu0 %v17961_v49  ;;  %14458 = vmatmul.mubr.f32.gmra.mxu1 %v17917_v11  ;;  %21816 = vst [vmem:[#allocation29_spill] sm:$0xff] %v18159_v10  ;;  %v3653_v11 = vld [vmem:[%s21589_s13] sm:$0xff]  ;;  %v5112_v1 = vsub.f32 %v18155_v35, %v18159_v10 }
 0x65f   :  { %14441 = vmatprep.mubr.msk.f32.mxu0 %vm15780_vm1, %v21793_v39  ;;  %14460 = vmatprep.mubr.msk.f32.mxu1 %vm15780_vm1, %v21793_v39  ;;  %v18164_v43 = vand.u32 4294901760, %v3653_v11 }
 0x660   :  { %v18172_v52 = vand.u32 4294901760, %v5112_v1 }
 0x661   :  { %21817 = vst [vmem:[#allocation22_spill] sm:$0xff] %v18164_v43  ;;  %14475 = vmatpush3.msra.mxu0 %v18164_v43  ;;  %v18170_v51 = vsub.f32 %v3653_v11, %v18164_v43 }
 0x662   :  { %14442 = vmatmul.mubr.f32.gmra.mxu0 %v17980_v38  ;;  %14461 = vmatmul.mubr.f32.gmra.mxu1 %v17943_v56  ;;  %21819 = vst [vmem:[#allocation27_spill] sm:$0xff] %v18172_v52 }
 0x663   :  { %14444 = vmatprep.mubr.msk.f32.mxu0 %vm15780_vm1, %v21793_v39  ;;  %14463 = vmatprep.mubr.msk.f32.mxu1 %vm15780_vm1, %v21793_v39  ;;  %21818 = vst [vmem:[#allocation30_spill] sm:$0xff] %v18170_v51  ;;  %v18176_v36 = vand.u32 4294901760, %v18170_v51 }
 0x664   :  { %14522 = vmatprep.subr.mxu0 %v21793_v39  ;;  %14498 = vmatpush3.msra.mxu1 %v18172_v52 }
 0x665   :  { %21820 = vst [vmem:[#allocation16_spill] sm:$0xff] %v18176_v36  ;;  %14499 = vmatprep.subr.mxu1 %v21793_v39  ;;  %v5119_v3 = vsub.f32 %v18170_v51, %v18176_v36 }
 0x666   :  { %14445 = vmatmul.mubr.f32.gmra.mxu0 %v17993_v41  ;;  %14464 = vmatmul.mubr.f32.gmra.mxu1 %v17961_v49 }
 0x667   :  { %14466 = vmatprep.mubr.msk.f32.mxu1 %vm15780_vm1, %v21793_v39  ;;  %14476 = vmatprep.mubr.msk.f32.mxu0 %vm15780_vm1, %v21793_v39  ;;  %v18182_v7 = vand.u32 4294901760, %v5119_v3 }
 0x669   :  { %21821 = vst [vmem:[#allocation19_spill] sm:$0xff] %v18182_v7  ;;  %14500 = vmatpush3.msra.mxu1 %v18182_v7 }
 0x66a   :  { %14467 = vmatmul.mubr.f32.gmra.mxu1 %v17980_v38  ;;  %14547 = vmatprep.subr.mxu1 %v21793_v39 }
 0x66b   :  { %14469 = vmatprep.mubr.msk.f32.mxu1 %vm15780_vm1, %v21793_v39 }
 0x66e   :  { %14470 = vmatmul.mubr.f32.gmra.mxu1 %v17993_v41 }
 0x66f   :  { %14501 = vmatprep.mubr.msk.f32.mxu1 %vm15780_vm1, %v21793_v39 }
 0x6d6   :  { %v4271_v16 = vpop.f32.mrf.mxu0 }
 0x6d8   :  { %v14328_v40 = vpop.f32.mrf.mxu0 }
 0x6da   :  { %v4281_v45 = vpop.f32.mrf.mxu0 }
 0x6dc   :  { %v14331_v29 = vpop.f32.mrf.mxu0 }
 0x6de   :  { %v18186_v18 = vpop.f32.mrf.mxu0  ;;  %v4412_v53 = vpop.f32.mrf.mxu1 }
 0x6e0   :  { %v14334_v56 = vpop.f32.mrf.mxu0  ;;  %v14353_v62 = vpop.f32.mrf.mxu1 }
 0x6e2   :  { %v18188_v6 = vpop.f32.mrf.mxu0  ;;  %v4418_v22 = vpop.f32.mrf.mxu1 }
 0x6e4   :  { %v14337_v44 = vpop.f32.mrf.mxu0  ;;  %v14356_v27 = vpop.f32.mrf.mxu1 }
 0x6e5   :  { %v4413_v27 = vadd.f32 %v4412_v53, %v4271_v16 }
 0x6e6   :  { %v18190_v9 = vpop.f32.mrf.mxu0  ;;  %v4424_v0 = vpop.f32.mrf.mxu1 }
 0x6e8   :  { %v14340_v2 = vpop.f32.mrf.mxu0  ;;  %v14359_v37 = vpop.f32.mrf.mxu1 }
 0x6ea   :  { %v18192_v49 = vpop.f32.mrf.mxu0  ;;  %v18194_v21 = vpop.f32.mrf.mxu1 }
 0x6ec   :  { %v14343_v54 = vpop.f32.mrf.mxu0  ;;  %v14362_v31 = vpop.f32.mrf.mxu1 }
 0x6ee   :  { %v18196_v23 = vpop.f32.mrf.mxu0  ;;  %v18198_v42 = vpop.f32.mrf.mxu1 }
 0x6f0   :  { %v14346_v48 = vpop.f32.mrf.mxu0  ;;  %v14365_v13 = vpop.f32.mrf.mxu1 }
 0x6f1   :  { %v4419_v13 = vadd.f32 %v4418_v22, %v4281_v45 }
 0x6f2   :  { %v18200_v5 = vpop.f32.mrf.mxu1  ;;  %v4524_v38 = vpop.f32.mrf.mxu0 }
 0x6f3   :  { %v4525_v54 = vadd.f32 %v4524_v38, %v4413_v27 }
 0x6f4   :  { %v14368_v24 = vpop.f32.mrf.mxu1  ;;  %v14378_v25 = vpop.f32.mrf.mxu0 }
 0x6f6   :  { %v18202_v30 = vpop.f32.mrf.mxu1  ;;  %v4531_v61 = vpop.f32.mrf.mxu0 }
 0x6f8   :  { %v14371_v63 = vpop.f32.mrf.mxu1  ;;  %v14381_v55 = vpop.f32.mrf.mxu0 }
 0x6f9   :  { %v4532_v55 = vadd.f32 %v4531_v61, %v4419_v13  ;;  %v4431_v61 = vadd.f32 %v18194_v21, %v18188_v6 }
 0x6fa   :  { %v4538_v26 = vpop.f32.mrf.mxu0  ;;  %v4641_v41 = vpop.f32.mrf.mxu1 }
 0x6fb   :  { %v4642_v24 = vadd.f32 %v4641_v41, %v4525_v54 }
 0x6fc   :  { %v14384_v17 = vpop.f32.mrf.mxu0  ;;  %v14403_v20 = vpop.f32.mrf.mxu1 }
 0x6fe   :  { %v4545_v46 = vpop.f32.mrf.mxu0  ;;  %v4649_v59 = vpop.f32.mrf.mxu1 }
 0x700   :  { %v14387_v19 = vpop.f32.mrf.mxu0  ;;  %v14406_v47 = vpop.f32.mrf.mxu1 }
 0x701   :  { %v4425_v47 = vadd.f32 %v4424_v0, %v18186_v18 }
 0x702   :  { %v18204_v12 = vpop.f32.mrf.mxu0  ;;  %v4657_v14 = vpop.f32.mrf.mxu1 }
 0x704   :  { %v14390_v15 = vpop.f32.mrf.mxu0  ;;  %v14409_v34 = vpop.f32.mrf.mxu1 }
 0x705   :  { %v4650_v15 = vadd.f32 %v4649_v59, %v4532_v55 }
 0x706   :  { %v18206_v58 = vpop.f32.mrf.mxu0  ;;  %v4665_v60 = vpop.f32.mrf.mxu1 }
 0x708   :  { %v14393_v11 = vpop.f32.mrf.mxu0  ;;  %v14412_v1 = vpop.f32.mrf.mxu1 }
 0x709   :  { %v4539_v11 = vadd.f32 %v4538_v26, %v4425_v47  ;;  %v4546_v26 = vadd.f32 %v4545_v46, %v4431_v61  ;;  %v4443_v47 = vadd.f32 %v18200_v5, %v18192_v49 }
 0x70a   :  { %v18208_v3 = vpop.f32.mrf.mxu0  ;;  %v18210_v40 = vpop.f32.mrf.mxu1 }
 0x70b   :  { %v4658_v41 = vadd.f32 %v4657_v14, %v4539_v11  ;;  %v4666_v46 = vadd.f32 %v4665_v60, %v4546_v26 }
 0x70c   :  { %v14396_v29 = vpop.f32.mrf.mxu0  ;;  %v14415_v56 = vpop.f32.mrf.mxu1 }
 0x70e   :  { %v18212_v62 = vpop.f32.mrf.mxu1  ;;  %v4766_v44 = vpop.f32.mrf.mxu0 }
 0x70f   :  { %v4767_v17 = vadd.f32 %v4766_v44, %v4642_v24 }
 0x710   :  { %v14418_v2 = vpop.f32.mrf.mxu1  ;;  %v14428_v37 = vpop.f32.mrf.mxu0 }
 0x711   :  { %v4437_v37 = vadd.f32 %v18198_v42, %v18190_v9 }
 0x712   :  { %v18214_v31 = vpop.f32.mrf.mxu1  ;;  %v4772_v48 = vpop.f32.mrf.mxu0 }
 0x713   :  { %v4773_v38 = vadd.f32 %v4772_v48, %v4650_v15 }
 0x714   :  { %v14421_v25 = vpop.f32.mrf.mxu1  ;;  %v14431_v63 = vpop.f32.mrf.mxu0 }
 0x715   :  { %v4553_v63 = vadd.f32 %v18204_v12, %v4437_v37 }
 0x716   :  { %v4778_v20 = vpop.f32.mrf.mxu0  ;;  %v4875_v19 = vpop.f32.mrf.mxu1 }
 0x717   :  { %v4876_v34 = vadd.f32 %v4875_v19, %v4767_v17  ;;  %v4779_v59 = vadd.f32 %v4778_v20, %v4658_v41  ;;  %v4674_v15 = vadd.f32 %v18210_v40, %v4553_v63 }
 0x718   :  { %v14434_v16 = vpop.f32.mrf.mxu0  ;;  %v14453_v53 = vpop.f32.mrf.mxu1 }
 0x719   :  { %v4923_v1 = vsel %vm4921_vm7, %v4876_v34, 0 }
 0x71a   :  { %v18218_v29 = vand.u32 4294901760, %v4923_v1  ;;  %v4784_v45 = vpop.f32.mrf.mxu0  ;;  %v4881_v22 = vpop.f32.mrf.mxu1 }
 0x71b   :  { %v4882_v56 = vadd.f32 %v4881_v22, %v4773_v38  ;;  %v4785_v9 = vadd.f32 %v4784_v45, %v4666_v46  ;;  %v4560_v38 = vadd.f32 %v18206_v58, %v4443_v47  ;;  %v4449_v58 = vadd.f32 %v18202_v30, %v18196_v23 }
 0x71c   :  { %v18223_v44 = vsub.f32 %v4923_v1, %v18218_v29  ;;  %v14437_v18 = vpop.f32.mrf.mxu0  ;;  %v14456_v0 = vpop.f32.mrf.mxu1  ;;  %14502 = vmatmul.mubr.f32.vlgmr.msra.gmra.mxu1 %v18218_v29 }
 0x71d   :  { %v4926_v27 = vsel %vm4921_vm7, %v4882_v56, 0  ;;  %14504 = vmatprep.mubr.msk.f32.mxu1 %vm15780_vm1, %v21793_v39  ;;  %14548 = vmatpush3.msra.mxu1 %v18151_v33  ;;  %v4682_v41 = vadd.f32 %v18212_v62, %v4560_v38 }
 0x71e   :  { %v5012_v6 = vand.u32 4294901760, %v18223_v44  ;;  %v18231_v21 = vand.u32 4294901760, %v4926_v27  ;;  %v4790_v14 = vpop.f32.mrf.mxu0  ;;  %v4887_v2 = vpop.f32.mrf.mxu1  ;;  %14549 = vmatprep.subr.mxu1 %v21793_v39 }
 0x71f   :  { %v4888_v54 = vadd.f32 %v4887_v2, %v4779_v59  ;;  %14550 = vmatpush3.msra.mxu1 %v18164_v43  ;;  %v4791_v1 = vadd.f32 %v4790_v14, %v4674_v15 }
 0x720   :  { %v5013_v48 = vsub.f32 %v18223_v44, %v5012_v6  ;;  %v18241_v13 = vsub.f32 %v4926_v27, %v18231_v21  ;;  %v14440_v24 = vpop.f32.mrf.mxu0  ;;  %v14459_v25 = vpop.f32.mrf.mxu1  ;;  %14505 = vmatmul.mubr.f32.gmra.mxu1 %v18231_v21  ;;  %14597 = vmatprep.subr.mxu1 %v21793_v39  ;;  %v4567_v27 = vadd.f32 %v18208_v3, %v4449_v58 }
 0x721   :  { %v4929_v42 = vsel %vm4921_vm7, %v4888_v54, 0  ;;  %14507 = vmatprep.mubr.msk.f32.mxu1 %vm15780_vm1, %v21793_v39 }
 0x722   :  { %v5014_v60 = vand.u32 4294901760, %v5013_v48  ;;  %v5022_v55 = vand.u32 4294901760, %v18241_v13  ;;  %v18250_v17 = vand.u32 4294901760, %v4929_v42  ;;  %v4796_v20 = vpop.f32.mrf.mxu0  ;;  %v4893_v19 = vpop.f32.mrf.mxu1  ;;  %v4690_v46 = vadd.f32 %v18214_v31, %v4567_v27 }
 0x723   :  { %v4894_v34 = vadd.f32 %v4893_v19, %v4785_v9  ;;  %v4797_v23 = vadd.f32 %v4796_v20, %v4682_v41 }
 0x724   :  { %v18256_v12 = vsub.f32 %v4929_v42, %v18250_v17  ;;  %v14443_v16 = vpop.f32.mrf.mxu0  ;;  %v14462_v53 = vpop.f32.mrf.mxu1  ;;  %14477 = vmatmul.mubr.f32.vlgmr.msra.gmra.mxu0 %v5014_v60  ;;  %14508 = vmatmul.mubr.f32.gmra.mxu1 %v18250_v17  ;;  %v5023_v11 = vsub.f32 %v18241_v13, %v5022_v55 }
 0x725   :  { %v4932_v49 = vsel %vm4921_vm7, %v4894_v34, 0  ;;  %14479 = vmatprep.mubr.msk.f32.mxu0 %vm15780_vm1, %v21793_v39  ;;  %14510 = vmatprep.mubr.msk.f32.mxu1 %vm15780_vm1, %v21793_v39 }
 0x726   :  { %v5032_v5 = vand.u32 4294901760, %v18256_v12  ;;  %v18269_v40 = vand.u32 4294901760, %v4932_v49  ;;  %v4802_v45 = vpop.f32.mrf.mxu0  ;;  %v4899_v22 = vpop.f32.mrf.mxu1  ;;  %14523 = vmatpush3.msra.mxu0 %v18155_v35  ;;  %v5024_v61 = vand.u32 4294901760, %v5023_v11 }
 0x727   :  { %v4900_v56 = vadd.f32 %v4899_v22, %v4791_v1  ;;  %14524 = vmatprep.subr.mxu0 %v21793_v39  ;;  %v4803_v25 = vadd.f32 %v4802_v45, %v4690_v46 }
 0x728   :  { %v18277_v18 = vsub.f32 %v4932_v49, %v18269_v40  ;;  %v14446_v0 = vpop.f32.mrf.mxu0  ;;  %v14465_v26 = vpop.f32.mrf.mxu1  ;;  %14480 = vmatmul.mubr.f32.gmra.mxu0 %v5024_v61  ;;  %14511 = vmatmul.mubr.f32.gmra.mxu1 %v18269_v40  ;;  %v5033_v59 = vsub.f32 %v18256_v12, %v5032_v5 }
 0x729   :  { %v4935_v30 = vsel %vm4921_vm7, %v4900_v56, 0  ;;  %14482 = vmatprep.mubr.msk.f32.mxu0 %vm15780_vm1, %v21793_v39  ;;  %14513 = vmatprep.mubr.msk.f32.mxu1 %vm15780_vm1, %v21793_v39 }
 0x72a   :  { %v5042_v62 = vand.u32 4294901760, %v18277_v18  ;;  %v18290_v14 = vand.u32 4294901760, %v4935_v30  ;;  %v4905_v2 = vpop.f32.mrf.mxu1  ;;  %v5034_v37 = vand.u32 4294901760, %v5033_v59  ;;  %14525 = vmatpush3.msra.mxu0 %v18170_v51 }
 0x72b   :  { %v4906_v3 = vadd.f32 %v4905_v2, %v4797_v23  ;;  %14572 = vmatprep.subr.mxu0 %v21793_v39 }
 0x72c   :  { %v18296_v54 = vsub.f32 %v4935_v30, %v18290_v14  ;;  %v14468_v48 = vpop.f32.mrf.mxu1  ;;  %14483 = vmatmul.mubr.f32.gmra.mxu0 %v5034_v37  ;;  %14514 = vmatmul.mubr.f32.gmra.mxu1 %v18290_v14  ;;  %v5043_v24 = vsub.f32 %v18277_v18, %v5042_v62 }
 0x72d   :  { %v4938_v63 = vsel %vm4921_vm7, %v4906_v3, 0  ;;  %14485 = vmatprep.mubr.msk.f32.mxu0 %vm15780_vm1, %v21793_v39  ;;  %14516 = vmatprep.mubr.msk.f32.mxu1 %vm15780_vm1, %v21793_v39 }
 0x72e   :  { %v5052_v31 = vand.u32 4294901760, %v18296_v54  ;;  %v18306_v9 = vand.u32 4294901760, %v4938_v63  ;;  %v4911_v42 = vpop.f32.mrf.mxu1  ;;  %v5044_v60 = vand.u32 4294901760, %v5043_v24 }
 0x72f   :  { %v4912_v20 = vadd.f32 %v4911_v42, %v4803_v25 }
 0x730   :  { %v5061_v19 = vsub.f32 %v4938_v63, %v18306_v9  ;;  %v14471_v47 = vpop.f32.mrf.mxu1  ;;  %14486 = vmatmul.mubr.f32.gmra.mxu0 %v5044_v60  ;;  %14517 = vmatmul.mubr.f32.gmra.mxu1 %v18306_v9  ;;  %v5053_v15 = vsub.f32 %v18296_v54, %v5052_v31 }
 0x731   :  { %v4941_v34 = vsel %vm4921_vm7, %v4912_v20, 0  ;;  %14488 = vmatprep.mubr.msk.f32.mxu0 %vm15780_vm1, %v21793_v39  ;;  %14519 = vmatprep.mubr.msk.f32.mxu1 %vm15780_vm1, %v21793_v39 }
 0x732   :  { %v5062_v16 = vand.u32 4294901760, %v5061_v19  ;;  %v18316_v53 = vand.u32 4294901760, %v4941_v34  ;;  %v5054_v11 = vand.u32 4294901760, %v5053_v15 }
 0x734   :  { %v5071_v38 = vsub.f32 %v4941_v34, %v18316_v53  ;;  %14489 = vmatmul.mubr.f32.gmra.mxu0 %v5054_v11  ;;  %14520 = vmatmul.mubr.f32.gmra.mxu1 %v18316_v53  ;;  %v5063_v1 = vsub.f32 %v5061_v19, %v5062_v16 }
 0x735   :  { %14491 = vmatprep.mubr.msk.f32.mxu0 %vm15780_vm1, %v21793_v39  ;;  %14551 = vmatprep.mubr.msk.f32.mxu1 %vm15780_vm1, %v21793_v39 }
 0x736   :  { %v5072_v49 = vand.u32 4294901760, %v5071_v38  ;;  %v5064_v45 = vand.u32 4294901760, %v5063_v1 }
 0x738   :  { %14492 = vmatmul.mubr.f32.gmra.mxu0 %v5064_v45  ;;  %14552 = vmatmul.mubr.f32.vlgmr.msra.gmra.mxu1 %v5012_v6  ;;  %v5073_v22 = vsub.f32 %v5071_v38, %v5072_v49 }
 0x739   :  { %14494 = vmatprep.mubr.msk.f32.mxu0 %vm15780_vm1, %v21793_v39  ;;  %14554 = vmatprep.mubr.msk.f32.mxu1 %vm15780_vm1, %v21793_v39 }
 0x73a   :  { %v5074_v61 = vand.u32 4294901760, %v5073_v22  ;;  %14598 = vmatpush3.msra.mxu1 %v18151_v33 }
 0x73b   :  { %14599 = vmatprep.subr.mxu1 %v21793_v39 }
 0x73c   :  { %14495 = vmatmul.mubr.f32.gmra.mxu0 %v5074_v61  ;;  %14555 = vmatmul.mubr.f32.gmra.mxu1 %v5022_v55 }
 0x73d   :  { %14526 = vmatprep.mubr.msk.f32.mxu0 %vm15780_vm1, %v21793_v39  ;;  %14557 = vmatprep.mubr.msk.f32.mxu1 %vm15780_vm1, %v21793_v39 }
 0x73e   :  { %14600 = vmatpush3.msra.mxu1 %v18164_v43 }
 0x73f   :  { %14647 = vmatprep.subr.mxu1 %v21793_v39 }
 0x740   :  { %14527 = vmatmul.mubr.f32.vlgmr.msra.gmra.mxu0 %v18223_v44  ;;  %14558 = vmatmul.mubr.f32.gmra.mxu1 %v5032_v5 }
 0x741   :  { %14529 = vmatprep.mubr.msk.f32.mxu0 %vm15780_vm1, %v21793_v39  ;;  %14560 = vmatprep.mubr.msk.f32.mxu1 %vm15780_vm1, %v21793_v39 }
 0x742   :  { %14573 = vmatpush3.msra.mxu0 %v18159_v10 }
 0x743   :  { %14574 = vmatprep.subr.mxu0 %v21793_v39 }
 0x744   :  { %14530 = vmatmul.mubr.f32.gmra.mxu0 %v18241_v13  ;;  %14561 = vmatmul.mubr.f32.gmra.mxu1 %v5042_v62  ;;  %v18432_v62 = vld [vmem:[%s21590_s14] ss:$0 sm:$0xff] }
 0x745   :  { %14532 = vmatprep.mubr.msk.f32.mxu0 %vm15780_vm1, %v21793_v39  ;;  %14563 = vmatprep.mubr.msk.f32.mxu1 %vm15780_vm1, %v21793_v39 }
 0x746   :  { %14575 = vmatpush3.msra.mxu0 %v18176_v36 }
 0x747   :  { %14622 = vmatprep.subr.mxu0 %v21793_v39 }
 0x748   :  { %14533 = vmatmul.mubr.f32.gmra.mxu0 %v18256_v12  ;;  %14564 = vmatmul.mubr.f32.gmra.mxu1 %v5052_v31 }
 0x749   :  { %14535 = vmatprep.mubr.msk.f32.mxu0 %vm15780_vm1, %v21793_v39  ;;  %14566 = vmatprep.mubr.msk.f32.mxu1 %vm15780_vm1, %v21793_v39 }
 0x74c   :  { %14536 = vmatmul.mubr.f32.gmra.mxu0 %v18277_v18  ;;  %14567 = vmatmul.mubr.f32.gmra.mxu1 %v5062_v16 }
 0x74d   :  { %14538 = vmatprep.mubr.msk.f32.mxu0 %vm15780_vm1, %v21793_v39  ;;  %14569 = vmatprep.mubr.msk.f32.mxu1 %vm15780_vm1, %v21793_v39 }
 0x750   :  { %14539 = vmatmul.mubr.f32.gmra.mxu0 %v18296_v54  ;;  %14570 = vmatmul.mubr.f32.gmra.mxu1 %v5072_v49 }
 0x751   :  { %14541 = vmatprep.mubr.msk.f32.mxu0 %vm15780_vm1, %v21793_v39  ;;  %14601 = vmatprep.mubr.msk.f32.mxu1 %vm15780_vm1, %v21793_v39 }
 0x754   :  { %14542 = vmatmul.mubr.f32.gmra.mxu0 %v5061_v19  ;;  %14602 = vmatmul.mubr.f32.vlgmr.msra.gmra.mxu1 %v18218_v29 }
 0x755   :  { %14544 = vmatprep.mubr.msk.f32.mxu0 %vm15780_vm1, %v21793_v39  ;;  %14604 = vmatprep.mubr.msk.f32.mxu1 %vm15780_vm1, %v21793_v39 }
 0x758   :  { %14545 = vmatmul.mubr.f32.gmra.mxu0 %v5071_v38  ;;  %14605 = vmatmul.mubr.f32.gmra.mxu1 %v18231_v21 }
 0x759   :  { %14576 = vmatprep.mubr.msk.f32.mxu0 %vm15780_vm1, %v21793_v39  ;;  %14607 = vmatprep.mubr.msk.f32.mxu1 %vm15780_vm1, %v21793_v39 }
 0x75c   :  { %14577 = vmatmul.mubr.f32.vlgmr.msra.gmra.mxu0 %v18218_v29  ;;  %14608 = vmatmul.mubr.f32.gmra.mxu1 %v18250_v17 }
 0x75d   :  { %14579 = vmatprep.mubr.msk.f32.mxu0 %vm15780_vm1, %v21793_v39  ;;  %14610 = vmatprep.mubr.msk.f32.mxu1 %vm15780_vm1, %v21793_v39 }
 0x760   :  { %14580 = vmatmul.mubr.f32.gmra.mxu0 %v18231_v21  ;;  %14611 = vmatmul.mubr.f32.gmra.mxu1 %v18269_v40 }
 0x761   :  { %14582 = vmatprep.mubr.msk.f32.mxu0 %vm15780_vm1, %v21793_v39  ;;  %14613 = vmatprep.mubr.msk.f32.mxu1 %vm15780_vm1, %v21793_v39 }
 0x764   :  { %14583 = vmatmul.mubr.f32.gmra.mxu0 %v18250_v17  ;;  %14614 = vmatmul.mubr.f32.gmra.mxu1 %v18290_v14 }
 0x765   :  { %14585 = vmatprep.mubr.msk.f32.mxu0 %vm15780_vm1, %v21793_v39  ;;  %14616 = vmatprep.mubr.msk.f32.mxu1 %vm15780_vm1, %v21793_v39 }
 0x768   :  { %14586 = vmatmul.mubr.f32.gmra.mxu0 %v18269_v40  ;;  %14617 = vmatmul.mubr.f32.gmra.mxu1 %v18306_v9 }
 0x769   :  { %14588 = vmatprep.mubr.msk.f32.mxu0 %vm15780_vm1, %v21793_v39  ;;  %14619 = vmatprep.mubr.msk.f32.mxu1 %vm15780_vm1, %v21793_v39 }
 0x76c   :  { %14589 = vmatmul.mubr.f32.gmra.mxu0 %v18290_v14  ;;  %14620 = vmatmul.mubr.f32.gmra.mxu1 %v18316_v53 }
 0x76d   :  { %14591 = vmatprep.mubr.msk.f32.mxu0 %vm15780_vm1, %v21793_v39  ;;  %14651 = vmatprep.mubr.msk.f32.mxu1 %vm15780_vm1, %v21793_v39 }
 0x770   :  { %14592 = vmatmul.mubr.f32.gmra.mxu0 %v18306_v9 }
 0x771   :  { %14594 = vmatprep.mubr.msk.f32.mxu0 %vm15780_vm1, %v21793_v39 }
 0x774   :  { %14595 = vmatmul.mubr.f32.gmra.mxu0 %v18316_v53 }
 0x775   :  { %14626 = vmatprep.mubr.msk.f32.mxu0 %vm15780_vm1, %v21793_v39 }
 0x7dc   :  { %v18417_v29 = vpop.f32.mrf.mxu1 }
 0x7de   :  { %v14503_v44 = vpop.f32.mrf.mxu1 }
 0x7e0   :  { %v18419_v6 = vpop.f32.mrf.mxu1 }
 0x7e2   :  { %v14506_v21 = vpop.f32.mrf.mxu1 }
 0x7e4   :  { %v5016_v13 = vpop.f32.mrf.mxu0  ;;  %v18421_v55 = vpop.f32.mrf.mxu1 }
 0x7e6   :  { %v14478_v17 = vpop.f32.mrf.mxu0  ;;  %v14509_v12 = vpop.f32.mrf.mxu1 }
 0x7e8   :  { %v5026_v5 = vpop.f32.mrf.mxu0  ;;  %v18423_v40 = vpop.f32.mrf.mxu1 }
 0x7ea   :  { %v14481_v58 = vpop.f32.mrf.mxu0  ;;  %v14512_v41 = vpop.f32.mrf.mxu1 }
 0x7ec   :  { %v18425_v56 = vpop.f32.mrf.mxu0  ;;  %v5181_v18 = vpop.f32.mrf.mxu1 }
 0x7ee   :  { %v14484_v0 = vpop.f32.mrf.mxu0  ;;  %v14515_v26 = vpop.f32.mrf.mxu1 }
 0x7f0   :  { %v18427_v59 = vpop.f32.mrf.mxu0  ;;  %v5187_v27 = vpop.f32.mrf.mxu1 }
 0x7f2   :  { %v14487_v23 = vpop.f32.mrf.mxu0  ;;  %v14518_v30 = vpop.f32.mrf.mxu1 }
 0x7f3   :  { %v18463_v23 = vld [vmem:[%s21591_s15] sm:$0xf] }
 0x7f4   :  { %v5056_v14 = vpop.f32.mrf.mxu0  ;;  %v5193_v2 = vpop.f32.mrf.mxu1  ;;  %vm5660_vm8 = vcmp.gt.f32.partialorder %v18463_v23, 0.5 }
 0x7f5   :  { %v5057_v37 = vadd.f32 %v18432_v62, %v5056_v14 }
 0x7f6   :  { %v14490_v46 = vpop.f32.mrf.mxu0  ;;  %v14521_v3 = vpop.f32.mrf.mxu1 }
 0x7f7   :  { %v18435_v54 = vadd.f32 %v5181_v18, %v5057_v37  ;;  %v5662_v18 = vlaneseq  ;;  %v5027_v3 = vadd.f32 %v18432_v62, %v5026_v5 }
 0x7f8   :  { %v5066_v48 = vpop.f32.mrf.mxu0  ;;  %v5386_v24 = vpop.f32.mrf.mxu1 }
 0x7f9   :  { %v5067_v25 = vadd.f32 %v18432_v62, %v5066_v48  ;;  %v5164_v5 = vadd.f32 %v18419_v6, %v5027_v3 }
 0x7fa   :  { %v14493_v63 = vpop.f32.mrf.mxu0  ;;  %v14553_v31 = vpop.f32.mrf.mxu1 }
 0x7fb   :  { %v18438_v9 = vadd.f32 %v5187_v27, %v5067_v25  ;;  %v5017_v27 = vadd.f32 %v18432_v62, %v5016_v13 }
 0x7fc   :  { %v5076_v42 = vpop.f32.mrf.mxu0  ;;  %v18440_v60 = vpop.f32.mrf.mxu1 }
 0x7fd   :  { %v5077_v20 = vadd.f32 %v18432_v62, %v5076_v42  ;;  %v5158_v48 = vadd.f32 %v18417_v29, %v5017_v27  ;;  %v5037_v29 = vadd.f32 %v18432_v62, %v18425_v56 }
 0x7fe   :  { %v14496_v19 = vpop.f32.mrf.mxu0  ;;  %v14556_v47 = vpop.f32.mrf.mxu1 }
 0x7ff   :  { %v18443_v15 = vadd.f32 %v5193_v2, %v5077_v20  ;;  %v18465_v2 = vshrl.u32 %v5662_v18, 7  ;;  %v15781_v20 = vmov 0   ;;  %v5170_v6 = vadd.f32 %v18421_v55, %v5037_v29 }
 0x800   :  { %v5269_v34 = vpop.f32.mrf.mxu0  ;;  %v18445_v16 = vpop.f32.mrf.mxu1  ;;  %v5661_v19 = vsel %vm5660_vm8, 1, %v15781_v20 }
 0x801   :  { %v5716_v63 = vsub.s32 1, %v18465_v2  ;;  %v18474_v31 = vsub.s32 0, %v18465_v2  ;;  %v5270_v42 = vadd.f32 %v5269_v34, %v5158_v48 }
 0x802   :  { %v14528_v53 = vpop.f32.mrf.mxu0  ;;  %v14559_v11 = vpop.f32.mrf.mxu1 }
 0x803   :  { %21822 = vst [vmem:[#allocation28_spill] sm:$0xff] %v18474_v31  ;;  %v5767_v11 = vsub.s32 2, %v18465_v2  ;;  %v5665_v34 = vrot.slane %v5661_v19, %v18474_v31 }
 0x804   :  { %v5276_v38 = vpop.f32.mrf.mxu0  ;;  %v18447_v1 = vpop.f32.mrf.mxu1 }
 0x805   :  { %vm18498_vm10 = vcmp.eq.s32.totalorder %v5665_v34, 1 }
 0x806   :  { %v14531_v49 = vpop.f32.mrf.mxu0  ;;  %v14562_v45 = vpop.f32.mrf.mxu1 }
 0x807   :  { %v5818_v49 = vsub.s32 3, %v18465_v2 }
 0x808   :  { %v5283_v22 = vpop.f32.mrf.mxu0  ;;  %v18449_v61 = vpop.f32.mrf.mxu1 }
 0x809   :  { %v18494_v56 = vrot.slane %v5661_v19, %v5818_v49 }
 0x80a   :  { %v14534_v44 = vpop.f32.mrf.mxu0  ;;  %v14565_v21 = vpop.f32.mrf.mxu1 }
 0x80b   :  { %v18485_v21 = vrot.slane %v5661_v19, %v5716_v63  ;;  %21825 = vst [vmem:[#allocation25_spill] sm:$0xff] %v18494_v56  ;;  %vm5820_vm12 = vcmp.eq.s32.totalorder %v18494_v56, 1 }
 0x80c   :  { %v18451_v17 = vpop.f32.mrf.mxu0  ;;  %v18453_v12 = vpop.f32.mrf.mxu1 }
 0x80d   :  { %21823 = vst [vmem:[#allocation20_spill] sm:$0xff] %v18485_v21  ;;  %vm5718_vm9 = vcmp.eq.s32.totalorder %v18485_v21, 1 }
 0x80e   :  { %v14537_v58 = vpop.f32.mrf.mxu0  ;;  %v14568_v41 = vpop.f32.mrf.mxu1 }
 0x80f   :  { %v5277_v58 = vadd.f32 %v5276_v38, %v5164_v5  ;;  %v5387_v41 = vadd.f32 %v5386_v24, %v5270_v42  ;;  %v21826_v38 = vmov 0  ;;  %v5284_v24 = vadd.f32 %v5283_v22, %v5170_v6 }
 0x810   :  { %v18455_v0 = vpop.f32.mrf.mxu0  ;;  %v18457_v26 = vpop.f32.mrf.mxu1  ;;  %v21827_v38 = vsel %vm18498_vm10, 4294967295, %v21826_v38  ;;  %v5047_v22 = vadd.f32 %v18432_v62, %v18427_v59 }
 0x811   :  { %21828 = vst [vmem:[#allocation2_spill] sm:$0xff] %v21827_v38  ;;  %v5403_v34 = vadd.f32 %v18445_v16, %v5284_v24 }
 0x812   :  { %v14540_v30 = vpop.f32.mrf.mxu0  ;;  %v14571_v14 = vpop.f32.mrf.mxu1 }
 0x813   :  { %v18490_v30 = vrot.slane %v5661_v19, %v5767_v11 }
 0x814   :  { %v18467_v37 = vpop.f32.mrf.mxu0  ;;  %v5620_v46 = vpop.f32.mrf.mxu1 }
 0x815   :  { %21824 = vst [vmem:[#allocation23_spill] sm:$0xff] %v18490_v30  ;;  %vm5769_vm11 = vcmp.eq.s32.totalorder %v18490_v30, 1 }
 0x816   :  { %v14543_v25 = vpop.f32.mrf.mxu0  ;;  %v14603_v13 = vpop.f32.mrf.mxu1 }
 0x817   :  { %v5395_v13 = vadd.f32 %v18440_v60, %v5277_v58 }
 0x818   :  { %v18476_v47 = vpop.f32.mrf.mxu0  ;;  %v5626_v53 = vpop.f32.mrf.mxu1 }
 0x81a   :  { %v14546_v45 = vpop.f32.mrf.mxu0  ;;  %v14606_v44 = vpop.f32.mrf.mxu1 }
 0x81c   :  { %v5511_v18 = vpop.f32.mrf.mxu0  ;;  %v5632_v27 = vpop.f32.mrf.mxu1 }
 0x81d   :  { %v5512_v14 = vadd.f32 %v5511_v18, %v5387_v41 }
 0x81e   :  { %v14578_v3 = vpop.f32.mrf.mxu0  ;;  %v14609_v48 = vpop.f32.mrf.mxu1 }
 0x81f   :  { %v18502_v25 = vadd.f32 %v5620_v46, %v5512_v14  ;;  %v5176_v48 = vadd.f32 %v18423_v40, %v5047_v22 }
 0x820   :  { %v5517_v42 = vpop.f32.mrf.mxu0  ;;  %v5638_v20 = vpop.f32.mrf.mxu1 }
 0x821   :  { %v5518_v55 = vadd.f32 %v5517_v42, %v5395_v13  ;;  %v5719_v19 = vsel %vm5718_vm9, %v18502_v25, -1e+30  ;;  %v5667_v29 = vsel %vm18498_vm10, %v18502_v25, -1e+30  ;;  %v5770_v58 = vsel %vm5769_vm11, %v18502_v25, -1e+30 }
 0x822   :  { %v14581_v46 = vpop.f32.mrf.mxu0  ;;  %v14612_v60 = vpop.f32.mrf.mxu1  ;;  %v5726_v5 = vsel %vm4921_vm7, %v5719_v19, -inf  ;;  %v5674_v45 = vsel %vm4921_vm7, %v5667_v29, -inf  ;;  %v5821_v59 = vsel %vm5820_vm12, %v18502_v25, -1e+30  ;;  %v5291_v19 = vadd.f32 %v18451_v17, %v5176_v48 }
 0x823   :  { %v18517_v44 = vadd.f32 %v5626_v53, %v5518_v55  ;;  %5727 = vmax.xlane.f32.xlu0 %v5726_v5  ;;  %5675 = vmax.xlane.f32.xlu1 %v5674_v45  ;;  %v5777_v53 = vsel %vm4921_vm7, %v5770_v58, -inf  ;;  %v5828_v3 = vsel %vm4921_vm7, %v5821_v59, -inf }
 0x824   :  { %v5523_v62 = vpop.f32.mrf.mxu0  ;;  %v5644_v41 = vpop.f32.mrf.mxu1  ;;  %v5411_v17 = vadd.f32 %v18447_v1, %v5291_v19  ;;  %v5298_v1 = vadd.f32 %v18455_v0, %v18435_v54 }
 0x825   :  { %v5524_v18 = vadd.f32 %v5523_v62, %v5403_v34  ;;  %v5822_v24 = vsel %vm5820_vm12, %v18517_v44, -1e+30  ;;  %v5668_v13 = vsel %vm18498_vm10, %v18517_v44, -1e+30  ;;  %v5720_v22 = vsel %vm5718_vm9, %v18517_v44, -1e+30 }
 0x826   :  { %v14584_v6 = vpop.f32.mrf.mxu0  ;;  %v14615_v14 = vpop.f32.mrf.mxu1  ;;  %v5831_v40 = vsel %vm4921_vm7, %v5822_v24, -inf  ;;  %v5729_v59 = vsel %vm4921_vm7, %v5720_v22, -inf  ;;  %v5419_v54 = vadd.f32 %v18449_v61, %v5298_v1 }
 0x827   :  { %v18529_v16 = vadd.f32 %v5632_v27, %v5524_v18  ;;  %5778 = vmax.xlane.f32.xlu0 %v5777_v53  ;;  %5829 = vmax.xlane.f32.xlu1 %v5828_v3  ;;  %v5677_v27 = vsel %vm4921_vm7, %v5668_v13, -inf  ;;  %v5771_v6 = vsel %vm5769_vm11, %v18517_v44, -1e+30 }
 0x828   :  { %v5529_v42 = vpop.f32.mrf.mxu0  ;;  %v5650_v55 = vpop.f32.mrf.mxu1  ;;  %v5780_v48 = vsel %vm4921_vm7, %v5771_v6, -inf }
 0x829   :  { %v5669_v60 = vsel %vm18498_vm10, %v18529_v16, -1e+30  ;;  %v5530_v18 = vadd.f32 %v5529_v42, %v5411_v17  ;;  %v5772_v14 = vsel %vm5769_vm11, %v18529_v16, -1e+30  ;;  %v5721_v42 = vsel %vm5718_vm9, %v18529_v16, -1e+30 }
 0x82a   :  { %v14587_v29 = vpop.f32.mrf.mxu0  ;;  %v14618_v46 = vpop.f32.mrf.mxu1  ;;  %v5680_v62 = vsel %vm4921_vm7, %v5669_v60, -inf  ;;  %v5783_v24 = vsel %vm4921_vm7, %v5772_v14, -inf  ;;  %v5823_v19 = vsel %vm5820_vm12, %v18529_v16, -1e+30  ;;  %v5305_v60 = vadd.f32 %v18467_v37, %v18438_v9 }
 0x82b   :  { %5832 = vmax.xlane.f32.xlu0 %v5831_v40  ;;  %5678 = vmax.xlane.f32.xlu1 %v5677_v27  ;;  %v18559_v13 = vadd.f32 %v5638_v20, %v5530_v18  ;;  %v5732_v46 = vsel %vm4921_vm7, %v5721_v42, -inf  ;;  %v5834_v40 = vsel %vm4921_vm7, %v5823_v19, -inf }
 0x82c   :  { %v5535_v5 = vpop.f32.mrf.mxu0  ;;  %v5656_v45 = vpop.f32.mrf.mxu1  ;;  %v5427_v9 = vadd.f32 %v18453_v12, %v5305_v60 }
 0x82d   :  { %v5536_v20 = vadd.f32 %v5535_v5, %v5419_v54  ;;  %v5722_v27 = vsel %vm5718_vm9, %v18559_v13, -1e+30  ;;  %v5670_v22 = vsel %vm18498_vm10, %v18559_v13, -1e+30  ;;  %v5773_v5 = vsel %vm5769_vm11, %v18559_v13, -1e+30 }
 0x82e   :  { %v14590_v34 = vpop.f32.mrf.mxu0  ;;  %v14621_v58 = vpop.f32.mrf.mxu1  ;;  %v5735_v61 = vsel %vm4921_vm7, %v5722_v27, -inf  ;;  %v5683_v17 = vsel %vm4921_vm7, %v5670_v22, -inf  ;;  %v5786_v37 = vsel %vm4921_vm7, %v5773_v5, -inf }
 0x82f   :  { %5730 = vmax.xlane.f32.xlu1 %v5729_v59  ;;  %5681 = vmax.xlane.f32.xlu0 %v5680_v62  ;;  %v18580_v34 = vadd.f32 %v5644_v41, %v5536_v20  ;;  %v5824_v58 = vsel %vm5820_vm12, %v18559_v13, -1e+30  ;;  %v5312_v59 = vadd.f32 %v18476_v47, %v18443_v15 }
 0x830   :  { %v5541_v53 = vpop.f32.mrf.mxu0  ;;  %v5837_v41 = vsel %vm4921_vm7, %v5824_v58, -inf  ;;  %v18649_v58 = vrot.slane %v18463_v23, %v5716_v63  ;;  %v18665_v63 = vrot.slane %v18463_v23, %v5818_v49 }
 0x831   :  { %v5542_v62 = vadd.f32 %v5541_v53, %v5427_v9  ;;  %v5723_v18 = vsel %vm5718_vm9, %v18580_v34, -1e+30  ;;  %v5671_v6 = vsel %vm18498_vm10, %v18580_v34, -1e+30  ;;  %v5435_v14 = vadd.f32 %v18457_v26, %v5312_v59 }
 0x832   :  { %v14593_v3 = vpop.f32.mrf.mxu0  ;;  %v5738_v15 = vsel %vm4921_vm7, %v5723_v18, -inf  ;;  %v5686_v12 = vsel %vm4921_vm7, %v5671_v6, -inf  ;;  %v5825_v53 = vsel %vm5820_vm12, %v18580_v34, -1e+30  ;;  %21829 = vst [vmem:[#allocation3_spill] sm:$0xff] %v18649_v58  ;;  %v18653_v59 = vrot.slane %v18463_v23, %v18474_v31  ;;  %21832 = vst [vmem:[#allocation6_spill] sm:$0xff] %v18665_v63 }
 0x833   :  { %5781 = vmax.xlane.f32.xlu1 %v5780_v48  ;;  %5784 = vmax.xlane.f32.xlu0 %v5783_v24  ;;  %v18602_v47 = vadd.f32 %v5650_v55, %v5542_v62  ;;  %v5774_v3 = vsel %vm5769_vm11, %v18580_v34, -1e+30  ;;  %v5840_v48 = vsel %vm4921_vm7, %v5825_v53, -inf }
 0x834   :  { %v5547_v29 = vpop.f32.mrf.mxu0  ;;  %v5789_v26 = vsel %vm4921_vm7, %v5774_v3, -inf  ;;  %21830 = vst [vmem:[#allocation4_spill] sm:$0xff] %v18653_v59 }
 0x835   :  { %v5548_v1 = vadd.f32 %v5547_v29, %v5435_v14  ;;  %v5724_v55 = vsel %vm5718_vm9, %v18602_v47, -1e+30  ;;  %v5672_v42 = vsel %vm18498_vm10, %v18602_v47, -1e+30 }
 0x836   :  { %v14596_v0 = vpop.f32.mrf.mxu0  ;;  %v5741_v19 = vsel %vm4921_vm7, %v5724_v55, -inf  ;;  %v5689_v29 = vsel %vm4921_vm7, %v5672_v42, -inf }
 0x837   :  { %5733 = vmax.xlane.f32.xlu1 %v5732_v46  ;;  %5835 = vmax.xlane.f32.xlu0 %v5834_v40  ;;  %v18612_v24 = vadd.f32 %v5656_v45, %v5548_v1  ;;  %v5775_v45 = vsel %vm5769_vm11, %v18602_v47, -1e+30  ;;  %v5826_v40 = vsel %vm5820_vm12, %v18602_v47, -1e+30 }
 0x838   :  { %v5792_v0 = vsel %vm4921_vm7, %v5775_v45, -inf  ;;  %v5843_v27 = vsel %vm4921_vm7, %v5826_v40, -inf }
 0x839   :  { %v5725_v54 = vsel %vm5718_vm9, %v18612_v24, -1e+30  ;;  %v5673_v20 = vsel %vm18498_vm10, %v18612_v24, -1e+30  ;;  %v5776_v60 = vsel %vm5769_vm11, %v18612_v24, -1e+30 }
 0x83a   :  { %v5744_v46 = vsel %vm5692_vm13, %v5725_v54, -inf  ;;  %v5693_v22 = vsel %vm5692_vm13, %v5673_v20, -inf }
 0x83b   :  { %5736 = vmax.xlane.f32.xlu1 %v5735_v61  ;;  %5684 = vmax.xlane.f32.xlu0 %v5683_v17  ;;  %v5795_v61 = vsel %vm5692_vm13, %v5776_v60, -inf  ;;  %v5827_v17 = vsel %vm5820_vm12, %v18612_v24, -1e+30 }
 0x83c   :  { %v5846_v5 = vsel %vm5692_vm13, %v5827_v17, -inf }
 0x83f   :  { %5787 = vmax.xlane.f32.xlu1 %v5786_v37  ;;  %5838 = vmax.xlane.f32.xlu0 %v5837_v41  ;;  %v18658_v41 = vrot.slane %v18463_v23, %v5767_v11 }
 0x841   :  { %21831 = vst [vmem:[#allocation5_spill] sm:$0xff] %v18658_v41 }
 0x843   :  { %5739 = vmax.xlane.f32.xlu0 %v5738_v15  ;;  %5687 = vmax.xlane.f32.xlu1 %v5686_v12 }
 0x847   :  { %5841 = vmax.xlane.f32.xlu0 %v5840_v48  ;;  %5790 = vmax.xlane.f32.xlu1 %v5789_v26 }
 0x84b   :  { %5742 = vmax.xlane.f32.xlu0 %v5741_v19  ;;  %5690 = vmax.xlane.f32.xlu1 %v5689_v29 }
 0x84f   :  { %5793 = vmax.xlane.f32.xlu1 %v5792_v0  ;;  %5745 = vmax.xlane.f32.xlu0 %v5744_v46 }
 0x853   :  { %5844 = vmax.xlane.f32.xlu0 %v5843_v27  ;;  %5694 = vmax.xlane.f32.xlu1 %v5693_v22 }
 0x857   :  { %5796 = vmax.xlane.f32.xlu1 %v5795_v61 }
 0x85b   :  { %5847 = vmax.xlane.f32.xlu1 %v5846_v5 }
 0x8ac   :  { %v5728_v9 = vpop.xlane.xlu0 %5727  ;;  %v5676_v37 = vpop.xlane.xlu1 %5675 }
 0x8ad   :  { %v5751_v62 = vmul.f32 %v18649_v58, %v5728_v9  ;;  %v5700_v18 = vmul.f32 %v18653_v59, %v5676_v37 }
 0x8af   :  { %v5758_v15 = vadd.f32 %v5751_v62, %v5700_v18 }
 0x8b0   :  { %v5779_v6 = vpop.xlane.xlu0 %5778  ;;  %v5830_v14 = vpop.xlane.xlu1 %5829 }
 0x8b1   :  { %v5802_v12 = vmul.f32 %v18658_v41, %v5779_v6  ;;  %v5853_v53 = vmul.f32 %v18665_v63, %v5830_v14 }
 0x8b3   :  { %v5809_v1 = vadd.f32 %v5802_v12, %v5758_v15 }
 0x8b4   :  { %v5833_v3 = vpop.xlane.xlu0 %5832  ;;  %v5679_v11 = vpop.xlane.xlu1 %5678 }
 0x8b5   :  { %v5860_v48 = vadd.f32 %v5853_v53, %v5809_v1  ;;  %v5701_v23 = vmul.f32 %v18653_v59, %v5679_v11  ;;  %v5854_v0 = vmul.f32 %v18665_v63, %v5833_v3 }
 0x8b7   :  { %v5867_v26 = vsub.f32 %v18502_v25, %v5860_v48 }
 0x8b8   :  { %v5731_v55 = vpop.xlane.xlu1 %5730  ;;  %v5682_v42 = vpop.xlane.xlu0 %5681 }
 0x8b9   :  { %v5874_v19 = vmul.f32 1.442695, %v5867_v26  ;;  %v5752_v2 = vmul.f32 %v18649_v58, %v5731_v55  ;;  %v5702_v25 = vmul.f32 %v18653_v59, %v5682_v42 }
 0x8bb   :  { %15702 = vpow2.f32 %v5874_v19  ;;  %v5759_v45 = vadd.f32 %v5752_v2, %v5701_v23 }
 0x8bc   :  { %v5782_v49 = vpop.xlane.xlu1 %5781  ;;  %v5785_v29 = vpop.xlane.xlu0 %5784 }
 0x8bd   :  { %v5803_v54 = vmul.f32 %v18658_v41, %v5782_v49  ;;  %v5804_v61 = vmul.f32 %v18658_v41, %v5785_v29 }
 0x8bf   :  { %v5810_v46 = vadd.f32 %v5803_v54, %v5759_v45 }
 0x8c0   :  { %v5734_v40 = vpop.xlane.xlu1 %5733  ;;  %v5836_v20 = vpop.xlane.xlu0 %5835 }
 0x8c1   :  { %v5861_v27 = vadd.f32 %v5854_v0, %v5810_v46  ;;  %v5753_v22 = vmul.f32 %v18649_v58, %v5734_v40  ;;  %v5855_v5 = vmul.f32 %v18665_v63, %v5836_v20 }
 0x8c3   :  { %v5868_v60 = vsub.f32 %v18517_v44, %v5861_v27  ;;  %v5760_v17 = vadd.f32 %v5753_v22, %v5702_v25 }
 0x8c4   :  { %v5737_v9 = vpop.xlane.xlu1 %5736  ;;  %v5685_v37 = vpop.xlane.xlu0 %5684 }
 0x8c5   :  { %v5876_v62 = vmul.f32 1.442695, %v5868_v60  ;;  %v5811_v18 = vadd.f32 %v5804_v61, %v5760_v17  ;;  %v5754_v6 = vmul.f32 %v18649_v58, %v5737_v9  ;;  %v5703_v14 = vmul.f32 %v18653_v59, %v5685_v37 }
 0x8c7   :  { %15704 = vpow2.f32 %v5876_v62  ;;  %v5862_v15 = vadd.f32 %v5855_v5, %v5811_v18  ;;  %v5761_v3 = vadd.f32 %v5754_v6, %v5703_v14 }
 0x8c8   :  { %v18681_v12 = vpop.eup %15702  ;;  %v5788_v1 = vpop.xlane.xlu1 %5787 }
 0x8c9   :  { %v5839_v53 = vpop.xlane.xlu0 %5838  ;;  %v5869_v44 = vsub.f32 %v18529_v16, %v5862_v15  ;;  %v5805_v11 = vmul.f32 %v18658_v41, %v5788_v1  ;;  %v5888_v48 = vmul.f32 %v18681_v12, %v18653_v59  ;;  %v6014_v55 = vmul.f32 %v18681_v12, %v18665_v63 }
 0x8ca   :  { %v5856_v26 = vmul.f32 %v18665_v63, %v5839_v53  ;;  %v5930_v23 = vmul.f32 %v18681_v12, %v18649_v58  ;;  %v5972_v20 = vmul.f32 %v18681_v12, %v18658_v41 }
 0x8cb   :  { %v5878_v42 = vmul.f32 1.442695, %v5869_v44  ;;  %v5812_v19 = vadd.f32 %v5805_v11, %v5761_v3  ;;  %v5895_v2 = vsel %vm4921_vm7, %v5888_v48, 0.0  ;;  %v6021_v29 = vsel %vm4921_vm7, %v6014_v55, 0.0 }
 0x8cc   :  { %v5688_v16 = vpop.xlane.xlu1 %5687  ;;  %5896 = vadd.xlane.f32.xlu0 %v5895_v2  ;;  %6022 = vadd.xlane.f32.xlu1 %v6021_v29  ;;  %v5937_v40 = vsel %vm4921_vm7, %v5930_v23, 0.0  ;;  %v5979_v9 = vsel %vm4921_vm7, %v5972_v20, 0.0 }
 0x8cd   :  { %v5740_v49 = vpop.xlane.xlu0 %5739  ;;  %15706 = vpow2.f32 %v5878_v42  ;;  %v5863_v45 = vadd.f32 %v5856_v26, %v5812_v19  ;;  %v5704_v0 = vmul.f32 %v18653_v59, %v5688_v16 }
 0x8ce   :  { %v5755_v54 = vmul.f32 %v18649_v58, %v5740_v49 }
 0x8cf   :  { %v5870_v46 = vsub.f32 %v18559_v13, %v5863_v45 }
 0x8d0   :  { %v5791_v27 = vpop.xlane.xlu1 %5790  ;;  %5938 = vadd.xlane.f32.xlu0 %v5937_v40  ;;  %v5762_v60 = vadd.f32 %v5755_v54, %v5704_v0 }
 0x8d1   :  { %v5842_v25 = vpop.xlane.xlu0 %5841  ;;  %v5880_v22 = vmul.f32 1.442695, %v5870_v46  ;;  %v5806_v61 = vmul.f32 %v18658_v41, %v5791_v27 }
 0x8d2   :  { %v5857_v17 = vmul.f32 %v18665_v63, %v5842_v25 }
 0x8d3   :  { %v5813_v5 = vadd.f32 %v5806_v61, %v5762_v60  ;;  %15708 = vpow2.f32 %v5880_v22 }
 0x8d4   :  { %v18703_v37 = vpop.eup %15704  ;;  %v5691_v62 = vpop.xlane.xlu1 %5690  ;;  %5980 = vadd.xlane.f32.xlu0 %v5979_v9 }
 0x8d5   :  { %v5743_v13 = vpop.xlane.xlu0 %5742  ;;  %v5864_v18 = vadd.f32 %v5857_v17, %v5813_v5  ;;  %v6015_v6 = vmul.f32 %v18703_v37, %v18665_v63  ;;  %v5889_v14 = vmul.f32 %v18703_v37, %v18653_v59  ;;  %v5705_v53 = vmul.f32 %v18653_v59, %v5691_v62 }
 0x8d6   :  { %v5756_v1 = vmul.f32 %v18649_v58, %v5743_v13  ;;  %v5931_v26 = vmul.f32 %v18703_v37, %v18649_v58  ;;  %v5973_v29 = vmul.f32 %v18703_v37, %v18658_v41 }
 0x8d7   :  { %v5871_v15 = vsub.f32 %v18580_v34, %v5864_v18  ;;  %v6024_v44 = vsel %vm4921_vm7, %v6015_v6, 0.0  ;;  %v5898_v48 = vsel %vm4921_vm7, %v5889_v14, 0.0 }
 0x8d8   :  { %v5794_v3 = vpop.xlane.xlu1 %5793  ;;  %6025 = vadd.xlane.f32.xlu0 %v6024_v44  ;;  %5899 = vadd.xlane.f32.xlu1 %v5898_v48  ;;  %v5763_v34 = vadd.f32 %v5756_v1, %v5705_v53  ;;  %v5940_v49 = vsel %vm4921_vm7, %v5931_v26, 0.0  ;;  %v5982_v25 = vsel %vm4921_vm7, %v5973_v29, 0.0 }
 0x8d9   :  { %v5746_v11 = vpop.xlane.xlu0 %5745  ;;  %v5882_v55 = vmul.f32 1.442695, %v5871_v15  ;;  %v5807_v42 = vmul.f32 %v18658_v41, %v5794_v3 }
 0x8da   :  { %v18717_v19 = vpop.eup %15706  ;;  %v5757_v17 = vmul.f32 %v18649_v58, %v5746_v11 }
 0x8db   :  { %v5890_v2 = vmul.f32 %v18717_v19, %v18653_v59  ;;  %15710 = vpow2.f32 %v5882_v55  ;;  %v5814_v45 = vadd.f32 %v5807_v42, %v5763_v34  ;;  %v5974_v46 = vmul.f32 %v18717_v19, %v18658_v41 }
 0x8dc   :  { %v5695_v16 = vpop.xlane.xlu1 %5694  ;;  %5941 = vadd.xlane.f32.xlu1 %v5940_v49  ;;  %v5932_v22 = vmul.f32 %v18717_v19, %v18649_v58  ;;  %v6016_v60 = vmul.f32 %v18717_v19, %v18665_v63 }
 0x8dd   :  { %v5845_v23 = vpop.xlane.xlu0 %5844  ;;  %v5901_v0 = vsel %vm4921_vm7, %v5890_v2, 0.0  ;;  %v5706_v20 = vmul.f32 %v18653_v59, %v5695_v16  ;;  %v5985_v13 = vsel %vm4921_vm7, %v5974_v46, 0.0 }
 0x8de   :  { %v5858_v54 = vmul.f32 %v18665_v63, %v5845_v23  ;;  %5902 = vadd.xlane.f32.xlu0 %v5901_v0  ;;  %v5943_v6 = vsel %vm4921_vm7, %v5932_v22, 0.0  ;;  %v6027_v15 = vsel %vm4921_vm7, %v6016_v60, 0.0 }
 0x8df   :  { %v5764_v18 = vadd.f32 %v5757_v17, %v5706_v20 }
 0x8e0   :  { %v5865_v40 = vadd.f32 %v5858_v54, %v5814_v45  ;;  %v5797_v27 = vpop.xlane.xlu1 %5796  ;;  %v18734_v61 = vpop.eup %15708  ;;  %5983 = vadd.xlane.f32.xlu1 %v5982_v25 }
 0x8e1   :  { %v5808_v9 = vmul.f32 %v18658_v41, %v5797_v27  ;;  %v5933_v1 = vmul.f32 %v18734_v61, %v18649_v58  ;;  %v5891_v44 = vmul.f32 %v18734_v61, %v18653_v59  ;;  %v5975_v48 = vmul.f32 %v18734_v61, %v18658_v41 }
 0x8e2   :  { %v5872_v5 = vsub.f32 %v18602_v47, %v5865_v40  ;;  %5986 = vadd.xlane.f32.xlu0 %v5985_v13  ;;  %v6017_v34 = vmul.f32 %v18734_v61, %v18665_v63 }
 0x8e3   :  { %v5815_v53 = vadd.f32 %v5808_v9, %v5764_v18  ;;  %v5946_v11 = vsel %vm4921_vm7, %v5933_v1, 0.0  ;;  %v5904_v42 = vsel %vm4921_vm7, %v5891_v44, 0.0  ;;  %v5988_v23 = vsel %vm4921_vm7, %v5975_v48, 0.0 }
 0x8e4   :  { %v5884_v62 = vmul.f32 1.442695, %v5872_v5  ;;  %v5848_v14 = vpop.xlane.xlu1 %5847  ;;  %5944 = vadd.xlane.f32.xlu1 %v5943_v6  ;;  %v6030_v16 = vsel %vm4921_vm7, %v6017_v34, 0.0 }
 0x8e5   :  { %v5859_v47 = vmul.f32 %v18665_v63, %v5848_v14 }
 0x8e6   :  { %15712 = vpow2.f32 %v5884_v62  ;;  %6028 = vadd.xlane.f32.xlu0 %v6027_v15 }
 0x8e7   :  { %v5866_v3 = vadd.f32 %v5859_v47, %v5815_v53 }
 0x8e8   :  { %v18750_v26 = vpop.eup %15710  ;;  %5947 = vadd.xlane.f32.xlu1 %v5946_v11 }
 0x8e9   :  { %v5873_v55 = vsub.f32 %v18612_v24, %v5866_v3  ;;  %v5892_v49 = vmul.f32 %v18750_v26, %v18653_v59  ;;  %v5934_v24 = vmul.f32 %v18750_v26, %v18649_v58  ;;  %v5976_v45 = vmul.f32 %v18750_v26, %v18658_v41 }
 0x8ea   :  { %5905 = vadd.xlane.f32.xlu0 %v5904_v42  ;;  %v6018_v0 = vmul.f32 %v18750_v26, %v18665_v63 }
 0x8eb   :  { %v5886_v2 = vmul.f32 1.442695, %v5873_v55  ;;  %v5907_v29 = vsel %vm4921_vm7, %v5892_v49, 0.0  ;;  %v5949_v54 = vsel %vm4921_vm7, %v5934_v24, 0.0  ;;  %v5991_v40 = vsel %vm4921_vm7, %v5976_v45, 0.0 }
 0x8ec   :  { %5989 = vadd.xlane.f32.xlu1 %v5988_v23  ;;  %v6033_v25 = vsel %vm4921_vm7, %v6018_v0, 0.0 }
 0x8ed   :  { %15714 = vpow2.f32 %v5886_v2 }
 0x8ee   :  { %6031 = vadd.xlane.f32.xlu0 %v6030_v16 }
 0x8f0   :  { %5908 = vadd.xlane.f32.xlu1 %v5907_v29 }
 0x8f2   :  { %5950 = vadd.xlane.f32.xlu0 %v5949_v54 }
 0x8f3   :  { %v18768_v46 = vpop.eup %15712 }
 0x8f4   :  { %v5893_v20 = vmul.f32 %v18768_v46, %v18653_v59  ;;  %5992 = vadd.xlane.f32.xlu1 %v5991_v40  ;;  %v5935_v27 = vmul.f32 %v18768_v46, %v18649_v58  ;;  %v5977_v60 = vmul.f32 %v18768_v46, %v18658_v41  ;;  %v6019_v6 = vmul.f32 %v18768_v46, %v18665_v63 }
 0x8f6   :  { %6034 = vadd.xlane.f32.xlu0 %v6033_v25  ;;  %v5910_v22 = vsel %vm4921_vm7, %v5893_v20, 0.0  ;;  %v5952_v17 = vsel %vm4921_vm7, %v5935_v27, 0.0  ;;  %v5994_v13 = vsel %vm4921_vm7, %v5977_v60, 0.0  ;;  %v6036_v1 = vsel %vm4921_vm7, %v6019_v6, 0.0 }
 0x8f8   :  { %5911 = vadd.xlane.f32.xlu1 %v5910_v22 }
 0x8fa   :  { %v18780_v5 = vpop.eup %15714  ;;  %5953 = vadd.xlane.f32.xlu0 %v5952_v17 }
 0x8fb   :  { %v5936_v9 = vmul.f32 %v18780_v5, %v18649_v58  ;;  %v5894_v62 = vmul.f32 %v18780_v5, %v18653_v59  ;;  %v5978_v15 = vmul.f32 %v18780_v5, %v18658_v41  ;;  %v6020_v47 = vmul.f32 %v18780_v5, %v18665_v63 }
 0x8fc   :  { %5995 = vadd.xlane.f32.xlu1 %v5994_v13 }
 0x8fd   :  { %v5955_v18 = vsel %vm5692_vm13, %v5936_v9, 0.0  ;;  %v5913_v14 = vsel %vm5692_vm13, %v5894_v62, 0.0  ;;  %v5997_v53 = vsel %vm5692_vm13, %v5978_v15, 0.0  ;;  %v6039_v44 = vsel %vm5692_vm13, %v6020_v47, 0.0 }
 0x8fe   :  { %5956 = vadd.xlane.f32.xlu0 %v5955_v18 }
 0x900   :  { %5914 = vadd.xlane.f32.xlu1 %v5913_v14 }
 0x902   :  { %6037 = vadd.xlane.f32.xlu0 %v6036_v1 }
 0x904   :  { %5998 = vadd.xlane.f32.xlu1 %v5997_v53 }
 0x908   :  { %6040 = vadd.xlane.f32.xlu1 %v6039_v44 }
 0x955   :  { %v5897_v3 = vpop.xlane.xlu0 %5896  ;;  %v6023_v42 = vpop.xlane.xlu1 %6022 }
 0x956   :  { %v5916_v55 = vmul.f32 %v5897_v3, %v18653_v59  ;;  %v6042_v49 = vmul.f32 %v6023_v42, %v18665_v63 }
 0x959   :  { %v5939_v11 = vpop.xlane.xlu0 %5938 }
 0x95a   :  { %v5958_v48 = vmul.f32 %v5939_v11, %v18649_v58 }
 0x95c   :  { %v5965_v2 = vadd.f32 %v5958_v48, %v5916_v55 }
 0x95d   :  { %v5981_v34 = vpop.xlane.xlu0 %5980 }
 0x95e   :  { %v6000_v23 = vmul.f32 %v5981_v34, %v18658_v41 }
 0x960   :  { %v6007_v16 = vadd.f32 %v6000_v23, %v5965_v2 }
 0x961   :  { %v5900_v29 = vpop.xlane.xlu1 %5899  ;;  %v6026_v45 = vpop.xlane.xlu0 %6025 }
 0x962   :  { %v6049_v24 = vadd.f32 %v6042_v49, %v6007_v16  ;;  %v5917_v20 = vmul.f32 %v5900_v29, %v18653_v59  ;;  %v6043_v17 = vmul.f32 %v6026_v45, %v18665_v63 }
 0x964   :  { %15716 = vrcp.f32 %v6049_v24 }
 0x965   :  { %v5942_v54 = vpop.xlane.xlu1 %5941 }
 0x966   :  { %v5959_v0 = vmul.f32 %v5942_v54, %v18649_v58 }
 0x967   :  { %v5903_v40 = vpop.xlane.xlu0 %5902 }
 0x968   :  { %v5966_v27 = vadd.f32 %v5959_v0, %v5917_v20  ;;  %v5918_v62 = vmul.f32 %v5903_v40, %v18653_v59 }
 0x969   :  { %v5984_v25 = vpop.xlane.xlu1 %5983 }
 0x96a   :  { %v6001_v22 = vmul.f32 %v5984_v25, %v18658_v41 }
 0x96b   :  { %v5987_v60 = vpop.xlane.xlu0 %5986 }
 0x96c   :  { %v6008_v9 = vadd.f32 %v6001_v22, %v5966_v27  ;;  %v6002_v1 = vmul.f32 %v5987_v60, %v18658_v41 }
 0x96d   :  { %v5945_v13 = vpop.xlane.xlu1 %5944 }
 0x96e   :  { %v6050_v18 = vadd.f32 %v6043_v17, %v6008_v9  ;;  %v5960_v6 = vmul.f32 %v5945_v13, %v18649_v58 }
 0x96f   :  { %v6029_v14 = vpop.xlane.xlu0 %6028 }
 0x970   :  { %15718 = vrcp.f32 %v6050_v18  ;;  %v5967_v53 = vadd.f32 %v5960_v6, %v5918_v62  ;;  %v6044_v11 = vmul.f32 %v6029_v14, %v18665_v63 }
 0x971   :  { %v15717_v15 = vpop.eup %15716  ;;  %v5948_v47 = vpop.xlane.xlu1 %5947 }
 0x972   :  { %v18810_v44 = vmul.f32 %v15717_v15, %v18681_v12  ;;  %v6009_v3 = vadd.f32 %v6002_v1, %v5967_v53  ;;  %v5961_v55 = vmul.f32 %v5948_v47, %v18649_v58 }
 0x973   :  { %v5906_v48 = vpop.xlane.xlu0 %5905 }
 0x974   :  { %v5919_v42 = vmul.f32 %v5906_v48, %v18653_v59  ;;  %v6162_v34 = vmul.f32 %v18810_v44, %v18658_v41  ;;  %v6115_v2 = vmul.f32 %v18810_v44, %v18649_v58  ;;  %v6051_v23 = vadd.f32 %v6044_v11, %v6009_v3 }
 0x975   :  { %v5990_v16 = vpop.xlane.xlu1 %5989  ;;  %v6070_v29 = vmul.f32 %v18810_v44, %v18653_v59  ;;  %v6209_v27 = vmul.f32 %v18810_v44, %v18665_v63 }
 0x976   :  { %v5968_v49 = vadd.f32 %v5961_v55, %v5919_v42  ;;  %v6169_v12 = vsel %vm4921_vm7, %v6162_v34, 0.0  ;;  %v6122_v24 = vsel %vm4921_vm7, %v6115_v2, 0.0  ;;  %15720 = vrcp.f32 %v6051_v23 }
 0x977   :  { %v6003_v45 = vmul.f32 %v5990_v16, %v18658_v41  ;;  %v6032_v54 = vpop.xlane.xlu0 %6031  ;;  %6170 = vadd.xlane.f32.xlu1 %v6169_v12  ;;  %6123 = vadd.xlane.f32.xlu0 %v6122_v24  ;;  %v6077_v25 = vsel %vm4921_vm7, %v6070_v29, 0.0  ;;  %v6216_v6 = vsel %vm4921_vm7, %v6209_v27, 0.0 }
 0x978   :  { %v6045_v0 = vmul.f32 %v6032_v54, %v18665_v63 }
 0x979   :  { %v6010_v40 = vadd.f32 %v6003_v45, %v5968_v49  ;;  %v5909_v20 = vpop.xlane.xlu1 %5908 }
 0x97a   :  { %v5920_v17 = vmul.f32 %v5909_v20, %v18653_v59 }
 0x97b   :  { %v6052_v22 = vadd.f32 %v6045_v0, %v6010_v40  ;;  %v5951_v60 = vpop.xlane.xlu0 %5950  ;;  %6078 = vadd.xlane.f32.xlu0 %v6077_v25 }
 0x97c   :  { %v5962_v9 = vmul.f32 %v5951_v60, %v18649_v58 }
 0x97d   :  { %15722 = vrcp.f32 %v6052_v22  ;;  %v15719_v13 = vpop.eup %15718  ;;  %v5993_v18 = vpop.xlane.xlu1 %5992 }
 0x97e   :  { %v5969_v62 = vadd.f32 %v5962_v9, %v5920_v17  ;;  %v6004_v14 = vmul.f32 %v5993_v18, %v18658_v41  ;;  %v18833_v1 = vmul.f32 %v15719_v13, %v18703_v37 }
 0x97f   :  { %v6035_v15 = vpop.xlane.xlu0 %6034  ;;  %6217 = vadd.xlane.f32.xlu0 %v6216_v6 }
 0x980   :  { %v6046_v53 = vmul.f32 %v6035_v15, %v18665_v63  ;;  %v6011_v47 = vadd.f32 %v6004_v14, %v5969_v62  ;;  %v6163_v3 = vmul.f32 %v18833_v1, %v18658_v41  ;;  %v6116_v11 = vmul.f32 %v18833_v1, %v18649_v58 }
 0x981   :  { %v5912_v48 = vpop.xlane.xlu1 %5911  ;;  %v6071_v37 = vmul.f32 %v18833_v1, %v18653_v59  ;;  %v6210_v0 = vmul.f32 %v18833_v1, %v18665_v63 }
 0x982   :  { %v6053_v55 = vadd.f32 %v6046_v53, %v6011_v47  ;;  %v6172_v34 = vsel %vm4921_vm7, %v6163_v3, 0.0  ;;  %v6125_v2 = vsel %vm4921_vm7, %v6116_v11, 0.0  ;;  %v5921_v12 = vmul.f32 %v5912_v48, %v18653_v59 }
 0x983   :  { %v5954_v42 = vpop.xlane.xlu0 %5953  ;;  %v15721_v23 = vpop.eup %15720  ;;  %6173 = vadd.xlane.f32.xlu0 %v6172_v34  ;;  %6126 = vadd.xlane.f32.xlu1 %v6125_v2  ;;  %v6080_v45 = vsel %vm4921_vm7, %v6071_v37, 0.0  ;;  %v6219_v60 = vsel %vm4921_vm7, %v6210_v0, 0.0 }
 0x984   :  { %v5963_v49 = vmul.f32 %v5954_v42, %v18649_v58  ;;  %15724 = vrcp.f32 %v6053_v55  ;;  %v18846_v16 = vmul.f32 %v15721_v23, %v18717_v19 }
 0x985   :  { %v5996_v24 = vpop.xlane.xlu1 %5995 }
 0x986   :  { %v6117_v54 = vmul.f32 %v18846_v16, %v18649_v58  ;;  %v5970_v40 = vadd.f32 %v5963_v49, %v5921_v12  ;;  %v6005_v20 = vmul.f32 %v5996_v24, %v18658_v41  ;;  %v6072_v17 = vmul.f32 %v18846_v16, %v18653_v59 }
 0x987   :  { %v5957_v29 = vpop.xlane.xlu0 %5956  ;;  %6081 = vadd.xlane.f32.xlu1 %v6080_v45  ;;  %v6164_v47 = vmul.f32 %v18846_v16, %v18658_v41  ;;  %v6211_v37 = vmul.f32 %v18846_v16, %v18665_v63 }
 0x988   :  { %v6128_v25 = vsel %vm4921_vm7, %v6117_v54, 0.0  ;;  %v6012_v13 = vadd.f32 %v6005_v20, %v5970_v40  ;;  %v5964_v14 = vmul.f32 %v5957_v29, %v18649_v58 }
 0x989   :  { %6129 = vadd.xlane.f32.xlu0 %v6128_v25  ;;  %v5915_v27 = vpop.xlane.xlu1 %5914  ;;  %v6175_v2 = vsel %vm4921_vm7, %v6164_v47, 0.0  ;;  %v6222_v54 = vsel %vm4921_vm7, %v6211_v37, 0.0 }
 0x98a   :  { %v15723_v19 = vpop.eup %15722  ;;  %v5922_v18 = vmul.f32 %v5915_v27, %v18653_v59 }
 0x98b   :  { %v6038_v22 = vpop.xlane.xlu0 %6037  ;;  %v18860_v9 = vmul.f32 %v15723_v19, %v18734_v61  ;;  %6220 = vadd.xlane.f32.xlu1 %v6219_v60  ;;  %v6083_v61 = vsel %vm4921_vm7, %v6072_v17, 0.0 }
 0x98c   :  { %v6047_v62 = vmul.f32 %v6038_v22, %v18665_v63  ;;  %v5971_v55 = vadd.f32 %v5964_v14, %v5922_v18 }
 0x98d   :  { %v6118_v6 = vmul.f32 %v18860_v9, %v18649_v58  ;;  %v5999_v53 = vpop.xlane.xlu1 %5998  ;;  %v6073_v48 = vmul.f32 %v18860_v9, %v18653_v59  ;;  %v6165_v23 = vmul.f32 %v18860_v9, %v18658_v41  ;;  %v6212_v40 = vmul.f32 %v18860_v9, %v18665_v63 }
 0x98e   :  { %v6054_v15 = vadd.f32 %v6047_v62, %v6012_v13  ;;  %v6006_v3 = vmul.f32 %v5999_v53, %v18658_v41 }
 0x98f   :  { %v6131_v11 = vsel %vm4921_vm7, %v6118_v6, 0.0  ;;  %6084 = vadd.xlane.f32.xlu1 %v6083_v61  ;;  %v6086_v24 = vsel %vm4921_vm7, %v6073_v48, 0.0  ;;  %v6178_v0 = vsel %vm4921_vm7, %v6165_v23, 0.0  ;;  %v6225_v25 = vsel %vm4921_vm7, %v6212_v40, 0.0 }
 0x990   :  { %15726 = vrcp.f32 %v6054_v15  ;;  %6132 = vadd.xlane.f32.xlu0 %v6131_v11  ;;  %v6013_v49 = vadd.f32 %v6006_v3, %v5971_v55 }
 0x991   :  { %v15725_v42 = vpop.eup %15724  ;;  %v6041_v34 = vpop.xlane.xlu1 %6040 }
 0x992   :  { %v6048_v12 = vmul.f32 %v6041_v34, %v18665_v63  ;;  %v18882_v29 = vmul.f32 %v15725_v42, %v18750_v26 }
 0x993   :  { %6176 = vadd.xlane.f32.xlu1 %v6175_v2 }
 0x994   :  { %6087 = vadd.xlane.f32.xlu0 %v6086_v24  ;;  %v6055_v45 = vadd.f32 %v6048_v12, %v6013_v49  ;;  %v6074_v20 = vmul.f32 %v18882_v29, %v18653_v59  ;;  %v6119_v19 = vmul.f32 %v18882_v29, %v18649_v58  ;;  %v6166_v27 = vmul.f32 %v18882_v29, %v18658_v41  ;;  %v3658_v12 = vld [vmem:[%s21592_s18] sm:$0xff]  ;;  %v3659_v24 = vld [vmem:[%s21592_s18 + $0x8] sm:$0xff] }
 0x995   :  { %v6213_v62 = vmul.f32 %v18882_v29, %v18665_v63 }
 0x996   :  { %15728 = vrcp.f32 %v6055_v45  ;;  %v6089_v26 = vsel %vm4921_vm7, %v6074_v20, 0.0  ;;  %v6134_v17 = vsel %vm4921_vm7, %v6119_v19, 0.0  ;;  %v6181_v13 = vsel %vm4921_vm7, %v6166_v27, 0.0 }
 0x997   :  { %6223 = vadd.xlane.f32.xlu1 %v6222_v54  ;;  %v6228_v14 = vsel %vm4921_vm7, %v6213_v62, 0.0 }
 0x998   :  { %6179 = vadd.xlane.f32.xlu0 %v6178_v0 }
 0x99b   :  { %6226 = vadd.xlane.f32.xlu1 %v6225_v25 }
 0x99c   :  { %6090 = vadd.xlane.f32.xlu0 %v6089_v26 }
 0x99d   :  { %v15727_v22 = vpop.eup %15726 }
 0x99e   :  { %v18897_v60 = vmul.f32 %v15727_v22, %v18768_v46 }
 0x99f   :  { %6135 = vadd.xlane.f32.xlu1 %v6134_v17 }
 0x9a0   :  { %6182 = vadd.xlane.f32.xlu0 %v6181_v13  ;;  %v6167_v18 = vmul.f32 %v18897_v60, %v18658_v41  ;;  %v6120_v46 = vmul.f32 %v18897_v60, %v18649_v58  ;;  %v6075_v61 = vmul.f32 %v18897_v60, %v18653_v59  ;;  %v6214_v34 = vmul.f32 %v18897_v60, %v18665_v63 }
 0x9a2   :  { %v6184_v6 = vsel %vm4921_vm7, %v6167_v18, 0.0  ;;  %v6137_v47 = vsel %vm4921_vm7, %v6120_v46, 0.0  ;;  %v6092_v55 = vsel %vm4921_vm7, %v6075_v61, 0.0  ;;  %v6231_v23 = vsel %vm4921_vm7, %v6214_v34, 0.0 }
 0x9a3   :  { %v15729_v15 = vpop.eup %15728  ;;  %6229 = vadd.xlane.f32.xlu1 %v6228_v14 }
 0x9a4   :  { %6185 = vadd.xlane.f32.xlu0 %v6184_v6  ;;  %v18910_v53 = vmul.f32 %v15729_v15, %v18780_v5 }
 0x9a6   :  { %v6121_v3 = vmul.f32 %v18910_v53, %v18649_v58  ;;  %v6076_v48 = vmul.f32 %v18910_v53, %v18653_v59  ;;  %v6168_v5 = vmul.f32 %v18910_v53, %v18658_v41  ;;  %v6215_v37 = vmul.f32 %v18910_v53, %v18665_v63 }
 0x9a7   :  { %6138 = vadd.xlane.f32.xlu1 %v6137_v47 }
 0x9a8   :  { %v6140_v11 = vsel %vm5692_vm13, %v6121_v3, 0.0  ;;  %v6095_v42 = vsel %vm5692_vm13, %v6076_v48, 0.0  ;;  %v6187_v2 = vsel %vm5692_vm13, %v6168_v5, 0.0  ;;  %v6234_v49 = vsel %vm5692_vm13, %v6215_v37, 0.0 }
 0x9a9   :  { %6141 = vadd.xlane.f32.xlu0 %v6140_v11 }
 0x9ab   :  { %6093 = vadd.xlane.f32.xlu1 %v6092_v55 }
 0x9ad   :  { %6096 = vadd.xlane.f32.xlu0 %v6095_v42 }
 0x9af   :  { %6188 = vadd.xlane.f32.xlu1 %v6187_v2 }
 0x9b1   :  { %6232 = vadd.xlane.f32.xlu0 %v6231_v23 }
 0x9b3   :  { %6235 = vadd.xlane.f32.xlu1 %v6234_v49 }
 0x9c4   :  { %4162 = vrot.lane.b32.xlu1 %v3658_v12, %s15782_s27 }
 0x9c7   :  { %4164 = vrot.lane.b32.xlu0 %v3659_v24, %s15782_s27 }
 0xa00   :  { %v6124_v45 = vpop.xlane.xlu0 %6123  ;;  %v6171_v0 = vpop.xlane.xlu1 %6170 }
 0xa04   :  { %v6079_v54 = vpop.xlane.xlu0 %6078 }
 0xa08   :  { %v6218_v40 = vpop.xlane.xlu0 %6217 }
 0xa0c   :  { %v6127_v20 = vpop.xlane.xlu1 %6126  ;;  %v6174_v25 = vpop.xlane.xlu0 %6173 }
 0xa0d   :  { %v6143_v3 = vadd.f32 %v6127_v20, %v6124_v45  ;;  %v6190_v2 = vadd.f32 %v6174_v25, %v6171_v0 }
 0xa10   :  { %v6082_v26 = vpop.xlane.xlu1 %6081 }
 0xa11   :  { %v6098_v48 = vadd.f32 %v6082_v26, %v6079_v54 }
 0xa12   :  { %v6130_v19 = vpop.xlane.xlu0 %6129 }
 0xa13   :  { %v6144_v61 = vadd.f32 %v6143_v3, %v6130_v19 }
 0xa14   :  { %v6221_v27 = vpop.xlane.xlu1 %6220 }
 0xa15   :  { %v6237_v56 = vadd.f32 %v6221_v27, %v6218_v40 }
 0xa18   :  { %v6085_v17 = vpop.xlane.xlu1 %6084 }
 0xa19   :  { %v6133_v22 = vpop.xlane.xlu0 %6132  ;;  %v6099_v42 = vadd.f32 %v6098_v48, %v6085_v17 }
 0xa1a   :  { %v6145_v55 = vadd.f32 %v6144_v61, %v6133_v22 }
 0xa1c   :  { %v6177_v62 = vpop.xlane.xlu1 %6176 }
 0xa1d   :  { %v6088_v13 = vpop.xlane.xlu0 %6087  ;;  %v6191_v12 = vadd.f32 %v6190_v2, %v6177_v62 }
 0xa1e   :  { %v6100_v23 = vadd.f32 %v6099_v42, %v6088_v13 }
 0xa20   :  { %v6224_v6 = vpop.xlane.xlu1 %6223 }
 0xa21   :  { %v6180_v18 = vpop.xlane.xlu0 %6179  ;;  %v6238_v19 = vadd.f32 %v6237_v56, %v6224_v6 }
 0xa22   :  { %v6192_v21 = vadd.f32 %v6191_v12, %v6180_v18 }
 0xa24   :  { %v6227_v46 = vpop.xlane.xlu1 %6226 }
 0xa25   :  { %v6091_v14 = vpop.xlane.xlu0 %6090 }
 0xa26   :  { %v6101_v30 = vadd.f32 %v6100_v23, %v6091_v14 }
 0xa28   :  { %v6136_v47 = vpop.xlane.xlu1 %6135 }
 0xa29   :  { %v6183_v15 = vpop.xlane.xlu0 %6182  ;;  %v6146_v34 = vadd.f32 %v6145_v55, %v6136_v47  ;;  %v6239_v47 = vadd.f32 %v6238_v19, %v6227_v46 }
 0xa2a   :  { %v6193_v26 = vadd.f32 %v6192_v21, %v6183_v15 }
 0xa2c   :  { %v6230_v11 = vpop.xlane.xlu1 %6229 }
 0xa2d   :  { %v6186_v5 = vpop.xlane.xlu0 %6185  ;;  %v6240_v61 = vadd.f32 %v6239_v47, %v6230_v11 }
 0xa2e   :  { %v6194_v25 = vadd.f32 %v6193_v26, %v6186_v5 }
 0xa30   :  { %v6139_v37 = vpop.xlane.xlu1 %6138 }
 0xa31   :  { %v6147_v49 = vadd.f32 %v6146_v34, %v6139_v37 }
 0xa32   :  { %v6142_v24 = vpop.xlane.xlu0 %6141 }
 0xa33   :  { %v6148_v38 = vsel %vm6103_vm14, %v6142_v24, 0.0 }
 0xa34   :  { %v6149_v45 = vadd.f32 %v6148_v38, %v6147_v49  ;;  %v6094_v20 = vpop.xlane.xlu1 %6093 }
 0xa35   :  { %v6102_v54 = vadd.f32 %v6101_v30, %v6094_v20 }
 0xa36   :  { %v6150_v22 = vrot.slane %v6149_v45, 4  ;;  %v6097_v17 = vpop.xlane.xlu0 %6096 }
 0xa37   :  { %v6104_v0 = vsel %vm6103_vm14, %v6097_v17, 0.0  ;;  %v18946_v17 = vld [vmem:[%s21591_s15] sm:$0xf] }
 0xa38   :  { %v6151_v13 = vadd.f32 %v6150_v22, %v6149_v45  ;;  %v6105_v3 = vadd.f32 %v6104_v0, %v6102_v54  ;;  %v6189_v62 = vpop.xlane.xlu1 %6188 }
 0xa39   :  { %v6195_v40 = vsel %vm6103_vm14, %v6189_v62, 0.0 }
 0xa3a   :  { %v6152_v27 = vrot.slane %v6151_v13, 2  ;;  %v6106_v14 = vrot.slane %v6105_v3, 4  ;;  %v6196_v18 = vadd.f32 %v6195_v40, %v6194_v25  ;;  %v6233_v38 = vpop.xlane.xlu0 %6232 }
 0xa3b   :  { %v6241_v48 = vadd.f32 %v6240_v61, %v6233_v38 }
 0xa3c   :  { %v6153_v56 = vadd.f32 %v6152_v27, %v6151_v13  ;;  %v6107_v30 = vadd.f32 %v6106_v14, %v6105_v3  ;;  %v6197_v21 = vrot.slane %v6196_v18, 4  ;;  %v6236_v6 = vpop.xlane.xlu1 %6235 }
 0xa3d   :  { %v6242_v46 = vsel %vm6103_vm14, %v6236_v6, 0.0 }
 0xa3e   :  { %v6154_v15 = vrot.slane %v6153_v56, 1  ;;  %v6108_v55 = vrot.slane %v6107_v30, 2  ;;  %v6198_v5 = vadd.f32 %v6197_v21, %v6196_v18  ;;  %v6243_v42 = vadd.f32 %v6242_v46, %v6241_v48 }
 0xa40   :  { %v6155_v34 = vadd.f32 %v6154_v15, %v6153_v56  ;;  %v6109_v2 = vadd.f32 %v6108_v55, %v6107_v30  ;;  %v6199_v11 = vrot.slane %v6198_v5, 2  ;;  %v6244_v37 = vrot.slane %v6243_v42, 4 }
 0xa42   :  { %v6110_v23 = vrot.slane %v6109_v2, 1  ;;  %v6200_v49 = vadd.f32 %v6199_v11, %v6198_v5  ;;  %v6245_v12 = vadd.f32 %v6244_v37, %v6243_v42  ;;  %v6156_v24 = vmul.f32 0.0051020407, %v6155_v34 }
 0xa44   :  { %v6111_v45 = vadd.f32 %v6110_v23, %v6109_v2  ;;  %v6201_v20 = vrot.slane %v6200_v49, 1  ;;  %v6246_v19 = vrot.slane %v6245_v12, 2  ;;  %v6157_v47 = vmul.f32 %v18946_v17, %v6156_v24 }
 0xa46   :  { %v6112_v54 = vmul.f32 0.0051020407, %v6111_v45  ;;  %v6202_v26 = vadd.f32 %v6201_v20, %v6200_v49  ;;  %v6247_v22 = vadd.f32 %v6246_v19, %v6245_v12  ;;  %v6159_v61 = vrot.slane %v6157_v47, 1 }
 0xa48   :  { %v6203_v0 = vmul.f32 0.0051020407, %v6202_v26  ;;  %v6248_v25 = vrot.slane %v6247_v22, 1  ;;  %v6113_v13 = vmul.f32 %v18946_v17, %v6112_v54 }
 0xa4a   :  { %v6204_v3 = vmul.f32 %v18946_v17, %v6203_v0  ;;  %v6249_v62 = vadd.f32 %v6248_v25, %v6247_v22  ;;  %v6161_v14 = vadd.f32 %v6159_v61, %v6113_v13 }
 0xa4c   :  { %v6206_v40 = vrot.slane %v6204_v3, 2  ;;  %v6250_v27 = vmul.f32 0.0051020407, %v6249_v62 }
 0xa4e   :  { %v6251_v18 = vmul.f32 %v18946_v17, %v6250_v27  ;;  %v6208_v38 = vadd.f32 %v6206_v40, %v6161_v14 }
 0xa50   :  { %v6253_v48 = vrot.slane %v6251_v18, 3 }
 0xa52   :  { %v6255_v56 = vadd.f32 %v6253_v48, %v6208_v38 }
 0xa54   :  { %v18953_v30 = vrot.slane %v6255_v56, %v18474_v31 }
 0xa56   :  { %v18957_v21 = vsub.f32 %v18833_v1, %v18953_v30  ;;  %v18961_v6 = vsub.f32 %v18810_v44, %v18953_v30  ;;  %v18965_v46 = vsub.f32 %v18846_v16, %v18953_v30  ;;  %v18987_v24 = vsub.f32 %v18860_v9, %v18953_v30 }
 0xa57   :  { %v19001_v62 = vsub.f32 %v18882_v29, %v18953_v30 }
 0xa58   :  { %v6321_v15 = vmul.f32 %v18957_v21, %v18649_v58  ;;  %v6320_v55 = vmul.f32 %v18961_v6, %v18649_v58  ;;  %v6268_v5 = vmul.f32 %v18957_v21, %v18653_v59  ;;  %v6267_v1 = vmul.f32 %v18961_v6, %v18653_v59 }
 0xa59   :  { %v6376_v44 = vmul.f32 %v18961_v6, %v18658_v41  ;;  %v6322_v16 = vmul.f32 %v18965_v46, %v18649_v58  ;;  %v6269_v49 = vmul.f32 %v18965_v46, %v18653_v59  ;;  %v6377_v12 = vmul.f32 %v18957_v21, %v18658_v41 }
 0xa5a   :  { %v6328_v42 = vmul.f32 %v6321_v15, %v6321_v15  ;;  %v6327_v34 = vmul.f32 %v6320_v55, %v6320_v55  ;;  %v6275_v37 = vmul.f32 %v6268_v5, %v6268_v5  ;;  %v6274_v23 = vmul.f32 %v6267_v1, %v6267_v1 }
 0xa5b   :  { %v6383_v19 = vmul.f32 %v6376_v44, %v6376_v44  ;;  %v6329_v54 = vmul.f32 %v6322_v16, %v6322_v16  ;;  %v6276_v26 = vmul.f32 %v6269_v49, %v6269_v49  ;;  %v6384_v22 = vmul.f32 %v6377_v12, %v6377_v12 }
 0xa5c   :  { %v6337_v2 = vsel %vm4921_vm7, %v6328_v42, 0.0  ;;  %v6334_v11 = vsel %vm4921_vm7, %v6327_v34, 0.0  ;;  %v6284_v45 = vsel %vm4921_vm7, %v6275_v37, 0.0  ;;  %v6281_v20 = vsel %vm4921_vm7, %v6274_v23, 0.0 }
 0xa5d   :  { %6338 = vadd.xlane.f32.xlu1 %v6337_v2  ;;  %6335 = vadd.xlane.f32.xlu0 %v6334_v11  ;;  %v6390_v47 = vsel %vm4921_vm7, %v6383_v19, 0.0  ;;  %v6340_v0 = vsel %vm4921_vm7, %v6329_v54, 0.0  ;;  %v6378_v25 = vmul.f32 %v18965_v46, %v18658_v41  ;;  %v6323_v9 = vmul.f32 %v18987_v24, %v18649_v58 }
 0xa5e   :  { %v6287_v13 = vsel %vm4921_vm7, %v6276_v26, 0.0  ;;  %v6393_v3 = vsel %vm4921_vm7, %v6384_v22, 0.0  ;;  %v6433_v27 = vmul.f32 %v18957_v21, %v18665_v63  ;;  %v6432_v14 = vmul.f32 %v18961_v6, %v18665_v63 }
 0xa5f   :  { %v6385_v61 = vmul.f32 %v6378_v25, %v6378_v25  ;;  %v6330_v40 = vmul.f32 %v6323_v9, %v6323_v9  ;;  %v6324_v18 = vmul.f32 %v19001_v62, %v18649_v58  ;;  %v6270_v38 = vmul.f32 %v18987_v24, %v18653_v59 }
 0xa60   :  { %v6440_v56 = vmul.f32 %v6433_v27, %v6433_v27  ;;  %v6439_v15 = vmul.f32 %v6432_v14, %v6432_v14  ;;  %v6434_v5 = vmul.f32 %v18965_v46, %v18665_v63  ;;  %v19017_v1 = vsub.f32 %v18897_v60, %v18953_v30 }
 0xa61   :  { %6285 = vadd.xlane.f32.xlu1 %v6284_v45  ;;  %6282 = vadd.xlane.f32.xlu0 %v6281_v20  ;;  %v6396_v48 = vsel %vm4921_vm7, %v6385_v61, 0.0  ;;  %v6343_v29 = vsel %vm4921_vm7, %v6330_v40, 0.0  ;;  %v6331_v55 = vmul.f32 %v6324_v18, %v6324_v18  ;;  %v6277_v44 = vmul.f32 %v6270_v38, %v6270_v38 }
 0xa62   :  { %v6449_v42 = vsel %vm4921_vm7, %v6440_v56, 0.0  ;;  %v6446_v34 = vsel %vm4921_vm7, %v6439_v15, 0.0  ;;  %v6379_v16 = vmul.f32 %v18987_v24, %v18658_v41  ;;  %v6441_v11 = vmul.f32 %v6434_v5, %v6434_v5 }
 0xa63   :  { %v6346_v2 = vsel %vm4921_vm7, %v6331_v55, 0.0  ;;  %v6290_v37 = vsel %vm4921_vm7, %v6277_v44, 0.0  ;;  %v6271_v60 = vmul.f32 %v19001_v62, %v18653_v59  ;;  %v6272_v49 = vmul.f32 %v19017_v1, %v18653_v59 }
 0xa64   :  { %v6386_v23 = vmul.f32 %v6379_v16, %v6379_v16  ;;  %v6452_v12 = vsel %vm4921_vm7, %v6441_v11, 0.0  ;;  %v6325_v45 = vmul.f32 %v19017_v1, %v18649_v58  ;;  %v19034_v20 = vsub.f32 %v18910_v53, %v18953_v30 }
 0xa65   :  { %6391 = vadd.xlane.f32.xlu1 %v6390_v47  ;;  %6341 = vadd.xlane.f32.xlu0 %v6340_v0  ;;  %v6278_v54 = vmul.f32 %v6271_v60, %v6271_v60  ;;  %v6279_v26 = vmul.f32 %v6272_v49, %v6272_v49  ;;  %v6436_v22 = vmul.f32 %v19001_v62, %v18665_v63 }
 0xa66   :  { %v6399_v19 = vsel %vm4921_vm7, %v6386_v23, 0.0  ;;  %v6380_v47 = vmul.f32 %v19001_v62, %v18658_v41  ;;  %v6273_v0 = vmul.f32 %v19034_v20, %v18653_v59  ;;  %v6332_v30 = vmul.f32 %v6325_v45, %v6325_v45 }
 0xa67   :  { %v6293_v25 = vsel %vm4921_vm7, %v6278_v54, 0.0  ;;  %v6296_v53 = vsel %vm4921_vm7, %v6279_v26, 0.0  ;;  %v6443_v9 = vmul.f32 %v6436_v22, %v6436_v22  ;;  %v6382_v14 = vmul.f32 %v19034_v20, %v18658_v41 }
 0xa68   :  { %v6349_v61 = vsel %vm4921_vm7, %v6332_v30, 0.0  ;;  %v6280_v27 = vmul.f32 %v6273_v0, %v6273_v0  ;;  %v6326_v56 = vmul.f32 %v19034_v20, %v18649_v58  ;;  %v6437_v15 = vmul.f32 %v19017_v1, %v18665_v63 }
 0xa69   :  { %6288 = vadd.xlane.f32.xlu1 %v6287_v13  ;;  %6394 = vadd.xlane.f32.xlu0 %v6393_v3  ;;  %v6387_v13 = vmul.f32 %v6380_v47, %v6380_v47  ;;  %v6435_v3 = vmul.f32 %v18987_v24, %v18665_v63  ;;  %v6458_v40 = vsel %vm4921_vm7, %v6443_v9, 0.0  ;;  %v6381_v5 = vmul.f32 %v19017_v1, %v18658_v41 }
 0xa6a   :  { %v6444_v44 = vmul.f32 %v6437_v15, %v6437_v15  ;;  %v6438_v16 = vmul.f32 %v19034_v20, %v18665_v63 }
 0xa6b   :  { %v6402_v18 = vsel %vm4921_vm7, %v6387_v13, 0.0  ;;  %v6442_v38 = vmul.f32 %v6435_v3, %v6435_v3 }
 0xa6c   :  { %v6461_v11 = vsel %vm4921_vm7, %v6444_v44, 0.0  ;;  %v6445_v23 = vmul.f32 %v6438_v16, %v6438_v16 }
 0xa6d   :  { %6397 = vadd.xlane.f32.xlu1 %v6396_v48  ;;  %6344 = vadd.xlane.f32.xlu0 %v6343_v29  ;;  %v6299_v48 = vsel %vm5692_vm13, %v6280_v27, 0.0  ;;  %v6389_v29 = vmul.f32 %v6382_v14, %v6382_v14  ;;  %v6455_v55 = vsel %vm4921_vm7, %v6442_v38, 0.0 }
 0xa6e   :  { %v6464_v49 = vsel %vm5692_vm13, %v6445_v23, 0.0 }
 0xa71   :  { %6450 = vadd.xlane.f32.xlu1 %v6449_v42  ;;  %6447 = vadd.xlane.f32.xlu0 %v6446_v34  ;;  %v6408_v42 = vsel %vm5692_vm13, %v6389_v29, 0.0  ;;  %v6333_v34 = vmul.f32 %v6326_v56, %v6326_v56 }
 0xa75   :  { %6347 = vadd.xlane.f32.xlu1 %v6346_v2  ;;  %6291 = vadd.xlane.f32.xlu0 %v6290_v37  ;;  %v6352_v2 = vsel %vm5692_vm13, %v6333_v34, 0.0  ;;  %v6388_v37 = vmul.f32 %v6381_v5, %v6381_v5 }
 0xa77   :  { %v6405_v60 = vsel %vm4921_vm7, %v6388_v37, 0.0 }
 0xa79   :  { %6453 = vadd.xlane.f32.xlu1 %v6452_v12  ;;  %6400 = vadd.xlane.f32.xlu0 %v6399_v19  ;;  %v19067_v12 = vpop.permute.xlu1 %4162  ;;  %v19071_v19 = vpop.permute.xlu0 %4164 }
 0xa7a   :  { %21833 = vst [vmem:[#allocation7_spill] sm:$0xff] %v19067_v12  ;;  %v4168_v45 = vmul.f32 %v19067_v12, %v17915_v32  ;;  %21834 = vst [vmem:[#allocation8_spill] sm:$0xff] %v19071_v19  ;;  %v4169_v54 = vmul.f32 %v19071_v19, %v17909_v50 }
 0xa7d   :  { %6294 = vadd.xlane.f32.xlu1 %v6293_v25  ;;  %6297 = vadd.xlane.f32.xlu0 %v6296_v53 }
 0xa81   :  { %6350 = vadd.xlane.f32.xlu1 %v6349_v61  ;;  %6459 = vadd.xlane.f32.xlu0 %v6458_v40 }
 0xa85   :  { %6403 = vadd.xlane.f32.xlu1 %v6402_v18  ;;  %6300 = vadd.xlane.f32.xlu0 %v6299_v48 }
 0xa89   :  { %6456 = vadd.xlane.f32.xlu1 %v6455_v55  ;;  %6409 = vadd.xlane.f32.xlu0 %v6408_v42 }
 0xa8d   :  { %6353 = vadd.xlane.f32.xlu1 %v6352_v2  ;;  %6462 = vadd.xlane.f32.xlu0 %v6461_v11 }
 0xa91   :  { %6406 = vadd.xlane.f32.xlu1 %v6405_v60  ;;  %6465 = vadd.xlane.f32.xlu0 %v6464_v49 }
 0xaa2   :  { %6501 = vrot.lane.b32.xlu1 %v4168_v45, %s15782_s27 }
 0xaa7   :  { %6503 = vrot.lane.b32.xlu0 %v4169_v54, %s15782_s27 }
 0xae6   :  { %v6336_v26 = vpop.xlane.xlu0 %6335  ;;  %v6339_v22 = vpop.xlane.xlu1 %6338 }
 0xae7   :  { %v6355_v42 = vadd.f32 %v6339_v22, %v6336_v26 }
 0xaea   :  { %v6283_v47 = vpop.xlane.xlu0 %6282  ;;  %v6286_v0 = vpop.xlane.xlu1 %6285 }
 0xaeb   :  { %v6302_v38 = vadd.f32 %v6286_v0, %v6283_v47 }
 0xaee   :  { %v6342_v25 = vpop.xlane.xlu0 %6341  ;;  %v6392_v53 = vpop.xlane.xlu1 %6391 }
 0xaef   :  { %v6356_v37 = vadd.f32 %v6355_v42, %v6342_v25 }
 0xaf2   :  { %v6395_v30 = vpop.xlane.xlu0 %6394  ;;  %v6289_v9 = vpop.xlane.xlu1 %6288 }
 0xaf3   :  { %v6303_v50 = vadd.f32 %v6302_v38, %v6289_v9  ;;  %v6411_v0 = vadd.f32 %v6395_v30, %v6392_v53 }
 0xaf6   :  { %v6345_v13 = vpop.xlane.xlu0 %6344  ;;  %v6398_v3 = vpop.xlane.xlu1 %6397 }
 0xaf7   :  { %v6357_v49 = vadd.f32 %v6356_v37, %v6345_v13 }
 0xafa   :  { %v6448_v32 = vpop.xlane.xlu0 %6447  ;;  %v6451_v61 = vpop.xlane.xlu1 %6450 }
 0xafb   :  { %v6467_v2 = vadd.f32 %v6451_v61, %v6448_v32 }
 0xafe   :  { %v6292_v40 = vpop.xlane.xlu0 %6291  ;;  %v6348_v27 = vpop.xlane.xlu1 %6347 }
 0xaff   :  { %v6304_v56 = vadd.f32 %v6303_v50, %v6292_v40  ;;  %v6358_v40 = vadd.f32 %v6357_v49, %v6348_v27  ;;  %v6412_v50 = vadd.f32 %v6411_v0, %v6398_v3 }
 0xb02   :  { %v6401_v14 = vpop.xlane.xlu0 %6400  ;;  %v6454_v18 = vpop.xlane.xlu1 %6453 }
 0xb03   :  { %v6468_v60 = vadd.f32 %v6467_v2, %v6454_v18  ;;  %v6413_v32 = vadd.f32 %v6412_v50, %v6401_v14 }
 0xb06   :  { %v6298_v48 = vpop.xlane.xlu0 %6297  ;;  %v6295_v29 = vpop.xlane.xlu1 %6294 }
 0xb07   :  { %v6305_v15 = vadd.f32 %v6304_v56, %v6295_v29 }
 0xb09   :  { %v6306_v34 = vadd.f32 %v6305_v15, %v6298_v48 }
 0xb0a   :  { %v6460_v55 = vpop.xlane.xlu0 %6459  ;;  %v6351_v5 = vpop.xlane.xlu1 %6350 }
 0xb0b   :  { %v6359_v29 = vadd.f32 %v6358_v40, %v6351_v5 }
 0xb0e   :  { %v6301_v44 = vpop.xlane.xlu0 %6300  ;;  %v6404_v16 = vpop.xlane.xlu1 %6403 }
 0xb0f   :  { %v6307_v11 = vsel %vm6103_vm14, %v6301_v44, 0.0  ;;  %v6414_v18 = vadd.f32 %v6413_v32, %v6404_v16 }
 0xb10   :  { %v6308_v23 = vadd.f32 %v6307_v11, %v6306_v34 }
 0xb12   :  { %v6309_v45 = vrot.slane %v6308_v23, 4  ;;  %v6410_v54 = vpop.xlane.xlu0 %6409  ;;  %v6457_v47 = vpop.xlane.xlu1 %6456 }
 0xb13   :  { %v6469_v9 = vadd.f32 %v6468_v60, %v6457_v47  ;;  %v6416_v3 = vsel %vm6103_vm14, %v6410_v54, 0.0 }
 0xb14   :  { %v6310_v38 = vadd.f32 %v6309_v45, %v6308_v23 }
 0xb15   :  { %v6470_v48 = vadd.f32 %v6469_v9, %v6460_v55 }
 0xb16   :  { %v6311_v26 = vrot.slane %v6310_v38, 2  ;;  %v6463_v22 = vpop.xlane.xlu0 %6462  ;;  %v6354_v56 = vpop.xlane.xlu1 %6353 }
 0xb17   :  { %v6360_v61 = vsel %vm6103_vm14, %v6354_v56, 0.0  ;;  %v6471_v13 = vadd.f32 %v6470_v48, %v6463_v22 }
 0xb18   :  { %v6361_v25 = vadd.f32 %v6360_v61, %v6359_v29  ;;  %v6312_v15 = vadd.f32 %v6311_v26, %v6310_v38 }
 0xb1a   :  { %v6362_v42 = vrot.slane %v6361_v25, 4  ;;  %v6466_v34 = vpop.xlane.xlu0 %6465  ;;  %v6407_v44 = vpop.xlane.xlu1 %6406  ;;  %v6313_v2 = vrot.slane %v6312_v15, 1 }
 0xb1b   :  { %v6472_v53 = vsel %vm6103_vm14, %v6466_v34, 0.0  ;;  %v6415_v30 = vadd.f32 %v6414_v18, %v6407_v44 }
 0xb1c   :  { %v6363_v27 = vadd.f32 %v6362_v42, %v6361_v25  ;;  %v6473_v5 = vadd.f32 %v6472_v53, %v6471_v13  ;;  %v6314_v0 = vadd.f32 %v6313_v2, %v6312_v15 }
 0xb1d   :  { %v6417_v55 = vadd.f32 %v6416_v3, %v6415_v30 }
 0xb1e   :  { %v6364_v11 = vrot.slane %v6363_v27, 2  ;;  %v6474_v14 = vrot.slane %v6473_v5, 4  ;;  %v6504_v37 = vpop.permute.xlu0 %6503  ;;  %v6502_v23 = vpop.permute.xlu1 %6501  ;;  %v6315_v32 = vmul.f32 0.0051020407, %v6314_v0 }
 0xb1f   :  { %v6418_v60 = vrot.slane %v6417_v55, 4  ;;  %v19081_v49 = vand.u32 4294901760, %v6504_v37  ;;  %v19083_v16 = vand.u32 4294901760, %v6502_v23 }
 0xb20   :  { %v6365_v45 = vadd.f32 %v6364_v11, %v6363_v27  ;;  %v6475_v47 = vadd.f32 %v6474_v14, %v6473_v5  ;;  %v6316_v30 = vadd.f32 1e-05, %v6315_v32 }
 0xb21   :  { %v6419_v9 = vadd.f32 %v6418_v60, %v6417_v55  ;;  %v19086_v40 = vsub.f32 %v6504_v37, %v19081_v49  ;;  %v19089_v54 = vsub.f32 %v6502_v23, %v19083_v16  ;;  %14623 = vmatpush3.msra.mxu0 %v19081_v49 }
 0xb22   :  { %v6366_v38 = vrot.slane %v6365_v45, 1  ;;  %v6476_v50 = vrot.slane %v6475_v47, 2  ;;  %14624 = vmatprep.subr.mxu0 %v21793_v39 }
 0xb23   :  { %v6420_v29 = vrot.slane %v6419_v9, 2  ;;  %v6696_v26 = vand.u32 4294901760, %v19086_v40  ;;  %v6703_v22 = vand.u32 4294901760, %v19089_v54  ;;  %14625 = vmatpush3.msra.mxu0 %v19083_v16 }
 0xb24   :  { %v6367_v48 = vadd.f32 %v6366_v38, %v6365_v45  ;;  %v6477_v56 = vadd.f32 %v6476_v50, %v6475_v47  ;;  %14672 = vmatprep.subr.mxu0 %v21793_v39 }
 0xb25   :  { %v6421_v61 = vadd.f32 %v6420_v29, %v6419_v9  ;;  %v6697_v25 = vsub.f32 %v19086_v40, %v6696_v26  ;;  %v6704_v15 = vsub.f32 %v19089_v54, %v6703_v22 }
 0xb26   :  { %v6368_v18 = vmul.f32 0.0051020407, %v6367_v48  ;;  %v6478_v13 = vrot.slane %v6477_v56, 1 }
 0xb27   :  { %v6422_v42 = vrot.slane %v6421_v61, 1  ;;  %v6698_v34 = vand.u32 4294901760, %v6697_v25  ;;  %v6705_v27 = vand.u32 4294901760, %v6704_v15 }
 0xb28   :  { %v6369_v44 = vadd.f32 1e-05, %v6368_v18  ;;  %v6479_v53 = vadd.f32 %v6478_v13, %v6477_v56 }
 0xb29   :  { %v6423_v3 = vadd.f32 %v6422_v42, %v6421_v61  ;;  %14648 = vmatpush3.msra.mxu1 %v6698_v34 }
 0xb2a   :  { %15730 = vrsqrt.f32 %v6369_v44  ;;  %v6480_v5 = vmul.f32 0.0051020407, %v6479_v53  ;;  %14649 = vmatprep.subr.mxu1 %v21793_v39 }
 0xb2b   :  { %v6424_v2 = vmul.f32 0.0051020407, %v6423_v3  ;;  %14650 = vmatpush3.msra.mxu1 %v6705_v27  ;;  %15732 = vrsqrt.f32 %v6316_v30 }
 0xb2c   :  { %v6481_v55 = vadd.f32 1e-05, %v6480_v5  ;;  %14697 = vmatprep.subr.mxu1 %v21793_v39 }
 0xb2d   :  { %v6425_v11 = vadd.f32 1e-05, %v6424_v2 }
 0xb2e   :  { %15734 = vrsqrt.f32 %v6481_v55 }
 0xb2f   :  { %15736 = vrsqrt.f32 %v6425_v11 }
 0xb37   :  { %v15731_v14 = vpop.eup %15730 }
 0xb38   :  { %v6371_v37 = vmul.f32 %v18946_v17, %v15731_v14  ;;  %v15733_v23 = vpop.eup %15732 }
 0xb39   :  { %v6318_v0 = vmul.f32 %v18946_v17, %v15733_v23 }
 0xb3a   :  { %v6373_v45 = vrot.slane %v6371_v37, 1 }
 0xb3b   :  { %v15735_v60 = vpop.eup %15734 }
 0xb3c   :  { %v15737_v47 = vpop.eup %15736  ;;  %v6483_v9 = vmul.f32 %v18946_v17, %v15735_v60  ;;  %v6375_v50 = vadd.f32 %v6373_v45, %v6318_v0 }
 0xb3d   :  { %v6427_v38 = vmul.f32 %v18946_v17, %v15737_v47 }
 0xb3e   :  { %v6485_v48 = vrot.slane %v6483_v9, 3 }
 0xb3f   :  { %v6429_v29 = vrot.slane %v6427_v38, 2 }
 0xb41   :  { %v6431_v56 = vadd.f32 %v6429_v29, %v6375_v50 }
 0xb43   :  { %v6487_v32 = vadd.f32 %v6485_v48, %v6431_v56 }
 0xb45   :  { %v6491_v61 = vrot.slane %v6487_v32, %v18474_v31 }
 0xb47   :  { %v6492_v25 = vmul.f32 %v6491_v61, %v18961_v6  ;;  %v6493_v15 = vmul.f32 %v6491_v61, %v18957_v21  ;;  %v6494_v18 = vmul.f32 %v6491_v61, %v18965_v46  ;;  %v6495_v13 = vmul.f32 %v6491_v61, %v18987_v24 }
 0xb48   :  { %v6496_v21 = vmul.f32 %v6491_v61, %v19001_v62  ;;  %v6497_v27 = vmul.f32 %v6491_v61, %v19017_v1  ;;  %v6498_v37 = vmul.f32 %v6491_v61, %v19034_v20 }
 0xb49   :  { %v6508_v42 = vsel %vm4921_vm7, %v6492_v25, 0  ;;  %v6511_v34 = vsel %vm4921_vm7, %v6493_v15, 0  ;;  %v6514_v17 = vsel %vm4921_vm7, %v6494_v18, 0  ;;  %v6517_v6 = vsel %vm4921_vm7, %v6495_v13, 0 }
 0xb4a   :  { %v19117_v44 = vand.u32 4294901760, %v6508_v42  ;;  %v19119_v53 = vand.u32 4294901760, %v6511_v34  ;;  %v19121_v30 = vand.u32 4294901760, %v6514_v17  ;;  %v19135_v3 = vand.u32 4294901760, %v6517_v6 }
 0xb4b   :  { %v6520_v55 = vsel %vm4921_vm7, %v6496_v21, 0  ;;  %v6523_v14 = vsel %vm4921_vm7, %v6497_v27, 0  ;;  %v6526_v0 = vsel %vm4921_vm7, %v6498_v37, 0 }
 0xb4c   :  { %v19126_v46 = vsub.f32 %v6508_v42, %v19117_v44  ;;  %14652 = vmatmul.mubr.f32.vlgmr.msra.gmra.mxu1 %v19117_v44  ;;  %v19130_v24 = vsub.f32 %v6511_v34, %v19119_v53  ;;  %v19141_v5 = vsub.f32 %v6514_v17, %v19121_v30  ;;  %v19151_v1 = vsub.f32 %v6517_v6, %v19135_v3 }
 0xb4d   :  { %14698 = vmatpush3.msra.mxu1 %v19081_v49  ;;  %14654 = vmatprep.mubr.msk.f32.mxu1 %vm15780_vm1, %v21793_v39  ;;  %v19160_v47 = vand.u32 4294901760, %v6520_v55  ;;  %v19166_v20 = vand.u32 4294901760, %v6523_v14  ;;  %v19183_v48 = vand.u32 4294901760, %v6526_v0 }
 0xb4e   :  { %14699 = vmatprep.subr.mxu1 %v21793_v39  ;;  %v6597_v62 = vand.u32 4294901760, %v19126_v46  ;;  %v6607_v2 = vand.u32 4294901760, %v19130_v24  ;;  %v6617_v45 = vand.u32 4294901760, %v19141_v5  ;;  %v6627_v29 = vand.u32 4294901760, %v19151_v1 }
 0xb4f   :  { %14700 = vmatpush3.msra.mxu1 %v19083_v16  ;;  %v19174_v50 = vsub.f32 %v6520_v55, %v19160_v47  ;;  %v6646_v61 = vsub.f32 %v6523_v14, %v19166_v20  ;;  %v6656_v13 = vsub.f32 %v6526_v0, %v19183_v48  ;;  %v7248_v0 = vld [vmem:[%s21593_s5 + $0x18] sm:$0xff] }
 0xb50   :  { %14655 = vmatmul.mubr.f32.gmra.mxu1 %v19119_v53  ;;  %v6598_v11 = vsub.f32 %v19126_v46, %v6597_v62  ;;  %14747 = vmatprep.subr.mxu1 %v21793_v39  ;;  %v6608_v60 = vsub.f32 %v19130_v24, %v6607_v2  ;;  %v6618_v38 = vsub.f32 %v19141_v5, %v6617_v45 }
 0xb51   :  { %14657 = vmatprep.mubr.msk.f32.mxu1 %vm15780_vm1, %v21793_v39  ;;  %v6628_v32 = vsub.f32 %v19151_v1, %v6627_v29  ;;  %v6637_v25 = vand.u32 4294901760, %v19174_v50  ;;  %v6647_v42 = vand.u32 4294901760, %v6646_v61  ;;  %v6657_v6 = vand.u32 4294901760, %v6656_v13 }
 0xb52   :  { %v6599_v23 = vand.u32 4294901760, %v6598_v11  ;;  %v6609_v9 = vand.u32 4294901760, %v6608_v60  ;;  %v6619_v56 = vand.u32 4294901760, %v6618_v38  ;;  %v7247_v38 = vld [vmem:[%s21593_s5 + $0x10] sm:$0xff] }
 0xb53   :  { %v6629_v15 = vand.u32 4294901760, %v6628_v32  ;;  %v6638_v18 = vsub.f32 %v19174_v50, %v6637_v25  ;;  %v6648_v17 = vsub.f32 %v6646_v61, %v6647_v42  ;;  %v6658_v27 = vsub.f32 %v6656_v13, %v6657_v6 }
 0xb54   :  { %14627 = vmatmul.mubr.f32.vlgmr.msra.gmra.mxu0 %v6599_v23  ;;  %14658 = vmatmul.mubr.f32.gmra.mxu1 %v19121_v30 }
 0xb55   :  { %14673 = vmatpush3.msra.mxu0 %v19086_v40  ;;  %14629 = vmatprep.mubr.msk.f32.mxu0 %vm15780_vm1, %v21793_v39  ;;  %v6639_v34 = vand.u32 4294901760, %v6638_v18  ;;  %v6649_v21 = vand.u32 4294901760, %v6648_v17  ;;  %v6659_v55 = vand.u32 4294901760, %v6658_v27 }
 0xb56   :  { %14674 = vmatprep.subr.mxu0 %v21793_v39  ;;  %14660 = vmatprep.mubr.msk.f32.mxu1 %vm15780_vm1, %v21793_v39 }
 0xb57   :  { %14675 = vmatpush3.msra.mxu0 %v19089_v54  ;;  %v7251_v54 = vld [vmem:[%s21593_s5 + $0x30] sm:$0xff] }
 0xb58   :  { %14630 = vmatmul.mubr.f32.gmra.mxu0 %v6609_v9  ;;  %14661 = vmatmul.mubr.f32.gmra.mxu1 %v19135_v3  ;;  %v19359_v9 = vand.u32 4294901760, %v7248_v0 }
 0xb59   :  { %14632 = vmatprep.mubr.msk.f32.mxu0 %vm15780_vm1, %v21793_v39  ;;  %14663 = vmatprep.mubr.msk.f32.mxu1 %vm15780_vm1, %v21793_v39 }
 0xb5a   :  { %14722 = vmatprep.subr.mxu0 %v21793_v39 }
 0xb5c   :  { %14633 = vmatmul.mubr.f32.gmra.mxu0 %v6619_v56  ;;  %14664 = vmatmul.mubr.f32.gmra.mxu1 %v19160_v47 }
 0xb5d   :  { %14635 = vmatprep.mubr.msk.f32.mxu0 %vm15780_vm1, %v21793_v39  ;;  %14666 = vmatprep.mubr.msk.f32.mxu1 %vm15780_vm1, %v21793_v39 }
 0xb60   :  { %14636 = vmatmul.mubr.f32.gmra.mxu0 %v6629_v15  ;;  %14667 = vmatmul.mubr.f32.gmra.mxu1 %v19166_v20 }
 0xb61   :  { %14638 = vmatprep.mubr.msk.f32.mxu0 %vm15780_vm1, %v21793_v39  ;;  %14669 = vmatprep.mubr.msk.f32.mxu1 %vm15780_vm1, %v21793_v39 }
 0xb64   :  { %14639 = vmatmul.mubr.f32.gmra.mxu0 %v6639_v34  ;;  %14670 = vmatmul.mubr.f32.gmra.mxu1 %v19183_v48 }
 0xb65   :  { %14641 = vmatprep.mubr.msk.f32.mxu0 %vm15780_vm1, %v21793_v39  ;;  %14701 = vmatprep.mubr.msk.f32.mxu1 %vm15780_vm1, %v21793_v39 }
 0xb68   :  { %14642 = vmatmul.mubr.f32.gmra.mxu0 %v6649_v21  ;;  %14702 = vmatmul.mubr.f32.vlgmr.msra.gmra.mxu1 %v6597_v62 }
 0xb69   :  { %14748 = vmatpush3.msra.mxu1 %v19081_v49  ;;  %14644 = vmatprep.mubr.msk.f32.mxu0 %vm15780_vm1, %v21793_v39  ;;  %v7252_v49 = vld [vmem:[%s21593_s5 + $0x38] sm:$0xff] }
 0xb6a   :  { %14749 = vmatprep.subr.mxu1 %v21793_v39  ;;  %14704 = vmatprep.mubr.msk.f32.mxu1 %vm15780_vm1, %v21793_v39 }
 0xb6b   :  { %14750 = vmatpush3.msra.mxu1 %v19083_v16  ;;  %v19300_v16 = vand.u32 4294901760, %v7252_v49 }
 0xb6c   :  { %14645 = vmatmul.mubr.f32.gmra.mxu0 %v6659_v55  ;;  %14705 = vmatmul.mubr.f32.gmra.mxu1 %v6607_v2 }
 0xb6d   :  { %14676 = vmatprep.mubr.msk.f32.mxu0 %vm15780_vm1, %v21793_v39  ;;  %14707 = vmatprep.mubr.msk.f32.mxu1 %vm15780_vm1, %v21793_v39  ;;  %v19304_v40 = vsub.f32 %v7252_v49, %v19300_v16 }
 0xb6e   :  { %14809 = vmatprep.subr.mxu1 %v21793_v39 }
 0xb70   :  { %14677 = vmatmul.mubr.f32.vlgmr.msra.gmra.mxu0 %v19126_v46  ;;  %14708 = vmatmul.mubr.f32.gmra.mxu1 %v6617_v45 }
 0xb71   :  { %14723 = vmatpush3.msra.mxu0 %v6696_v26  ;;  %14679 = vmatprep.mubr.msk.f32.mxu0 %vm15780_vm1, %v21793_v39  ;;  %v19310_v26 = vand.u32 4294901760, %v7251_v54 }
 0xb72   :  { %14724 = vmatprep.subr.mxu0 %v21793_v39  ;;  %14710 = vmatprep.mubr.msk.f32.mxu1 %vm15780_vm1, %v21793_v39 }
 0xb73   :  { %14725 = vmatpush3.msra.mxu0 %v6703_v22  ;;  %v21658_v22 = vand.u32 4294901760, %v19304_v40 }
 0xb74   :  { %14680 = vmatmul.mubr.f32.gmra.mxu0 %v19130_v24  ;;  %14711 = vmatmul.mubr.f32.gmra.mxu1 %v6627_v29  ;;  %v7249_v24 = vld [vmem:[%s21593_s5 + $0x20] sm:$0xff]  ;;  %v19368_v29 = vand.u32 4294901760, %v7247_v38 }
 0xb75   :  { %14682 = vmatprep.mubr.msk.f32.mxu0 %vm15780_vm1, %v21793_v39  ;;  %14713 = vmatprep.mubr.msk.f32.mxu1 %vm15780_vm1, %v21793_v39  ;;  %v19330_v62 = vand.u32 4294901760, %v7249_v24 }
 0xb76   :  { %14772 = vmatprep.subr.mxu0 %v21793_v39  ;;  %v19377_v32 = vsub.f32 %v7247_v38, %v19368_v29 }
 0xb78   :  { %14683 = vmatmul.mubr.f32.gmra.mxu0 %v19141_v5  ;;  %14714 = vmatmul.mubr.f32.gmra.mxu1 %v6637_v25  ;;  %v7245_v25 = vld [vmem:[%s21593_s5] sm:$0xff]  ;;  %v21653_v18 = vand.u32 4294901760, %v19377_v32 }
 0xb79   :  { %14685 = vmatprep.mubr.msk.f32.mxu0 %vm15780_vm1, %v21793_v39  ;;  %14716 = vmatprep.mubr.msk.f32.mxu1 %vm15780_vm1, %v21793_v39 }
 0xb7a   :  { %v7479_v17 = vsub.f32 %v19377_v32, %v21653_v18 }
 0xb7c   :  { %14686 = vmatmul.mubr.f32.gmra.mxu0 %v19151_v1  ;;  %14717 = vmatmul.mubr.f32.gmra.mxu1 %v6647_v42  ;;  %v19340_v1 = vsub.f32 %v7249_v24, %v19330_v62  ;;  %v19393_v42 = vand.u32 4294901760, %v7245_v25  ;;  %v7480_v27 = vand.u32 4294901760, %v7479_v17 }
 0xb7d   :  { %14688 = vmatprep.mubr.msk.f32.mxu0 %vm15780_vm1, %v21793_v39  ;;  %14719 = vmatprep.mubr.msk.f32.mxu1 %vm15780_vm1, %v21793_v39 }
 0xb7e   :  { %v21655_v23 = vand.u32 4294901760, %v19340_v1  ;;  %v19402_v21 = vsub.f32 %v7245_v25, %v19393_v42 }
 0xb80   :  { %14689 = vmatmul.mubr.f32.gmra.mxu0 %v19174_v50  ;;  %14720 = vmatmul.mubr.f32.gmra.mxu1 %v6657_v6  ;;  %v7465_v45 = vsub.f32 %v19340_v1, %v21655_v23  ;;  %v19366_v50 = vsub.f32 %v7248_v0, %v19359_v9  ;;  %v21651_v49 = vand.u32 4294901760, %v19402_v21 }
 0xb81   :  { %14691 = vmatprep.mubr.msk.f32.mxu0 %vm15780_vm1, %v21793_v39  ;;  %14751 = vmatprep.mubr.msk.f32.mxu1 %vm15780_vm1, %v21793_v39 }
 0xb82   :  { %v21654_v56 = vand.u32 4294901760, %v19366_v50 }
 0xb84   :  { %14692 = vmatmul.mubr.f32.gmra.mxu0 %v6646_v61  ;;  %14752 = vmatmul.mubr.f32.vlgmr.msra.gmra.mxu1 %v19117_v44  ;;  %v7472_v15 = vsub.f32 %v19366_v50, %v21654_v56 }
 0xb85   :  { %14694 = vmatprep.mubr.msk.f32.mxu0 %vm15780_vm1, %v21793_v39  ;;  %14754 = vmatprep.mubr.msk.f32.mxu1 %vm15780_vm1, %v21793_v39 }
 0xb86   :  { %v7473_v34 = vand.u32 4294901760, %v7472_v15 }
 0xb88   :  { %14695 = vmatmul.mubr.f32.gmra.mxu0 %v6656_v13  ;;  %14755 = vmatmul.mubr.f32.gmra.mxu1 %v19119_v53 }
 0xb89   :  { %14726 = vmatprep.mubr.msk.f32.mxu0 %vm15780_vm1, %v21793_v39  ;;  %14757 = vmatprep.mubr.msk.f32.mxu1 %vm15780_vm1, %v21793_v39 }
 0xb8c   :  { %14727 = vmatmul.mubr.f32.vlgmr.msra.gmra.mxu0 %v19117_v44  ;;  %14758 = vmatmul.mubr.f32.gmra.mxu1 %v19121_v30  ;;  %v19315_v44 = vsub.f32 %v7251_v54, %v19310_v26 }
 0xb8d   :  { %14729 = vmatprep.mubr.msk.f32.mxu0 %vm15780_vm1, %v21793_v39  ;;  %14760 = vmatprep.mubr.msk.f32.mxu1 %vm15780_vm1, %v21793_v39 }
 0xb8e   :  { %14773 = vmatpush3.msra.mxu0 %v19300_v16 }
 0xb8f   :  { %14774 = vmatprep.subr.mxu0 %v21793_v39 }
 0xb90   :  { %14730 = vmatmul.mubr.f32.gmra.mxu0 %v19119_v53  ;;  %14761 = vmatmul.mubr.f32.gmra.mxu1 %v19135_v3  ;;  %v7250_v53 = vld [vmem:[%s21593_s5 + $0x28] sm:$0xff] }
 0xb91   :  { %14732 = vmatprep.mubr.msk.f32.mxu0 %vm15780_vm1, %v21793_v39  ;;  %14763 = vmatprep.mubr.msk.f32.mxu1 %vm15780_vm1, %v21793_v39  ;;  %v19324_v46 = vand.u32 4294901760, %v7250_v53 }
 0xb92   :  { %14775 = vmatpush3.msra.mxu0 %v19310_v26 }
 0xb93   :  { %14776 = vmatprep.subr.mxu0 %v21793_v39  ;;  %v19333_v2 = vsub.f32 %v7250_v53, %v19324_v46  ;;  %v7493_v53 = vsub.f32 %v19402_v21, %v21651_v49 }
 0xb94   :  { %14733 = vmatmul.mubr.f32.gmra.mxu0 %v19121_v30  ;;  %14764 = vmatmul.mubr.f32.gmra.mxu1 %v19160_v47  ;;  %v7444_v30 = vsub.f32 %v19304_v40, %v21658_v22 }
 0xb95   :  { %14735 = vmatprep.mubr.msk.f32.mxu0 %vm15780_vm1, %v21793_v39  ;;  %14766 = vmatprep.mubr.msk.f32.mxu1 %vm15780_vm1, %v21793_v39  ;;  %v21656_v14 = vand.u32 4294901760, %v19333_v2 }
 0xb96   :  { %v7445_v5 = vand.u32 4294901760, %v7444_v30  ;;  %14777 = vmatpush3.msra.mxu0 %v19324_v46  ;;  %v7494_v30 = vand.u32 4294901760, %v7493_v53 }
 0xb97   :  { %14778 = vmatprep.subr.mxu0 %v21793_v39  ;;  %v7458_v60 = vsub.f32 %v19333_v2, %v21656_v14 }
 0xb98   :  { %14736 = vmatmul.mubr.f32.gmra.mxu0 %v19135_v3  ;;  %14767 = vmatmul.mubr.f32.gmra.mxu1 %v19166_v20  ;;  %v21657_v3 = vand.u32 4294901760, %v19315_v44 }
 0xb99   :  { %14738 = vmatprep.mubr.msk.f32.mxu0 %vm15780_vm1, %v21793_v39  ;;  %14769 = vmatprep.mubr.msk.f32.mxu1 %vm15780_vm1, %v21793_v39 }
 0xb9a   :  { %v7451_v11 = vsub.f32 %v19315_v44, %v21657_v3  ;;  %14810 = vmatpush3.msra.mxu1 %v7445_v5  ;;  %14779 = vmatpush3.msra.mxu0 %v19330_v62 }
 0xb9b   :  { %14811 = vmatprep.subr.mxu1 %v21793_v39  ;;  %14780 = vmatprep.subr.mxu0 %v21793_v39 }
 0xb9c   :  { %14739 = vmatmul.mubr.f32.gmra.mxu0 %v19160_v47  ;;  %14770 = vmatmul.mubr.f32.gmra.mxu1 %v19183_v48  ;;  %v7452_v37 = vand.u32 4294901760, %v7451_v11  ;;  %v7459_v47 = vand.u32 4294901760, %v7458_v60 }
 0xb9d   :  { %14741 = vmatprep.mubr.msk.f32.mxu0 %vm15780_vm1, %v21793_v39  ;;  %14825 = vmatprep.mubr.msk.f32.mxu1 %vm15780_vm1, %v21793_v39 }
 0xb9e   :  { %14812 = vmatpush3.msra.mxu1 %v7452_v37  ;;  %14781 = vmatpush3.msra.mxu0 %v19359_v9 }
 0xb9f   :  { %14813 = vmatprep.subr.mxu1 %v21793_v39  ;;  %14782 = vmatprep.subr.mxu0 %v21793_v39 }
 0xba0   :  { %14742 = vmatmul.mubr.f32.gmra.mxu0 %v19166_v20  ;;  %v7466_v20 = vand.u32 4294901760, %v7465_v45  ;;  %14814 = vmatpush3.msra.mxu1 %v7459_v47 }
 0xba1   :  { %14744 = vmatprep.mubr.msk.f32.mxu0 %vm15780_vm1, %v21793_v39  ;;  %14815 = vmatprep.subr.mxu1 %v21793_v39 }
 0xba2   :  { %14816 = vmatpush3.msra.mxu1 %v7466_v20  ;;  %14783 = vmatpush3.msra.mxu0 %v19368_v29 }
 0xba3   :  { %14817 = vmatprep.subr.mxu1 %v21793_v39  ;;  %14784 = vmatprep.subr.mxu0 %v21793_v39 }
 0xba4   :  { %14745 = vmatmul.mubr.f32.gmra.mxu0 %v19183_v48  ;;  %v7246_v48 = vld [vmem:[%s21593_s5 + $0x8] sm:$0xff]  ;;  %14818 = vmatpush3.msra.mxu1 %v7473_v34 }
 0xba5   :  { %14788 = vmatprep.mubr.msk.f32.mxu0 %vm15780_vm1, %v21793_v39  ;;  %v19379_v61 = vand.u32 4294901760, %v7246_v48  ;;  %14819 = vmatprep.subr.mxu1 %v21793_v39 }
 0xba6   :  { %14820 = vmatpush3.msra.mxu1 %v7480_v27 }
 0xba7   :  { %v19391_v13 = vsub.f32 %v7246_v48, %v19379_v61  ;;  %14785 = vmatpush3.msra.mxu0 %v19379_v61  ;;  %14821 = vmatprep.subr.mxu1 %v21793_v39 }
 0xba8   :  { %14786 = vmatprep.subr.mxu0 %v21793_v39 }
 0xba9   :  { %v21652_v6 = vand.u32 4294901760, %v19391_v13  ;;  %14787 = vmatpush3.msra.mxu0 %v19393_v42 }
 0xbaa   :  { %14846 = vmatprep.subr.mxu0 %v21793_v39 }
 0xbab   :  { %v7486_v55 = vsub.f32 %v19391_v13, %v21652_v6 }
 0xbad   :  { %v7487_v54 = vand.u32 4294901760, %v7486_v55 }
 0xbaf   :  { %14822 = vmatpush3.msra.mxu1 %v7487_v54 }
 0xbb0   :  { %14823 = vmatprep.subr.mxu1 %v21793_v39 }
 0xbb1   :  { %14824 = vmatpush3.msra.mxu1 %v7494_v30 }
 0xbb2   :  { %14883 = vmatprep.subr.mxu1 %v21793_v39 }
 0xc0c   :  { %v6742_v24 = vpop.f32.mrf.mxu1 }
 0xc0e   :  { %v14653_v5 = vpop.f32.mrf.mxu1 }
 0xc10   :  { %v6748_v11 = vpop.f32.mrf.mxu1 }
 0xc12   :  { %v14656_v37 = vpop.f32.mrf.mxu1 }
 0xc14   :  { %v6601_v60 = vpop.f32.mrf.mxu0  ;;  %v6754_v45 = vpop.f32.mrf.mxu1 }
 0xc16   :  { %v14628_v47 = vpop.f32.mrf.mxu0  ;;  %v14659_v20 = vpop.f32.mrf.mxu1 }
 0xc18   :  { %v6611_v0 = vpop.f32.mrf.mxu0  ;;  %v19417_v38 = vpop.f32.mrf.mxu1 }
 0xc1a   :  { %v14631_v48 = vpop.f32.mrf.mxu0  ;;  %v14662_v25 = vpop.f32.mrf.mxu1 }
 0xc1c   :  { %v6621_v15 = vpop.f32.mrf.mxu0  ;;  %v19419_v34 = vpop.f32.mrf.mxu1 }
 0xc1d   :  { %v6755_v8 = vadd.f32 %v6754_v45, %v6621_v15 }
 0xc1e   :  { %v14634_v17 = vpop.f32.mrf.mxu0  ;;  %v14665_v27 = vpop.f32.mrf.mxu1 }
 0xc20   :  { %v6631_v55 = vpop.f32.mrf.mxu0  ;;  %v19421_v54 = vpop.f32.mrf.mxu1 }
 0xc22   :  { %v14637_v53 = vpop.f32.mrf.mxu0  ;;  %v14668_v30 = vpop.f32.mrf.mxu1 }
 0xc24   :  { %v19423_v5 = vpop.f32.mrf.mxu0  ;;  %v19425_v37 = vpop.f32.mrf.mxu1 }
 0xc26   :  { %v14640_v47 = vpop.f32.mrf.mxu0  ;;  %v14671_v20 = vpop.f32.mrf.mxu1 }
 0xc28   :  { %v19427_v49 = vpop.f32.mrf.mxu0  ;;  %v6971_v48 = vpop.f32.mrf.mxu1 }
 0xc2a   :  { %v14643_v25 = vpop.f32.mrf.mxu0  ;;  %v14703_v6 = vpop.f32.mrf.mxu1 }
 0xc2c   :  { %v19429_v18 = vpop.f32.mrf.mxu0  ;;  %v6979_v17 = vpop.f32.mrf.mxu1 }
 0xc2e   :  { %v14646_v27 = vpop.f32.mrf.mxu0  ;;  %v14706_v56 = vpop.f32.mrf.mxu1 }
 0xc30   :  { %v6854_v23 = vpop.f32.mrf.mxu0  ;;  %v6987_v14 = vpop.f32.mrf.mxu1 }
 0xc32   :  { %v14678_v53 = vpop.f32.mrf.mxu0  ;;  %v14709_v30 = vpop.f32.mrf.mxu1 }
 0xc34   :  { %v6861_v3 = vpop.f32.mrf.mxu0  ;;  %v19431_v22 = vpop.f32.mrf.mxu1 }
 0xc36   :  { %v14681_v19 = vpop.f32.mrf.mxu0  ;;  %v14712_v47 = vpop.f32.mrf.mxu1 }
 0xc37   :  { %v6743_v19 = vadd.f32 %v6742_v24, %v6601_v60 }
 0xc38   :  { %v6868_v20 = vpop.f32.mrf.mxu0  ;;  %v19433_v12 = vpop.f32.mrf.mxu1 }
 0xc39   :  { %v6855_v51 = vadd.f32 %v6854_v23, %v6743_v19  ;;  %v6869_v28 = vadd.f32 %v6868_v20, %v6755_v8  ;;  %v6761_v23 = vadd.f32 %v19417_v38, %v6631_v55 }
 0xc3a   :  { %v14684_v31 = vpop.f32.mrf.mxu0  ;;  %v14715_v25 = vpop.f32.mrf.mxu1 }
 0xc3b   :  { %v6749_v25 = vadd.f32 %v6748_v11, %v6611_v0  ;;  %v6988_v45 = vadd.f32 %v6987_v14, %v6869_v28 }
 0xc3c   :  { %v6875_v6 = vpop.f32.mrf.mxu0  ;;  %v19435_v63 = vpop.f32.mrf.mxu1 }
 0xc3e   :  { %v14687_v41 = vpop.f32.mrf.mxu0  ;;  %v14718_v27 = vpop.f32.mrf.mxu1 }
 0xc3f   :  { %v6862_v41 = vadd.f32 %v6861_v3, %v6749_v25  ;;  %v6972_v27 = vadd.f32 %v6971_v48, %v6855_v51  ;;  %v6876_v3 = vadd.f32 %v6875_v6, %v6761_v23 }
 0xc40   :  { %v6882_v56 = vpop.f32.mrf.mxu0  ;;  %v19437_v59 = vpop.f32.mrf.mxu1 }
 0xc41   :  { %v6980_v24 = vadd.f32 %v6979_v17, %v6862_v41 }
 0xc42   :  { %v14690_v53 = vpop.f32.mrf.mxu0  ;;  %v14721_v30 = vpop.f32.mrf.mxu1 }
 0xc44   :  { %v19439_v58 = vpop.f32.mrf.mxu0  ;;  %v7205_v36 = vpop.f32.mrf.mxu1 }
 0xc46   :  { %v14693_v47 = vpop.f32.mrf.mxu0  ;;  %v14753_v10 = vpop.f32.mrf.mxu1 }
 0xc48   :  { %v19441_v35 = vpop.f32.mrf.mxu0  ;;  %v7211_v31 = vpop.f32.mrf.mxu1 }
 0xc4a   :  { %v14696_v7 = vpop.f32.mrf.mxu0  ;;  %v14756_v52 = vpop.f32.mrf.mxu1 }
 0xc4c   :  { %v7096_v43 = vpop.f32.mrf.mxu0  ;;  %v7217_v33 = vpop.f32.mrf.mxu1 }
 0xc4d   :  { %v7097_v53 = vadd.f32 %v7096_v43, %v6972_v27 }
 0xc4e   :  { %v14728_v30 = vpop.f32.mrf.mxu0  ;;  %v14759_v57 = vpop.f32.mrf.mxu1 }
 0xc4f   :  { %v7206_v4 = vadd.f32 %v7205_v36, %v7097_v53  ;;  %v6767_v36 = vadd.f32 %v19419_v34, %v19423_v5  ;;  %v6996_v34 = vadd.f32 %v19431_v22, %v6876_v3 }
 0xc50   :  { %v7102_v60 = vpop.f32.mrf.mxu0  ;;  %v7223_v10 = vpop.f32.mrf.mxu1 }
 0xc51   :  { %v7261_v19 = vsel %vm4170_vm6, %v7206_v4, 0  ;;  %v7103_v11 = vadd.f32 %v7102_v60, %v6980_v24  ;;  %v6883_v48 = vadd.f32 %v6882_v56, %v6767_v36 }
 0xc52   :  { %v19445_v7 = vand.u32 4294901760, %v7261_v19  ;;  %v14731_v52 = vpop.f32.mrf.mxu0  ;;  %v14762_v51 = vpop.f32.mrf.mxu1 }
 0xc53   :  { %v7212_v0 = vadd.f32 %v7211_v31, %v7103_v11 }
 0xc54   :  { %v19448_v43 = vsub.f32 %v7261_v19, %v19445_v7  ;;  %v7108_v57 = vpop.f32.mrf.mxu0  ;;  %v7229_v8 = vpop.f32.mrf.mxu1  ;;  %14826 = vmatmul.mubr.f32.vlgmr.msra.gmra.mxu1 %v19445_v7 }
 0xc55   :  { %v7264_v4 = vsel %vm4170_vm6, %v7212_v0, 0  ;;  %v7109_v38 = vadd.f32 %v7108_v57, %v6988_v45  ;;  %14828 = vmatprep.mubr.msk.f32.mxu1 %vm15780_vm1, %v21793_v39  ;;  %14884 = vmatpush3.msra.mxu1 %v19300_v16 }
 0xc56   :  { %v7356_v28 = vand.u32 4294901760, %v19448_v43  ;;  %v19458_v14 = vand.u32 4294901760, %v7264_v4  ;;  %v14734_v15 = vpop.f32.mrf.mxu0  ;;  %v14765_v55 = vpop.f32.mrf.mxu1  ;;  %14885 = vmatprep.subr.mxu1 %v21793_v39 }
 0xc57   :  { %v7218_v17 = vadd.f32 %v7217_v33, %v7109_v38  ;;  %14886 = vmatpush3.msra.mxu1 %v19310_v26  ;;  %v6773_v33 = vadd.f32 %v19421_v54, %v19427_v49  ;;  %v7004_v54 = vadd.f32 %v19433_v12, %v6883_v48 }
 0xc58   :  { %v7357_v5 = vsub.f32 %v19448_v43, %v7356_v28  ;;  %v19467_v20 = vsub.f32 %v7264_v4, %v19458_v14  ;;  %v7114_v6 = vpop.f32.mrf.mxu0  ;;  %v7235_v47 = vpop.f32.mrf.mxu1  ;;  %14829 = vmatmul.mubr.f32.gmra.mxu1 %v19458_v14  ;;  %14887 = vmatprep.subr.mxu1 %v21793_v39 }
 0xc59   :  { %v7267_v22 = vsel %vm4170_vm6, %v7218_v17, 0  ;;  %v7115_v56 = vadd.f32 %v7114_v6, %v6996_v34  ;;  %14831 = vmatprep.mubr.msk.f32.mxu1 %vm15780_vm1, %v21793_v39  ;;  %14888 = vmatpush3.msra.mxu1 %v19324_v46  ;;  %v6890_v30 = vadd.f32 %v19439_v58, %v6773_v33  ;;  %v6779_v58 = vadd.f32 %v19425_v37, %v19429_v18 }
 0xc5a   :  { %v7358_v31 = vand.u32 4294901760, %v7357_v5  ;;  %v19477_v25 = vand.u32 4294901760, %v7267_v22  ;;  %v14737_v41 = vpop.f32.mrf.mxu0  ;;  %v14768_v27 = vpop.f32.mrf.mxu1  ;;  %v7366_v53 = vand.u32 4294901760, %v19467_v20  ;;  %14889 = vmatprep.subr.mxu1 %v21793_v39 }
 0xc5b   :  { %v7224_v49 = vadd.f32 %v7223_v10, %v7115_v56  ;;  %14890 = vmatpush3.msra.mxu1 %v19330_v62  ;;  %v6897_v18 = vadd.f32 %v19441_v35, %v6779_v58  ;;  %v7012_v45 = vadd.f32 %v19435_v63, %v6890_v30 }
 0xc5c   :  { %v19485_v24 = vsub.f32 %v7267_v22, %v19477_v25  ;;  %v7120_v60 = vpop.f32.mrf.mxu0  ;;  %v7241_v23 = vpop.f32.mrf.mxu1  ;;  %14789 = vmatmul.mubr.f32.vlgmr.msra.gmra.mxu0 %v7358_v31  ;;  %14832 = vmatmul.mubr.f32.gmra.mxu1 %v19477_v25  ;;  %v7367_v19 = vsub.f32 %v19467_v20, %v7366_v53 }
 0xc5d   :  { %v7270_v10 = vsel %vm4170_vm6, %v7224_v49, 0  ;;  %v7121_v12 = vadd.f32 %v7120_v60, %v7004_v54  ;;  %14791 = vmatprep.mubr.msk.f32.mxu0 %vm15780_vm1, %v21793_v39  ;;  %14834 = vmatprep.mubr.msk.f32.mxu1 %vm15780_vm1, %v21793_v39  ;;  %v7020_v17 = vadd.f32 %v19437_v59, %v6897_v18 }
 0xc5e   :  { %v19498_v11 = vand.u32 4294901760, %v7270_v10  ;;  %v14740_v52 = vpop.f32.mrf.mxu0  ;;  %v14771_v51 = vpop.f32.mrf.mxu1  ;;  %14847 = vmatpush3.msra.mxu0 %v19304_v40  ;;  %v7368_v3 = vand.u32 4294901760, %v7367_v19  ;;  %v7376_v0 = vand.u32 4294901760, %v19485_v24  ;;  %14891 = vmatprep.subr.mxu1 %v21793_v39 }
 0xc5f   :  { %v7230_v37 = vadd.f32 %v7229_v8, %v7121_v12  ;;  %14848 = vmatprep.subr.mxu0 %v21793_v39  ;;  %14892 = vmatpush3.msra.mxu1 %v19359_v9 }
 0xc60   :  { %v19508_v57 = vsub.f32 %v7270_v10, %v19498_v11  ;;  %v7126_v36 = vpop.f32.mrf.mxu0  ;;  %14792 = vmatmul.mubr.f32.gmra.mxu0 %v7368_v3  ;;  %14835 = vmatmul.mubr.f32.gmra.mxu1 %v19498_v11  ;;  %v7377_v4 = vsub.f32 %v19485_v24, %v7376_v0  ;;  %v21846_v3 = vld [vmem:[#allocation18_spill] sm:$0xff] }
 0xc61   :  { %v7273_v35 = vsel %vm4170_vm6, %v7230_v37, 0  ;;  %v7127_v8 = vadd.f32 %v7126_v36, %v7012_v45  ;;  %14794 = vmatprep.mubr.msk.f32.mxu0 %vm15780_vm1, %v21793_v39  ;;  %14837 = vmatprep.mubr.msk.f32.mxu1 %vm15780_vm1, %v21793_v39 }
 0xc62   :  { %v19519_v63 = vand.u32 4294901760, %v7273_v35  ;;  %v14743_v38 = vpop.f32.mrf.mxu0  ;;  %14849 = vmatpush3.msra.mxu0 %v19315_v44  ;;  %v7378_v15 = vand.u32 4294901760, %v7377_v4  ;;  %v7386_v55 = vand.u32 4294901760, %v19508_v57  ;;  %14893 = vmatprep.subr.mxu1 %v21793_v39 }
 0xc63   :  { %v7236_v48 = vadd.f32 %v7235_v47, %v7127_v8  ;;  %14850 = vmatprep.subr.mxu0 %v21793_v39  ;;  %14894 = vmatpush3.msra.mxu1 %v19368_v29 }
 0xc64   :  { %v19528_v34 = vsub.f32 %v7273_v35, %v19519_v63  ;;  %v7132_v5 = vpop.f32.mrf.mxu0  ;;  %14795 = vmatmul.mubr.f32.gmra.mxu0 %v7378_v15  ;;  %14838 = vmatmul.mubr.f32.gmra.mxu1 %v19519_v63  ;;  %v7387_v6 = vsub.f32 %v19508_v57, %v7386_v55 }
 0xc65   :  { %v7276_v33 = vsel %vm4170_vm6, %v7236_v48, 0  ;;  %v7133_v47 = vadd.f32 %v7132_v5, %v7020_v17  ;;  %14851 = vmatpush3.msra.mxu0 %v19333_v2  ;;  %14797 = vmatprep.mubr.msk.f32.mxu0 %vm15780_vm1, %v21793_v39 }
 0xc66   :  { %v19538_v59 = vand.u32 4294901760, %v7276_v33  ;;  %v14746_v22 = vpop.f32.mrf.mxu0  ;;  %14840 = vmatprep.mubr.msk.f32.mxu1 %vm15780_vm1, %v21793_v39  ;;  %v7388_v56 = vand.u32 4294901760, %v7387_v6  ;;  %14852 = vmatprep.subr.mxu0 %v21793_v39  ;;  %v7396_v31 = vand.u32 4294901760, %v19528_v34 }
 0xc67   :  { %v7242_v41 = vadd.f32 %v7241_v23, %v7133_v47  ;;  %14853 = vmatpush3.msra.mxu0 %v19340_v1  ;;  %14895 = vmatprep.subr.mxu1 %v21793_v39 }
 0xc68   :  { %v19547_v27 = vsub.f32 %v7276_v33, %v19538_v59  ;;  %14798 = vmatmul.mubr.f32.gmra.mxu0 %v7388_v56  ;;  %14841 = vmatmul.mubr.f32.gmra.mxu1 %v19538_v59  ;;  %v7397_v30 = vsub.f32 %v19528_v34, %v7396_v31 }
 0xc69   :  { %v7279_v49 = vsel %vm4170_vm6, %v7242_v41, 0  ;;  %14800 = vmatprep.mubr.msk.f32.mxu0 %vm15780_vm1, %v21793_v39  ;;  %14843 = vmatprep.mubr.msk.f32.mxu1 %vm15780_vm1, %v21793_v39 }
 0xc6a   :  { %v19558_v54 = vand.u32 4294901760, %v7279_v49  ;;  %v7398_v60 = vand.u32 4294901760, %v7397_v30  ;;  %14854 = vmatprep.subr.mxu0 %v21793_v39  ;;  %14896 = vmatpush3.msra.mxu1 %v19379_v61  ;;  %v7406_v23 = vand.u32 4294901760, %v19547_v27 }
 0xc6b   :  { %14855 = vmatpush3.msra.mxu0 %v19366_v50  ;;  %14897 = vmatprep.subr.mxu1 %v21793_v39 }
 0xc6c   :  { %v19566_v19 = vsub.f32 %v7279_v49, %v19558_v54  ;;  %14801 = vmatmul.mubr.f32.gmra.mxu0 %v7398_v60  ;;  %14844 = vmatmul.mubr.f32.gmra.mxu1 %v19558_v54  ;;  %v7407_v58 = vsub.f32 %v19547_v27, %v7406_v23 }
 0xc6d   :  { %14898 = vmatpush3.msra.mxu1 %v19393_v42  ;;  %14803 = vmatprep.mubr.msk.f32.mxu0 %vm15780_vm1, %v21793_v39 }
 0xc6e   :  { %14899 = vmatprep.mubr.msk.f32.mxu1 %vm15780_vm1, %v21793_v39  ;;  %14957 = vmatprep.subr.mxu1 %v21793_v39  ;;  %v7408_v10 = vand.u32 4294901760, %v7407_v58  ;;  %v7416_v12 = vand.u32 4294901760, %v19566_v19 }
 0xc6f   :  { %14856 = vmatprep.subr.mxu0 %v21793_v39 }
 0xc70   :  { %14804 = vmatmul.mubr.f32.gmra.mxu0 %v7408_v10  ;;  %14900 = vmatmul.mubr.f32.vlgmr.msra.gmra.mxu1 %v7356_v28  ;;  %v7417_v52 = vsub.f32 %v19566_v19, %v7416_v12 }
 0xc71   :  { %14958 = vmatpush3.msra.mxu1 %v19300_v16  ;;  %14857 = vmatpush3.msra.mxu0 %v19377_v32  ;;  %v21835_v16 = vand.u32 4294901760, %v19304_v40  ;;  %v21837_v40 = vand.u32 4294901760, %v19333_v2  ;;  %v21841_v2 = vand.u32 4294901760, %v19377_v32  ;;  %v12477_v32 = vld [vmem:[%s21586_s16 + $0x18] sm:$0xff] }
 0xc72   :  { %14959 = vmatprep.subr.mxu1 %v21793_v39  ;;  %14806 = vmatprep.mubr.msk.f32.mxu0 %vm15780_vm1, %v21793_v39  ;;  %v7418_v51 = vand.u32 4294901760, %v7417_v52 }
 0xc73   :  { %14960 = vmatpush3.msra.mxu1 %v19310_v26  ;;  %14858 = vmatprep.subr.mxu0 %v21793_v39  ;;  %v21836_v26 = vand.u32 4294901760, %v19315_v44  ;;  %v21838_v44 = vand.u32 4294901760, %v19340_v1  ;;  %v21842_v1 = vand.u32 4294901760, %v19391_v13 }
 0xc74   :  { %14902 = vmatprep.mubr.msk.f32.mxu1 %vm15780_vm1, %v21793_v39  ;;  %14961 = vmatprep.subr.mxu1 %v21793_v39 }
 0xc75   :  { %14807 = vmatmul.mubr.f32.gmra.mxu0 %v7418_v51  ;;  %14903 = vmatmul.mubr.f32.gmra.mxu1 %v7366_v53 }
 0xc76   :  { %14859 = vmatpush3.msra.mxu0 %v19391_v13  ;;  %14962 = vmatpush3.msra.mxu1 %v19324_v46  ;;  %v21839_v46 = vld [vmem:[#allocation24_spill] sm:$0xff] }
 0xc77   :  { %14860 = vmatprep.subr.mxu0 %v21793_v39  ;;  %14963 = vmatprep.subr.mxu1 %v21793_v39 }
 0xc78   :  { %14861 = vmatpush3.msra.mxu0 %v19402_v21  ;;  %14964 = vmatpush3.msra.mxu1 %v19330_v62  ;;  %v21840_v62 = vand.u32 4294901760, %v19366_v50  ;;  %v21844_v50 = vld [vmem:[#allocation17_spill] sm:$0xff] }
 0xc79   :  { %14862 = vmatprep.mubr.msk.f32.mxu0 %vm15780_vm1, %v21793_v39  ;;  %14905 = vmatprep.mubr.msk.f32.mxu1 %vm15780_vm1, %v21793_v39 }
 0xc7a   :  { %14920 = vmatprep.subr.mxu0 %v21793_v39  ;;  %14965 = vmatprep.subr.mxu1 %v21793_v39 }
 0xc7b   :  { %14863 = vmatmul.mubr.f32.vlgmr.msra.gmra.mxu0 %v19448_v43  ;;  %14906 = vmatmul.mubr.f32.gmra.mxu1 %v7376_v0 }
 0xc7c   :  { %14921 = vmatpush3.msra.mxu0 %v21835_v16  ;;  %14966 = vmatpush3.msra.mxu1 %v19359_v9  ;;  %v21843_v9 = vand.u32 4294901760, %v19402_v21 }
 0xc7d   :  { %14922 = vmatprep.subr.mxu0 %v21793_v39  ;;  %14967 = vmatprep.subr.mxu1 %v21793_v39 }
 0xc7e   :  { %14923 = vmatpush3.msra.mxu0 %v21836_v26  ;;  %14968 = vmatpush3.msra.mxu1 %v19368_v29  ;;  %v12476_v29 = vld [vmem:[%s21586_s16 + $0x10] sm:$0xff] }
 0xc7f   :  { %14865 = vmatprep.mubr.msk.f32.mxu0 %vm15780_vm1, %v21793_v39  ;;  %14908 = vmatprep.mubr.msk.f32.mxu1 %vm15780_vm1, %v21793_v39  ;;  %v8088_v13 = vsel %vm3662_vm5, %v12476_v29, 0 }
 0xc80   :  { %14924 = vmatprep.subr.mxu0 %v21793_v39  ;;  %14969 = vmatprep.subr.mxu1 %v21793_v39  ;;  %v8159_v21 = vand.u32 4294901760, %v8088_v13 }
 0xc81   :  { %14866 = vmatmul.mubr.f32.gmra.mxu0 %v19467_v20  ;;  %14909 = vmatmul.mubr.f32.gmra.mxu1 %v7386_v55 }
 0xc82   :  { %14925 = vmatpush3.msra.mxu0 %v21837_v40  ;;  %14970 = vmatpush3.msra.mxu1 %v19379_v61  ;;  %v21845_v61 = vld [vmem:[#allocation21_spill] sm:$0xff]  ;;  %v8160_v43 = vsub.f32 %v8088_v13, %v8159_v21 }
 0xc83   :  { %14926 = vmatprep.subr.mxu0 %v21793_v39  ;;  %14971 = vmatprep.subr.mxu1 %v21793_v39 }
 0xc84   :  { %14927 = vmatpush3.msra.mxu0 %v21838_v44  ;;  %14972 = vmatpush3.msra.mxu1 %v19393_v42  ;;  %v8091_v42 = vsel %vm3662_vm5, %v12477_v32, 0 }
 0xc85   :  { %14868 = vmatprep.mubr.msk.f32.mxu0 %vm15780_vm1, %v21793_v39  ;;  %14911 = vmatprep.mubr.msk.f32.mxu1 %vm15780_vm1, %v21793_v39 }
 0xc86   :  { %14928 = vmatprep.subr.mxu0 %v21793_v39  ;;  %14999 = vmatprep.subr.mxu1 %v21839_v46 }
 0xc87   :  { %14869 = vmatmul.mubr.f32.gmra.mxu0 %v19485_v24  ;;  %14912 = vmatmul.mubr.f32.gmra.mxu1 %v7396_v31 }
 0xc88   :  { %14929 = vmatpush3.msra.mxu0 %v21840_v62  ;;  %14871 = vmatprep.mubr.msk.f32.mxu0 %vm15780_vm1, %v21793_v39 }
 0xc89   :  { %14930 = vmatprep.subr.mxu0 %v21793_v39  ;;  %14914 = vmatprep.mubr.msk.f32.mxu1 %vm15780_vm1, %v21793_v39 }
 0xc8a   :  { %14931 = vmatpush3.msra.mxu0 %v21841_v2 }
 0xc8b   :  { %14932 = vmatprep.subr.mxu0 %v21793_v39  ;;  %14872 = vmatmul.mubr.f32.gmra.mxu0 %v19508_v57 }
 0xc8c   :  { %14915 = vmatmul.mubr.f32.gmra.mxu1 %v7406_v23  ;;  %14933 = vmatpush3.msra.mxu0 %v21842_v1 }
 0xc8d   :  { %14934 = vmatprep.subr.mxu0 %v21793_v39  ;;  %14874 = vmatprep.mubr.msk.f32.mxu0 %vm15780_vm1, %v21793_v39 }
 0xc8e   :  { %14935 = vmatpush3.msra.mxu0 %v21843_v9  ;;  %14917 = vmatprep.mubr.msk.f32.mxu1 %vm15780_vm1, %v21793_v39 }
 0xc8f   :  { %14994 = vmatprep.subr.mxu0 %v21844_v50  ;;  %14875 = vmatmul.mubr.f32.gmra.mxu0 %v19528_v34 }
 0xc90   :  { %14918 = vmatmul.mubr.f32.gmra.mxu1 %v7416_v12  ;;  %14877 = vmatprep.mubr.msk.f32.mxu0 %vm15780_vm1, %v21793_v39 }
 0xc91   :  { %14973 = vmatprep.mubr.msk.f32.mxu1 %vm15780_vm1, %v21793_v39 }
 0xc93   :  { %14878 = vmatmul.mubr.f32.gmra.mxu0 %v19547_v27 }
 0xc94   :  { %14974 = vmatmul.mubr.f32.vlgmr.msra.gmra.mxu1 %v19445_v7  ;;  %14880 = vmatprep.mubr.msk.f32.mxu0 %vm15780_vm1, %v21793_v39 }
 0xc95   :  { %15000 = vmatpush3.msra.mxu1 %v21839_v46  ;;  %14976 = vmatprep.mubr.msk.f32.mxu1 %vm15780_vm1, %v21793_v39 }
 0xc96   :  { %15009 = vmatprep.subr.mxu1 %v21844_v50 }
 0xc97   :  { %14881 = vmatmul.mubr.f32.gmra.mxu0 %v19566_v19 }
 0xc98   :  { %14977 = vmatmul.mubr.f32.gmra.mxu1 %v19458_v14  ;;  %14936 = vmatprep.mubr.msk.f32.mxu0 %vm15780_vm1, %v21793_v39 }
 0xc99   :  { %14979 = vmatprep.mubr.msk.f32.mxu1 %vm15780_vm1, %v21793_v39 }
 0xc9b   :  { %14937 = vmatmul.mubr.f32.vlgmr.msra.gmra.mxu0 %v19445_v7  ;;  %v8169_v7 = vand.u32 4294901760, %v8091_v42 }
 0xc9c   :  { %14980 = vmatmul.mubr.f32.gmra.mxu1 %v19477_v25  ;;  %14995 = vmatpush3.msra.mxu0 %v21844_v50 }
 0xc9d   :  { %15004 = vmatprep.subr.mxu0 %v21845_v61  ;;  %14939 = vmatprep.mubr.msk.f32.mxu0 %vm15780_vm1, %v21793_v39  ;;  %v8170_v28 = vsub.f32 %v8091_v42, %v8169_v7 }
 0xc9e   :  { %14982 = vmatprep.mubr.msk.f32.mxu1 %vm15780_vm1, %v21793_v39 }
 0xc9f   :  { %14940 = vmatmul.mubr.f32.gmra.mxu0 %v19458_v14  ;;  %v8161_v14 = vand.u32 4294901760, %v8160_v43  ;;  %v8171_v20 = vand.u32 4294901760, %v8170_v28 }
 0xca0   :  { %14983 = vmatmul.mubr.f32.gmra.mxu1 %v19498_v11  ;;  %14942 = vmatprep.mubr.msk.f32.mxu0 %vm15780_vm1, %v21793_v39 }
 0xca1   :  { %14985 = vmatprep.mubr.msk.f32.mxu1 %vm15780_vm1, %v21793_v39  ;;  %v8172_v53 = vsub.f32 %v8170_v28, %v8171_v20 }
 0xca3   :  { %14943 = vmatmul.mubr.f32.gmra.mxu0 %v19477_v25  ;;  %v8162_v25 = vsub.f32 %v8160_v43, %v8161_v14 }
 0xca4   :  { %14986 = vmatmul.mubr.f32.gmra.mxu1 %v19519_v63  ;;  %14945 = vmatprep.mubr.msk.f32.mxu0 %vm15780_vm1, %v21793_v39 }
 0xca5   :  { %14988 = vmatprep.mubr.msk.f32.mxu1 %vm15780_vm1, %v21793_v39  ;;  %v8163_v24 = vand.u32 4294901760, %v8162_v25 }
 0xca7   :  { %14946 = vmatmul.mubr.f32.gmra.mxu0 %v19498_v11  ;;  %v8173_v11 = vand.u32 4294901760, %v8172_v53 }
 0xca8   :  { %14989 = vmatmul.mubr.f32.gmra.mxu1 %v19538_v59  ;;  %14948 = vmatprep.mubr.msk.f32.mxu0 %vm15780_vm1, %v21793_v39 }
 0xca9   :  { %14991 = vmatprep.mubr.msk.f32.mxu1 %vm15780_vm1, %v21793_v39 }
 0xcab   :  { %14949 = vmatmul.mubr.f32.gmra.mxu0 %v19519_v63 }
 0xcac   :  { %14992 = vmatmul.mubr.f32.gmra.mxu1 %v19558_v54  ;;  %14951 = vmatprep.mubr.msk.f32.mxu0 %vm15780_vm1, %v21793_v39 }
 0xcad   :  { %15001 = vmatprep.mubr.f32.mxu1 %v8159_v21 }
 0xcaf   :  { %14952 = vmatmul.mubr.f32.gmra.mxu0 %v19538_v59 }
 0xcb0   :  { %15002 = vmatmul.mubr.f32.vlgmr.msra.gmra.mxu1 %v8169_v7  ;;  %14954 = vmatprep.mubr.msk.f32.mxu0 %vm15780_vm1, %v21793_v39 }
 0xcb1   :  { %15010 = vmatpush3.msra.mxu1 %v21844_v50  ;;  %15011 = vmatprep.mubr.f32.mxu1 %v8161_v14 }
 0xcb2   :  { %15019 = vmatprep.subr.mxu1 %v21844_v50 }
 0xcb3   :  { %14955 = vmatmul.mubr.f32.gmra.mxu0 %v19558_v54 }
 0xcb4   :  { %15012 = vmatmul.mubr.f32.vlgmr.msra.gmra.mxu1 %v8171_v20  ;;  %14996 = vmatprep.mubr.f32.mxu0 %v8163_v24 }
 0xcb5   :  { %15020 = vmatpush3.msra.mxu1 %v21844_v50  ;;  %15021 = vmatprep.mubr.f32.mxu1 %v8159_v21  ;;  %v12475_v50 = vld [vmem:[%s21594_s6] ss:$0 sm:$0xff] }
 0xcb6   :  { %15049 = vmatprep.subr.mxu1 %v21793_v39 }
 0xcb7   :  { %14997 = vmatmul.mubr.f32.vlgmr.msra.gmra.mxu0 %v8173_v11 }
 0xcb8   :  { %15005 = vmatpush3.msra.mxu0 %v21845_v61  ;;  %15006 = vmatprep.mubr.f32.mxu0 %v8160_v43 }
 0xcb9   :  { %15014 = vmatprep.subr.mxu0 %v21846_v3  ;;  %15022 = vmatmul.mubr.f32.vlgmr.msra.gmra.mxu1 %v8169_v7 }
 0xcba   :  { %15053 = vmatprep.mubr.msk.f32.mxu1 %vm15780_vm1, %v21793_v39 }
 0xcbb   :  { %15007 = vmatmul.mubr.f32.vlgmr.msra.gmra.mxu0 %v8170_v28 }
 0xcbc   :  { %15015 = vmatpush3.msra.mxu0 %v21846_v3  ;;  %15016 = vmatprep.mubr.f32.mxu0 %v8159_v21 }
 0xcbd   :  { %15024 = vmatprep.subr.mxu0 %v21793_v39 }
 0xcbf   :  { %15017 = vmatmul.mubr.f32.vlgmr.msra.gmra.mxu0 %v8169_v7 }
 0xcc0   :  { %15028 = vmatprep.mubr.msk.f32.mxu0 %vm15780_vm1, %v21793_v39 }
 0xd14   :  { %v7531_v0 = vpop.f32.mrf.mxu1 }
 0xd16   :  { %v14827_v18 = vpop.f32.mrf.mxu1 }
 0xd18   :  { %v7537_v37 = vpop.f32.mrf.mxu1 }
 0xd1a   :  { %v14830_v45 = vpop.f32.mrf.mxu1 }
 0xd1c   :  { %v7360_v57 = vpop.f32.mrf.mxu0  ;;  %v19744_v36 = vpop.f32.mrf.mxu1 }
 0xd1d   :  { %v7361_v13 = vadd.f32 %v12475_v50, %v7360_v57 }
 0xd1e   :  { %v14790_v4 = vpop.f32.mrf.mxu0  ;;  %v14833_v35 = vpop.f32.mrf.mxu1 }
 0xd1f   :  { %v7532_v14 = vadd.f32 %v7531_v0, %v7361_v13 }
 0xd20   :  { %v7370_v8 = vpop.f32.mrf.mxu0  ;;  %v19746_v63 = vpop.f32.mrf.mxu1 }
 0xd21   :  { %v7371_v28 = vadd.f32 %v12475_v50, %v7370_v8 }
 0xd22   :  { %v14793_v38 = vpop.f32.mrf.mxu0  ;;  %v14836_v15 = vpop.f32.mrf.mxu1 }
 0xd23   :  { %v7538_v18 = vadd.f32 %v7537_v37, %v7371_v28 }
 0xd24   :  { %v7380_v55 = vpop.f32.mrf.mxu0  ;;  %v19748_v48 = vpop.f32.mrf.mxu1 }
 0xd25   :  { %v7381_v3 = vadd.f32 %v12475_v50, %v7380_v55 }
 0xd26   :  { %v14796_v17 = vpop.f32.mrf.mxu0  ;;  %v14839_v34 = vpop.f32.mrf.mxu1 }
 0xd27   :  { %v7544_v34 = vadd.f32 %v19744_v36, %v7381_v3 }
 0xd28   :  { %v7390_v5 = vpop.f32.mrf.mxu0  ;;  %v19750_v6 = vpop.f32.mrf.mxu1 }
 0xd29   :  { %v7391_v17 = vadd.f32 %v12475_v50, %v7390_v5 }
 0xd2a   :  { %v14799_v33 = vpop.f32.mrf.mxu0  ;;  %v14842_v47 = vpop.f32.mrf.mxu1 }
 0xd2b   :  { %v7550_v37 = vadd.f32 %v19746_v63, %v7391_v17 }
 0xd2c   :  { %v7400_v59 = vpop.f32.mrf.mxu0  ;;  %v19752_v22 = vpop.f32.mrf.mxu1 }
 0xd2e   :  { %v14802_v56 = vpop.f32.mrf.mxu0  ;;  %v14845_v31 = vpop.f32.mrf.mxu1 }
 0xd30   :  { %v19754_v41 = vpop.f32.mrf.mxu0  ;;  %v7778_v27 = vpop.f32.mrf.mxu1 }
 0xd32   :  { %v14805_v30 = vpop.f32.mrf.mxu0  ;;  %v14901_v49 = vpop.f32.mrf.mxu1 }
 0xd35   :  { %v19756_v54 = vpop.f32.mrf.mxu0  ;;  %v7786_v60 = vpop.f32.mrf.mxu1 }
 0xd37   :  { %v14808_v23 = vpop.f32.mrf.mxu0  ;;  %v14904_v19 = vpop.f32.mrf.mxu1 }
 0xd38   :  { %v7401_v23 = vadd.f32 %v12475_v50, %v7400_v59 }
 0xd3b   :  { %v7655_v58 = vpop.f32.mrf.mxu0  ;;  %v7794_v10 = vpop.f32.mrf.mxu1 }
 0xd3c   :  { %v7656_v53 = vadd.f32 %v7655_v58, %v7532_v14 }
 0xd3d   :  { %v14864_v12 = vpop.f32.mrf.mxu0  ;;  %v14907_v52 = vpop.f32.mrf.mxu1 }
 0xd3e   :  { %v7779_v15 = vadd.f32 %v7778_v27, %v7656_v53 }
 0xd41   :  { %v7662_v51 = vpop.f32.mrf.mxu0  ;;  %v19758_v16 = vpop.f32.mrf.mxu1 }
 0xd42   :  { %v7663_v35 = vadd.f32 %v7662_v51, %v7538_v18  ;;  %v7411_v51 = vadd.f32 %v12475_v50, %v19754_v41 }
 0xd43   :  { %v14867_v26 = vpop.f32.mrf.mxu0  ;;  %v14910_v40 = vpop.f32.mrf.mxu1 }
 0xd44   :  { %v7787_v30 = vadd.f32 %v7786_v60, %v7663_v35  ;;  %v7556_v60 = vadd.f32 %v19748_v48, %v7401_v23  ;;  %v7562_v41 = vadd.f32 %v19750_v6, %v7411_v51  ;;  %v21848_v23 = vld [vmem:[#allocation10_spill] sm:$0xff] }
 0xd47   :  { %v7669_v44 = vpop.f32.mrf.mxu0  ;;  %v19760_v46 = vpop.f32.mrf.mxu1 }
 0xd48   :  { %v7670_v0 = vadd.f32 %v7669_v44, %v7544_v34 }
 0xd49   :  { %v14870_v62 = vpop.f32.mrf.mxu0  ;;  %v14913_v2 = vpop.f32.mrf.mxu1 }
 0xd4a   :  { %v7795_v12 = vadd.f32 %v7794_v10, %v7670_v0  ;;  %v7421_v10 = vadd.f32 %v12475_v50, %v19756_v54 }
 0xd4b   :  { %v7676_v1 = vpop.f32.mrf.mxu0 }
 0xd4c   :  { %v19762_v9 = vpop.f32.mrf.mxu1  ;;  %v7677_v36 = vadd.f32 %v7676_v1, %v7550_v37  ;;  %v8608_v37 = vsel %vm4170_vm6, %v21848_v23, 0 }
 0xd4d   :  { %v14873_v29 = vpop.f32.mrf.mxu0 }
 0xd4e   :  { %v14916_v32 = vpop.f32.mrf.mxu1  ;;  %v7803_v2 = vadd.f32 %v19758_v16, %v7677_v36  ;;  %v7568_v16 = vadd.f32 %v19752_v22, %v7421_v10 }
 0xd4f   :  { %v7683_v61 = vpop.f32.mrf.mxu0 }
 0xd50   :  { %v19767_v42 = vpop.f32.mrf.mxu1  ;;  %v7684_v40 = vadd.f32 %v7683_v61, %v7556_v60 }
 0xd51   :  { %v14876_v21 = vpop.f32.mrf.mxu0 }
 0xd52   :  { %v14919_v7 = vpop.f32.mrf.mxu1 }
 0xd53   :  { %v7690_v43 = vpop.f32.mrf.mxu0  ;;  %v7811_v7 = vadd.f32 %v19760_v46, %v7684_v40 }
 0xd54   :  { %v8036_v20 = vpop.f32.mrf.mxu1  ;;  %v7691_v13 = vadd.f32 %v7690_v43, %v7562_v41  ;;  %v15776_v41 = vld [vmem:[%s21588_s17] sm:$0xff] }
 0xd55   :  { %v14879_v25 = vpop.f32.mrf.mxu0 }
 0xd56   :  { %v14975_v24 = vpop.f32.mrf.mxu1  ;;  %v7819_v43 = vadd.f32 %v19762_v9, %v7691_v13 }
 0xd57   :  { %v7697_v11 = vpop.f32.mrf.mxu0 }
 0xd58   :  { %v8042_v45 = vpop.f32.mrf.mxu1  ;;  %v7698_v14 = vadd.f32 %v7697_v11, %v7568_v16 }
 0xd59   :  { %v14882_v4 = vpop.f32.mrf.mxu0 }
 0xd5a   :  { %v14978_v38 = vpop.f32.mrf.mxu1  ;;  %v7827_v18 = vadd.f32 %v19767_v42, %v7698_v14  ;;  %v21847_v42 = vld [vmem:[#allocation9_spill] sm:$0xff] }
 0xd5b   :  { %v7921_v57 = vpop.f32.mrf.mxu0  ;;  %v8606_v17 = vsel %vm4170_vm6, %v21847_v42, 0 }
 0xd5c   :  { %v7922_v33 = vadd.f32 %v7921_v57, %v7779_v15  ;;  %v8048_v47 = vpop.f32.mrf.mxu1 }
 0xd5d   :  { %v14938_v8 = vpop.f32.mrf.mxu0 }
 0xd5e   :  { %v8037_v56 = vadd.f32 %v8036_v20, %v7922_v33  ;;  %v14981_v31 = vpop.f32.mrf.mxu1 }
 0xd5f   :  { %v7927_v49 = vpop.f32.mrf.mxu0 }
 0xd60   :  { %8076 = vst.msk [vmem:[%s21595_s19] sm:$0xff] %vm86_vm0, %v8037_v56  ;;  %v7928_v55 = vadd.f32 %v7927_v49, %v7787_v30  ;;  %v8054_v5 = vpop.f32.mrf.mxu1  ;;  %v19810_v56 = vand.u32 4294901760, %v8606_v17 }
 0xd61   :  { %v14941_v27 = vpop.f32.mrf.mxu0 }
 0xd62   :  { %v8043_v19 = vadd.f32 %v8042_v45, %v7928_v55  ;;  %v14984_v58 = vpop.f32.mrf.mxu1 }
 0xd63   :  { %v7933_v52 = vpop.f32.mrf.mxu0 }
 0xd64   :  { %8077 = vst.msk [vmem:[%s21595_s19 + $0x8] sm:$0xff] %vm86_vm0, %v8043_v19  ;;  %v7934_v63 = vadd.f32 %v7933_v52, %v7795_v12  ;;  %v8060_v59 = vpop.f32.mrf.mxu1  ;;  %v19815_v19 = vsub.f32 %v8606_v17, %v19810_v56  ;;  %v19817_v12 = vand.u32 4294901760, %v8608_v37  ;;  %v21849_v52 = vld [vmem:[#allocation11_spill] sm:$0xff]  ;;  %v21853_v17 = vld [vmem:[#allocation12_spill] sm:$0xff] }
 0xd65   :  { %v14944_v26 = vpop.f32.mrf.mxu0  ;;  %v8610_v51 = vsel %vm4170_vm6, %v21849_v52, 0 }
 0xd66   :  { %v8049_v44 = vadd.f32 %v8048_v47, %v7934_v63  ;;  %v14987_v62 = vpop.f32.mrf.mxu1  ;;  %v15775_v26 = vld [vmem:[%s21588_s17 + $0x8] sm:$0xff] }
 0xd67   :  { %v7939_v1 = vpop.f32.mrf.mxu0  ;;  %v19829_v62 = vand.u32 4294901760, %v8610_v51 }
 0xd68   :  { %8078 = vst.msk [vmem:[%s21595_s19 + $0x10] sm:$0xff] %vm86_vm0, %v8049_v44  ;;  %v7940_v48 = vadd.f32 %v7939_v1, %v7803_v2  ;;  %v8066_v29 = vpop.f32.mrf.mxu1  ;;  %v8695_v2 = vand.u32 4294901760, %v19815_v19  ;;  %v19833_v1 = vsub.f32 %v8608_v37, %v19817_v12 }
 0xd69   :  { %v14947_v32 = vpop.f32.mrf.mxu0 }
 0xd6a   :  { %v8055_v21 = vadd.f32 %v8054_v5, %v7940_v48  ;;  %v14990_v61 = vpop.f32.mrf.mxu1  ;;  %v8696_v16 = vsub.f32 %v19815_v19, %v8695_v2 }
 0xd6b   :  { %v7945_v28 = vpop.f32.mrf.mxu0  ;;  %v19846_v61 = vsub.f32 %v8610_v51, %v19829_v62 }
 0xd6c   :  { %8079 = vst.msk [vmem:[%s21595_s19 + $0x18] sm:$0xff] %vm86_vm0, %v8055_v21  ;;  %v7946_v6 = vadd.f32 %v7945_v28, %v7811_v7  ;;  %v8072_v54 = vpop.f32.mrf.mxu1 }
 0xd6d   :  { %v14950_v50 = vpop.f32.mrf.mxu0 }
 0xd6e   :  { %v8061_v20 = vadd.f32 %v8060_v59, %v7946_v6  ;;  %v14993_v25 = vpop.f32.mrf.mxu1  ;;  %v21851_v50 = vld [vmem:[#allocation14_spill] sm:$0xff] }
 0xd6f   :  { %v7951_v53 = vpop.f32.mrf.mxu0  ;;  %v8614_v14 = vsel %vm4170_vm6, %v21851_v50, 0 }
 0xd70   :  { %8080 = vst.msk [vmem:[%s21595_s19 + $0x20] sm:$0xff] %vm86_vm0, %v8061_v20  ;;  %v7952_v22 = vadd.f32 %v7951_v53, %v7819_v43  ;;  %v15003_v46 = vpop.f32.mrf.mxu1 }
 0xd71   :  { %v14953_v24 = vpop.f32.mrf.mxu0 }
 0xd72   :  { %v8067_v3 = vadd.f32 %v8066_v29, %v7952_v22  ;;  %v8251_v4 = vpop.f32.mrf.mxu1  ;;  %v21850_v29 = vld [vmem:[#allocation13_spill] sm:$0xff]  ;;  %v8715_v22 = vand.u32 4294901760, %v19846_v61  ;;  %v19876_v24 = vand.u32 4294901760, %v8614_v14 }
 0xd73   :  { %v7957_v45 = vpop.f32.mrf.mxu0  ;;  %v8612_v32 = vsel %vm4170_vm6, %v21850_v29, 0 }
 0xd74   :  { %8081 = vst.msk [vmem:[%s21595_s19 + $0x28] sm:$0xff] %vm86_vm0, %v8067_v3  ;;  %v7958_v9 = vadd.f32 %v7957_v45, %v7827_v18  ;;  %v15013_v15 = vpop.f32.mrf.mxu1  ;;  %v19857_v6 = vand.u32 4294901760, %v8612_v32  ;;  %v8697_v3 = vand.u32 4294901760, %v8696_v16  ;;  %v21852_v45 = vld [vmem:[#allocation15_spill] sm:$0xff] }
 0xd75   :  { %v14956_v11 = vpop.f32.mrf.mxu0 }
 0xd76   :  { %v8073_v35 = vadd.f32 %v8072_v54, %v7958_v9  ;;  %v8412_v47 = vpop.f32.mrf.mxu1  ;;  %v8705_v54 = vand.u32 4294901760, %v19833_v1 }
 0xd77   :  { %v14998_v38 = vpop.f32.mrf.mxu0 }
 0xd78   :  { %8083 = vst.msk [vmem:[%s21595_s19 + $0x30] sm:$0x1] %vm8082_vm15, %v8073_v35  ;;  %v8258_v34 = vadd.f32 %v15003_v46, %v14998_v38  ;;  %v19874_v46 = vsub.f32 %v8612_v32, %v19857_v6  ;;  %v8706_v18 = vsub.f32 %v19833_v1, %v8705_v54  ;;  %v8716_v35 = vsub.f32 %v19846_v61, %v8715_v22 }
 0xd79   :  { %v8165_v57 = vpop.f32.mrf.mxu0  ;;  %v15023_v5 = vpop.f32.mrf.mxu1  ;;  %v19892_v38 = vsub.f32 %v8614_v14, %v19876_v24 }
 0xd7a   :  { %v8252_v8 = vadd.f32 %v8251_v4, %v8165_v57  ;;  %v8616_v4 = vsel %vm4170_vm6, %v21852_v45, 0  ;;  %v8707_v57 = vand.u32 4294901760, %v8706_v18  ;;  %v8725_v42 = vand.u32 4294901760, %v19874_v46 }
 0xd7b   :  { %v15008_v33 = vpop.f32.mrf.mxu0  ;;  %v8572_v59 = vpop.f32.mrf.mxu1 }
 0xd7c   :  { %v8339_v0 = vadd.f32 %v15008_v33, %v8258_v34  ;;  %v21854_v34 = vrot.slane %v21853_v17, 1 }
 0xd7d   :  { %v8331_v31 = vpop.f32.mrf.mxu0 }
 0xd7e   :  { %v8332_v30 = vadd.f32 %v8331_v31, %v8252_v8  ;;  %v8421_v49 = vadd.f32 %v15013_v15, %v8339_v0  ;;  %v19894_v15 = vand.u32 4294901760, %v8616_v4  ;;  %v8618_v33 = vsel %vm4170_vm6, %v21854_v34, 0 }
 0xd7f   :  { %v15018_v55 = vpop.f32.mrf.mxu0  ;;  %v8717_v8 = vand.u32 4294901760, %v8716_v35  ;;  %v19908_v31 = vand.u32 4294901760, %v8618_v33 }
 0xd80   :  { %v8413_v27 = vadd.f32 %v8412_v47, %v8332_v30  ;;  %v8501_v36 = vadd.f32 %v15018_v55, %v8421_v49  ;;  %v19906_v0 = vsub.f32 %v8616_v4, %v19894_v15  ;;  %v8726_v30 = vsub.f32 %v19874_v46, %v8725_v42 }
 0xd81   :  { %v8494_v58 = vpop.f32.mrf.mxu0  ;;  %v8735_v49 = vand.u32 4294901760, %v19892_v38  ;;  %v19923_v23 = vsub.f32 %v8618_v33, %v19908_v31 }
 0xd82   :  { %v8495_v60 = vadd.f32 %v8494_v58, %v8413_v27  ;;  %v19821_v63 = vadd.f32 %v15023_v5, %v8501_v36  ;;  %v8727_v37 = vand.u32 4294901760, %v8726_v30  ;;  %v8745_v5 = vand.u32 4294901760, %v19906_v0 }
 0xd83   :  { %v8736_v55 = vsub.f32 %v19892_v38, %v8735_v49  ;;  %v8755_v27 = vand.u32 4294901760, %v19923_v23 }
 0xd84   :  { %v8583_v40 = vmul.f32 %v15775_v26, %v19821_v63  ;;  %v19827_v44 = vadd.f32 %v8572_v59, %v8495_v60  ;;  %v8746_v58 = vsub.f32 %v19906_v0, %v8745_v5  ;;  %v21856_v59 = vld [vmem:[#allocation22_spill] sm:$0xff]  ;;  %v21857_v26 = vld [vmem:[#allocation27_spill] sm:$0xff] }
 0xd85   :  { %v8737_v36 = vand.u32 4294901760, %v8736_v55  ;;  %v8756_v51 = vsub.f32 %v19923_v23, %v8755_v27 }
 0xd86   :  { %v8624_v10 = vsel %vm4170_vm6, %v8583_v40, 0  ;;  %v8582_v48 = vmul.f32 %v15776_v41, %v19827_v44  ;;  %v8747_v52 = vand.u32 4294901760, %v8746_v58 }
 0xd87   :  { %v19842_v13 = vand.u32 4294901760, %v8624_v10  ;;  %v8757_v60 = vand.u32 4294901760, %v8756_v51 }
 0xd88   :  { %v8621_v21 = vsel %vm4170_vm6, %v8582_v48, 0 }
 0xd89   :  { %v19849_v7 = vsub.f32 %v8624_v10, %v19842_v13  ;;  %v19851_v28 = vand.u32 4294901760, %v8621_v21  ;;  %15025 = vmatpush3.xpose.msra.mxu0 %v19842_v13 }
 0xd8a   :  { %15026 = vmatprep.subr.mxu0 %v21793_v39 }
 0xd8b   :  { %v19864_v20 = vsub.f32 %v8621_v21, %v19851_v28  ;;  %v8794_v25 = vand.u32 4294901760, %v19849_v7 }
 0xd8d   :  { %15027 = vmatpush3.xpose.msra.mxu0 %v19851_v28  ;;  %v8795_v43 = vsub.f32 %v19849_v7, %v8794_v25  ;;  %v8801_v53 = vand.u32 4294901760, %v19864_v20 }
 0xd8e   :  { %15074 = vmatprep.subr.mxu0 %v21793_v39 }
 0xd8f   :  { %v8796_v9 = vand.u32 4294901760, %v8795_v43  ;;  %v8802_v11 = vsub.f32 %v19864_v20, %v8801_v53 }
 0xd90   :  { %15029 = vmatmul.mubr.f32.vlgmr.msra.gmra.mxu0 %v8697_v3 }
 0xd91   :  { %15050 = vmatpush3.xpose.msra.mxu1 %v8796_v9  ;;  %15075 = vmatpush3.xpose.msra.mxu0 %v19849_v7  ;;  %v8803_v47 = vand.u32 4294901760, %v8802_v11 }
 0xd92   :  { %15031 = vmatprep.mubr.msk.f32.mxu0 %vm15780_vm1, %v21793_v39  ;;  %15051 = vmatprep.subr.mxu1 %v21793_v39 }
 0xd93   :  { %15076 = vmatprep.subr.mxu0 %v21793_v39 }
 0xd94   :  { %15032 = vmatmul.mubr.f32.gmra.mxu0 %v8707_v57 }
 0xd95   :  { %15052 = vmatpush3.xpose.msra.mxu1 %v8803_v47  ;;  %15077 = vmatpush3.xpose.msra.mxu0 %v19864_v20 }
 0xd96   :  { %15034 = vmatprep.mubr.msk.f32.mxu0 %vm15780_vm1, %v21793_v39  ;;  %15099 = vmatprep.subr.mxu1 %v21793_v39 }
 0xd97   :  { %15124 = vmatprep.subr.mxu0 %v21793_v39 }
 0xd98   :  { %15035 = vmatmul.mubr.f32.gmra.mxu0 %v8717_v8  ;;  %15054 = vmatmul.mubr.f32.vlgmr.msra.gmra.mxu1 %v19810_v56 }
 0xd99   :  { %15100 = vmatpush3.xpose.msra.mxu1 %v19842_v13  ;;  %15037 = vmatprep.mubr.msk.f32.mxu0 %vm15780_vm1, %v21793_v39 }
 0xd9a   :  { %15056 = vmatprep.mubr.msk.f32.mxu1 %vm15780_vm1, %v21793_v39  ;;  %15101 = vmatprep.subr.mxu1 %v21793_v39 }
 0xd9c   :  { %15038 = vmatmul.mubr.f32.gmra.mxu0 %v8727_v37  ;;  %15057 = vmatmul.mubr.f32.gmra.mxu1 %v19817_v12 }
 0xd9d   :  { %15102 = vmatpush3.xpose.msra.mxu1 %v19851_v28  ;;  %15040 = vmatprep.mubr.msk.f32.mxu0 %vm15780_vm1, %v21793_v39 }
 0xd9e   :  { %15059 = vmatprep.mubr.msk.f32.mxu1 %vm15780_vm1, %v21793_v39  ;;  %15149 = vmatprep.subr.mxu1 %v21793_v39 }
 0xda0   :  { %15041 = vmatmul.mubr.f32.gmra.mxu0 %v8737_v36  ;;  %15060 = vmatmul.mubr.f32.gmra.mxu1 %v19829_v62 }
 0xda1   :  { %15043 = vmatprep.mubr.msk.f32.mxu0 %vm15780_vm1, %v21793_v39  ;;  %15062 = vmatprep.mubr.msk.f32.mxu1 %vm15780_vm1, %v21793_v39 }
 0xda4   :  { %15044 = vmatmul.mubr.f32.gmra.mxu0 %v8747_v52  ;;  %15063 = vmatmul.mubr.f32.gmra.mxu1 %v19857_v6 }
 0xda5   :  { %15046 = vmatprep.mubr.msk.f32.mxu0 %vm15780_vm1, %v21793_v39  ;;  %15065 = vmatprep.mubr.msk.f32.mxu1 %vm15780_vm1, %v21793_v39 }
 0xda8   :  { %15047 = vmatmul.mubr.f32.gmra.mxu0 %v8757_v60  ;;  %15066 = vmatmul.mubr.f32.gmra.mxu1 %v19876_v24 }
 0xda9   :  { %15068 = vmatprep.mubr.msk.f32.mxu1 %vm15780_vm1, %v21793_v39  ;;  %15078 = vmatprep.mubr.msk.f32.mxu0 %vm15780_vm1, %v21793_v39 }
 0xdac   :  { %15069 = vmatmul.mubr.f32.gmra.mxu1 %v19894_v15  ;;  %15079 = vmatmul.mubr.f32.vlgmr.msra.gmra.mxu0 %v19815_v19  ;;  %v21855_v19 = vld [vmem:[#allocation31_spill] sm:$0xff] }
 0xdad   :  { %15125 = vmatpush3.xpose.msra.mxu0 %v8794_v25  ;;  %15071 = vmatprep.mubr.msk.f32.mxu1 %vm15780_vm1, %v21793_v39 }
 0xdae   :  { %15081 = vmatprep.mubr.msk.f32.mxu0 %vm15780_vm1, %v21793_v39  ;;  %15126 = vmatprep.subr.mxu0 %v21793_v39 }
 0xdb0   :  { %15072 = vmatmul.mubr.f32.gmra.mxu1 %v19908_v31  ;;  %15082 = vmatmul.mubr.f32.gmra.mxu0 %v19833_v1 }
 0xdb1   :  { %15127 = vmatpush3.xpose.msra.mxu0 %v8801_v53  ;;  %15084 = vmatprep.mubr.msk.f32.mxu0 %vm15780_vm1, %v21793_v39 }
 0xdb2   :  { %15103 = vmatprep.mubr.msk.f32.mxu1 %vm15780_vm1, %v21793_v39  ;;  %15174 = vmatprep.subr.mxu0 %v21793_v39 }
 0xdb4   :  { %15085 = vmatmul.mubr.f32.gmra.mxu0 %v19846_v61  ;;  %15104 = vmatmul.mubr.f32.vlgmr.msra.gmra.mxu1 %v8695_v2 }
 0xdb5   :  { %15150 = vmatpush3.xpose.msra.mxu1 %v19842_v13  ;;  %15087 = vmatprep.mubr.msk.f32.mxu0 %vm15780_vm1, %v21793_v39 }
 0xdb6   :  { %15106 = vmatprep.mubr.msk.f32.mxu1 %vm15780_vm1, %v21793_v39  ;;  %15151 = vmatprep.subr.mxu1 %v21793_v39 }
 0xdb8   :  { %15088 = vmatmul.mubr.f32.gmra.mxu0 %v19874_v46  ;;  %15107 = vmatmul.mubr.f32.gmra.mxu1 %v8705_v54 }
 0xdb9   :  { %15152 = vmatpush3.xpose.msra.mxu1 %v19851_v28  ;;  %15090 = vmatprep.mubr.msk.f32.mxu0 %vm15780_vm1, %v21793_v39 }
 0xdba   :  { %15109 = vmatprep.mubr.msk.f32.mxu1 %vm15780_vm1, %v21793_v39  ;;  %15199 = vmatprep.subr.mxu1 %v21793_v39 }
 0xdbc   :  { %15091 = vmatmul.mubr.f32.gmra.mxu0 %v19892_v38  ;;  %15110 = vmatmul.mubr.f32.gmra.mxu1 %v8715_v22 }
 0xdbd   :  { %15093 = vmatprep.mubr.msk.f32.mxu0 %vm15780_vm1, %v21793_v39  ;;  %15112 = vmatprep.mubr.msk.f32.mxu1 %vm15780_vm1, %v21793_v39 }
 0xdc0   :  { %15094 = vmatmul.mubr.f32.gmra.mxu0 %v19906_v0  ;;  %15113 = vmatmul.mubr.f32.gmra.mxu1 %v8725_v42 }
 0xdc1   :  { %15096 = vmatprep.mubr.msk.f32.mxu0 %vm15780_vm1, %v21793_v39  ;;  %15115 = vmatprep.mubr.msk.f32.mxu1 %vm15780_vm1, %v21793_v39 }
 0xdc4   :  { %15097 = vmatmul.mubr.f32.gmra.mxu0 %v19923_v23  ;;  %15116 = vmatmul.mubr.f32.gmra.mxu1 %v8735_v49 }
 0xdc5   :  { %15118 = vmatprep.mubr.msk.f32.mxu1 %vm15780_vm1, %v21793_v39  ;;  %15128 = vmatprep.mubr.msk.f32.mxu0 %vm15780_vm1, %v21793_v39 }
 0xdc8   :  { %15119 = vmatmul.mubr.f32.gmra.mxu1 %v8745_v5  ;;  %15129 = vmatmul.mubr.f32.vlgmr.msra.gmra.mxu0 %v19810_v56 }
 0xdc9   :  { %15121 = vmatprep.mubr.msk.f32.mxu1 %vm15780_vm1, %v21793_v39  ;;  %15131 = vmatprep.mubr.msk.f32.mxu0 %vm15780_vm1, %v21793_v39 }
 0xdca   :  { %15175 = vmatpush3.msra.mxu0 %v21855_v19 }
 0xdcb   :  { %15176 = vmatprep.subr.mxu0 %v21793_v39 }
 0xdcc   :  { %15122 = vmatmul.mubr.f32.gmra.mxu1 %v8755_v27  ;;  %15132 = vmatmul.mubr.f32.gmra.mxu0 %v19817_v12 }
 0xdcd   :  { %15134 = vmatprep.mubr.msk.f32.mxu0 %vm15780_vm1, %v21793_v39  ;;  %15153 = vmatprep.mubr.msk.f32.mxu1 %vm15780_vm1, %v21793_v39 }
 0xdce   :  { %15177 = vmatpush3.msra.mxu0 %v21856_v59 }
 0xdcf   :  { %15224 = vmatprep.subr.mxu0 %v21793_v39 }
 0xdd0   :  { %15135 = vmatmul.mubr.f32.gmra.mxu0 %v19829_v62  ;;  %15154 = vmatmul.mubr.f32.vlgmr.msra.gmra.mxu1 %v19810_v56  ;;  %v21858_v56 = vld [vmem:[#allocation19_spill] sm:$0xff] }
 0xdd1   :  { %15137 = vmatprep.mubr.msk.f32.mxu0 %vm15780_vm1, %v21793_v39  ;;  %15156 = vmatprep.mubr.msk.f32.mxu1 %vm15780_vm1, %v21793_v39 }
 0xdd2   :  { %15200 = vmatpush3.msra.mxu1 %v21857_v26 }
 0xdd3   :  { %15201 = vmatprep.subr.mxu1 %v21793_v39 }
 0xdd4   :  { %15138 = vmatmul.mubr.f32.gmra.mxu0 %v19857_v6  ;;  %15157 = vmatmul.mubr.f32.gmra.mxu1 %v19817_v12 }
 0xdd5   :  { %15140 = vmatprep.mubr.msk.f32.mxu0 %vm15780_vm1, %v21793_v39  ;;  %15159 = vmatprep.mubr.msk.f32.mxu1 %vm15780_vm1, %v21793_v39 }
 0xdd6   :  { %15202 = vmatpush3.msra.mxu1 %v21858_v56 }
 0xdd7   :  { %15249 = vmatprep.subr.mxu1 %v21793_v39 }
 0xdd8   :  { %15141 = vmatmul.mubr.f32.gmra.mxu0 %v19876_v24  ;;  %15160 = vmatmul.mubr.f32.gmra.mxu1 %v19829_v62 }
 0xdd9   :  { %15143 = vmatprep.mubr.msk.f32.mxu0 %vm15780_vm1, %v21793_v39  ;;  %15162 = vmatprep.mubr.msk.f32.mxu1 %vm15780_vm1, %v21793_v39 }
 0xddc   :  { %15144 = vmatmul.mubr.f32.gmra.mxu0 %v19894_v15  ;;  %15163 = vmatmul.mubr.f32.gmra.mxu1 %v19857_v6 }
 0xddd   :  { %15146 = vmatprep.mubr.msk.f32.mxu0 %vm15780_vm1, %v21793_v39  ;;  %15165 = vmatprep.mubr.msk.f32.mxu1 %vm15780_vm1, %v21793_v39 }
 0xde0   :  { %15147 = vmatmul.mubr.f32.gmra.mxu0 %v19908_v31  ;;  %15166 = vmatmul.mubr.f32.gmra.mxu1 %v19876_v24 }
 0xde1   :  { %15168 = vmatprep.mubr.msk.f32.mxu1 %vm15780_vm1, %v21793_v39  ;;  %15178 = vmatprep.mubr.msk.f32.mxu0 %vm15780_vm1, %v21793_v39 }
 0xde4   :  { %15169 = vmatmul.mubr.f32.gmra.mxu1 %v19894_v15 }
 0xde5   :  { %15171 = vmatprep.mubr.msk.f32.mxu1 %vm15780_vm1, %v21793_v39 }
 0xde8   :  { %15172 = vmatmul.mubr.f32.gmra.mxu1 %v19908_v31 }
 0xde9   :  { %15203 = vmatprep.mubr.msk.f32.mxu1 %vm15780_vm1, %v21793_v39 }
 0xe50   :  { %v8699_v12 = vpop.f32.mrf.mxu0 }
 0xe52   :  { %v15030_v40 = vpop.f32.mrf.mxu0 }
 0xe54   :  { %v8709_v62 = vpop.f32.mrf.mxu0 }
 0xe56   :  { %v15033_v2 = vpop.f32.mrf.mxu0 }
 0xe58   :  { %v20068_v1 = vpop.f32.mrf.mxu0  ;;  %v8840_v10 = vpop.f32.mrf.mxu1 }
 0xe59   :  { %v8841_v52 = vadd.f32 %v8840_v10, %v8699_v12 }
 0xe5a   :  { %v15036_v41 = vpop.f32.mrf.mxu0  ;;  %v15055_v48 = vpop.f32.mrf.mxu1 }
 0xe5c   :  { %v20070_v29 = vpop.f32.mrf.mxu0  ;;  %v8846_v32 = vpop.f32.mrf.mxu1 }
 0xe5d   :  { %v8847_v2 = vadd.f32 %v8846_v32, %v8709_v62 }
 0xe5e   :  { %v15039_v13 = vpop.f32.mrf.mxu0  ;;  %v15058_v21 = vpop.f32.mrf.mxu1 }
 0xe60   :  { %v20072_v61 = vpop.f32.mrf.mxu0  ;;  %v8852_v7 = vpop.f32.mrf.mxu1 }
 0xe62   :  { %v15042_v28 = vpop.f32.mrf.mxu0  ;;  %v15061_v16 = vpop.f32.mrf.mxu1 }
 0xe64   :  { %v20074_v6 = vpop.f32.mrf.mxu0  ;;  %v8858_v54 = vpop.f32.mrf.mxu1 }
 0xe66   :  { %v15045_v50 = vpop.f32.mrf.mxu0  ;;  %v15064_v14 = vpop.f32.mrf.mxu1 }
 0xe67   :  { %v8853_v14 = vadd.f32 %v8852_v7, %v20068_v1 }
 0xe68   :  { %v20076_v20 = vpop.f32.mrf.mxu0  ;;  %v20078_v25 = vpop.f32.mrf.mxu1 }
 0xe6a   :  { %v15048_v43 = vpop.f32.mrf.mxu0  ;;  %v15067_v53 = vpop.f32.mrf.mxu1 }
 0xe6c   :  { %v20080_v22 = vpop.f32.mrf.mxu1  ;;  %v8952_v46 = vpop.f32.mrf.mxu0 }
 0xe6d   :  { %v8953_v26 = vadd.f32 %v8952_v46, %v8841_v52 }
 0xe6e   :  { %v15070_v24 = vpop.f32.mrf.mxu1  ;;  %v15080_v3 = vpop.f32.mrf.mxu0 }
 0xe70   :  { %v20082_v18 = vpop.f32.mrf.mxu1  ;;  %v8959_v45 = vpop.f32.mrf.mxu0 }
 0xe71   :  { %v8960_v21 = vadd.f32 %v8959_v45, %v8847_v2 }
 0xe72   :  { %v15073_v4 = vpop.f32.mrf.mxu1  ;;  %v15083_v9 = vpop.f32.mrf.mxu0 }
 0xe73   :  { %v8859_v9 = vadd.f32 %v8858_v54, %v20070_v29 }
 0xe74   :  { %v8966_v11 = vpop.f32.mrf.mxu0  ;;  %v9069_v35 = vpop.f32.mrf.mxu1 }
 0xe75   :  { %v9070_v41 = vadd.f32 %v9069_v35, %v8953_v26  ;;  %v8967_v10 = vadd.f32 %v8966_v11, %v8853_v14  ;;  %v8871_v26 = vadd.f32 %v20080_v22, %v20074_v6  ;;  %v21859_v14 = vld [vmem:[#allocation26_spill] sm:$0xff] }
 0xe76   :  { %v15086_v38 = vpop.f32.mrf.mxu0  ;;  %v15105_v15 = vpop.f32.mrf.mxu1 }
 0xe78   :  { %v8973_v57 = vpop.f32.mrf.mxu0  ;;  %v9077_v42 = vpop.f32.mrf.mxu1 }
 0xe79   :  { %v9078_v43 = vadd.f32 %v9077_v42, %v8960_v21  ;;  %v8974_v15 = vadd.f32 %v8973_v57, %v8859_v9 }
 0xe7a   :  { %v15089_v17 = vpop.f32.mrf.mxu0  ;;  %v15108_v34 = vpop.f32.mrf.mxu1 }
 0xe7c   :  { %v20084_v33 = vpop.f32.mrf.mxu0  ;;  %v9085_v47 = vpop.f32.mrf.mxu1 }
 0xe7d   :  { %v9086_v45 = vadd.f32 %v9085_v47, %v8967_v10  ;;  %v8865_v47 = vadd.f32 %v20078_v25, %v20072_v61 }
 0xe7e   :  { %v15092_v8 = vpop.f32.mrf.mxu0  ;;  %v15111_v0 = vpop.f32.mrf.mxu1 }
 0xe80   :  { %v20086_v31 = vpop.f32.mrf.mxu0  ;;  %v9093_v30 = vpop.f32.mrf.mxu1 }
 0xe81   :  { %v9094_v57 = vadd.f32 %v9093_v30, %v8974_v15  ;;  %v8988_v21 = vadd.f32 %v20086_v31, %v8871_v26  ;;  %v8877_v31 = vadd.f32 %v20082_v18, %v20076_v20 }
 0xe82   :  { %v15095_v49 = vpop.f32.mrf.mxu0  ;;  %v15114_v23 = vpop.f32.mrf.mxu1 }
 0xe84   :  { %v20088_v37 = vpop.f32.mrf.mxu0  ;;  %v20090_v55 = vpop.f32.mrf.mxu1 }
 0xe86   :  { %v15098_v5 = vpop.f32.mrf.mxu0  ;;  %v15117_v27 = vpop.f32.mrf.mxu1 }
 0xe87   :  { %v8981_v27 = vadd.f32 %v20084_v33, %v8865_v47 }
 0xe88   :  { %v20092_v36 = vpop.f32.mrf.mxu1  ;;  %v9194_v58 = vpop.f32.mrf.mxu0 }
 0xe89   :  { %v9195_v28 = vadd.f32 %v9194_v58, %v9070_v41 }
 0xe8a   :  { %v15120_v51 = vpop.f32.mrf.mxu1  ;;  %v15130_v60 = vpop.f32.mrf.mxu0 }
 0xe8c   :  { %v20094_v56 = vpop.f32.mrf.mxu1  ;;  %v9200_v40 = vpop.f32.mrf.mxu0 }
 0xe8d   :  { %v9201_v3 = vadd.f32 %v9200_v40, %v9078_v43  ;;  %v9102_v40 = vadd.f32 %v20090_v55, %v8981_v27 }
 0xe8e   :  { %v15123_v48 = vpop.f32.mrf.mxu1  ;;  %v15133_v13 = vpop.f32.mrf.mxu0 }
 0xe90   :  { %v9206_v16 = vpop.f32.mrf.mxu0  ;;  %v9303_v50 = vpop.f32.mrf.mxu1 }
 0xe91   :  { %v9304_v53 = vadd.f32 %v9303_v50, %v9195_v28  ;;  %v9207_v11 = vadd.f32 %v9206_v16, %v9086_v45 }
 0xe92   :  { %v15136_v24 = vpop.f32.mrf.mxu0  ;;  %v15155_v12 = vpop.f32.mrf.mxu1 }
 0xe93   :  { %v9344_v46 = vsel %vm4921_vm7, %v9304_v53, 0  ;;  %v9110_v53 = vadd.f32 %v20092_v36, %v8988_v21 }
 0xe94   :  { %v20098_v4 = vand.u32 4294901760, %v9344_v46  ;;  %v9212_v62 = vpop.f32.mrf.mxu0  ;;  %v9309_v32 = vpop.f32.mrf.mxu1 }
 0xe95   :  { %v9310_v35 = vadd.f32 %v9309_v32, %v9201_v3  ;;  %v9213_v61 = vadd.f32 %v9212_v62, %v9094_v57  ;;  %v8995_v62 = vadd.f32 %v20088_v37, %v8877_v31 }
 0xe96   :  { %v20102_v38 = vsub.f32 %v9344_v46, %v20098_v4  ;;  %v15139_v1 = vpop.f32.mrf.mxu0  ;;  %v15158_v7 = vpop.f32.mrf.mxu1  ;;  %15204 = vmatmul.mubr.f32.vlgmr.msra.gmra.mxu1 %v20098_v4 }
 0xe97   :  { %v9347_v42 = vsel %vm4921_vm7, %v9310_v35, 0  ;;  %15206 = vmatprep.mubr.msk.f32.mxu1 %vm15780_vm1, %v21793_v39  ;;  %15250 = vmatpush3.msra.mxu1 %v21855_v19  ;;  %v21860_v35 = vld [vmem:[#allocation30_spill] sm:$0xff]  ;;  %v9118_v1 = vadd.f32 %v20094_v56, %v8995_v62 }
 0xe98   :  { %v9433_v29 = vand.u32 4294901760, %v20102_v38  ;;  %v20110_v54 = vand.u32 4294901760, %v9347_v42  ;;  %v9218_v17 = vpop.f32.mrf.mxu0  ;;  %v9315_v34 = vpop.f32.mrf.mxu1  ;;  %15251 = vmatprep.subr.mxu1 %v21793_v39  ;;  %v20309_v62 = vld [vmem:[%s21590_s14] ss:$0 sm:$0xff] }
 0xe99   :  { %v9316_v8 = vadd.f32 %v9315_v34, %v9207_v11  ;;  %15252 = vmatpush3.msra.mxu1 %v21856_v59  ;;  %v9219_v28 = vadd.f32 %v9218_v17, %v9102_v40 }
 0xe9a   :  { %v9434_v0 = vsub.f32 %v20102_v38, %v9433_v29  ;;  %v20120_v49 = vsub.f32 %v9347_v42, %v20110_v54  ;;  %v15142_v23 = vpop.f32.mrf.mxu0  ;;  %v15161_v5 = vpop.f32.mrf.mxu1  ;;  %15207 = vmatmul.mubr.f32.gmra.mxu1 %v20110_v54  ;;  %15299 = vmatprep.subr.mxu1 %v21793_v39 }
 0xe9b   :  { %v9350_v25 = vsel %vm4921_vm7, %v9316_v8, 0  ;;  %15209 = vmatprep.mubr.msk.f32.mxu1 %vm15780_vm1, %v21793_v39 }
 0xe9c   :  { %v9435_v30 = vand.u32 4294901760, %v9434_v0  ;;  %v9443_v58 = vand.u32 4294901760, %v20120_v49  ;;  %v20129_v52 = vand.u32 4294901760, %v9350_v25  ;;  %v9224_v51 = vpop.f32.mrf.mxu0  ;;  %v9321_v60 = vpop.f32.mrf.mxu1 }
 0xe9d   :  { %v9322_v2 = vadd.f32 %v9321_v60, %v9213_v61  ;;  %v9225_v20 = vadd.f32 %v9224_v51, %v9110_v53 }
 0xe9e   :  { %v20135_v33 = vsub.f32 %v9350_v25, %v20129_v52  ;;  %v15145_v41 = vpop.f32.mrf.mxu0  ;;  %v15164_v48 = vpop.f32.mrf.mxu1  ;;  %15179 = vmatmul.mubr.f32.vlgmr.msra.gmra.mxu0 %v9435_v30  ;;  %15210 = vmatmul.mubr.f32.gmra.mxu1 %v20129_v52  ;;  %v9444_v13 = vsub.f32 %v20120_v49, %v9443_v58 }
 0xe9f   :  { %v9353_v6 = vsel %vm4921_vm7, %v9322_v2, 0  ;;  %15181 = vmatprep.mubr.msk.f32.mxu0 %vm15780_vm1, %v21793_v39  ;;  %15212 = vmatprep.mubr.msk.f32.mxu1 %vm15780_vm1, %v21793_v39 }
 0xea0   :  { %v9453_v22 = vand.u32 4294901760, %v20135_v33  ;;  %v20148_v55 = vand.u32 4294901760, %v9353_v6  ;;  %v9230_v16 = vpop.f32.mrf.mxu0  ;;  %v9327_v50 = vpop.f32.mrf.mxu1  ;;  %15225 = vmatpush3.msra.mxu0 %v21859_v14  ;;  %v9445_v43 = vand.u32 4294901760, %v9444_v13 }
 0xea1   :  { %v9328_v24 = vadd.f32 %v9327_v50, %v9219_v28  ;;  %15226 = vmatprep.subr.mxu0 %v21793_v39  ;;  %v9231_v42 = vadd.f32 %v9230_v16, %v9118_v1 }
 0xea2   :  { %v20156_v12 = vsub.f32 %v9353_v6, %v20148_v55  ;;  %v15148_v10 = vpop.f32.mrf.mxu0  ;;  %v15167_v3 = vpop.f32.mrf.mxu1  ;;  %15182 = vmatmul.mubr.f32.gmra.mxu0 %v9445_v43  ;;  %15213 = vmatmul.mubr.f32.gmra.mxu1 %v20148_v55  ;;  %v9454_v46 = vsub.f32 %v20135_v33, %v9453_v22 }
 0xea3   :  { %v9356_v18 = vsel %vm4921_vm7, %v9328_v24, 0  ;;  %15184 = vmatprep.mubr.msk.f32.mxu0 %vm15780_vm1, %v21793_v39  ;;  %15215 = vmatprep.mubr.msk.f32.mxu1 %vm15780_vm1, %v21793_v39 }
 0xea4   :  { %v9463_v36 = vand.u32 4294901760, %v20156_v12  ;;  %v20169_v32 = vand.u32 4294901760, %v9356_v18  ;;  %v9333_v9 = vpop.f32.mrf.mxu1  ;;  %v9455_v45 = vand.u32 4294901760, %v9454_v46  ;;  %15227 = vmatpush3.msra.mxu0 %v21860_v35 }
 0xea5   :  { %v9334_v37 = vadd.f32 %v9333_v9, %v9225_v20  ;;  %15274 = vmatprep.subr.mxu0 %v21793_v39 }
 0xea6   :  { %v20175_v7 = vsub.f32 %v9356_v18, %v20169_v32  ;;  %v15170_v15 = vpop.f32.mrf.mxu1  ;;  %15185 = vmatmul.mubr.f32.gmra.mxu0 %v9455_v45  ;;  %15216 = vmatmul.mubr.f32.gmra.mxu1 %v20169_v32  ;;  %v9464_v11 = vsub.f32 %v20156_v12, %v9463_v36 }
 0xea7   :  { %v9359_v17 = vsel %vm4921_vm7, %v9334_v37, 0  ;;  %15187 = vmatprep.mubr.msk.f32.mxu0 %vm15780_vm1, %v21793_v39  ;;  %15218 = vmatprep.mubr.msk.f32.mxu1 %vm15780_vm1, %v21793_v39 }
 0xea8   :  { %v9473_v56 = vand.u32 4294901760, %v20175_v7  ;;  %v20185_v34 = vand.u32 4294901760, %v9359_v17  ;;  %v9339_v47 = vpop.f32.mrf.mxu1  ;;  %v9465_v57 = vand.u32 4294901760, %v9464_v11 }
 0xea9   :  { %v9340_v8 = vadd.f32 %v9339_v47, %v9231_v42 }
 0xeaa   :  { %v9482_v0 = vsub.f32 %v9359_v17, %v20185_v34  ;;  %v15173_v23 = vpop.f32.mrf.mxu1  ;;  %15188 = vmatmul.mubr.f32.gmra.mxu0 %v9465_v57  ;;  %15219 = vmatmul.mubr.f32.gmra.mxu1 %v20185_v34  ;;  %v9474_v5 = vsub.f32 %v20175_v7, %v9473_v56 }
 0xeab   :  { %v9362_v27 = vsel %vm4921_vm7, %v9340_v8, 0  ;;  %15190 = vmatprep.mubr.msk.f32.mxu0 %vm15780_vm1, %v21793_v39  ;;  %15221 = vmatprep.mubr.msk.f32.mxu1 %vm15780_vm1, %v21793_v39 }
 0xeac   :  { %v9483_v61 = vand.u32 4294901760, %v9482_v0  ;;  %v20195_v25 = vand.u32 4294901760, %v9362_v27  ;;  %v9475_v30 = vand.u32 4294901760, %v9474_v5 }
 0xeae   :  { %v9492_v51 = vsub.f32 %v9362_v27, %v20195_v25  ;;  %15191 = vmatmul.mubr.f32.gmra.mxu0 %v9475_v30  ;;  %15222 = vmatmul.mubr.f32.gmra.mxu1 %v20195_v25  ;;  %v9484_v60 = vsub.f32 %v9482_v0, %v9483_v61 }
 0xeaf   :  { %15193 = vmatprep.mubr.msk.f32.mxu0 %vm15780_vm1, %v21793_v39  ;;  %15253 = vmatprep.mubr.msk.f32.mxu1 %vm15780_vm1, %v21793_v39 }
 0xeb0   :  { %v9493_v26 = vand.u32 4294901760, %v9492_v51  ;;  %v9485_v40 = vand.u32 4294901760, %v9484_v60 }
 0xeb2   :  { %15194 = vmatmul.mubr.f32.gmra.mxu0 %v9485_v40  ;;  %15254 = vmatmul.mubr.f32.vlgmr.msra.gmra.mxu1 %v9433_v29  ;;  %v9494_v2 = vsub.f32 %v9492_v51, %v9493_v26 }
 0xeb3   :  { %15196 = vmatprep.mubr.msk.f32.mxu0 %vm15780_vm1, %v21793_v39  ;;  %15256 = vmatprep.mubr.msk.f32.mxu1 %vm15780_vm1, %v21793_v39 }
 0xeb4   :  { %v9495_v41 = vand.u32 4294901760, %v9494_v2  ;;  %15300 = vmatpush3.msra.mxu1 %v21855_v19  ;;  %v21861_v19 = vld [vmem:[#allocation29_spill] sm:$0xff] }
 0xeb5   :  { %15301 = vmatprep.subr.mxu1 %v21793_v39 }
 0xeb6   :  { %15197 = vmatmul.mubr.f32.gmra.mxu0 %v9495_v41  ;;  %15257 = vmatmul.mubr.f32.gmra.mxu1 %v9443_v58 }
 0xeb7   :  { %15228 = vmatprep.mubr.msk.f32.mxu0 %vm15780_vm1, %v21793_v39  ;;  %15259 = vmatprep.mubr.msk.f32.mxu1 %vm15780_vm1, %v21793_v39 }
 0xeb8   :  { %15302 = vmatpush3.msra.mxu1 %v21856_v59  ;;  %v21862_v59 = vld [vmem:[#allocation16_spill] sm:$0xff] }
 0xeb9   :  { %15349 = vmatprep.subr.mxu1 %v21793_v39 }
 0xeba   :  { %15229 = vmatmul.mubr.f32.vlgmr.msra.gmra.mxu0 %v20102_v38  ;;  %15260 = vmatmul.mubr.f32.gmra.mxu1 %v9453_v22 }
 0xebb   :  { %15231 = vmatprep.mubr.msk.f32.mxu0 %vm15780_vm1, %v21793_v39  ;;  %15262 = vmatprep.mubr.msk.f32.mxu1 %vm15780_vm1, %v21793_v39 }
 0xebc   :  { %15275 = vmatpush3.msra.mxu0 %v21861_v19 }
 0xebd   :  { %15276 = vmatprep.subr.mxu0 %v21793_v39 }
 0xebe   :  { %15232 = vmatmul.mubr.f32.gmra.mxu0 %v20120_v49  ;;  %15263 = vmatmul.mubr.f32.gmra.mxu1 %v9463_v36 }
 0xebf   :  { %15234 = vmatprep.mubr.msk.f32.mxu0 %vm15780_vm1, %v21793_v39  ;;  %15265 = vmatprep.mubr.msk.f32.mxu1 %vm15780_vm1, %v21793_v39 }
 0xec0   :  { %15277 = vmatpush3.msra.mxu0 %v21862_v59 }
 0xec1   :  { %15324 = vmatprep.subr.mxu0 %v21793_v39 }
 0xec2   :  { %15235 = vmatmul.mubr.f32.gmra.mxu0 %v20135_v33  ;;  %15266 = vmatmul.mubr.f32.gmra.mxu1 %v9473_v56 }
 0xec3   :  { %15237 = vmatprep.mubr.msk.f32.mxu0 %vm15780_vm1, %v21793_v39  ;;  %15268 = vmatprep.mubr.msk.f32.mxu1 %vm15780_vm1, %v21793_v39 }
 0xec6   :  { %15238 = vmatmul.mubr.f32.gmra.mxu0 %v20156_v12  ;;  %15269 = vmatmul.mubr.f32.gmra.mxu1 %v9483_v61 }
 0xec7   :  { %15240 = vmatprep.mubr.msk.f32.mxu0 %vm15780_vm1, %v21793_v39  ;;  %15271 = vmatprep.mubr.msk.f32.mxu1 %vm15780_vm1, %v21793_v39 }
 0xeca   :  { %15241 = vmatmul.mubr.f32.gmra.mxu0 %v20175_v7  ;;  %15272 = vmatmul.mubr.f32.gmra.mxu1 %v9493_v26 }
 0xecb   :  { %15243 = vmatprep.mubr.msk.f32.mxu0 %vm15780_vm1, %v21793_v39  ;;  %15303 = vmatprep.mubr.msk.f32.mxu1 %vm15780_vm1, %v21793_v39 }
 0xece   :  { %15244 = vmatmul.mubr.f32.gmra.mxu0 %v9482_v0  ;;  %15304 = vmatmul.mubr.f32.vlgmr.msra.gmra.mxu1 %v20098_v4 }
 0xecf   :  { %15246 = vmatprep.mubr.msk.f32.mxu0 %vm15780_vm1, %v21793_v39  ;;  %15306 = vmatprep.mubr.msk.f32.mxu1 %vm15780_vm1, %v21793_v39 }
 0xed2   :  { %15247 = vmatmul.mubr.f32.gmra.mxu0 %v9492_v51  ;;  %15307 = vmatmul.mubr.f32.gmra.mxu1 %v20110_v54 }
 0xed3   :  { %15278 = vmatprep.mubr.msk.f32.mxu0 %vm15780_vm1, %v21793_v39  ;;  %15309 = vmatprep.mubr.msk.f32.mxu1 %vm15780_vm1, %v21793_v39 }
 0xed6   :  { %15279 = vmatmul.mubr.f32.vlgmr.msra.gmra.mxu0 %v20098_v4  ;;  %15310 = vmatmul.mubr.f32.gmra.mxu1 %v20129_v52 }
 0xed7   :  { %15281 = vmatprep.mubr.msk.f32.mxu0 %vm15780_vm1, %v21793_v39  ;;  %15312 = vmatprep.mubr.msk.f32.mxu1 %vm15780_vm1, %v21793_v39 }
 0xeda   :  { %15282 = vmatmul.mubr.f32.gmra.mxu0 %v20110_v54  ;;  %15313 = vmatmul.mubr.f32.gmra.mxu1 %v20148_v55 }
 0xedb   :  { %15284 = vmatprep.mubr.msk.f32.mxu0 %vm15780_vm1, %v21793_v39  ;;  %15315 = vmatprep.mubr.msk.f32.mxu1 %vm15780_vm1, %v21793_v39 }
 0xede   :  { %15285 = vmatmul.mubr.f32.gmra.mxu0 %v20129_v52  ;;  %15316 = vmatmul.mubr.f32.gmra.mxu1 %v20169_v32 }
 0xedf   :  { %15287 = vmatprep.mubr.msk.f32.mxu0 %vm15780_vm1, %v21793_v39  ;;  %15318 = vmatprep.mubr.msk.f32.mxu1 %vm15780_vm1, %v21793_v39 }
 0xee2   :  { %15288 = vmatmul.mubr.f32.gmra.mxu0 %v20148_v55  ;;  %15319 = vmatmul.mubr.f32.gmra.mxu1 %v20185_v34 }
 0xee3   :  { %15290 = vmatprep.mubr.msk.f32.mxu0 %vm15780_vm1, %v21793_v39  ;;  %15321 = vmatprep.mubr.msk.f32.mxu1 %vm15780_vm1, %v21793_v39 }
 0xee6   :  { %15291 = vmatmul.mubr.f32.gmra.mxu0 %v20169_v32  ;;  %15322 = vmatmul.mubr.f32.gmra.mxu1 %v20195_v25 }
 0xee7   :  { %15293 = vmatprep.mubr.msk.f32.mxu0 %vm15780_vm1, %v21793_v39  ;;  %15353 = vmatprep.mubr.msk.f32.mxu1 %vm15780_vm1, %v21793_v39 }
 0xeea   :  { %15294 = vmatmul.mubr.f32.gmra.mxu0 %v20185_v34 }
 0xeeb   :  { %15296 = vmatprep.mubr.msk.f32.mxu0 %vm15780_vm1, %v21793_v39 }
 0xeee   :  { %15297 = vmatmul.mubr.f32.gmra.mxu0 %v20195_v25 }
 0xeef   :  { %15328 = vmatprep.mubr.msk.f32.mxu0 %vm15780_vm1, %v21793_v39 }
 0xf56   :  { %v9578_v4 = vpop.f32.mrf.mxu1 }
 0xf58   :  { %v15205_v38 = vpop.f32.mrf.mxu1 }
 0xf5a   :  { %v20296_v29 = vpop.f32.mrf.mxu1 }
 0xf5c   :  { %v15208_v54 = vpop.f32.mrf.mxu1 }
 0xf5e   :  { %v9437_v49 = vpop.f32.mrf.mxu0  ;;  %v20298_v58 = vpop.f32.mrf.mxu1 }
 0xf5f   :  { %v9438_v26 = vadd.f32 %v20309_v62, %v9437_v49 }
 0xf60   :  { %v15180_v52 = vpop.f32.mrf.mxu0  ;;  %v15211_v33 = vpop.f32.mrf.mxu1 }
 0xf61   :  { %v9579_v38 = vadd.f32 %v9578_v4, %v9438_v26 }
 0xf62   :  { %v9447_v48 = vpop.f32.mrf.mxu0  ;;  %v20300_v13 = vpop.f32.mrf.mxu1 }
 0xf63   :  { %v9448_v59 = vadd.f32 %v20309_v62, %v9447_v48 }
 0xf64   :  { %v15183_v21 = vpop.f32.mrf.mxu0  ;;  %v15214_v28 = vpop.f32.mrf.mxu1 }
 0xf66   :  { %v9457_v6 = vpop.f32.mrf.mxu0  ;;  %v20302_v22 = vpop.f32.mrf.mxu1 }
 0xf67   :  { %v9458_v49 = vadd.f32 %v20309_v62, %v9457_v6 }
 0xf68   :  { %v15186_v55 = vpop.f32.mrf.mxu0  ;;  %v15217_v16 = vpop.f32.mrf.mxu1 }
 0xf69   :  { %v9585_v55 = vadd.f32 %v20296_v29, %v9448_v59 }
 0xf6a   :  { %v9467_v50 = vpop.f32.mrf.mxu0  ;;  %v9608_v14 = vpop.f32.mrf.mxu1 }
 0xf6b   :  { %v9468_v4 = vadd.f32 %v20309_v62, %v9467_v50 }
 0xf6c   :  { %v15189_v43 = vpop.f32.mrf.mxu0  ;;  %v15220_v31 = vpop.f32.mrf.mxu1 }
 0xf6e   :  { %v20304_v53 = vpop.f32.mrf.mxu0  ;;  %v9614_v24 = vpop.f32.mrf.mxu1 }
 0xf70   :  { %v15192_v12 = vpop.f32.mrf.mxu0  ;;  %v15223_v10 = vpop.f32.mrf.mxu1 }
 0xf72   :  { %v9487_v3 = vpop.f32.mrf.mxu0  ;;  %v9807_v46 = vpop.f32.mrf.mxu1 }
 0xf73   :  { %v9488_v20 = vadd.f32 %v20309_v62, %v9487_v3 }
 0xf74   :  { %v15195_v18 = vpop.f32.mrf.mxu0  ;;  %v15255_v36 = vpop.f32.mrf.mxu1 }
 0xf75   :  { %v20312_v32 = vadd.f32 %v9608_v14, %v9488_v20  ;;  %v9591_v20 = vadd.f32 %v20298_v58, %v9458_v49 }
 0xf76   :  { %v9497_v9 = vpop.f32.mrf.mxu0  ;;  %v9815_v45 = vpop.f32.mrf.mxu1 }
 0xf77   :  { %v9498_v35 = vadd.f32 %v20309_v62, %v9497_v9 }
 0xf78   :  { %v15198_v1 = vpop.f32.mrf.mxu0  ;;  %v15258_v37 = vpop.f32.mrf.mxu1 }
 0xf79   :  { %v20315_v7 = vadd.f32 %v9614_v24, %v9498_v35 }
 0xf7a   :  { %v9690_v15 = vpop.f32.mrf.mxu0  ;;  %v20317_v11 = vpop.f32.mrf.mxu1 }
 0xf7b   :  { %v9691_v33 = vadd.f32 %v9690_v15, %v9579_v38 }
 0xf7c   :  { %v15230_v42 = vpop.f32.mrf.mxu0  ;;  %v15261_v17 = vpop.f32.mrf.mxu1 }
 0xf7d   :  { %v9808_v31 = vadd.f32 %v9807_v46, %v9691_v33 }
 0xf7e   :  { %v9697_v56 = vpop.f32.mrf.mxu0  ;;  %v20319_v34 = vpop.f32.mrf.mxu1 }
 0xf7f   :  { %v9698_v43 = vadd.f32 %v9697_v56, %v9585_v55 }
 0xf80   :  { %v15233_v47 = vpop.f32.mrf.mxu0  ;;  %v15264_v57 = vpop.f32.mrf.mxu1 }
 0xf81   :  { %v9816_v36 = vadd.f32 %v9815_v45, %v9698_v43  ;;  %v9597_v45 = vadd.f32 %v20300_v13, %v9468_v4  ;;  %v9478_v13 = vadd.f32 %v20309_v62, %v20304_v53 }
 0xf82   :  { %v9704_v8 = vpop.f32.mrf.mxu0  ;;  %v20321_v0 = vpop.f32.mrf.mxu1 }
 0xf83   :  { %v9705_v35 = vadd.f32 %v9704_v8, %v9591_v20  ;;  %v9603_v62 = vadd.f32 %v20302_v22, %v9478_v13  ;;  %v21870_v8 = vld [vmem:[#allocation6_spill] sm:$0xff] }
 0xf84   :  { %v15236_v23 = vpop.f32.mrf.mxu0  ;;  %v15267_v5 = vpop.f32.mrf.mxu1 }
 0xf85   :  { %v9824_v26 = vadd.f32 %v20317_v11, %v9705_v35 }
 0xf86   :  { %v9711_v27 = vpop.f32.mrf.mxu0  ;;  %v20323_v61 = vpop.f32.mrf.mxu1 }
 0xf88   :  { %v15239_v25 = vpop.f32.mrf.mxu0  ;;  %v15270_v30 = vpop.f32.mrf.mxu1 }
 0xf89   :  { %v9712_v30 = vadd.f32 %v9711_v27, %v9597_v45 }
 0xf8a   :  { %v20325_v51 = vpop.f32.mrf.mxu0  ;;  %v20327_v60 = vpop.f32.mrf.mxu1 }
 0xf8b   :  { %v9832_v53 = vadd.f32 %v20319_v34, %v9712_v30 }
 0xf8c   :  { %v15242_v40 = vpop.f32.mrf.mxu0  ;;  %v15273_v2 = vpop.f32.mrf.mxu1 }
 0xf8e   :  { %v20330_v41 = vpop.f32.mrf.mxu0  ;;  %v10041_v19 = vpop.f32.mrf.mxu1 }
 0xf90   :  { %v15245_v54 = vpop.f32.mrf.mxu0  ;;  %v15305_v52 = vpop.f32.mrf.mxu1 }
 0xf92   :  { %v20333_v21 = vpop.f32.mrf.mxu0  ;;  %v10047_v28 = vpop.f32.mrf.mxu1 }
 0xf94   :  { %v15248_v16 = vpop.f32.mrf.mxu0  ;;  %v15308_v14 = vpop.f32.mrf.mxu1 }
 0xf96   :  { %v9932_v24 = vpop.f32.mrf.mxu0  ;;  %v10053_v12 = vpop.f32.mrf.mxu1 }
 0xf97   :  { %v9933_v10 = vadd.f32 %v9932_v24, %v9808_v31  ;;  %v9719_v24 = vadd.f32 %v20325_v51, %v9603_v62 }
 0xf98   :  { %v15280_v3 = vpop.f32.mrf.mxu0  ;;  %v15311_v48 = vpop.f32.mrf.mxu1 }
 0xf99   :  { %v20339_v18 = vadd.f32 %v10041_v19, %v9933_v10  ;;  %v9840_v51 = vadd.f32 %v20321_v0, %v9719_v24  ;;  %v9726_v0 = vadd.f32 %v20330_v41, %v20312_v32 }
 0xf9a   :  { %v9938_v9 = vpop.f32.mrf.mxu0  ;;  %v10059_v29 = vpop.f32.mrf.mxu1 }
 0xf9b   :  { %v9939_v1 = vadd.f32 %v9938_v9, %v9816_v36  ;;  %v10123_v46 = vsel %vm5718_vm9, %v20339_v18, -1e+30  ;;  %v10081_v15 = vsel %vm18498_vm10, %v20339_v18, -1e+30  ;;  %v10165_v57 = vsel %vm5769_vm11, %v20339_v18, -1e+30 }
 0xf9c   :  { %v15283_v42 = vpop.f32.mrf.mxu0  ;;  %v15314_v17 = vpop.f32.mrf.mxu1  ;;  %v10130_v50 = vsel %vm4921_vm7, %v10123_v46, -inf  ;;  %v10088_v58 = vsel %vm4921_vm7, %v10081_v15, -inf  ;;  %v10207_v23 = vsel %vm5820_vm12, %v20339_v18, -1e+30  ;;  %v10172_v19 = vsel %vm4921_vm7, %v10165_v57, -inf }
 0xf9d   :  { %v20350_v56 = vadd.f32 %v10047_v28, %v9939_v1  ;;  %10131 = vmax.xlane.f32.xlu0 %v10130_v50  ;;  %10089 = vmax.xlane.f32.xlu1 %v10088_v58  ;;  %v10214_v59 = vsel %vm4921_vm7, %v10207_v23, -inf  ;;  %v9848_v30 = vadd.f32 %v20323_v61, %v9726_v0 }
 0xf9e   :  { %v9944_v5 = vpop.f32.mrf.mxu0  ;;  %v10065_v25 = vpop.f32.mrf.mxu1 }
 0xf9f   :  { %v9945_v38 = vadd.f32 %v9944_v5, %v9824_v26  ;;  %v10124_v54 = vsel %vm5718_vm9, %v20350_v56, -1e+30  ;;  %v10082_v11 = vsel %vm18498_vm10, %v20350_v56, -1e+30  ;;  %v10166_v43 = vsel %vm5769_vm11, %v20350_v56, -1e+30 }
 0xfa0   :  { %v15286_v40 = vpop.f32.mrf.mxu0  ;;  %v15317_v2 = vpop.f32.mrf.mxu1  ;;  %v10133_v55 = vsel %vm4921_vm7, %v10124_v54, -inf  ;;  %v10091_v16 = vsel %vm4921_vm7, %v10082_v11, -inf  ;;  %v10208_v34 = vsel %vm5820_vm12, %v20350_v56, -1e+30 }
 0xfa1   :  { %10173 = vmax.xlane.f32.xlu0 %v10172_v19  ;;  %10215 = vmax.xlane.f32.xlu1 %v10214_v59  ;;  %v20373_v14 = vadd.f32 %v10053_v12, %v9945_v38  ;;  %v10175_v12 = vsel %vm4921_vm7, %v10166_v43, -inf  ;;  %v10217_v48 = vsel %vm4921_vm7, %v10208_v34, -inf  ;;  %v9733_v40 = vadd.f32 %v20333_v21, %v20315_v7 }
 0xfa2   :  { %v9950_v27 = vpop.f32.mrf.mxu0  ;;  %v10071_v52 = vpop.f32.mrf.mxu1 }
 0xfa3   :  { %v9951_v49 = vadd.f32 %v9950_v27, %v9832_v53  ;;  %v10125_v20 = vsel %vm5718_vm9, %v20373_v14, -1e+30  ;;  %v10083_v36 = vsel %vm18498_vm10, %v20373_v14, -1e+30  ;;  %v10167_v15 = vsel %vm5769_vm11, %v20373_v14, -1e+30 }
 0xfa4   :  { %v15289_v33 = vpop.f32.mrf.mxu0  ;;  %v15320_v28 = vpop.f32.mrf.mxu1  ;;  %v10136_v1 = vsel %vm4921_vm7, %v10125_v20, -inf  ;;  %v10094_v46 = vsel %vm4921_vm7, %v10083_v36, -inf  ;;  %v10178_v58 = vsel %vm4921_vm7, %v10167_v15, -inf  ;;  %v10209_v23 = vsel %vm5820_vm12, %v20373_v14, -1e+30  ;;  %v21867_v36 = vld [vmem:[#allocation3_spill] sm:$0xff] }
 0xfa5   :  { %10134 = vmax.xlane.f32.xlu1 %v10133_v55  ;;  %10092 = vmax.xlane.f32.xlu0 %v10091_v16  ;;  %v20384_v4 = vadd.f32 %v10059_v29, %v9951_v49  ;;  %v10220_v32 = vsel %vm4921_vm7, %v10209_v23, -inf  ;;  %v9856_v54 = vadd.f32 %v20327_v60, %v9733_v40  ;;  %v21869_v15 = vld [vmem:[#allocation5_spill] sm:$0xff] }
 0xfa6   :  { %v9956_v22 = vpop.f32.mrf.mxu0  ;;  %v10077_v31 = vpop.f32.mrf.mxu1 }
 0xfa7   :  { %v9957_v29 = vadd.f32 %v9956_v22, %v9840_v51  ;;  %v10126_v42 = vsel %vm5718_vm9, %v20384_v4, -1e+30  ;;  %v10168_v5 = vsel %vm5769_vm11, %v20384_v4, -1e+30  ;;  %v10210_v59 = vsel %vm5820_vm12, %v20384_v4, -1e+30 }
 0xfa8   :  { %v15292_v10 = vpop.f32.mrf.mxu0  ;;  %v15323_v3 = vpop.f32.mrf.mxu1  ;;  %v10139_v45 = vsel %vm4921_vm7, %v10126_v42, -inf  ;;  %v10181_v41 = vsel %vm4921_vm7, %v10168_v5, -inf  ;;  %v10223_v7 = vsel %vm4921_vm7, %v10210_v59, -inf  ;;  %v21868_v51 = vld [vmem:[#allocation4_spill] sm:$0xff] }
 0xfa9   :  { %10176 = vmax.xlane.f32.xlu1 %v10175_v12  ;;  %10218 = vmax.xlane.f32.xlu0 %v10217_v48  ;;  %v20405_v57 = vadd.f32 %v10065_v25, %v9957_v29  ;;  %v10084_v25 = vsel %vm18498_vm10, %v20384_v4, -1e+30 }
 0xfaa   :  { %v9962_v9 = vpop.f32.mrf.mxu0  ;;  %v10097_v61 = vsel %vm4921_vm7, %v10084_v25, -inf }
 0xfab   :  { %v9963_v26 = vadd.f32 %v9962_v9, %v9848_v30  ;;  %v10085_v13 = vsel %vm18498_vm10, %v20405_v57, -1e+30  ;;  %v10169_v38 = vsel %vm5769_vm11, %v20405_v57, -1e+30  ;;  %v10127_v27 = vsel %vm5718_vm9, %v20405_v57, -1e+30 }
 0xfac   :  { %v15295_v35 = vpop.f32.mrf.mxu0  ;;  %v10100_v2 = vsel %vm4921_vm7, %v10085_v13, -inf  ;;  %v10184_v21 = vsel %vm4921_vm7, %v10169_v38, -inf  ;;  %v10142_v53 = vsel %vm4921_vm7, %v10127_v27, -inf  ;;  %v10211_v33 = vsel %vm5820_vm12, %v20405_v57, -1e+30 }
 0xfad   :  { %10137 = vmax.xlane.f32.xlu1 %v10136_v1  ;;  %10095 = vmax.xlane.f32.xlu0 %v10094_v46  ;;  %v20426_v19 = vadd.f32 %v10071_v52, %v9963_v26  ;;  %v10226_v55 = vsel %vm4921_vm7, %v10211_v33, -inf }
 0xfae   :  { %v9968_v17 = vpop.f32.mrf.mxu0 }
 0xfaf   :  { %v9969_v11 = vadd.f32 %v9968_v17, %v9856_v54  ;;  %v10086_v52 = vsel %vm18498_vm10, %v20426_v19, -1e+30  ;;  %v10170_v28 = vsel %vm5769_vm11, %v20426_v19, -1e+30  ;;  %v10128_v49 = vsel %vm5718_vm9, %v20426_v19, -1e+30 }
 0xfb0   :  { %v15298_v50 = vpop.f32.mrf.mxu0  ;;  %v10103_v62 = vsel %vm4921_vm7, %v10086_v52, -inf  ;;  %v10187_v16 = vsel %vm4921_vm7, %v10170_v28, -inf  ;;  %v10145_v34 = vsel %vm4921_vm7, %v10128_v49, -inf  ;;  %v10212_v37 = vsel %vm5820_vm12, %v20426_v19, -1e+30 }
 0xfb1   :  { %10179 = vmax.xlane.f32.xlu0 %v10178_v58  ;;  %10140 = vmax.xlane.f32.xlu1 %v10139_v45  ;;  %v20445_v60 = vadd.f32 %v10077_v31, %v9969_v11  ;;  %v10229_v6 = vsel %vm4921_vm7, %v10212_v37, -inf }
 0xfb3   :  { %v10087_v43 = vsel %vm18498_vm10, %v20445_v60, -1e+30  ;;  %v10129_v31 = vsel %vm5718_vm9, %v20445_v60, -1e+30  ;;  %v10171_v24 = vsel %vm5769_vm11, %v20445_v60, -1e+30 }
 0xfb4   :  { %v10106_v22 = vsel %vm5692_vm13, %v10087_v43, -inf  ;;  %v10148_v10 = vsel %vm5692_vm13, %v10129_v31, -inf  ;;  %v10190_v3 = vsel %vm5692_vm13, %v10171_v24, -inf  ;;  %v10213_v12 = vsel %vm5820_vm12, %v20445_v60, -1e+30 }
 0xfb5   :  { %10221 = vmax.xlane.f32.xlu0 %v10220_v32  ;;  %10182 = vmax.xlane.f32.xlu1 %v10181_v41  ;;  %v10232_v48 = vsel %vm5692_vm13, %v10213_v12, -inf }
 0xfb9   :  { %10098 = vmax.xlane.f32.xlu0 %v10097_v61  ;;  %10101 = vmax.xlane.f32.xlu1 %v10100_v2 }
 0xfbd   :  { %10224 = vmax.xlane.f32.xlu0 %v10223_v7  ;;  %10185 = vmax.xlane.f32.xlu1 %v10184_v21 }
 0xfc1   :  { %10143 = vmax.xlane.f32.xlu0 %v10142_v53  ;;  %10104 = vmax.xlane.f32.xlu1 %v10103_v62 }
 0xfc5   :  { %10227 = vmax.xlane.f32.xlu0 %v10226_v55  ;;  %10188 = vmax.xlane.f32.xlu1 %v10187_v16 }
 0xfc9   :  { %10146 = vmax.xlane.f32.xlu0 %v10145_v34  ;;  %10107 = vmax.xlane.f32.xlu1 %v10106_v22 }
 0xfcd   :  { %10149 = vmax.xlane.f32.xlu0 %v10148_v10  ;;  %10191 = vmax.xlane.f32.xlu1 %v10190_v3 }
 0xfd1   :  { %10230 = vmax.xlane.f32.xlu0 %v10229_v6  ;;  %10233 = vmax.xlane.f32.xlu1 %v10232_v48 }
0x1026   :  { %v10132_v47 = vpop.xlane.xlu0 %10131  ;;  %v10090_v20 = vpop.xlane.xlu1 %10089 }
0x1027   :  { %v10151_v9 = vmul.f32 %v10132_v47, %v21867_v36  ;;  %v10109_v35 = vmul.f32 %v10090_v20, %v21868_v51 }
0x1029   :  { %v10158_v29 = vadd.f32 %v10151_v9, %v10109_v35 }
0x102a   :  { %v10174_v1 = vpop.xlane.xlu0 %10173  ;;  %v10216_v46 = vpop.xlane.xlu1 %10215 }
0x102b   :  { %v10193_v42 = vmul.f32 %v10174_v1, %v21869_v15  ;;  %v10235_v0 = vmul.f32 %v10216_v46, %v21870_v8 }
0x102d   :  { %v10200_v17 = vadd.f32 %v10193_v42, %v10158_v29 }
0x102e   :  { %v10135_v50 = vpop.xlane.xlu1 %10134  ;;  %v10093_v58 = vpop.xlane.xlu0 %10092 }
0x102f   :  { %v10242_v45 = vadd.f32 %v10235_v0, %v10200_v17  ;;  %v10152_v23 = vmul.f32 %v10135_v50, %v21867_v36  ;;  %v10110_v5 = vmul.f32 %v10093_v58, %v21868_v51 }
0x1031   :  { %v10249_v30 = vsub.f32 %v20339_v18, %v10242_v45  ;;  %v10159_v25 = vadd.f32 %v10152_v23, %v10110_v5 }
0x1032   :  { %v10177_v32 = vpop.xlane.xlu1 %10176  ;;  %v10219_v41 = vpop.xlane.xlu0 %10218 }
0x1033   :  { %v10256_v26 = vmul.f32 1.442695, %v10249_v30  ;;  %v10194_v13 = vmul.f32 %v10177_v32, %v21869_v15  ;;  %v10236_v61 = vmul.f32 %v10219_v41, %v21870_v8 }
0x1035   :  { %15738 = vpow2.f32 %v10256_v26  ;;  %v10201_v40 = vadd.f32 %v10194_v13, %v10159_v25 }
0x1036   :  { %v10138_v2 = vpop.xlane.xlu1 %10137  ;;  %v10096_v59 = vpop.xlane.xlu0 %10095 }
0x1037   :  { %v10243_v38 = vadd.f32 %v10236_v61, %v10201_v40  ;;  %v10153_v7 = vmul.f32 %v10138_v2, %v21867_v36  ;;  %v10111_v21 = vmul.f32 %v10096_v59, %v21868_v51 }
0x1039   :  { %v10250_v54 = vsub.f32 %v20350_v56, %v10243_v38  ;;  %v10160_v53 = vadd.f32 %v10153_v7, %v10111_v21 }
0x103a   :  { %v10180_v18 = vpop.xlane.xlu0 %10179  ;;  %v10141_v11 = vpop.xlane.xlu1 %10140 }
0x103b   :  { %v10258_v27 = vmul.f32 1.442695, %v10250_v54  ;;  %v10195_v52 = vmul.f32 %v10180_v18, %v21869_v15  ;;  %v10154_v34 = vmul.f32 %v10141_v11, %v21867_v36 }
0x103d   :  { %15740 = vpow2.f32 %v10258_v27  ;;  %v10202_v28 = vadd.f32 %v10195_v52, %v10160_v53 }
0x103e   :  { %v10222_v62 = vpop.xlane.xlu0 %10221  ;;  %v10183_v33 = vpop.xlane.xlu1 %10182 }
0x103f   :  { %v10237_v55 = vmul.f32 %v10222_v62, %v21870_v8  ;;  %v10196_v10 = vmul.f32 %v10183_v33, %v21869_v15 }
0x1041   :  { %v10244_v16 = vadd.f32 %v10237_v55, %v10202_v28 }
0x1042   :  { %v20493_v49 = vpop.eup %15738  ;;  %v10099_v56 = vpop.xlane.xlu0 %10098 }
0x1043   :  { %v10102_v43 = vpop.xlane.xlu1 %10101  ;;  %v10251_v22 = vsub.f32 %v20373_v14, %v10244_v16  ;;  %v10112_v31 = vmul.f32 %v10099_v56, %v21868_v51  ;;  %v10270_v24 = vmul.f32 %v20493_v49, %v21868_v51  ;;  %v10396_v3 = vmul.f32 %v20493_v49, %v21870_v8 }
0x1044   :  { %v10312_v48 = vmul.f32 %v20493_v49, %v21867_v36  ;;  %v10354_v1 = vmul.f32 %v20493_v49, %v21869_v15  ;;  %v10113_v50 = vmul.f32 %v10102_v43, %v21868_v51 }
0x1045   :  { %v10260_v37 = vmul.f32 1.442695, %v10251_v22  ;;  %v10161_v12 = vadd.f32 %v10154_v34, %v10112_v31  ;;  %v10277_v6 = vsel %vm4921_vm7, %v10270_v24, 0.0  ;;  %v10403_v14 = vsel %vm4921_vm7, %v10396_v3, 0.0 }
0x1046   :  { %v10225_v47 = vpop.xlane.xlu0 %10224  ;;  %10278 = vadd.xlane.f32.xlu0 %v10277_v6  ;;  %10404 = vadd.xlane.f32.xlu1 %v10403_v14  ;;  %v10319_v29 = vsel %vm4921_vm7, %v10312_v48, 0.0  ;;  %v10361_v30 = vsel %vm4921_vm7, %v10354_v1, 0.0 }
0x1047   :  { %v10186_v20 = vpop.xlane.xlu1 %10185  ;;  %15742 = vpow2.f32 %v10260_v37  ;;  %v10203_v9 = vadd.f32 %v10196_v10, %v10161_v12  ;;  %v10238_v35 = vmul.f32 %v10225_v47, %v21870_v8 }
0x1048   :  { %v10197_v5 = vmul.f32 %v10186_v20, %v21869_v15 }
0x1049   :  { %v10245_v46 = vadd.f32 %v10238_v35, %v10203_v9 }
0x104a   :  { %v20511_v42 = vpop.eup %15740  ;;  %v10144_v17 = vpop.xlane.xlu0 %10143  ;;  %10320 = vadd.xlane.f32.xlu0 %v10319_v29 }
0x104b   :  { %v10105_v0 = vpop.xlane.xlu1 %10104  ;;  %v10252_v58 = vsub.f32 %v20384_v4, %v10245_v46  ;;  %v10155_v45 = vmul.f32 %v10144_v17, %v21867_v36  ;;  %v10271_v23 = vmul.f32 %v20511_v42, %v21868_v51  ;;  %v10397_v32 = vmul.f32 %v20511_v42, %v21870_v8 }
0x104c   :  { %v10313_v13 = vmul.f32 %v20511_v42, %v21867_v36  ;;  %v10355_v7 = vmul.f32 %v20511_v42, %v21869_v15  ;;  %v10114_v53 = vmul.f32 %v10105_v0, %v21868_v51 }
0x104d   :  { %v10262_v41 = vmul.f32 1.442695, %v10252_v58  ;;  %v10162_v26 = vadd.f32 %v10155_v45, %v10113_v50  ;;  %v10280_v25 = vsel %vm4921_vm7, %v10271_v23, 0.0  ;;  %v10406_v38 = vsel %vm4921_vm7, %v10397_v32, 0.0 }
0x104e   :  { %v10228_v4 = vpop.xlane.xlu0 %10227  ;;  %10362 = vadd.xlane.f32.xlu0 %v10361_v30  ;;  %10281 = vadd.xlane.f32.xlu1 %v10280_v25  ;;  %v10322_v54 = vsel %vm4921_vm7, %v10313_v13, 0.0  ;;  %v10364_v33 = vsel %vm4921_vm7, %v10355_v7, 0.0 }
0x104f   :  { %v10189_v40 = vpop.xlane.xlu1 %10188  ;;  %15744 = vpow2.f32 %v10262_v41  ;;  %v10204_v61 = vadd.f32 %v10197_v5, %v10162_v26  ;;  %v10239_v2 = vmul.f32 %v10228_v4, %v21870_v8 }
0x1050   :  { %v10198_v24 = vmul.f32 %v10189_v40, %v21869_v15 }
0x1051   :  { %v10246_v59 = vadd.f32 %v10239_v2, %v10204_v61 }
0x1052   :  { %v10147_v21 = vpop.xlane.xlu0 %10146  ;;  %10407 = vadd.xlane.f32.xlu0 %v10406_v38  ;;  %10323 = vadd.xlane.f32.xlu1 %v10322_v54 }
0x1053   :  { %v10108_v18 = vpop.xlane.xlu1 %10107  ;;  %v10253_v11 = vsub.f32 %v20405_v57, %v10246_v59  ;;  %v10156_v27 = vmul.f32 %v10147_v21, %v21867_v36 }
0x1054   :  { %v20532_v52 = vpop.eup %15742  ;;  %v10115_v56 = vmul.f32 %v10108_v18, %v21868_v51 }
0x1055   :  { %v10264_v62 = vmul.f32 1.442695, %v10253_v11  ;;  %v10272_v28 = vmul.f32 %v20532_v52, %v21868_v51  ;;  %v10314_v55 = vmul.f32 %v20532_v52, %v21867_v36  ;;  %v10163_v16 = vadd.f32 %v10156_v27, %v10114_v53 }
0x1056   :  { %v10150_v43 = vpop.xlane.xlu0 %10149  ;;  %10365 = vadd.xlane.f32.xlu1 %v10364_v33  ;;  %v10356_v31 = vmul.f32 %v20532_v52, %v21869_v15  ;;  %v10398_v47 = vmul.f32 %v20532_v52, %v21870_v8 }
0x1057   :  { %v10192_v57 = vpop.xlane.xlu1 %10191  ;;  %15746 = vpow2.f32 %v10264_v62  ;;  %v10157_v34 = vmul.f32 %v10150_v43, %v21867_v36  ;;  %v10283_v22 = vsel %vm4921_vm7, %v10272_v28, 0.0  ;;  %v10325_v37 = vsel %vm4921_vm7, %v10314_v55, 0.0 }
0x1058   :  { %10284 = vadd.xlane.f32.xlu0 %v10283_v22  ;;  %v10199_v3 = vmul.f32 %v10192_v57, %v21869_v15  ;;  %v10205_v12 = vadd.f32 %v10198_v24, %v10163_v16  ;;  %v10367_v35 = vsel %vm4921_vm7, %v10356_v31, 0.0  ;;  %v10409_v0 = vsel %vm4921_vm7, %v10398_v47, 0.0 }
0x1059   :  { %v10164_v10 = vadd.f32 %v10157_v34, %v10115_v56 }
0x105a   :  { %v10231_v6 = vpop.xlane.xlu0 %10230  ;;  %10326 = vadd.xlane.f32.xlu1 %v10325_v37 }
0x105b   :  { %v10234_v48 = vpop.xlane.xlu1 %10233  ;;  %v10206_v20 = vadd.f32 %v10199_v3, %v10164_v10  ;;  %v10240_v14 = vmul.f32 %v10231_v6, %v21870_v8 }
0x105c   :  { %v10241_v9 = vmul.f32 %v10234_v48, %v21870_v8  ;;  %v20553_v1 = vpop.eup %15744  ;;  %10368 = vadd.xlane.f32.xlu0 %v10367_v35 }
0x105d   :  { %v10247_v46 = vadd.f32 %v10240_v14, %v10205_v12  ;;  %v10315_v17 = vmul.f32 %v20553_v1, %v21867_v36  ;;  %v10273_v50 = vmul.f32 %v20553_v1, %v21868_v51  ;;  %v10357_v5 = vmul.f32 %v20553_v1, %v21869_v15 }
0x105e   :  { %v10248_v29 = vadd.f32 %v10241_v9, %v10206_v20  ;;  %v10399_v25 = vmul.f32 %v20553_v1, %v21870_v8 }
0x105f   :  { %v10254_v58 = vsub.f32 %v20426_v19, %v10247_v46  ;;  %v10328_v23 = vsel %vm4921_vm7, %v10315_v17, 0.0  ;;  %v10286_v41 = vsel %vm4921_vm7, %v10273_v50, 0.0  ;;  %v10370_v26 = vsel %vm4921_vm7, %v10357_v5, 0.0 }
0x1060   :  { %v10255_v45 = vsub.f32 %v20445_v60, %v10248_v29  ;;  %10410 = vadd.xlane.f32.xlu0 %v10409_v0  ;;  %10329 = vadd.xlane.f32.xlu1 %v10328_v23  ;;  %v10412_v13 = vsel %vm4921_vm7, %v10399_v25, 0.0 }
0x1061   :  { %v10266_v30 = vmul.f32 1.442695, %v10254_v58 }
0x1062   :  { %v10268_v32 = vmul.f32 1.442695, %v10255_v45 }
0x1063   :  { %15748 = vpow2.f32 %v10266_v30 }
0x1064   :  { %v20569_v19 = vpop.eup %15746  ;;  %15750 = vpow2.f32 %v10268_v32  ;;  %10287 = vadd.xlane.f32.xlu0 %v10286_v41  ;;  %10371 = vadd.xlane.f32.xlu1 %v10370_v26 }
0x1065   :  { %v10274_v60 = vmul.f32 %v20569_v19, %v21868_v51  ;;  %v10316_v40 = vmul.f32 %v20569_v19, %v21867_v36  ;;  %v10358_v61 = vmul.f32 %v20569_v19, %v21869_v15  ;;  %v10400_v38 = vmul.f32 %v20569_v19, %v21870_v8 }
0x1067   :  { %v10289_v4 = vsel %vm4921_vm7, %v10274_v60, 0.0  ;;  %v10331_v2 = vsel %vm4921_vm7, %v10316_v40, 0.0  ;;  %v10373_v59 = vsel %vm4921_vm7, %v10358_v61, 0.0  ;;  %v10415_v54 = vsel %vm4921_vm7, %v10400_v38, 0.0 }
0x1068   :  { %10413 = vadd.xlane.f32.xlu0 %v10412_v13  ;;  %10290 = vadd.xlane.f32.xlu1 %v10289_v4 }
0x106c   :  { %10332 = vadd.xlane.f32.xlu0 %v10331_v2  ;;  %10374 = vadd.xlane.f32.xlu1 %v10373_v59 }
0x1070   :  { %v20584_v7 = vpop.eup %15748  ;;  %10416 = vadd.xlane.f32.xlu0 %v10415_v54 }
0x1071   :  { %v20586_v21 = vpop.eup %15750  ;;  %v10317_v18 = vmul.f32 %v20584_v7, %v21867_v36  ;;  %v10275_v11 = vmul.f32 %v20584_v7, %v21868_v51  ;;  %v10359_v62 = vmul.f32 %v20584_v7, %v21869_v15  ;;  %v10401_v16 = vmul.f32 %v20584_v7, %v21870_v8 }
0x1072   :  { %v10318_v33 = vmul.f32 %v20586_v21, %v21867_v36  ;;  %v10276_v56 = vmul.f32 %v20586_v21, %v21868_v51  ;;  %v10360_v34 = vmul.f32 %v20586_v21, %v21869_v15  ;;  %v10402_v31 = vmul.f32 %v20586_v21, %v21870_v8 }
0x1073   :  { %v10334_v27 = vsel %vm4921_vm7, %v10317_v18, 0.0  ;;  %v10292_v53 = vsel %vm4921_vm7, %v10275_v11, 0.0  ;;  %v10376_v28 = vsel %vm4921_vm7, %v10359_v62, 0.0  ;;  %v10418_v43 = vsel %vm4921_vm7, %v10401_v16, 0.0 }
0x1074   :  { %10335 = vadd.xlane.f32.xlu0 %v10334_v27  ;;  %10293 = vadd.xlane.f32.xlu1 %v10292_v53  ;;  %v10337_v55 = vsel %vm5692_vm13, %v10318_v33, 0.0  ;;  %v10295_v57 = vsel %vm5692_vm13, %v10276_v56, 0.0  ;;  %v10379_v22 = vsel %vm5692_vm13, %v10360_v34, 0.0  ;;  %v10421_v24 = vsel %vm5692_vm13, %v10402_v31, 0.0 }
0x1078   :  { %10377 = vadd.xlane.f32.xlu1 %v10376_v28  ;;  %10338 = vadd.xlane.f32.xlu0 %v10337_v55 }
0x107c   :  { %10419 = vadd.xlane.f32.xlu0 %v10418_v43  ;;  %10296 = vadd.xlane.f32.xlu1 %v10295_v57 }
0x1080   :  { %10380 = vadd.xlane.f32.xlu1 %v10379_v22 }
0x1084   :  { %10422 = vadd.xlane.f32.xlu1 %v10421_v24 }
0x10cf   :  { %v10279_v10 = vpop.xlane.xlu0 %10278  ;;  %v10405_v3 = vpop.xlane.xlu1 %10404 }
0x10d0   :  { %v10298_v6 = vmul.f32 %v10279_v10, %v21868_v51  ;;  %v10424_v9 = vmul.f32 %v10405_v3, %v21870_v8 }
0x10d3   :  { %v10321_v37 = vpop.xlane.xlu0 %10320 }
0x10d4   :  { %v10340_v12 = vmul.f32 %v10321_v37, %v21867_v36 }
0x10d6   :  { %v10347_v20 = vadd.f32 %v10340_v12, %v10298_v6 }
0x10d7   :  { %v10363_v48 = vpop.xlane.xlu0 %10362  ;;  %v10282_v47 = vpop.xlane.xlu1 %10281 }
0x10d8   :  { %v10382_v14 = vmul.f32 %v10363_v48, %v21869_v15  ;;  %v10299_v50 = vmul.f32 %v10282_v47, %v21868_v51 }
0x10da   :  { %v10389_v35 = vadd.f32 %v10382_v14, %v10347_v20 }
0x10db   :  { %v10324_v46 = vpop.xlane.xlu1 %10323  ;;  %v10408_v0 = vpop.xlane.xlu0 %10407 }
0x10dc   :  { %v10431_v29 = vadd.f32 %v10424_v9, %v10389_v35  ;;  %v10341_v17 = vmul.f32 %v10324_v46, %v21867_v36  ;;  %v10425_v30 = vmul.f32 %v10408_v0, %v21870_v8 }
0x10de   :  { %15752 = vrcp.f32 %v10431_v29  ;;  %v10348_v45 = vadd.f32 %v10341_v17, %v10299_v50 }
0x10df   :  { %v10366_v58 = vpop.xlane.xlu1 %10365 }
0x10e0   :  { %v10383_v23 = vmul.f32 %v10366_v58, %v21869_v15 }
0x10e1   :  { %v10285_v5 = vpop.xlane.xlu0 %10284 }
0x10e2   :  { %v10390_v32 = vadd.f32 %v10383_v23, %v10348_v45  ;;  %v10300_v25 = vmul.f32 %v10285_v5, %v21868_v51 }
0x10e3   :  { %v10327_v41 = vpop.xlane.xlu1 %10326 }
0x10e4   :  { %v10432_v26 = vadd.f32 %v10425_v30, %v10390_v32  ;;  %v10342_v60 = vmul.f32 %v10327_v41, %v21867_v36 }
0x10e5   :  { %v10369_v13 = vpop.xlane.xlu0 %10368 }
0x10e6   :  { %15754 = vrcp.f32 %v10432_v26  ;;  %v10349_v4 = vadd.f32 %v10342_v60, %v10300_v25  ;;  %v10384_v40 = vmul.f32 %v10369_v13, %v21869_v15 }
0x10e8   :  { %v10391_v59 = vadd.f32 %v10384_v40, %v10349_v4 }
0x10e9   :  { %v10411_v61 = vpop.xlane.xlu0 %10410  ;;  %v10330_v2 = vpop.xlane.xlu1 %10329 }
0x10ea   :  { %v10426_v38 = vmul.f32 %v10411_v61, %v21870_v8  ;;  %v10343_v62 = vmul.f32 %v10330_v2, %v21867_v36 }
0x10eb   :  { %v15753_v54 = vpop.eup %15752 }
0x10ec   :  { %v10433_v18 = vadd.f32 %v10426_v38, %v10391_v59  ;;  %v20625_v11 = vmul.f32 %v15753_v54, %v20493_v49 }
0x10ed   :  { %v10288_v27 = vpop.xlane.xlu0 %10287  ;;  %v10372_v53 = vpop.xlane.xlu1 %10371 }
0x10ee   :  { %15756 = vrcp.f32 %v10433_v18  ;;  %v10301_v33 = vmul.f32 %v10288_v27, %v21868_v51  ;;  %v10543_v28 = vmul.f32 %v20625_v11, %v21869_v15  ;;  %v10496_v55 = vmul.f32 %v20625_v11, %v21867_v36 }
0x10ef   :  { %v10385_v56 = vmul.f32 %v10372_v53, %v21869_v15  ;;  %v10452_v22 = vmul.f32 %v20625_v11, %v21868_v51  ;;  %v10590_v47 = vmul.f32 %v20625_v11, %v21870_v8 }
0x10f0   :  { %v10350_v16 = vadd.f32 %v10343_v62, %v10301_v33  ;;  %v10550_v43 = vsel %vm4921_vm7, %v10543_v28, 0.0  ;;  %v10503_v57 = vsel %vm4921_vm7, %v10496_v55, 0.0 }
0x10f1   :  { %v10414_v49 = vpop.xlane.xlu0 %10413  ;;  %10551 = vadd.xlane.f32.xlu1 %v10550_v43  ;;  %v10291_v34 = vpop.xlane.xlu1 %10290  ;;  %10504 = vadd.xlane.f32.xlu0 %v10503_v57  ;;  %v10459_v6 = vsel %vm4921_vm7, %v10452_v22, 0.0  ;;  %v10597_v0 = vsel %vm4921_vm7, %v10590_v47, 0.0 }
0x10f2   :  { %v10392_v31 = vadd.f32 %v10385_v56, %v10350_v16  ;;  %v10427_v24 = vmul.f32 %v10414_v49, %v21870_v8  ;;  %v10302_v20 = vmul.f32 %v10291_v34, %v21868_v51 }
0x10f3   :  { %v15755_v10 = vpop.eup %15754 }
0x10f4   :  { %v10434_v3 = vadd.f32 %v10427_v24, %v10392_v31  ;;  %v20640_v37 = vmul.f32 %v15755_v10, %v20511_v42 }
0x10f5   :  { %v10333_v12 = vpop.xlane.xlu0 %10332  ;;  %v10375_v48 = vpop.xlane.xlu1 %10374  ;;  %10460 = vadd.xlane.f32.xlu0 %v10459_v6 }
0x10f6   :  { %15758 = vrcp.f32 %v10434_v3  ;;  %v10344_v14 = vmul.f32 %v10333_v12, %v21867_v36  ;;  %v10497_v9 = vmul.f32 %v20640_v37, %v21867_v36  ;;  %v10386_v42 = vmul.f32 %v10375_v48, %v21869_v15 }
0x10f7   :  { %v10453_v29 = vmul.f32 %v20640_v37, %v21868_v51  ;;  %v10544_v50 = vmul.f32 %v20640_v37, %v21869_v15  ;;  %v10591_v5 = vmul.f32 %v20640_v37, %v21870_v8 }
0x10f8   :  { %v10351_v35 = vadd.f32 %v10344_v14, %v10302_v20  ;;  %v10506_v46 = vsel %vm4921_vm7, %v10497_v9, 0.0 }
0x10f9   :  { %v10417_v17 = vpop.xlane.xlu0 %10416  ;;  %10507 = vadd.xlane.f32.xlu1 %v10506_v46  ;;  %10598 = vadd.xlane.f32.xlu0 %v10597_v0  ;;  %v10462_v32 = vsel %vm4921_vm7, %v10453_v29, 0.0  ;;  %v10553_v25 = vsel %vm4921_vm7, %v10544_v50, 0.0  ;;  %v10600_v4 = vsel %vm4921_vm7, %v10591_v5, 0.0 }
0x10fa   :  { %v10393_v58 = vadd.f32 %v10386_v42, %v10351_v35  ;;  %v10428_v45 = vmul.f32 %v10417_v17, %v21870_v8 }
0x10fb   :  { %v15757_v23 = vpop.eup %15756 }
0x10fc   :  { %v10435_v30 = vadd.f32 %v10428_v45, %v10393_v58  ;;  %v20661_v41 = vmul.f32 %v15757_v23, %v20532_v52 }
0x10fd   :  { %v10336_v26 = vpop.xlane.xlu0 %10335  ;;  %10463 = vadd.xlane.f32.xlu1 %v10462_v32  ;;  %v10294_v60 = vpop.xlane.xlu1 %10293  ;;  %10554 = vadd.xlane.f32.xlu0 %v10553_v25 }
0x10fe   :  { %15760 = vrcp.f32 %v10435_v30  ;;  %v10498_v13 = vmul.f32 %v20661_v41, %v21867_v36  ;;  %v10345_v40 = vmul.f32 %v10336_v26, %v21867_v36  ;;  %v10303_v61 = vmul.f32 %v10294_v60, %v21868_v51 }
0x10ff   :  { %v10454_v52 = vmul.f32 %v20661_v41, %v21868_v51  ;;  %v10545_v27 = vmul.f32 %v20661_v41, %v21869_v15  ;;  %v10592_v57 = vmul.f32 %v20661_v41, %v21870_v8 }
0x1100   :  { %v10509_v2 = vsel %vm4921_vm7, %v10498_v13, 0.0  ;;  %v10352_v53 = vadd.f32 %v10345_v40, %v10303_v61 }
0x1101   :  { %v10339_v59 = vpop.xlane.xlu0 %10338  ;;  %10601 = vadd.xlane.f32.xlu1 %v10600_v4  ;;  %v10378_v38 = vpop.xlane.xlu1 %10377  ;;  %10510 = vadd.xlane.f32.xlu0 %v10509_v2  ;;  %v10465_v62 = vsel %vm4921_vm7, %v10454_v52, 0.0  ;;  %v10556_v49 = vsel %vm4921_vm7, %v10545_v27, 0.0  ;;  %v10603_v6 = vsel %vm4921_vm7, %v10592_v57, 0.0 }
0x1102   :  { %v10387_v54 = vmul.f32 %v10378_v38, %v21869_v15  ;;  %v10346_v10 = vmul.f32 %v10339_v59, %v21867_v36 }
0x1103   :  { %v15759_v18 = vpop.eup %15758 }
0x1104   :  { %v20677_v33 = vmul.f32 %v15759_v18, %v20553_v1  ;;  %v10394_v16 = vadd.f32 %v10387_v54, %v10352_v53 }
0x1105   :  { %v10420_v28 = vpop.xlane.xlu0 %10419  ;;  %10466 = vadd.xlane.f32.xlu1 %v10465_v62  ;;  %v10297_v55 = vpop.xlane.xlu1 %10296 }
0x1106   :  { %v10429_v56 = vmul.f32 %v10420_v28, %v21870_v8  ;;  %v10499_v43 = vmul.f32 %v20677_v33, %v21867_v36  ;;  %v10304_v22 = vmul.f32 %v10297_v55, %v21868_v51  ;;  %v10455_v31 = vmul.f32 %v20677_v33, %v21868_v51 }
0x1107   :  { %v10593_v48 = vmul.f32 %v20677_v33, %v21870_v8  ;;  %v10546_v14 = vmul.f32 %v20677_v33, %v21869_v15 }
0x1108   :  { %v10436_v34 = vadd.f32 %v10429_v56, %v10394_v16  ;;  %v10512_v1 = vsel %vm4921_vm7, %v10499_v43, 0.0  ;;  %v10353_v47 = vadd.f32 %v10346_v10, %v10304_v22  ;;  %v10468_v20 = vsel %vm4921_vm7, %v10455_v31, 0.0 }
0x1109   :  { %10557 = vadd.xlane.f32.xlu1 %v10556_v49  ;;  %10513 = vadd.xlane.f32.xlu0 %v10512_v1  ;;  %v10381_v24 = vpop.xlane.xlu1 %10380  ;;  %v10606_v29 = vsel %vm4921_vm7, %v10593_v48, 0.0  ;;  %v10559_v0 = vsel %vm4921_vm7, %v10546_v14, 0.0 }
0x110a   :  { %15762 = vrcp.f32 %v10436_v34  ;;  %v10388_v3 = vmul.f32 %v10381_v24, %v21869_v15 }
0x110b   :  { %v15761_v12 = vpop.eup %15760 }
0x110c   :  { %v20698_v9 = vmul.f32 %v15761_v12, %v20569_v19  ;;  %v10395_v42 = vadd.f32 %v10388_v3, %v10353_v47 }
0x110d   :  { %10604 = vadd.xlane.f32.xlu1 %v10603_v6  ;;  %10469 = vadd.xlane.f32.xlu0 %v10468_v20  ;;  %v10423_v35 = vpop.xlane.xlu1 %10422 }
0x110e   :  { %v10430_v46 = vmul.f32 %v10423_v35, %v21870_v8  ;;  %v10500_v50 = vmul.f32 %v20698_v9, %v21867_v36  ;;  %v10456_v58 = vmul.f32 %v20698_v9, %v21868_v51  ;;  %v10594_v23 = vmul.f32 %v20698_v9, %v21870_v8 }
0x110f   :  { %v10547_v5 = vmul.f32 %v20698_v9, %v21869_v15 }
0x1110   :  { %v10437_v17 = vadd.f32 %v10430_v46, %v10395_v42  ;;  %v10515_v19 = vsel %vm4921_vm7, %v10500_v50, 0.0  ;;  %v10471_v45 = vsel %vm4921_vm7, %v10456_v58, 0.0  ;;  %v10609_v32 = vsel %vm4921_vm7, %v10594_v23, 0.0 }
0x1111   :  { %10607 = vadd.xlane.f32.xlu1 %v10606_v29  ;;  %10560 = vadd.xlane.f32.xlu0 %v10559_v0  ;;  %v10562_v26 = vsel %vm4921_vm7, %v10547_v5, 0.0 }
0x1112   :  { %15764 = vrcp.f32 %v10437_v17 }
0x1115   :  { %10516 = vadd.xlane.f32.xlu1 %v10515_v19  ;;  %10472 = vadd.xlane.f32.xlu0 %v10471_v45 }
0x1117   :  { %v15763_v30 = vpop.eup %15762 }
0x1118   :  { %v20716_v25 = vmul.f32 %v15763_v30, %v20584_v7 }
0x1119   :  { %10610 = vadd.xlane.f32.xlu1 %v10609_v32  ;;  %10563 = vadd.xlane.f32.xlu0 %v10562_v26 }
0x111a   :  { %v10548_v60 = vmul.f32 %v20716_v25, %v21869_v15  ;;  %v10501_v13 = vmul.f32 %v20716_v25, %v21867_v36  ;;  %v10457_v61 = vmul.f32 %v20716_v25, %v21868_v51  ;;  %v10595_v28 = vmul.f32 %v20716_v25, %v21870_v8 }
0x111c   :  { %v10565_v4 = vsel %vm4921_vm7, %v10548_v60, 0.0  ;;  %v10518_v40 = vsel %vm4921_vm7, %v10501_v13, 0.0  ;;  %v10474_v7 = vsel %vm4921_vm7, %v10457_v61, 0.0  ;;  %v10612_v55 = vsel %vm4921_vm7, %v10595_v28, 0.0 }
0x111d   :  { %10566 = vadd.xlane.f32.xlu0 %v10565_v4  ;;  %10519 = vadd.xlane.f32.xlu1 %v10518_v40 }
0x111f   :  { %v15765_v2 = vpop.eup %15764 }
0x1120   :  { %v20728_v52 = vmul.f32 %v15765_v2, %v20586_v21 }
0x1121   :  { %10475 = vadd.xlane.f32.xlu1 %v10474_v7 }
0x1122   :  { %v10549_v59 = vmul.f32 %v20728_v52, %v21869_v15  ;;  %v10502_v38 = vmul.f32 %v20728_v52, %v21867_v36  ;;  %v10596_v27 = vmul.f32 %v20728_v52, %v21870_v8  ;;  %v10458_v53 = vmul.f32 %v20728_v52, %v21868_v51 }
0x1124   :  { %v10568_v54 = vsel %vm5692_vm13, %v10549_v59, 0.0  ;;  %v10521_v18 = vsel %vm5692_vm13, %v10502_v38, 0.0  ;;  %v10615_v21 = vsel %vm5692_vm13, %v10596_v27, 0.0  ;;  %v10477_v62 = vsel %vm5692_vm13, %v10458_v53, 0.0 }
0x1125   :  { %10569 = vadd.xlane.f32.xlu1 %v10568_v54  ;;  %10522 = vadd.xlane.f32.xlu0 %v10521_v18 }
0x1129   :  { %10616 = vadd.xlane.f32.xlu1 %v10615_v21  ;;  %10478 = vadd.xlane.f32.xlu0 %v10477_v62 }
0x112d   :  { %10613 = vadd.xlane.f32.xlu0 %v10612_v55 }
0x117a   :  { %v10505_v16 = vpop.xlane.xlu0 %10504  ;;  %v10552_v56 = vpop.xlane.xlu1 %10551 }
0x117e   :  { %v10461_v43 = vpop.xlane.xlu0 %10460 }
0x1182   :  { %v10508_v49 = vpop.xlane.xlu1 %10507  ;;  %v10599_v57 = vpop.xlane.xlu0 %10598 }
0x1183   :  { %v10524_v46 = vadd.f32 %v10508_v49, %v10505_v16 }
0x1186   :  { %v10464_v34 = vpop.xlane.xlu1 %10463  ;;  %v10555_v22 = vpop.xlane.xlu0 %10554 }
0x1187   :  { %v10571_v29 = vadd.f32 %v10555_v22, %v10552_v56  ;;  %v10480_v58 = vadd.f32 %v10464_v34, %v10461_v43 }
0x118a   :  { %v10602_v1 = vpop.xlane.xlu1 %10601  ;;  %v10511_v31 = vpop.xlane.xlu0 %10510 }
0x118b   :  { %v10525_v0 = vadd.f32 %v10524_v46, %v10511_v31  ;;  %v10618_v2 = vadd.f32 %v10602_v1, %v10599_v57 }
0x118e   :  { %v10467_v24 = vpop.xlane.xlu1 %10466 }
0x118f   :  { %v10481_v30 = vadd.f32 %v10480_v58, %v10467_v24 }
0x1192   :  { %v10514_v10 = vpop.xlane.xlu0 %10513  ;;  %v10558_v3 = vpop.xlane.xlu1 %10557 }
0x1193   :  { %v10572_v50 = vadd.f32 %v10571_v29, %v10558_v3  ;;  %v10526_v19 = vadd.f32 %v10525_v0, %v10514_v10 }
0x1196   :  { %v10470_v12 = vpop.xlane.xlu0 %10469  ;;  %v10605_v6 = vpop.xlane.xlu1 %10604 }
0x1197   :  { %v10482_v60 = vadd.f32 %v10481_v30, %v10470_v12  ;;  %v10619_v27 = vadd.f32 %v10618_v2, %v10605_v6 }
0x119a   :  { %v10561_v48 = vpop.xlane.xlu0 %10560  ;;  %v10608_v47 = vpop.xlane.xlu1 %10607 }
0x119b   :  { %v10573_v45 = vadd.f32 %v10572_v50, %v10561_v48  ;;  %v10620_v55 = vadd.f32 %v10619_v27, %v10608_v47 }
0x119e   :  { %v10473_v20 = vpop.xlane.xlu0 %10472  ;;  %v10517_v14 = vpop.xlane.xlu1 %10516 }
0x119f   :  { %v10527_v32 = vadd.f32 %v10526_v19, %v10517_v14  ;;  %v10483_v38 = vadd.f32 %v10482_v60, %v10473_v20 }
0x11a2   :  { %v10611_v35 = vpop.xlane.xlu1 %10610  ;;  %v10564_v42 = vpop.xlane.xlu0 %10563 }
0x11a3   :  { %v10574_v26 = vadd.f32 %v10573_v45, %v10564_v42  ;;  %v10621_v34 = vadd.f32 %v10620_v55, %v10611_v35 }
0x11a6   :  { %v10520_v17 = vpop.xlane.xlu1 %10519  ;;  %v10567_v23 = vpop.xlane.xlu0 %10566 }
0x11a7   :  { %v10575_v13 = vadd.f32 %v10574_v26, %v10567_v23  ;;  %v10528_v4 = vadd.f32 %v10527_v32, %v10520_v17  ;;  %v20752_v23 = vld [vmem:[%s21591_s15] sm:$0xf] }
0x11aa   :  { %v10476_v5 = vpop.xlane.xlu1 %10475 }
0x11ab   :  { %v10484_v53 = vadd.f32 %v10483_v38, %v10476_v5 }
0x11ae   :  { %v10523_v40 = vpop.xlane.xlu0 %10522  ;;  %v10570_v61 = vpop.xlane.xlu1 %10569 }
0x11af   :  { %v10529_v7 = vsel %vm6103_vm14, %v10523_v40, 0.0  ;;  %v10576_v59 = vsel %vm6103_vm14, %v10570_v61, 0.0 }
0x11b0   :  { %v10530_v54 = vadd.f32 %v10529_v7, %v10528_v4  ;;  %v10577_v18 = vadd.f32 %v10576_v59, %v10575_v13 }
0x11b2   :  { %v10531_v21 = vrot.slane %v10530_v54, 4  ;;  %v10578_v62 = vrot.slane %v10577_v18, 4  ;;  %v10479_v28 = vpop.xlane.xlu0 %10478  ;;  %v10617_v57 = vpop.xlane.xlu1 %10616 }
0x11b3   :  { %v10485_v16 = vsel %vm6103_vm14, %v10479_v28, 0.0  ;;  %v10623_v48 = vsel %vm6103_vm14, %v10617_v57, 0.0 }
0x11b4   :  { %v10532_v56 = vadd.f32 %v10531_v21, %v10530_v54  ;;  %v10579_v43 = vadd.f32 %v10578_v62, %v10577_v18  ;;  %v10486_v49 = vadd.f32 %v10485_v16, %v10484_v53  ;;  %v21871_v53 = vld [vmem:[#allocation28_spill] sm:$0xff] }
0x11b6   :  { %v10533_v22 = vrot.slane %v10532_v56, 2  ;;  %v10580_v1 = vrot.slane %v10579_v43, 2  ;;  %v10487_v31 = vrot.slane %v10486_v49, 4  ;;  %v10614_v24 = vpop.xlane.xlu0 %10613 }
0x11b7   :  { %v10622_v10 = vadd.f32 %v10621_v34, %v10614_v24 }
0x11b8   :  { %v10534_v3 = vadd.f32 %v10533_v22, %v10532_v56  ;;  %v10581_v12 = vadd.f32 %v10580_v1, %v10579_v43  ;;  %v10488_v6 = vadd.f32 %v10487_v31, %v10486_v49 }
0x11b9   :  { %v10624_v20 = vadd.f32 %v10623_v48, %v10622_v10 }
0x11ba   :  { %v10535_v14 = vrot.slane %v10534_v3, 1  ;;  %v10582_v47 = vrot.slane %v10581_v12, 1  ;;  %v10489_v42 = vrot.slane %v10488_v6, 2 }
0x11bb   :  { %v10625_v46 = vrot.slane %v10624_v20, 4 }
0x11bc   :  { %v10536_v29 = vadd.f32 %v10535_v14, %v10534_v3  ;;  %v10490_v17 = vadd.f32 %v10489_v42, %v10488_v6  ;;  %v10583_v0 = vadd.f32 %v10582_v47, %v10581_v12 }
0x11bd   :  { %v10626_v35 = vadd.f32 %v10625_v46, %v10624_v20 }
0x11be   :  { %v10537_v50 = vmul.f32 0.0051020407, %v10536_v29  ;;  %v10491_v58 = vrot.slane %v10490_v17, 1  ;;  %v10584_v30 = vmul.f32 0.0051020407, %v10583_v0 }
0x11bf   :  { %v10627_v19 = vrot.slane %v10626_v35, 2 }
0x11c0   :  { %v10492_v45 = vadd.f32 %v10491_v58, %v10490_v17  ;;  %v10538_v5 = vmul.f32 %v20752_v23, %v10537_v50  ;;  %v10585_v40 = vmul.f32 %v20752_v23, %v10584_v30 }
0x11c1   :  { %v10628_v32 = vadd.f32 %v10627_v19, %v10626_v35 }
0x11c2   :  { %v10493_v26 = vmul.f32 0.0051020407, %v10492_v45  ;;  %v10540_v4 = vrot.slane %v10538_v5, 1  ;;  %v10587_v59 = vrot.slane %v10585_v40, 2 }
0x11c3   :  { %v10629_v60 = vrot.slane %v10628_v32, 1 }
0x11c4   :  { %v10494_v13 = vmul.f32 %v20752_v23, %v10493_v26 }
0x11c5   :  { %v10630_v61 = vadd.f32 %v10629_v60, %v10628_v32 }
0x11c6   :  { %v10542_v2 = vadd.f32 %v10540_v4, %v10494_v13 }
0x11c7   :  { %v10631_v7 = vmul.f32 0.0051020407, %v10630_v61 }
0x11c8   :  { %v10589_v54 = vadd.f32 %v10587_v59, %v10542_v2 }
0x11c9   :  { %v10632_v38 = vmul.f32 %v20752_v23, %v10631_v7 }
0x11cb   :  { %v10634_v18 = vrot.slane %v10632_v38, 3 }
0x11cd   :  { %v10636_v27 = vadd.f32 %v10634_v18, %v10589_v54 }
0x11cf   :  { %v20759_v21 = vrot.slane %v10636_v27, %v21871_v53 }
0x11d1   :  { %v20763_v62 = vsub.f32 %v20640_v37, %v20759_v21  ;;  %v20767_v28 = vsub.f32 %v20625_v11, %v20759_v21  ;;  %v20771_v55 = vsub.f32 %v20661_v41, %v20759_v21  ;;  %v20793_v3 = vsub.f32 %v20677_v33, %v20759_v21 }
0x11d2   :  { %v20807_v35 = vsub.f32 %v20698_v9, %v20759_v21  ;;  %v20823_v40 = vsub.f32 %v20716_v25, %v20759_v21 }
0x11d3   :  { %v10702_v16 = vmul.f32 %v20763_v62, %v21867_v36  ;;  %v10701_v56 = vmul.f32 %v20767_v28, %v21867_v36  ;;  %v10649_v43 = vmul.f32 %v20763_v62, %v21868_v51  ;;  %v10648_v37 = vmul.f32 %v20767_v28, %v21868_v51 }
0x11d4   :  { %v10757_v11 = vmul.f32 %v20767_v28, %v21869_v15  ;;  %v10703_v41 = vmul.f32 %v20771_v55, %v21867_v36  ;;  %v10650_v24 = vmul.f32 %v20771_v55, %v21868_v51  ;;  %v10758_v10 = vmul.f32 %v20763_v62, %v21869_v15 }
0x11d5   :  { %v10709_v49 = vmul.f32 %v10702_v16, %v10702_v16  ;;  %v10708_v34 = vmul.f32 %v10701_v56, %v10701_v56  ;;  %v10656_v1 = vmul.f32 %v10649_v43, %v10649_v43  ;;  %v10655_v31 = vmul.f32 %v10648_v37, %v10648_v37 }
0x11d6   :  { %v10764_v48 = vmul.f32 %v10757_v11, %v10757_v11  ;;  %v10710_v20 = vmul.f32 %v10703_v41, %v10703_v41  ;;  %v10657_v14 = vmul.f32 %v10650_v24, %v10650_v24  ;;  %v10765_v47 = vmul.f32 %v10758_v10, %v10758_v10 }
0x11d7   :  { %v10718_v57 = vsel %vm4921_vm7, %v10709_v49, 0.0  ;;  %v10715_v22 = vsel %vm4921_vm7, %v10708_v34, 0.0  ;;  %v10665_v12 = vsel %vm4921_vm7, %v10656_v1, 0.0  ;;  %v10662_v6 = vsel %vm4921_vm7, %v10655_v31, 0.0 }
0x11d8   :  { %10719 = vadd.xlane.f32.xlu1 %v10718_v57  ;;  %10716 = vadd.xlane.f32.xlu0 %v10715_v22  ;;  %v10771_v42 = vsel %vm4921_vm7, %v10764_v48, 0.0  ;;  %v10721_v46 = vsel %vm4921_vm7, %v10710_v20, 0.0  ;;  %v10759_v29 = vmul.f32 %v20771_v55, %v21869_v15  ;;  %v10704_v33 = vmul.f32 %v20793_v3, %v21867_v36 }
0x11d9   :  { %v10668_v17 = vsel %vm4921_vm7, %v10657_v14, 0.0  ;;  %v10774_v0 = vsel %vm4921_vm7, %v10765_v47, 0.0  ;;  %v10814_v19 = vmul.f32 %v20763_v62, %v21870_v8  ;;  %v10813_v45 = vmul.f32 %v20767_v28, %v21870_v8 }
0x11da   :  { %v10766_v50 = vmul.f32 %v10759_v29, %v10759_v29  ;;  %v10711_v58 = vmul.f32 %v10704_v33, %v10704_v33  ;;  %v10705_v5 = vmul.f32 %v20807_v35, %v21867_v36  ;;  %v10651_v30 = vmul.f32 %v20793_v3, %v21868_v51 }
0x11db   :  { %v10821_v26 = vmul.f32 %v10814_v19, %v10814_v19  ;;  %v10820_v60 = vmul.f32 %v10813_v45, %v10813_v45  ;;  %v10815_v4 = vmul.f32 %v20771_v55, %v21870_v8  ;;  %v10760_v59 = vmul.f32 %v20793_v3, %v21869_v15 }
0x11dc   :  { %10666 = vadd.xlane.f32.xlu1 %v10665_v12  ;;  %10663 = vadd.xlane.f32.xlu0 %v10662_v6  ;;  %v10777_v32 = vsel %vm4921_vm7, %v10766_v50, 0.0  ;;  %v10724_v9 = vsel %vm4921_vm7, %v10711_v58, 0.0  ;;  %v10712_v13 = vmul.f32 %v10705_v5, %v10705_v5  ;;  %v10658_v7 = vmul.f32 %v10651_v30, %v10651_v30 }
0x11dd   :  { %v10830_v61 = vsel %vm4921_vm7, %v10821_v26, 0.0  ;;  %v10827_v2 = vsel %vm4921_vm7, %v10820_v60, 0.0  ;;  %v10822_v54 = vmul.f32 %v10815_v4, %v10815_v4  ;;  %v10767_v27 = vmul.f32 %v10760_v59, %v10760_v59 }
0x11de   :  { %v10727_v38 = vsel %vm4921_vm7, %v10712_v13, 0.0  ;;  %v10671_v18 = vsel %vm4921_vm7, %v10658_v7, 0.0  ;;  %v10706_v25 = vmul.f32 %v20823_v40, %v21867_v36  ;;  %v10652_v16 = vmul.f32 %v20807_v35, %v21868_v51 }
0x11df   :  { %v10833_v56 = vsel %vm4921_vm7, %v10822_v54, 0.0  ;;  %v10816_v43 = vmul.f32 %v20793_v3, %v21870_v8  ;;  %v20840_v37 = vsub.f32 %v20728_v52, %v20759_v21  ;;  %v10780_v49 = vsel %vm4921_vm7, %v10767_v27, 0.0 }
0x11e0   :  { %10772 = vadd.xlane.f32.xlu1 %v10771_v42  ;;  %10722 = vadd.xlane.f32.xlu0 %v10721_v46  ;;  %v10713_v34 = vmul.f32 %v10706_v25, %v10706_v25  ;;  %v10659_v11 = vmul.f32 %v10652_v16, %v10652_v16  ;;  %v10761_v41 = vmul.f32 %v20807_v35, %v21869_v15 }
0x11e1   :  { %v10653_v57 = vmul.f32 %v20823_v40, %v21868_v51  ;;  %v10707_v22 = vmul.f32 %v20840_v37, %v21867_v36  ;;  %v10823_v21 = vmul.f32 %v10816_v43, %v10816_v43  ;;  %v10817_v10 = vmul.f32 %v20807_v35, %v21870_v8 }
0x11e2   :  { %v10730_v1 = vsel %vm4921_vm7, %v10713_v34, 0.0  ;;  %v10674_v52 = vsel %vm4921_vm7, %v10659_v11, 0.0  ;;  %v10768_v31 = vmul.f32 %v10761_v41, %v10761_v41  ;;  %v10762_v36 = vmul.f32 %v20823_v40, %v21869_v15 }
0x11e3   :  { %v10660_v24 = vmul.f32 %v10653_v57, %v10653_v57  ;;  %v10836_v12 = vsel %vm4921_vm7, %v10823_v21, 0.0  ;;  %v10714_v48 = vmul.f32 %v10707_v22, %v10707_v22  ;;  %v10824_v14 = vmul.f32 %v10817_v10, %v10817_v10 }
0x11e4   :  { %10669 = vadd.xlane.f32.xlu1 %v10668_v17  ;;  %10775 = vadd.xlane.f32.xlu0 %v10774_v0  ;;  %v10783_v6 = vsel %vm4921_vm7, %v10768_v31, 0.0  ;;  %v10769_v42 = vmul.f32 %v10762_v36, %v10762_v36  ;;  %v10763_v46 = vmul.f32 %v20840_v37, %v21869_v15  ;;  %v10654_v29 = vmul.f32 %v20840_v37, %v21868_v51 }
0x11e5   :  { %v10677_v20 = vsel %vm4921_vm7, %v10660_v24, 0.0  ;;  %v10733_v47 = vsel %vm5692_vm13, %v10714_v48, 0.0  ;;  %v10839_v33 = vsel %vm4921_vm7, %v10824_v14, 0.0  ;;  %v10819_v17 = vmul.f32 %v20840_v37, %v21870_v8 }
0x11e6   :  { %v10786_v0 = vsel %vm4921_vm7, %v10769_v42, 0.0  ;;  %v10770_v50 = vmul.f32 %v10763_v46, %v10763_v46  ;;  %v10661_v58 = vmul.f32 %v10654_v29, %v10654_v29  ;;  %v10818_v19 = vmul.f32 %v20823_v40, %v21870_v8  ;;  %v21873_v8 = vld [vmem:[#allocation8_spill] sm:$0xff] }
0x11e7   :  { %v10826_v45 = vmul.f32 %v10819_v17, %v10819_v17  ;;  %v8585_v60 = vmul.f32 %v19821_v63, %v21873_v8 }
0x11e8   :  { %10778 = vadd.xlane.f32.xlu1 %v10777_v32  ;;  %10725 = vadd.xlane.f32.xlu0 %v10724_v9  ;;  %v10789_v15 = vsel %vm5692_vm13, %v10770_v50, 0.0  ;;  %v10680_v51 = vsel %vm5692_vm13, %v10661_v58, 0.0  ;;  %v10825_v5 = vmul.f32 %v10818_v19, %v10818_v19  ;;  %v21872_v9 = vld [vmem:[#allocation7_spill] sm:$0xff] }
0x11e9   :  { %v10845_v30 = vsel %vm5692_vm13, %v10826_v45, 0.0  ;;  %v8584_v26 = vmul.f32 %v19827_v44, %v21872_v9 }
0x11ea   :  { %v10842_v32 = vsel %vm4921_vm7, %v10825_v5, 0.0 }
0x11ec   :  { %10831 = vadd.xlane.f32.xlu1 %v10830_v61  ;;  %10828 = vadd.xlane.f32.xlu0 %v10827_v2 }
0x11f0   :  { %10728 = vadd.xlane.f32.xlu1 %v10727_v38  ;;  %10672 = vadd.xlane.f32.xlu0 %v10671_v18 }
0x11f4   :  { %10834 = vadd.xlane.f32.xlu1 %v10833_v56  ;;  %10781 = vadd.xlane.f32.xlu0 %v10780_v49 }
0x11f8   :  { %10731 = vadd.xlane.f32.xlu1 %v10730_v1  ;;  %10675 = vadd.xlane.f32.xlu0 %v10674_v52 }
0x11fc   :  { %10837 = vadd.xlane.f32.xlu1 %v10836_v12  ;;  %10784 = vadd.xlane.f32.xlu0 %v10783_v6 }
0x1200   :  { %10678 = vadd.xlane.f32.xlu1 %v10677_v20  ;;  %10734 = vadd.xlane.f32.xlu0 %v10733_v47 }
0x1204   :  { %10840 = vadd.xlane.f32.xlu1 %v10839_v33  ;;  %10787 = vadd.xlane.f32.xlu0 %v10786_v0 }
0x1208   :  { %10790 = vadd.xlane.f32.xlu1 %v10789_v15  ;;  %10681 = vadd.xlane.f32.xlu0 %v10680_v51 }
0x120c   :  { %10846 = vadd.xlane.f32.xlu1 %v10845_v30  ;;  %10843 = vadd.xlane.f32.xlu0 %v10842_v32 }
0x121d   :  { %10882 = vrot.lane.b32.xlu1 %v8584_v26, %s15782_s27 }
0x1222   :  { %10884 = vrot.lane.b32.xlu0 %v8585_v60, %s15782_s27 }
0x1261   :  { %v10720_v13 = vpop.xlane.xlu1 %10719  ;;  %v10717_v4 = vpop.xlane.xlu0 %10716 }
0x1262   :  { %v10736_v34 = vadd.f32 %v10720_v13, %v10717_v4 }
0x1265   :  { %v10667_v61 = vpop.xlane.xlu1 %10666  ;;  %v10664_v2 = vpop.xlane.xlu0 %10663 }
0x1266   :  { %v10683_v21 = vadd.f32 %v10667_v61, %v10664_v2 }
0x1269   :  { %v10773_v7 = vpop.xlane.xlu1 %10772  ;;  %v10723_v59 = vpop.xlane.xlu0 %10722 }
0x126a   :  { %v10737_v41 = vadd.f32 %v10736_v34, %v10723_v59 }
0x126d   :  { %v10670_v38 = vpop.xlane.xlu1 %10669  ;;  %v10776_v54 = vpop.xlane.xlu0 %10775 }
0x126e   :  { %v10792_v31 = vadd.f32 %v10776_v54, %v10773_v7  ;;  %v10684_v48 = vadd.f32 %v10683_v21, %v10670_v38 }
0x1271   :  { %v10779_v18 = vpop.xlane.xlu1 %10778  ;;  %v10726_v27 = vpop.xlane.xlu0 %10725 }
0x1272   :  { %v10738_v57 = vadd.f32 %v10737_v41, %v10726_v27  ;;  %v10793_v36 = vadd.f32 %v10792_v31, %v10779_v18 }
0x1275   :  { %v10832_v25 = vpop.xlane.xlu1 %10831  ;;  %v10829_v16 = vpop.xlane.xlu0 %10828 }
0x1276   :  { %v10848_v33 = vadd.f32 %v10832_v25, %v10829_v16 }
0x1279   :  { %v10729_v44 = vpop.xlane.xlu1 %10728  ;;  %v10673_v56 = vpop.xlane.xlu0 %10672 }
0x127a   :  { %v10739_v52 = vadd.f32 %v10738_v57, %v10729_v44  ;;  %v10685_v14 = vadd.f32 %v10684_v48, %v10673_v56 }
0x127d   :  { %v10835_v43 = vpop.xlane.xlu1 %10834  ;;  %v10782_v49 = vpop.xlane.xlu0 %10781 }
0x127e   :  { %v10794_v47 = vadd.f32 %v10793_v36, %v10782_v49  ;;  %v10849_v58 = vadd.f32 %v10848_v33, %v10835_v43 }
0x1281   :  { %v10732_v63 = vpop.xlane.xlu1 %10731  ;;  %v10676_v11 = vpop.xlane.xlu0 %10675 }
0x1282   :  { %v10740_v24 = vadd.f32 %v10739_v52, %v10732_v63  ;;  %v10686_v17 = vadd.f32 %v10685_v14, %v10676_v11 }
0x1285   :  { %v10838_v22 = vpop.xlane.xlu1 %10837  ;;  %v10785_v1 = vpop.xlane.xlu0 %10784 }
0x1286   :  { %v10795_v0 = vadd.f32 %v10794_v47, %v10785_v1  ;;  %v10850_v30 = vadd.f32 %v10849_v58, %v10838_v22 }
0x1289   :  { %v10679_v10 = vpop.xlane.xlu1 %10678  ;;  %v10735_v12 = vpop.xlane.xlu0 %10734 }
0x128a   :  { %v10741_v6 = vsel %vm6103_vm14, %v10735_v12, 0.0  ;;  %v10687_v19 = vadd.f32 %v10686_v17, %v10679_v10 }
0x128b   :  { %v10742_v20 = vadd.f32 %v10741_v6, %v10740_v24 }
0x128d   :  { %v10743_v42 = vrot.slane %v10742_v20, 4  ;;  %v10841_v46 = vpop.xlane.xlu1 %10840  ;;  %v10788_v29 = vpop.xlane.xlu0 %10787 }
0x128e   :  { %v10796_v51 = vadd.f32 %v10795_v0, %v10788_v29  ;;  %v10851_v13 = vadd.f32 %v10850_v30, %v10841_v46 }
0x128f   :  { %v10744_v50 = vadd.f32 %v10743_v42, %v10742_v20 }
0x1291   :  { %v10745_v15 = vrot.slane %v10744_v50, 2  ;;  %v10791_v45 = vpop.xlane.xlu1 %10790  ;;  %v10682_v5 = vpop.xlane.xlu0 %10681 }
0x1292   :  { %v10797_v32 = vsel %vm6103_vm14, %v10791_v45, 0.0  ;;  %v10688_v9 = vsel %vm6103_vm14, %v10682_v5, 0.0 }
0x1293   :  { %v10746_v26 = vadd.f32 %v10745_v15, %v10744_v50  ;;  %v10798_v8 = vadd.f32 %v10797_v32, %v10796_v51  ;;  %v10689_v60 = vadd.f32 %v10688_v9, %v10687_v19 }
0x1295   :  { %v10747_v4 = vrot.slane %v10746_v26, 1  ;;  %v10799_v61 = vrot.slane %v10798_v8, 4  ;;  %v10690_v2 = vrot.slane %v10689_v60, 4  ;;  %v10847_v7 = vpop.xlane.xlu1 %10846  ;;  %v10844_v59 = vpop.xlane.xlu0 %10843 }
0x1296   :  { %v10853_v38 = vsel %vm6103_vm14, %v10847_v7, 0.0  ;;  %v10852_v54 = vadd.f32 %v10851_v13, %v10844_v59 }
0x1297   :  { %v10748_v18 = vadd.f32 %v10747_v4, %v10746_v26  ;;  %v10800_v27 = vadd.f32 %v10799_v61, %v10798_v8  ;;  %v10691_v25 = vadd.f32 %v10690_v2, %v10689_v60 }
0x1298   :  { %v10854_v16 = vadd.f32 %v10853_v38, %v10852_v54 }
0x1299   :  { %v10749_v44 = vmul.f32 0.0051020407, %v10748_v18  ;;  %v10801_v56 = vrot.slane %v10800_v27, 2  ;;  %v10692_v43 = vrot.slane %v10691_v25, 2  ;;  %v10883_v49 = vpop.permute.xlu1 %10882  ;;  %v10885_v34 = vpop.permute.xlu0 %10884 }
0x129a   :  { %v10855_v63 = vrot.slane %v10854_v16, 4  ;;  %v20883_v11 = vand.u32 4294901760, %v10883_v49  ;;  %v20885_v41 = vand.u32 4294901760, %v10885_v34 }
0x129b   :  { %v10802_v57 = vadd.f32 %v10801_v56, %v10800_v27  ;;  %v10693_v22 = vadd.f32 %v10692_v43, %v10691_v25  ;;  %v10750_v1 = vadd.f32 1e-05, %v10749_v44 }
0x129c   :  { %v10856_v52 = vadd.f32 %v10855_v63, %v10854_v16  ;;  %v20888_v21 = vsub.f32 %v10883_v49, %v20883_v11  ;;  %v20891_v31 = vsub.f32 %v10885_v34, %v20885_v41  ;;  %15325 = vmatpush3.msra.mxu0 %v20885_v41 }
0x129d   :  { %v10803_v24 = vrot.slane %v10802_v57, 1  ;;  %v10694_v10 = vrot.slane %v10693_v22, 1  ;;  %15326 = vmatprep.subr.mxu0 %v21793_v39  ;;  %15766 = vrsqrt.f32 %v10750_v1 }
0x129e   :  { %v10857_v12 = vrot.slane %v10856_v52, 2  ;;  %v11084_v6 = vand.u32 4294901760, %v20888_v21  ;;  %v11077_v48 = vand.u32 4294901760, %v20891_v31  ;;  %15327 = vmatpush3.msra.mxu0 %v20883_v11 }
0x129f   :  { %v10804_v36 = vadd.f32 %v10803_v24, %v10802_v57  ;;  %v10695_v20 = vadd.f32 %v10694_v10, %v10693_v22  ;;  %15374 = vmatprep.subr.mxu0 %v21793_v39 }
0x12a0   :  { %v10858_v14 = vadd.f32 %v10857_v12, %v10856_v52  ;;  %v11085_v47 = vsub.f32 %v20888_v21, %v11084_v6  ;;  %v11078_v42 = vsub.f32 %v20891_v31, %v11077_v48 }
0x12a1   :  { %v10805_v46 = vmul.f32 0.0051020407, %v10804_v36  ;;  %v10696_v29 = vmul.f32 0.0051020407, %v10695_v20 }
0x12a2   :  { %v10859_v33 = vrot.slane %v10858_v14, 1  ;;  %v11079_v17 = vand.u32 4294901760, %v11078_v42  ;;  %v11086_v19 = vand.u32 4294901760, %v11085_v47 }
0x12a3   :  { %v10806_v0 = vadd.f32 1e-05, %v10805_v46  ;;  %v10697_v50 = vadd.f32 1e-05, %v10696_v29 }
0x12a4   :  { %v10860_v58 = vadd.f32 %v10859_v33, %v10858_v14  ;;  %15350 = vmatpush3.msra.mxu1 %v11079_v17 }
0x12a5   :  { %15768 = vrsqrt.f32 %v10806_v0  ;;  %15351 = vmatprep.subr.mxu1 %v21793_v39 }
0x12a6   :  { %15770 = vrsqrt.f32 %v10697_v50  ;;  %v10861_v15 = vmul.f32 0.0051020407, %v10860_v58  ;;  %15352 = vmatpush3.msra.mxu1 %v11086_v19 }
0x12a7   :  { %15399 = vmatprep.subr.mxu1 %v21793_v39 }
0x12a8   :  { %v10862_v51 = vadd.f32 1e-05, %v10861_v15 }
0x12aa   :  { %15772 = vrsqrt.f32 %v10862_v51  ;;  %v15767_v45 = vpop.eup %15766 }
0x12ab   :  { %v10752_v5 = vmul.f32 %v20752_v23, %v15767_v45 }
0x12ad   :  { %v10754_v26 = vrot.slane %v10752_v5, 1 }
0x12b2   :  { %v15769_v30 = vpop.eup %15768 }
0x12b3   :  { %v15771_v32 = vpop.eup %15770  ;;  %v10808_v9 = vmul.f32 %v20752_v23, %v15769_v30 }
0x12b4   :  { %v10699_v8 = vmul.f32 %v20752_v23, %v15771_v32 }
0x12b5   :  { %v10810_v60 = vrot.slane %v10808_v9, 2 }
0x12b6   :  { %v10756_v13 = vadd.f32 %v10754_v26, %v10699_v8 }
0x12b7   :  { %v15773_v4 = vpop.eup %15772 }
0x12b8   :  { %v10864_v61 = vmul.f32 %v20752_v23, %v15773_v4  ;;  %v10812_v2 = vadd.f32 %v10810_v60, %v10756_v13  ;;  %v11631_v4 = vld [vmem:[%s21593_s5 + $0x28] sm:$0xff] }
0x12ba   :  { %v10866_v7 = vrot.slane %v10864_v61, 3  ;;  %v21126_v61 = vand.u32 4294901760, %v11631_v4 }
0x12bc   :  { %v10868_v59 = vadd.f32 %v10866_v7, %v10812_v2  ;;  %v11630_v2 = vld [vmem:[%s21593_s5 + $0x20] sm:$0xff] }
0x12be   :  { %v10872_v38 = vrot.slane %v10868_v59, %v21871_v53 }
0x12c0   :  { %v10873_v54 = vmul.f32 %v10872_v38, %v20767_v28  ;;  %v10874_v18 = vmul.f32 %v10872_v38, %v20763_v62  ;;  %v10875_v27 = vmul.f32 %v10872_v38, %v20771_v55  ;;  %v10876_v25 = vmul.f32 %v10872_v38, %v20793_v3 }
0x12c1   :  { %v10877_v62 = vmul.f32 %v10872_v38, %v20807_v35  ;;  %v10878_v34 = vmul.f32 %v10872_v38, %v20823_v40  ;;  %v10879_v24 = vmul.f32 %v10872_v38, %v20840_v37  ;;  %v21132_v38 = vand.u32 4294901760, %v11630_v2 }
0x12c2   :  { %v10889_v16 = vsel %vm4921_vm7, %v10873_v54, 0  ;;  %v10892_v44 = vsel %vm4921_vm7, %v10874_v18, 0  ;;  %v10895_v56 = vsel %vm4921_vm7, %v10875_v27, 0  ;;  %v10898_v53 = vsel %vm4921_vm7, %v10876_v25, 0 }
0x12c3   :  { %v20919_v23 = vand.u32 4294901760, %v10889_v16  ;;  %v20921_v43 = vand.u32 4294901760, %v10892_v44  ;;  %v20923_v49 = vand.u32 4294901760, %v10895_v56  ;;  %v20937_v3 = vand.u32 4294901760, %v10898_v53 }
0x12c4   :  { %v10901_v22 = vsel %vm4921_vm7, %v10877_v62, 0  ;;  %v10904_v52 = vsel %vm4921_vm7, %v10878_v34, 0  ;;  %v10907_v14 = vsel %vm4921_vm7, %v10879_v24, 0  ;;  %v21135_v54 = vsub.f32 %v11631_v4, %v21126_v61  ;;  %v11627_v34 = vld [vmem:[%s21593_s5 + $0x8] sm:$0xff] }
0x12c5   :  { %v20928_v28 = vsub.f32 %v10889_v16, %v20919_v23  ;;  %15354 = vmatmul.mubr.f32.vlgmr.msra.gmra.mxu1 %v20919_v23  ;;  %v20932_v55 = vsub.f32 %v10892_v44, %v20921_v43  ;;  %v20943_v63 = vsub.f32 %v10895_v56, %v20923_v49  ;;  %v20953_v40 = vsub.f32 %v10898_v53, %v20937_v3  ;;  %v11629_v53 = vld [vmem:[%s21593_s5 + $0x18] sm:$0xff] }
0x12c6   :  { %15400 = vmatpush3.msra.mxu1 %v20885_v41  ;;  %15356 = vmatprep.mubr.msk.f32.mxu1 %vm15780_vm1, %v21793_v39  ;;  %v20962_v20 = vand.u32 4294901760, %v10901_v22  ;;  %v20968_v37 = vand.u32 4294901760, %v10904_v52  ;;  %v20985_v33 = vand.u32 4294901760, %v10907_v14  ;;  %v21142_v27 = vsub.f32 %v11630_v2, %v21132_v38 }
0x12c7   :  { %15401 = vmatprep.subr.mxu1 %v21793_v39  ;;  %v10978_v35 = vand.u32 4294901760, %v20928_v28  ;;  %v10988_v57 = vand.u32 4294901760, %v20932_v55  ;;  %v10998_v36 = vand.u32 4294901760, %v20943_v63  ;;  %v11008_v29 = vand.u32 4294901760, %v20953_v40 }
0x12c8   :  { %15402 = vmatpush3.msra.mxu1 %v20883_v11  ;;  %v20976_v46 = vsub.f32 %v10901_v22, %v20962_v20  ;;  %v11027_v50 = vsub.f32 %v10904_v52, %v20968_v37  ;;  %v11037_v51 = vsub.f32 %v10907_v14, %v20985_v33  ;;  %v21694_v25 = vand.u32 4294901760, %v21135_v54  ;;  %v11626_v22 = vld [vmem:[%s21593_s5] sm:$0xff] }
0x12c9   :  { %15357 = vmatmul.mubr.f32.gmra.mxu1 %v20921_v43  ;;  %v10979_v1 = vsub.f32 %v20928_v28, %v10978_v35  ;;  %15449 = vmatprep.subr.mxu1 %v21793_v39  ;;  %v10989_v12 = vsub.f32 %v20932_v55, %v10988_v57  ;;  %v10999_v42 = vsub.f32 %v20943_v63, %v10998_v36  ;;  %v21693_v44 = vand.u32 4294901760, %v21142_v27 }
0x12ca   :  { %15359 = vmatprep.mubr.msk.f32.mxu1 %vm15780_vm1, %v21793_v39  ;;  %v11009_v0 = vsub.f32 %v20953_v40, %v11008_v29  ;;  %v11018_v58 = vand.u32 4294901760, %v20976_v46  ;;  %v11028_v45 = vand.u32 4294901760, %v11027_v50  ;;  %v11038_v32 = vand.u32 4294901760, %v11037_v51 }
0x12cb   :  { %v10980_v10 = vand.u32 4294901760, %v10979_v1  ;;  %v10990_v47 = vand.u32 4294901760, %v10989_v12  ;;  %v11000_v17 = vand.u32 4294901760, %v10999_v42  ;;  %v11839_v56 = vsub.f32 %v21135_v54, %v21694_v25 }
0x12cc   :  { %v11010_v19 = vand.u32 4294901760, %v11009_v0  ;;  %v11019_v15 = vsub.f32 %v20976_v46, %v11018_v58  ;;  %v11029_v30 = vsub.f32 %v11027_v50, %v11028_v45  ;;  %v11039_v26 = vsub.f32 %v11037_v51, %v11038_v32 }
0x12cd   :  { %15329 = vmatmul.mubr.f32.vlgmr.msra.gmra.mxu0 %v10980_v10  ;;  %15360 = vmatmul.mubr.f32.gmra.mxu1 %v20923_v49  ;;  %v21161_v62 = vand.u32 4294901760, %v11629_v53  ;;  %v21195_v24 = vand.u32 4294901760, %v11626_v22 }
0x12ce   :  { %15375 = vmatpush3.msra.mxu0 %v20891_v31  ;;  %15331 = vmatprep.mubr.msk.f32.mxu0 %vm15780_vm1, %v21793_v39  ;;  %v11020_v5 = vand.u32 4294901760, %v11019_v15  ;;  %v11030_v9 = vand.u32 4294901760, %v11029_v30  ;;  %v11040_v8 = vand.u32 4294901760, %v11039_v26  ;;  %v11632_v31 = vld [vmem:[%s21593_s5 + $0x30] sm:$0xff] }
0x12cf   :  { %15376 = vmatprep.subr.mxu0 %v21793_v39  ;;  %15362 = vmatprep.mubr.msk.f32.mxu1 %vm15780_vm1, %v21793_v39 }
0x12d0   :  { %15377 = vmatpush3.msra.mxu0 %v20888_v21 }
0x12d1   :  { %15332 = vmatmul.mubr.f32.gmra.mxu0 %v10990_v47  ;;  %15363 = vmatmul.mubr.f32.gmra.mxu1 %v20937_v3 }
0x12d2   :  { %15334 = vmatprep.mubr.msk.f32.mxu0 %vm15780_vm1, %v21793_v39  ;;  %15365 = vmatprep.mubr.msk.f32.mxu1 %vm15780_vm1, %v21793_v39 }
0x12d3   :  { %15424 = vmatprep.subr.mxu0 %v21793_v39 }
0x12d5   :  { %15335 = vmatmul.mubr.f32.gmra.mxu0 %v11000_v17  ;;  %15366 = vmatmul.mubr.f32.gmra.mxu1 %v20962_v20 }
0x12d6   :  { %15337 = vmatprep.mubr.msk.f32.mxu0 %vm15780_vm1, %v21793_v39  ;;  %15368 = vmatprep.mubr.msk.f32.mxu1 %vm15780_vm1, %v21793_v39 }
0x12d9   :  { %15338 = vmatmul.mubr.f32.gmra.mxu0 %v11010_v19  ;;  %15369 = vmatmul.mubr.f32.gmra.mxu1 %v20968_v37 }
0x12da   :  { %15340 = vmatprep.mubr.msk.f32.mxu0 %vm15780_vm1, %v21793_v39  ;;  %15371 = vmatprep.mubr.msk.f32.mxu1 %vm15780_vm1, %v21793_v39 }
0x12dd   :  { %15341 = vmatmul.mubr.f32.gmra.mxu0 %v11020_v5  ;;  %15372 = vmatmul.mubr.f32.gmra.mxu1 %v20985_v33 }
0x12de   :  { %15343 = vmatprep.mubr.msk.f32.mxu0 %vm15780_vm1, %v21793_v39  ;;  %15403 = vmatprep.mubr.msk.f32.mxu1 %vm15780_vm1, %v21793_v39 }
0x12e1   :  { %15344 = vmatmul.mubr.f32.gmra.mxu0 %v11030_v9  ;;  %15404 = vmatmul.mubr.f32.vlgmr.msra.gmra.mxu1 %v10978_v35 }
0x12e2   :  { %15450 = vmatpush3.msra.mxu1 %v20885_v41  ;;  %15346 = vmatprep.mubr.msk.f32.mxu0 %vm15780_vm1, %v21793_v39 }
0x12e3   :  { %15451 = vmatprep.subr.mxu1 %v21793_v39  ;;  %15406 = vmatprep.mubr.msk.f32.mxu1 %vm15780_vm1, %v21793_v39 }
0x12e4   :  { %15452 = vmatpush3.msra.mxu1 %v20883_v11  ;;  %v11633_v11 = vld [vmem:[%s21593_s5 + $0x38] sm:$0xff] }
0x12e5   :  { %15347 = vmatmul.mubr.f32.gmra.mxu0 %v11040_v8  ;;  %15407 = vmatmul.mubr.f32.gmra.mxu1 %v10988_v57  ;;  %v21102_v41 = vand.u32 4294901760, %v11633_v11  ;;  %v21181_v57 = vand.u32 4294901760, %v11627_v34 }
0x12e6   :  { %15378 = vmatprep.mubr.msk.f32.mxu0 %vm15780_vm1, %v21793_v39  ;;  %15409 = vmatprep.mubr.msk.f32.mxu1 %vm15780_vm1, %v21793_v39 }
0x12e7   :  { %15511 = vmatprep.subr.mxu1 %v21793_v39  ;;  %v21106_v21 = vsub.f32 %v11633_v11, %v21102_v41  ;;  %v21193_v52 = vsub.f32 %v11627_v34, %v21181_v57 }
0x12e9   :  { %15379 = vmatmul.mubr.f32.vlgmr.msra.gmra.mxu0 %v20928_v28  ;;  %15410 = vmatmul.mubr.f32.gmra.mxu1 %v10998_v36  ;;  %v11628_v28 = vld [vmem:[%s21593_s5 + $0x10] sm:$0xff]  ;;  %v21690_v36 = vand.u32 4294901760, %v21193_v52 }
0x12ea   :  { %15425 = vmatpush3.msra.mxu0 %v11077_v48  ;;  %15381 = vmatprep.mubr.msk.f32.mxu0 %vm15780_vm1, %v21793_v39  ;;  %v21113_v48 = vand.u32 4294901760, %v11632_v31 }
0x12eb   :  { %15426 = vmatprep.subr.mxu0 %v21793_v39  ;;  %15412 = vmatprep.mubr.msk.f32.mxu1 %vm15780_vm1, %v21793_v39  ;;  %v11867_v14 = vsub.f32 %v21193_v52, %v21690_v36 }
0x12ec   :  { %15427 = vmatpush3.msra.mxu0 %v11084_v6  ;;  %v21696_v6 = vand.u32 4294901760, %v21106_v21  ;;  %v21120_v13 = vsub.f32 %v11632_v31, %v21113_v48 }
0x12ed   :  { %15382 = vmatmul.mubr.f32.gmra.mxu0 %v20932_v55  ;;  %15413 = vmatmul.mubr.f32.gmra.mxu1 %v11008_v29  ;;  %v21168_v55 = vsub.f32 %v11629_v53, %v21161_v62  ;;  %v11868_v42 = vand.u32 4294901760, %v11867_v14 }
0x12ee   :  { %15384 = vmatprep.mubr.msk.f32.mxu0 %vm15780_vm1, %v21793_v39  ;;  %15415 = vmatprep.mubr.msk.f32.mxu1 %vm15780_vm1, %v21793_v39  ;;  %v11825_v60 = vsub.f32 %v21106_v21, %v21696_v6  ;;  %v21695_v59 = vand.u32 4294901760, %v21120_v13 }
0x12ef   :  { %15474 = vmatprep.subr.mxu0 %v21793_v39  ;;  %v21692_v35 = vand.u32 4294901760, %v21168_v55 }
0x12f0   :  { %v11826_v7 = vand.u32 4294901760, %v11825_v60  ;;  %v11832_v18 = vsub.f32 %v21120_v13, %v21695_v59 }
0x12f1   :  { %15385 = vmatmul.mubr.f32.gmra.mxu0 %v20943_v63  ;;  %15416 = vmatmul.mubr.f32.gmra.mxu1 %v11018_v58  ;;  %v11853_v1 = vsub.f32 %v21168_v55, %v21692_v35 }
0x12f2   :  { %15387 = vmatprep.mubr.msk.f32.mxu0 %vm15780_vm1, %v21793_v39  ;;  %15418 = vmatprep.mubr.msk.f32.mxu1 %vm15780_vm1, %v21793_v39  ;;  %v11833_v16 = vand.u32 4294901760, %v11832_v18 }
0x12f3   :  { %v11854_v10 = vand.u32 4294901760, %v11853_v1 }
0x12f5   :  { %15388 = vmatmul.mubr.f32.gmra.mxu0 %v20953_v40  ;;  %15419 = vmatmul.mubr.f32.gmra.mxu1 %v11028_v45 }
0x12f6   :  { %15390 = vmatprep.mubr.msk.f32.mxu0 %vm15780_vm1, %v21793_v39  ;;  %15421 = vmatprep.mubr.msk.f32.mxu1 %vm15780_vm1, %v21793_v39 }
0x12f9   :  { %15391 = vmatmul.mubr.f32.gmra.mxu0 %v20976_v46  ;;  %15422 = vmatmul.mubr.f32.gmra.mxu1 %v11038_v32 }
0x12fa   :  { %15393 = vmatprep.mubr.msk.f32.mxu0 %vm15780_vm1, %v21793_v39  ;;  %15453 = vmatprep.mubr.msk.f32.mxu1 %vm15780_vm1, %v21793_v39 }
0x12fd   :  { %15394 = vmatmul.mubr.f32.gmra.mxu0 %v11027_v50  ;;  %15454 = vmatmul.mubr.f32.vlgmr.msra.gmra.mxu1 %v20919_v23 }
0x12fe   :  { %15396 = vmatprep.mubr.msk.f32.mxu0 %vm15780_vm1, %v21793_v39  ;;  %15456 = vmatprep.mubr.msk.f32.mxu1 %vm15780_vm1, %v21793_v39 }
0x12ff   :  { %15512 = vmatpush3.msra.mxu1 %v11826_v7 }
0x1300   :  { %15513 = vmatprep.subr.mxu1 %v21793_v39 }
0x1301   :  { %15397 = vmatmul.mubr.f32.gmra.mxu0 %v11037_v51  ;;  %15457 = vmatmul.mubr.f32.gmra.mxu1 %v20921_v43 }
0x1302   :  { %15428 = vmatprep.mubr.msk.f32.mxu0 %vm15780_vm1, %v21793_v39  ;;  %15459 = vmatprep.mubr.msk.f32.mxu1 %vm15780_vm1, %v21793_v39 }
0x1303   :  { %15514 = vmatpush3.msra.mxu1 %v11833_v16 }
0x1304   :  { %15515 = vmatprep.subr.mxu1 %v21793_v39 }
0x1305   :  { %15429 = vmatmul.mubr.f32.vlgmr.msra.gmra.mxu0 %v20919_v23  ;;  %15460 = vmatmul.mubr.f32.gmra.mxu1 %v20923_v49  ;;  %v11846_v23 = vsub.f32 %v21142_v27, %v21693_v44 }
0x1306   :  { %15431 = vmatprep.mubr.msk.f32.mxu0 %vm15780_vm1, %v21793_v39  ;;  %15462 = vmatprep.mubr.msk.f32.mxu1 %vm15780_vm1, %v21793_v39 }
0x1307   :  { %15475 = vmatpush3.msra.mxu0 %v21102_v41 }
0x1308   :  { %15476 = vmatprep.subr.mxu0 %v21793_v39 }
0x1309   :  { %15432 = vmatmul.mubr.f32.gmra.mxu0 %v20921_v43  ;;  %15463 = vmatmul.mubr.f32.gmra.mxu1 %v20937_v3  ;;  %v11840_v43 = vand.u32 4294901760, %v11839_v56 }
0x130a   :  { %15434 = vmatprep.mubr.msk.f32.mxu0 %vm15780_vm1, %v21793_v39  ;;  %15465 = vmatprep.mubr.msk.f32.mxu1 %vm15780_vm1, %v21793_v39 }
0x130b   :  { %15477 = vmatpush3.msra.mxu0 %v21113_v48  ;;  %15516 = vmatpush3.msra.mxu1 %v11840_v43 }
0x130c   :  { %15478 = vmatprep.subr.mxu0 %v21793_v39  ;;  %15517 = vmatprep.subr.mxu1 %v21793_v39 }
0x130d   :  { %15435 = vmatmul.mubr.f32.gmra.mxu0 %v20923_v49  ;;  %15466 = vmatmul.mubr.f32.gmra.mxu1 %v20962_v20  ;;  %v11847_v49 = vand.u32 4294901760, %v11846_v23 }
0x130e   :  { %15437 = vmatprep.mubr.msk.f32.mxu0 %vm15780_vm1, %v21793_v39  ;;  %15468 = vmatprep.mubr.msk.f32.mxu1 %vm15780_vm1, %v21793_v39 }
0x130f   :  { %15479 = vmatpush3.msra.mxu0 %v21126_v61  ;;  %15518 = vmatpush3.msra.mxu1 %v11847_v49 }
0x1310   :  { %15480 = vmatprep.subr.mxu0 %v21793_v39  ;;  %15519 = vmatprep.subr.mxu1 %v21793_v39 }
0x1311   :  { %15438 = vmatmul.mubr.f32.gmra.mxu0 %v20937_v3  ;;  %15469 = vmatmul.mubr.f32.gmra.mxu1 %v20968_v37  ;;  %v21170_v3 = vand.u32 4294901760, %v11628_v28 }
0x1312   :  { %15440 = vmatprep.mubr.msk.f32.mxu0 %vm15780_vm1, %v21793_v39  ;;  %15471 = vmatprep.mubr.msk.f32.mxu1 %vm15780_vm1, %v21793_v39 }
0x1313   :  { %15481 = vmatpush3.msra.mxu0 %v21132_v38  ;;  %v21179_v63 = vsub.f32 %v11628_v28, %v21170_v3  ;;  %15520 = vmatpush3.msra.mxu1 %v11854_v10 }
0x1314   :  { %15482 = vmatprep.subr.mxu0 %v21793_v39  ;;  %15521 = vmatprep.subr.mxu1 %v21793_v39 }
0x1315   :  { %15441 = vmatmul.mubr.f32.gmra.mxu0 %v20962_v20  ;;  %15472 = vmatmul.mubr.f32.gmra.mxu1 %v20985_v33  ;;  %v21691_v40 = vand.u32 4294901760, %v21179_v63  ;;  %v21204_v20 = vsub.f32 %v11626_v22, %v21195_v24 }
0x1316   :  { %15443 = vmatprep.mubr.msk.f32.mxu0 %vm15780_vm1, %v21793_v39  ;;  %15527 = vmatprep.mubr.msk.f32.mxu1 %vm15780_vm1, %v21793_v39 }
0x1317   :  { %15483 = vmatpush3.msra.mxu0 %v21161_v62  ;;  %v11860_v12 = vsub.f32 %v21179_v63, %v21691_v40  ;;  %v21689_v47 = vand.u32 4294901760, %v21204_v20 }
0x1318   :  { %15484 = vmatprep.subr.mxu0 %v21793_v39 }
0x1319   :  { %15444 = vmatmul.mubr.f32.gmra.mxu0 %v20968_v37  ;;  %v11861_v37 = vand.u32 4294901760, %v11860_v12  ;;  %v11874_v46 = vsub.f32 %v21204_v20, %v21689_v47 }
0x131a   :  { %15446 = vmatprep.mubr.msk.f32.mxu0 %vm15780_vm1, %v21793_v39  ;;  %15485 = vmatpush3.msra.mxu0 %v21170_v3 }
0x131b   :  { %15486 = vmatprep.subr.mxu0 %v21793_v39  ;;  %15522 = vmatpush3.msra.mxu1 %v11861_v37  ;;  %v11875_v29 = vand.u32 4294901760, %v11874_v46 }
0x131c   :  { %15487 = vmatpush3.msra.mxu0 %v21181_v57  ;;  %15523 = vmatprep.subr.mxu1 %v21793_v39 }
0x131d   :  { %15447 = vmatmul.mubr.f32.gmra.mxu0 %v20985_v33  ;;  %15488 = vmatprep.subr.mxu0 %v21793_v39 }
0x131e   :  { %15490 = vmatprep.mubr.msk.f32.mxu0 %vm15780_vm1, %v21793_v39  ;;  %15489 = vmatpush3.msra.mxu0 %v21195_v24 }
0x131f   :  { %15548 = vmatprep.subr.mxu0 %v21793_v39  ;;  %15524 = vmatpush3.msra.mxu1 %v11868_v42 }
0x1320   :  { %15525 = vmatprep.subr.mxu1 %v21793_v39 }
0x1321   :  { %15526 = vmatpush3.msra.mxu1 %v11875_v29 }
0x1322   :  { %15585 = vmatprep.subr.mxu1 %v21793_v39 }
0x1385   :  { %v11123_v33 = vpop.f32.mrf.mxu1 }
0x1387   :  { %v15355_v17 = vpop.f32.mrf.mxu1 }
0x1389   :  { %v11129_v0 = vpop.f32.mrf.mxu1 }
0x138b   :  { %v15358_v50 = vpop.f32.mrf.mxu1 }
0x138d   :  { %v10982_v58 = vpop.f32.mrf.mxu0  ;;  %v11135_v19 = vpop.f32.mrf.mxu1 }
0x138f   :  { %v15330_v15 = vpop.f32.mrf.mxu0  ;;  %v15361_v51 = vpop.f32.mrf.mxu1 }
0x1391   :  { %v10992_v45 = vpop.f32.mrf.mxu0  ;;  %v21219_v5 = vpop.f32.mrf.mxu1 }
0x1393   :  { %v15333_v30 = vpop.f32.mrf.mxu0  ;;  %v15364_v32 = vpop.f32.mrf.mxu1 }
0x1395   :  { %v11002_v9 = vpop.f32.mrf.mxu0  ;;  %v21221_v26 = vpop.f32.mrf.mxu1 }
0x1396   :  { %v11136_v44 = vadd.f32 %v11135_v19, %v11002_v9 }
0x1397   :  { %v15336_v8 = vpop.f32.mrf.mxu0  ;;  %v15367_v11 = vpop.f32.mrf.mxu1 }
0x1399   :  { %v11012_v31 = vpop.f32.mrf.mxu0  ;;  %v21223_v60 = vpop.f32.mrf.mxu1 }
0x139b   :  { %v15339_v4 = vpop.f32.mrf.mxu0  ;;  %v15370_v2 = vpop.f32.mrf.mxu1 }
0x139d   :  { %v21225_v7 = vpop.f32.mrf.mxu0  ;;  %v21227_v18 = vpop.f32.mrf.mxu1 }
0x139f   :  { %v15342_v16 = vpop.f32.mrf.mxu0  ;;  %v15373_v56 = vpop.f32.mrf.mxu1 }
0x13a1   :  { %v21229_v23 = vpop.f32.mrf.mxu0  ;;  %v11352_v43 = vpop.f32.mrf.mxu1 }
0x13a3   :  { %v15345_v49 = vpop.f32.mrf.mxu0  ;;  %v15405_v53 = vpop.f32.mrf.mxu1 }
0x13a5   :  { %v21231_v28 = vpop.f32.mrf.mxu0  ;;  %v11360_v34 = vpop.f32.mrf.mxu1 }
0x13a7   :  { %v15348_v22 = vpop.f32.mrf.mxu0  ;;  %v15408_v1 = vpop.f32.mrf.mxu1 }
0x13a8   :  { %v11124_v1 = vadd.f32 %v11123_v33, %v10982_v58 }
0x13a9   :  { %v11235_v10 = vpop.f32.mrf.mxu0  ;;  %v11368_v12 = vpop.f32.mrf.mxu1 }
0x13ab   :  { %v15380_v37 = vpop.f32.mrf.mxu0  ;;  %v15411_v14 = vpop.f32.mrf.mxu1 }
0x13ad   :  { %v11242_v42 = vpop.f32.mrf.mxu0  ;;  %v21233_v46 = vpop.f32.mrf.mxu1 }
0x13af   :  { %v15383_v29 = vpop.f32.mrf.mxu0  ;;  %v15414_v17 = vpop.f32.mrf.mxu1 }
0x13b0   :  { %v11236_v29 = vadd.f32 %v11235_v10, %v11124_v1  ;;  %v11142_v10 = vadd.f32 %v21219_v5, %v11012_v31  ;;  %v11148_v5 = vadd.f32 %v21221_v26, %v21225_v7 }
0x13b1   :  { %v11249_v50 = vpop.f32.mrf.mxu0  ;;  %v21235_v15 = vpop.f32.mrf.mxu1 }
0x13b2   :  { %v11250_v59 = vadd.f32 %v11249_v50, %v11136_v44 }
0x13b3   :  { %v15386_v51 = vpop.f32.mrf.mxu0  ;;  %v15417_v30 = vpop.f32.mrf.mxu1 }
0x13b4   :  { %v11130_v30 = vadd.f32 %v11129_v0, %v10992_v45  ;;  %v11369_v19 = vadd.f32 %v11368_v12, %v11250_v59 }
0x13b5   :  { %v11256_v32 = vpop.f32.mrf.mxu0  ;;  %v21237_v8 = vpop.f32.mrf.mxu1 }
0x13b7   :  { %v15389_v11 = vpop.f32.mrf.mxu0  ;;  %v15420_v4 = vpop.f32.mrf.mxu1 }
0x13b8   :  { %v11243_v11 = vadd.f32 %v11242_v42, %v11130_v30  ;;  %v11353_v4 = vadd.f32 %v11352_v43, %v11236_v29  ;;  %v11257_v43 = vadd.f32 %v11256_v32, %v11142_v10 }
0x13b9   :  { %v11263_v2 = vpop.f32.mrf.mxu0  ;;  %v21239_v16 = vpop.f32.mrf.mxu1 }
0x13ba   :  { %v11361_v33 = vadd.f32 %v11360_v34, %v11243_v11  ;;  %v11264_v50 = vadd.f32 %v11263_v2, %v11148_v5  ;;  %v11377_v26 = vadd.f32 %v21233_v46, %v11257_v43 }
0x13bb   :  { %v15392_v56 = vpop.f32.mrf.mxu0  ;;  %v15423_v49 = vpop.f32.mrf.mxu1 }
0x13bd   :  { %v21241_v53 = vpop.f32.mrf.mxu0  ;;  %v11586_v22 = vpop.f32.mrf.mxu1 }
0x13bf   :  { %v15395_v37 = vpop.f32.mrf.mxu0  ;;  %v15455_v14 = vpop.f32.mrf.mxu1 }
0x13c1   :  { %v21243_v17 = vpop.f32.mrf.mxu0  ;;  %v11592_v51 = vpop.f32.mrf.mxu1 }
0x13c3   :  { %v15398_v47 = vpop.f32.mrf.mxu0  ;;  %v15458_v36 = vpop.f32.mrf.mxu1 }
0x13c5   :  { %v11477_v40 = vpop.f32.mrf.mxu0  ;;  %v11598_v35 = vpop.f32.mrf.mxu1 }
0x13c6   :  { %v11478_v56 = vadd.f32 %v11477_v40, %v11353_v4 }
0x13c7   :  { %v15430_v49 = vpop.f32.mrf.mxu0  ;;  %v15461_v25 = vpop.f32.mrf.mxu1 }
0x13c8   :  { %v11587_v6 = vadd.f32 %v11586_v22, %v11478_v56 }
0x13c9   :  { %v11483_v58 = vpop.f32.mrf.mxu0  ;;  %v11604_v37 = vpop.f32.mrf.mxu1 }
0x13ca   :  { %v11642_v1 = vsel %vm4170_vm6, %v11587_v6, 0  ;;  %v11484_v0 = vadd.f32 %v11483_v58, %v11361_v33 }
0x13cb   :  { %v21247_v47 = vand.u32 4294901760, %v11642_v1  ;;  %v15433_v36 = vpop.f32.mrf.mxu0  ;;  %v15464_v45 = vpop.f32.mrf.mxu1 }
0x13cc   :  { %v11593_v42 = vadd.f32 %v11592_v51, %v11484_v0 }
0x13cd   :  { %v21250_v40 = vsub.f32 %v11642_v1, %v21247_v47  ;;  %v11489_v25 = vpop.f32.mrf.mxu0  ;;  %v11610_v44 = vpop.f32.mrf.mxu1  ;;  %15528 = vmatmul.mubr.f32.vlgmr.msra.gmra.mxu1 %v21247_v47 }
0x13ce   :  { %v11645_v6 = vsel %vm4170_vm6, %v11593_v42, 0  ;;  %v11490_v9 = vadd.f32 %v11489_v25, %v11369_v19  ;;  %15530 = vmatprep.mubr.msk.f32.mxu1 %vm15780_vm1, %v21793_v39  ;;  %15586 = vmatpush3.msra.mxu1 %v21102_v41 }
0x13cf   :  { %v11737_v59 = vand.u32 4294901760, %v21250_v40  ;;  %v21260_v31 = vand.u32 4294901760, %v11645_v6  ;;  %v15436_v34 = vpop.f32.mrf.mxu0  ;;  %v15467_v12 = vpop.f32.mrf.mxu1  ;;  %15587 = vmatprep.subr.mxu1 %v21793_v39 }
0x13d0   :  { %v11599_v32 = vadd.f32 %v11598_v35, %v11490_v9  ;;  %15588 = vmatpush3.msra.mxu1 %v21113_v48  ;;  %v11154_v35 = vadd.f32 %v21223_v60, %v21229_v23  ;;  %v11385_v23 = vadd.f32 %v21235_v15, %v11264_v50 }
0x13d1   :  { %v11738_v7 = vsub.f32 %v21250_v40, %v11737_v59  ;;  %v21269_v22 = vsub.f32 %v11645_v6, %v21260_v31  ;;  %v11495_v14 = vpop.f32.mrf.mxu0  ;;  %v11616_v29 = vpop.f32.mrf.mxu1  ;;  %15531 = vmatmul.mubr.f32.gmra.mxu1 %v21260_v31  ;;  %15589 = vmatprep.subr.mxu1 %v21793_v39 }
0x13d2   :  { %v11648_v46 = vsel %vm4170_vm6, %v11599_v32, 0  ;;  %v11496_v2 = vadd.f32 %v11495_v14, %v11377_v26  ;;  %15533 = vmatprep.mubr.msk.f32.mxu1 %vm15780_vm1, %v21793_v39  ;;  %15590 = vmatpush3.msra.mxu1 %v21126_v61  ;;  %v11271_v49 = vadd.f32 %v21241_v53, %v11154_v35  ;;  %v11160_v53 = vadd.f32 %v21227_v18, %v21231_v28 }
0x13d3   :  { %v11739_v51 = vand.u32 4294901760, %v11738_v7  ;;  %v21279_v30 = vand.u32 4294901760, %v11648_v46  ;;  %v15439_v11 = vpop.f32.mrf.mxu0  ;;  %v15470_v4 = vpop.f32.mrf.mxu1  ;;  %v11747_v56 = vand.u32 4294901760, %v21269_v22  ;;  %15591 = vmatprep.subr.mxu1 %v21793_v39 }
0x13d4   :  { %v11605_v60 = vadd.f32 %v11604_v37, %v11496_v2  ;;  %15592 = vmatpush3.msra.mxu1 %v21132_v38  ;;  %v11278_v18 = vadd.f32 %v21243_v17, %v11160_v53  ;;  %v11393_v19 = vadd.f32 %v21237_v8, %v11271_v49 }
0x13d5   :  { %v21287_v33 = vsub.f32 %v11648_v46, %v21279_v30  ;;  %v11501_v58 = vpop.f32.mrf.mxu0  ;;  %v11622_v10 = vpop.f32.mrf.mxu1  ;;  %15491 = vmatmul.mubr.f32.vlgmr.msra.gmra.mxu0 %v11739_v51  ;;  %15534 = vmatmul.mubr.f32.gmra.mxu1 %v21279_v30  ;;  %v11748_v1 = vsub.f32 %v21269_v22, %v11747_v56 }
0x13d6   :  { %v11651_v37 = vsel %vm4170_vm6, %v11605_v60, 0  ;;  %v11502_v15 = vadd.f32 %v11501_v58, %v11385_v23  ;;  %15493 = vmatprep.mubr.msk.f32.mxu0 %vm15780_vm1, %v21793_v39  ;;  %15536 = vmatprep.mubr.msk.f32.mxu1 %vm15780_vm1, %v21793_v39  ;;  %v11401_v32 = vadd.f32 %v21239_v16, %v11278_v18 }
0x13d7   :  { %v21300_v0 = vand.u32 4294901760, %v11651_v37  ;;  %v15442_v36 = vpop.f32.mrf.mxu0  ;;  %v15473_v45 = vpop.f32.mrf.mxu1  ;;  %15549 = vmatpush3.msra.mxu0 %v21106_v21  ;;  %v11749_v43 = vand.u32 4294901760, %v11748_v1  ;;  %v11757_v42 = vand.u32 4294901760, %v21287_v33  ;;  %15593 = vmatprep.subr.mxu1 %v21793_v39 }
0x13d8   :  { %v11611_v28 = vadd.f32 %v11610_v44, %v11502_v15  ;;  %15550 = vmatprep.subr.mxu0 %v21793_v39  ;;  %15594 = vmatpush3.msra.mxu1 %v21161_v62 }
0x13d9   :  { %v21310_v25 = vsub.f32 %v11651_v37, %v21300_v0  ;;  %v11507_v5 = vpop.f32.mrf.mxu0  ;;  %15494 = vmatmul.mubr.f32.gmra.mxu0 %v11749_v43  ;;  %15537 = vmatmul.mubr.f32.gmra.mxu1 %v21300_v0  ;;  %v11758_v6 = vsub.f32 %v21287_v33, %v11757_v42 }
0x13da   :  { %v11654_v17 = vsel %vm4170_vm6, %v11611_v28, 0  ;;  %v11508_v44 = vadd.f32 %v11507_v5, %v11393_v19  ;;  %15496 = vmatprep.mubr.msk.f32.mxu0 %vm15780_vm1, %v21793_v39  ;;  %15539 = vmatprep.mubr.msk.f32.mxu1 %vm15780_vm1, %v21793_v39 }
0x13db   :  { %v21321_v8 = vand.u32 4294901760, %v11654_v17  ;;  %v15445_v9 = vpop.f32.mrf.mxu0  ;;  %15551 = vmatpush3.msra.mxu0 %v21120_v13  ;;  %v11759_v34 = vand.u32 4294901760, %v11758_v6  ;;  %v11767_v12 = vand.u32 4294901760, %v21310_v25  ;;  %15595 = vmatprep.subr.mxu1 %v21793_v39 }
0x13dc   :  { %v11617_v50 = vadd.f32 %v11616_v29, %v11508_v44  ;;  %15552 = vmatprep.subr.mxu0 %v21793_v39  ;;  %15596 = vmatpush3.msra.mxu1 %v21170_v3 }
0x13dd   :  { %v21330_v26 = vsub.f32 %v11654_v17, %v21321_v8  ;;  %v11513_v7 = vpop.f32.mrf.mxu0  ;;  %15497 = vmatmul.mubr.f32.gmra.mxu0 %v11759_v34  ;;  %15540 = vmatmul.mubr.f32.gmra.mxu1 %v21321_v8  ;;  %v11768_v14 = vsub.f32 %v21310_v25, %v11767_v12 }
0x13de   :  { %v11657_v35 = vsel %vm4170_vm6, %v11617_v50, 0  ;;  %v11514_v29 = vadd.f32 %v11513_v7, %v11401_v32  ;;  %15553 = vmatpush3.msra.mxu0 %v21135_v54  ;;  %15499 = vmatprep.mubr.msk.f32.mxu0 %vm15780_vm1, %v21793_v39 }
0x13df   :  { %v21340_v16 = vand.u32 4294901760, %v11657_v35  ;;  %v15448_v46 = vpop.f32.mrf.mxu0  ;;  %15542 = vmatprep.mubr.msk.f32.mxu1 %vm15780_vm1, %v21793_v39  ;;  %v11769_v2 = vand.u32 4294901760, %v11768_v14  ;;  %15554 = vmatprep.subr.mxu0 %v21793_v39  ;;  %v11777_v51 = vand.u32 4294901760, %v21330_v26 }
0x13e0   :  { %v11623_v11 = vadd.f32 %v11622_v10, %v11514_v29  ;;  %15555 = vmatpush3.msra.mxu0 %v21142_v27  ;;  %15597 = vmatprep.subr.mxu1 %v21793_v39 }
0x13e1   :  { %v21349_v4 = vsub.f32 %v11657_v35, %v21340_v16  ;;  %15500 = vmatmul.mubr.f32.gmra.mxu0 %v11769_v2  ;;  %15543 = vmatmul.mubr.f32.gmra.mxu1 %v21340_v16  ;;  %v11778_v49 = vsub.f32 %v21330_v26, %v11777_v51 }
0x13e2   :  { %v11660_v60 = vsel %vm4170_vm6, %v11623_v11, 0  ;;  %15502 = vmatprep.mubr.msk.f32.mxu0 %vm15780_vm1, %v21793_v39  ;;  %15545 = vmatprep.mubr.msk.f32.mxu1 %vm15780_vm1, %v21793_v39 }
0x13e3   :  { %v21360_v23 = vand.u32 4294901760, %v11660_v60  ;;  %v11779_v58 = vand.u32 4294901760, %v11778_v49  ;;  %15556 = vmatprep.subr.mxu0 %v21793_v39  ;;  %15598 = vmatpush3.msra.mxu1 %v21181_v57  ;;  %v11787_v10 = vand.u32 4294901760, %v21349_v4 }
0x13e4   :  { %15557 = vmatpush3.msra.mxu0 %v21168_v55  ;;  %15599 = vmatprep.subr.mxu1 %v21793_v39 }
0x13e5   :  { %v21368_v1 = vsub.f32 %v11660_v60, %v21360_v23  ;;  %15503 = vmatmul.mubr.f32.gmra.mxu0 %v11779_v58  ;;  %15546 = vmatmul.mubr.f32.gmra.mxu1 %v21360_v23  ;;  %v11788_v53 = vsub.f32 %v21349_v4, %v11787_v10  ;;  %v12478_v58 = vld [vmem:[%s21594_s6] ss:$0 sm:$0xff] }
0x13e6   :  { %15505 = vmatprep.mubr.msk.f32.mxu0 %vm15780_vm1, %v21793_v39  ;;  %15600 = vmatpush3.msra.mxu1 %v21195_v24 }
0x13e7   :  { %15601 = vmatprep.mubr.msk.f32.mxu1 %vm15780_vm1, %v21793_v39  ;;  %v11789_v37 = vand.u32 4294901760, %v11788_v53  ;;  %15558 = vmatprep.subr.mxu0 %v21793_v39  ;;  %v11797_v15 = vand.u32 4294901760, %v21368_v1 }
0x13e8   :  { %15559 = vmatpush3.msra.mxu0 %v21179_v63  ;;  %15659 = vmatprep.subr.mxu1 %v21793_v39 }
0x13e9   :  { %15506 = vmatmul.mubr.f32.gmra.mxu0 %v11789_v37  ;;  %15602 = vmatmul.mubr.f32.vlgmr.msra.gmra.mxu1 %v11737_v59  ;;  %v11798_v36 = vsub.f32 %v21368_v1, %v11797_v15 }
0x13ea   :  { %15508 = vmatprep.mubr.msk.f32.mxu0 %vm15780_vm1, %v21793_v39  ;;  %15560 = vmatprep.subr.mxu0 %v21793_v39 }
0x13eb   :  { %15604 = vmatprep.mubr.msk.f32.mxu1 %vm15780_vm1, %v21793_v39  ;;  %v11799_v45 = vand.u32 4294901760, %v11798_v36  ;;  %15561 = vmatpush3.msra.mxu0 %v21193_v52 }
0x13ec   :  { %15562 = vmatprep.subr.mxu0 %v21793_v39  ;;  %15660 = vmatpush3.msra.mxu1 %v21102_v41  ;;  %v21874_v41 = vand.u32 4294901760, %v21106_v21  ;;  %v21875_v21 = vand.u32 4294901760, %v21120_v13  ;;  %v21877_v13 = vand.u32 4294901760, %v21142_v27  ;;  %v21881_v27 = vand.u32 4294901760, %v21204_v20 }
0x13ed   :  { %15509 = vmatmul.mubr.f32.gmra.mxu0 %v11799_v45  ;;  %15605 = vmatmul.mubr.f32.gmra.mxu1 %v11747_v56 }
0x13ee   :  { %15563 = vmatpush3.msra.mxu0 %v21204_v20  ;;  %15564 = vmatprep.mubr.msk.f32.mxu0 %vm15780_vm1, %v21793_v39 }
0x13ef   :  { %15607 = vmatprep.mubr.msk.f32.mxu1 %vm15780_vm1, %v21793_v39  ;;  %15622 = vmatprep.subr.mxu0 %v21793_v39 }
0x13f0   :  { %15661 = vmatprep.subr.mxu1 %v21793_v39 }
0x13f1   :  { %15565 = vmatmul.mubr.f32.vlgmr.msra.gmra.mxu0 %v21250_v40  ;;  %15608 = vmatmul.mubr.f32.gmra.mxu1 %v11757_v42 }
0x13f2   :  { %15567 = vmatprep.mubr.msk.f32.mxu0 %vm15780_vm1, %v21793_v39  ;;  %15610 = vmatprep.mubr.msk.f32.mxu1 %vm15780_vm1, %v21793_v39 }
0x13f3   :  { %15623 = vmatpush3.msra.mxu0 %v21874_v41  ;;  %15662 = vmatpush3.msra.mxu1 %v21113_v48  ;;  %v21876_v48 = vand.u32 4294901760, %v21135_v54  ;;  %v21880_v54 = vand.u32 4294901760, %v21193_v52 }
0x13f4   :  { %15624 = vmatprep.subr.mxu0 %v21793_v39  ;;  %15663 = vmatprep.subr.mxu1 %v21793_v39 }
0x13f5   :  { %15568 = vmatmul.mubr.f32.gmra.mxu0 %v21269_v22  ;;  %15611 = vmatmul.mubr.f32.gmra.mxu1 %v11767_v12 }
0x13f6   :  { %15570 = vmatprep.mubr.msk.f32.mxu0 %vm15780_vm1, %v21793_v39  ;;  %15613 = vmatprep.mubr.msk.f32.mxu1 %vm15780_vm1, %v21793_v39 }
0x13f7   :  { %15625 = vmatpush3.msra.mxu0 %v21875_v21  ;;  %15664 = vmatpush3.msra.mxu1 %v21126_v61  ;;  %v21878_v61 = vand.u32 4294901760, %v21168_v55 }
0x13f8   :  { %15626 = vmatprep.subr.mxu0 %v21793_v39  ;;  %15665 = vmatprep.subr.mxu1 %v21793_v39 }
0x13f9   :  { %15571 = vmatmul.mubr.f32.gmra.mxu0 %v21287_v33  ;;  %15614 = vmatmul.mubr.f32.gmra.mxu1 %v11777_v51 }
0x13fa   :  { %15627 = vmatpush3.msra.mxu0 %v21876_v48  ;;  %15573 = vmatprep.mubr.msk.f32.mxu0 %vm15780_vm1, %v21793_v39 }
0x13fb   :  { %15616 = vmatprep.mubr.msk.f32.mxu1 %vm15780_vm1, %v21793_v39  ;;  %15666 = vmatpush3.msra.mxu1 %v21132_v38  ;;  %v21879_v38 = vand.u32 4294901760, %v21179_v63 }
0x13fc   :  { %15667 = vmatprep.subr.mxu1 %v21793_v39  ;;  %15628 = vmatprep.subr.mxu0 %v21793_v39 }
0x13fd   :  { %15574 = vmatmul.mubr.f32.gmra.mxu0 %v21310_v25  ;;  %15617 = vmatmul.mubr.f32.gmra.mxu1 %v11787_v10 }
0x13fe   :  { %15668 = vmatpush3.msra.mxu1 %v21161_v62  ;;  %15629 = vmatpush3.msra.mxu0 %v21877_v13 }
0x13ff   :  { %15669 = vmatprep.subr.mxu1 %v21793_v39  ;;  %15576 = vmatprep.mubr.msk.f32.mxu0 %vm15780_vm1, %v21793_v39 }
0x1400   :  { %15619 = vmatprep.mubr.msk.f32.mxu1 %vm15780_vm1, %v21793_v39  ;;  %15670 = vmatpush3.msra.mxu1 %v21170_v3 }
0x1401   :  { %15577 = vmatmul.mubr.f32.gmra.mxu0 %v21330_v26  ;;  %15620 = vmatmul.mubr.f32.gmra.mxu1 %v11797_v15 }
0x1402   :  { %15630 = vmatprep.subr.mxu0 %v21793_v39  ;;  %15671 = vmatprep.subr.mxu1 %v21793_v39 }
0x1403   :  { %15631 = vmatpush3.msra.mxu0 %v21878_v61  ;;  %15672 = vmatpush3.msra.mxu1 %v21181_v57 }
0x1404   :  { %15673 = vmatprep.subr.mxu1 %v21793_v39  ;;  %15579 = vmatprep.mubr.msk.f32.mxu0 %vm15780_vm1, %v21793_v39 }
0x1405   :  { %15674 = vmatpush3.msra.mxu1 %v21195_v24  ;;  %15675 = vmatprep.mubr.msk.f32.mxu1 %vm15780_vm1, %v21793_v39 }
0x1406   :  { %15580 = vmatmul.mubr.f32.gmra.mxu0 %v21349_v4  ;;  %15632 = vmatprep.subr.mxu0 %v21793_v39 }
0x1407   :  { %15676 = vmatmul.mubr.f32.vlgmr.msra.gmra.mxu1 %v21247_v47  ;;  %15633 = vmatpush3.msra.mxu0 %v21879_v38 }
0x1408   :  { %15582 = vmatprep.mubr.msk.f32.mxu0 %vm15780_vm1, %v21793_v39  ;;  %15634 = vmatprep.subr.mxu0 %v21793_v39 }
0x1409   :  { %15678 = vmatprep.mubr.msk.f32.mxu1 %vm15780_vm1, %v21793_v39  ;;  %15635 = vmatpush3.msra.mxu0 %v21880_v54 }
0x140a   :  { %15583 = vmatmul.mubr.f32.gmra.mxu0 %v21368_v1  ;;  %15636 = vmatprep.subr.mxu0 %v21793_v39 }
0x140b   :  { %15679 = vmatmul.mubr.f32.gmra.mxu1 %v21260_v31  ;;  %15637 = vmatpush3.msra.mxu0 %v21881_v27 }
0x140c   :  { %15638 = vmatprep.mubr.msk.f32.mxu0 %vm15780_vm1, %v21793_v39  ;;  %15681 = vmatprep.mubr.msk.f32.mxu1 %vm15780_vm1, %v21793_v39 }
0x140e   :  { %15639 = vmatmul.mubr.f32.vlgmr.msra.gmra.mxu0 %v21247_v47 }
0x140f   :  { %15682 = vmatmul.mubr.f32.gmra.mxu1 %v21279_v30  ;;  %15641 = vmatprep.mubr.msk.f32.mxu0 %vm15780_vm1, %v21793_v39 }
0x1410   :  { %15684 = vmatprep.mubr.msk.f32.mxu1 %vm15780_vm1, %v21793_v39 }
0x1412   :  { %15642 = vmatmul.mubr.f32.gmra.mxu0 %v21260_v31 }
0x1413   :  { %15685 = vmatmul.mubr.f32.gmra.mxu1 %v21300_v0  ;;  %15644 = vmatprep.mubr.msk.f32.mxu0 %vm15780_vm1, %v21793_v39 }
0x1414   :  { %15687 = vmatprep.mubr.msk.f32.mxu1 %vm15780_vm1, %v21793_v39 }
0x1416   :  { %15645 = vmatmul.mubr.f32.gmra.mxu0 %v21279_v30 }
0x1417   :  { %15688 = vmatmul.mubr.f32.gmra.mxu1 %v21321_v8  ;;  %15647 = vmatprep.mubr.msk.f32.mxu0 %vm15780_vm1, %v21793_v39 }
0x1418   :  { %15690 = vmatprep.mubr.msk.f32.mxu1 %vm15780_vm1, %v21793_v39 }
0x141a   :  { %15648 = vmatmul.mubr.f32.gmra.mxu0 %v21300_v0 }
0x141b   :  { %15691 = vmatmul.mubr.f32.gmra.mxu1 %v21340_v16  ;;  %15650 = vmatprep.mubr.msk.f32.mxu0 %vm15780_vm1, %v21793_v39 }
0x141c   :  { %15693 = vmatprep.mubr.msk.f32.mxu1 %vm15780_vm1, %v21793_v39 }
0x141e   :  { %15651 = vmatmul.mubr.f32.gmra.mxu0 %v21321_v8 }
0x141f   :  { %15694 = vmatmul.mubr.f32.gmra.mxu1 %v21360_v23  ;;  %15653 = vmatprep.mubr.msk.f32.mxu0 %vm15780_vm1, %v21793_v39 }
0x1422   :  { %15654 = vmatmul.mubr.f32.gmra.mxu0 %v21340_v16 }
0x1423   :  { %15656 = vmatprep.mubr.msk.f32.mxu0 %vm15780_vm1, %v21793_v39 }
0x1426   :  { %15657 = vmatmul.mubr.f32.gmra.mxu0 %v21360_v23 }
0x148d   :  { %v11912_v62 = vpop.f32.mrf.mxu1 }
0x148f   :  { %v15529_v55 = vpop.f32.mrf.mxu1 }
0x1491   :  { %v11918_v3 = vpop.f32.mrf.mxu1 }
0x1493   :  { %v15532_v63 = vpop.f32.mrf.mxu1 }
0x1495   :  { %v11741_v57 = vpop.f32.mrf.mxu0  ;;  %v21512_v52 = vpop.f32.mrf.mxu1 }
0x1496   :  { %v11742_v53 = vadd.f32 %v12478_v58, %v11741_v57 }
0x1497   :  { %v15492_v24 = vpop.f32.mrf.mxu0  ;;  %v15535_v20 = vpop.f32.mrf.mxu1 }
0x1498   :  { %v11913_v41 = vadd.f32 %v11912_v62, %v11742_v53 }
0x1499   :  { %v11751_v47 = vpop.f32.mrf.mxu0  ;;  %v21514_v40 = vpop.f32.mrf.mxu1 }
0x149a   :  { %v11752_v45 = vadd.f32 %v12478_v58, %v11751_v47 }
0x149b   :  { %v15495_v59 = vpop.f32.mrf.mxu0  ;;  %v15538_v31 = vpop.f32.mrf.mxu1 }
0x149c   :  { %v11919_v27 = vadd.f32 %v11918_v3, %v11752_v45 }
0x149d   :  { %v11761_v22 = vpop.f32.mrf.mxu0  ;;  %v21516_v30 = vpop.f32.mrf.mxu1 }
0x149e   :  { %v11762_v54 = vadd.f32 %v12478_v58, %v11761_v22 }
0x149f   :  { %v15498_v39 = vpop.f32.mrf.mxu0  ;;  %v15541_v56 = vpop.f32.mrf.mxu1 }
0x14a0   :  { %v11925_v57 = vadd.f32 %v21512_v52, %v11762_v54 }
0x14a1   :  { %v11771_v33 = vpop.f32.mrf.mxu0  ;;  %v21518_v0 = vpop.f32.mrf.mxu1 }
0x14a2   :  { %v11772_v39 = vadd.f32 %v12478_v58, %v11771_v33 }
0x14a3   :  { %v15501_v43 = vpop.f32.mrf.mxu0  ;;  %v15544_v42 = vpop.f32.mrf.mxu1 }
0x14a4   :  { %v11931_v3 = vadd.f32 %v21514_v40, %v11772_v39 }
0x14a5   :  { %v11781_v18 = vpop.f32.mrf.mxu0  ;;  %v21520_v28 = vpop.f32.mrf.mxu1 }
0x14a7   :  { %v15504_v19 = vpop.f32.mrf.mxu0  ;;  %v15547_v25 = vpop.f32.mrf.mxu1 }
0x14a9   :  { %v21522_v5 = vpop.f32.mrf.mxu0  ;;  %v12159_v6 = vpop.f32.mrf.mxu1 }
0x14ab   :  { %v15507_v17 = vpop.f32.mrf.mxu0  ;;  %v15603_v44 = vpop.f32.mrf.mxu1 }
0x14ac   :  { %v11782_v44 = vadd.f32 %v12478_v58, %v11781_v18 }
0x14ad   :  { %v21524_v8 = vpop.f32.mrf.mxu0  ;;  %v12167_v9 = vpop.f32.mrf.mxu1 }
0x14af   :  { %v15510_v34 = vpop.f32.mrf.mxu0  ;;  %v15606_v12 = vpop.f32.mrf.mxu1 }
0x14b1   :  { %v12036_v50 = vpop.f32.mrf.mxu0  ;;  %v12175_v32 = vpop.f32.mrf.mxu1 }
0x14b2   :  { %v12037_v13 = vadd.f32 %v12036_v50, %v11913_v41 }
0x14b3   :  { %v15566_v26 = vpop.f32.mrf.mxu0  ;;  %v15609_v7 = vpop.f32.mrf.mxu1 }
0x14b4   :  { %v12160_v59 = vadd.f32 %v12159_v6, %v12037_v13  ;;  %v11792_v7 = vadd.f32 %v12478_v58, %v21522_v5 }
0x14b5   :  { %v12043_v14 = vpop.f32.mrf.mxu0  ;;  %v21526_v35 = vpop.f32.mrf.mxu1 }
0x14b6   :  { %v12044_v24 = vadd.f32 %v12043_v14, %v11919_v27  ;;  %v11943_v5 = vadd.f32 %v21518_v0, %v11792_v7 }
0x14b7   :  { %v15569_v29 = vpop.f32.mrf.mxu0  ;;  %v15612_v16 = vpop.f32.mrf.mxu1 }
0x14b8   :  { %v12168_v25 = vadd.f32 %v12167_v9, %v12044_v24  ;;  %v11937_v9 = vadd.f32 %v21516_v30, %v11782_v44 }
0x14b9   :  { %v12050_v46 = vpop.f32.mrf.mxu0  ;;  %v21528_v2 = vpop.f32.mrf.mxu1 }
0x14ba   :  { %v12051_v62 = vadd.f32 %v12050_v46, %v11925_v57 }
0x14bb   :  { %v15572_v51 = vpop.f32.mrf.mxu0  ;;  %v15615_v11 = vpop.f32.mrf.mxu1 }
0x14bc   :  { %v12176_v50 = vadd.f32 %v12175_v32, %v12051_v62  ;;  %v11802_v32 = vadd.f32 %v12478_v58, %v21524_v8 }
0x14bd   :  { %v12057_v4 = vpop.f32.mrf.mxu0  ;;  %v21530_v49 = vpop.f32.mrf.mxu1 }
0x14be   :  { %v12058_v52 = vadd.f32 %v12057_v4, %v11931_v3 }
0x14bf   :  { %v15575_v60 = vpop.f32.mrf.mxu0  ;;  %v15618_v23 = vpop.f32.mrf.mxu1 }
0x14c0   :  { %v12184_v51 = vadd.f32 %v21526_v35, %v12058_v52  ;;  %v11949_v35 = vadd.f32 %v21520_v28, %v11802_v32 }
0x14c1   :  { %v12064_v10 = vpop.f32.mrf.mxu0  ;;  %v21535_v1 = vpop.f32.mrf.mxu1 }
0x14c2   :  { %v12065_v29 = vadd.f32 %v12064_v10, %v11937_v9 }
0x14c3   :  { %v15578_v37 = vpop.f32.mrf.mxu0  ;;  %v15621_v15 = vpop.f32.mrf.mxu1 }
0x14c4   :  { %v12192_v37 = vadd.f32 %v21528_v2, %v12065_v29 }
0x14c6   :  { %v12071_v36 = vpop.f32.mrf.mxu0 }
0x14c7   :  { %v12417_v21 = vpop.f32.mrf.mxu1  ;;  %v12072_v23 = vadd.f32 %v12071_v36, %v11943_v5 }
0x14c8   :  { %v15581_v48 = vpop.f32.mrf.mxu0 }
0x14c9   :  { %v15677_v61 = vpop.f32.mrf.mxu1  ;;  %v12200_v36 = vadd.f32 %v21530_v49, %v12072_v23 }
0x14ca   :  { %v12078_v38 = vpop.f32.mrf.mxu0 }
0x14cb   :  { %v12423_v55 = vpop.f32.mrf.mxu1  ;;  %v12079_v45 = vadd.f32 %v12078_v38, %v11949_v35 }
0x14cc   :  { %v15584_v63 = vpop.f32.mrf.mxu0 }
0x14cd   :  { %v15680_v20 = vpop.f32.mrf.mxu1  ;;  %v12208_v61 = vadd.f32 %v21535_v1, %v12079_v45 }
0x14ce   :  { %v12302_v31 = vpop.f32.mrf.mxu0 }
0x14cf   :  { %v12303_v56 = vadd.f32 %v12302_v31, %v12160_v59  ;;  %v12429_v43 = vpop.f32.mrf.mxu1 }
0x14d0   :  { %v15640_v47 = vpop.f32.mrf.mxu0 }
0x14d1   :  { %v12418_v42 = vadd.f32 %v12417_v21, %v12303_v56  ;;  %v15683_v19 = vpop.f32.mrf.mxu1 }
0x14d2   :  { %v12308_v17 = vpop.f32.mrf.mxu0 }
0x14d3   :  { %12479 = vst.msk [vmem:[%s21595_s19 + $0x38] sm:$0xff] %vm86_vm0, %v12418_v42  ;;  %v12309_v22 = vadd.f32 %v12308_v17, %v12168_v25  ;;  %v12435_v33 = vpop.f32.mrf.mxu1 }
0x14d4   :  { %v15643_v6 = vpop.f32.mrf.mxu0 }
0x14d5   :  { %v12424_v34 = vadd.f32 %v12423_v55, %v12309_v22  ;;  %v15686_v12 = vpop.f32.mrf.mxu1 }
0x14d6   :  { %v12314_v26 = vpop.f32.mrf.mxu0 }
0x14d7   :  { %12480 = vst.msk [vmem:[%s21595_s19 + $0x40] sm:$0xff] %vm86_vm0, %v12424_v34  ;;  %v12315_v40 = vadd.f32 %v12314_v26, %v12176_v50  ;;  %v12441_v18 = vpop.f32.mrf.mxu1 }
0x14d8   :  { %v15646_v14 = vpop.f32.mrf.mxu0 }
0x14d9   :  { %v12430_v16 = vadd.f32 %v12429_v43, %v12315_v40  ;;  %v15689_v46 = vpop.f32.mrf.mxu1 }
0x14da   :  { %v12320_v11 = vpop.f32.mrf.mxu0 }
0x14db   :  { %12481 = vst.msk [vmem:[%s21595_s19 + $0x48] sm:$0xff] %vm86_vm0, %v12430_v16  ;;  %v12321_v30 = vadd.f32 %v12320_v11, %v12184_v51  ;;  %v12447_v4 = vpop.f32.mrf.mxu1 }
0x14dc   :  { %v15649_v60 = vpop.f32.mrf.mxu0 }
0x14dd   :  { %v12436_v53 = vadd.f32 %v12435_v33, %v12321_v30  ;;  %v15692_v10 = vpop.f32.mrf.mxu1 }
0x14de   :  { %v12326_v15 = vpop.f32.mrf.mxu0 }
0x14df   :  { %12482 = vst.msk [vmem:[%s21595_s19 + $0x50] sm:$0xff] %vm86_vm0, %v12436_v53  ;;  %v12327_v0 = vadd.f32 %v12326_v15, %v12192_v37  ;;  %v12453_v8 = vpop.f32.mrf.mxu1 }
0x14e0   :  { %v15652_v58 = vpop.f32.mrf.mxu0 }
0x14e1   :  { %v12442_v41 = vadd.f32 %v12441_v18, %v12327_v0  ;;  %v15695_v21 = vpop.f32.mrf.mxu1 }
0x14e2   :  { %v12332_v48 = vpop.f32.mrf.mxu0 }
0x14e3   :  { %12483 = vst.msk [vmem:[%s21595_s19 + $0x58] sm:$0xff] %vm86_vm0, %v12442_v41  ;;  %v12333_v28 = vadd.f32 %v12332_v48, %v12200_v36 }
0x14e4   :  { %v15655_v2 = vpop.f32.mrf.mxu0 }
0x14e5   :  { %v12448_v13 = vadd.f32 %v12447_v4, %v12333_v28 }
0x14e6   :  { %v12338_v54 = vpop.f32.mrf.mxu0 }
0x14e7   :  { %12484 = vst.msk [vmem:[%s21595_s19 + $0x60] sm:$0xff] %vm86_vm0, %v12448_v13  ;;  %v12339_v38 = vadd.f32 %v12338_v54, %v12208_v61 }
0x14e8   :  { %v15658_v27 = vpop.f32.mrf.mxu0 }
0x14e9   :  { %v12454_v49 = vadd.f32 %v12453_v8, %v12339_v38 }
0x14eb   :  { %12485 = vst.msk [vmem:[%s21595_s19 + $0x68] sm:$0x1] %vm8082_vm15, %v12454_v49 }

</bundles_post_ra>
